<compile_context>
chip_gen: v7x
topology: tpu7x:2x2x1
jax: 0.10.0
libtpu: 0.0.40
codegen_flags: <defaults>
</compile_context>

<pallas_src>
import functools

import jax
import jax.numpy as jnp
from jax import lax
from jax.experimental import pallas as pl
from jax.experimental.pallas import tpu as pltpu


def _mini_resnet_kernel(x_ref, w1_ref, c1_ref, w2_ref, c2_ref, o_ref,
                        xpad_ref, xcur_ref,
                        *, H, W, num_blocks, top):
    HW = H * W
    Cp = x_ref.shape[-1]

    # Zero only the halo rows once per grid step; the centre [top, top+HW) is fully
    # rewritten before every read, so it never needs clearing.  The zero halos
    # implement the y-direction 'same' padding.
    xpad_ref[0:top, :] = jnp.zeros((top, Cp), jnp.float32)
    xpad_ref[top + HW:top + HW + top, :] = jnp.zeros((top, Cp), jnp.float32)
    xcur_ref[...] = x_ref[0]

    # Column-edge masks (hoisted once): kill the row-wrap artefacts of the flattened
    # +-1 column shifts (x-direction 'same' padding).
    col = lax.broadcasted_iota(jnp.int32, (HW, 1), 0) % W
    mask_l = col > 0          # valid output positions when dx == -1
    mask_r = col < (W - 1)    # valid output positions when dx == +1

    def conv3x3(w_ref, c_ref, src):
        # src: (HW, Cp) value. 3x3 'same' conv as 9 shifted MXU matmuls; eval-mode BN is
        # already folded into w_ref (column scale) and c_ref (per-channel shift).
        xpad_ref[top:top + HW, :] = src          # aligned centre store (top % 8 == 0)
        acc = None
        for k in range(9):
            dy, dx = k // 3 - 1, k % 3 - 1
            off = top + dy * W + dx              # static sublane offset
            win = xpad_ref[off:off + HW, :]
            if dx == -1:
                win = jnp.where(mask_l, win, 0.0)
            elif dx == 1:
                win = jnp.where(mask_r, win, 0.0)
            part = jnp.dot(win, w_ref[k], preferred_element_type=jnp.float32)
            acc = part if acc is None else acc + part
        return acc + c_ref[...]

    for i in range(num_blocks):
        h = jnp.maximum(conv3x3(w1_ref, c1_ref, xcur_ref[...]), 0.0)
        out = conv3x3(w2_ref, c2_ref, h) + xcur_ref[...]     # residual add
        if i != num_blocks - 1:
            out = jnp.maximum(out, 0.0)
        xcur_ref[...] = out

    o_ref[0] = xcur_ref[...]


def mini_resnet_forward(x, params, number_of_blocks):
    """x: (N, C, H, W) float32 (NCHW, like PyTorch). Returns (N, C, H, W) float32."""
    N, C, H, W = x.shape
    HW = H * W
    assert HW % 8 == 0, "H*W must be a multiple of 8 for the flattened layout"
    assert number_of_blocks >= 1

    Cp = max(128, ((C + 127) // 128) * 128)          # lane-dense channel padding
    top = ((W + 1 + 7) // 8) * 8                     # halo depth, tile-aligned, >= W+1
    pad_rows = top + HW + top

    eps = 1e-5
    # Fold eval-mode BatchNorm2d into the conv weights / per-channel bias.
    s1 = params["g1"] / jnp.sqrt(params["rv1"] + eps)
    t1 = params["beta1"] - params["rm1"] * s1
    s2 = params["g2"] / jnp.sqrt(params["rv2"] + eps)
    t2 = params["beta2"] - params["rm2"] * s2

    def fold(w, s):
        # w: (Cout, Cin, 3, 3) -> (9, Cp, Cp) per-tap (Cin, Cout) matrices, BN scale folded in.
        m = jnp.transpose(w * s[:, None, None, None], (2, 3, 1, 0))  # (3,3,Cin,Cout)
        m = m.reshape(9, C, C)
        return jnp.pad(m, ((0, 0), (0, Cp - C), (0, Cp - C)))

    w1p = fold(params["w1"], s1)
    w2p = fold(params["w2"], s2)
    c1p = jnp.pad(t1, (0, Cp - C)).reshape(1, Cp)
    c2p = jnp.pad(t2, (0, Cp - C)).reshape(1, Cp)

    # NCHW -> (N, H*W, Cp): channels last (lane dim), zero-padded to 128 lanes.
    x_l = jnp.transpose(x, (0, 2, 3, 1)).reshape(N, HW, C)
    x_l = jnp.pad(x_l, ((0, 0), (0, 0), (0, Cp - C)))

    kernel = functools.partial(_mini_resnet_kernel, H=H, W=W,
                               num_blocks=number_of_blocks, top=top)

    out = pl.pallas_call(
        kernel,
        out_shape=jax.ShapeDtypeStruct((N, HW, Cp), jnp.float32),
        grid=(N,),
        in_specs=[
            pl.BlockSpec((1, HW, Cp), lambda n: (n, 0, 0)),   # x (one batch element)
            pl.BlockSpec((9, Cp, Cp), lambda n: (0, 0, 0)),   # conv1 taps (BN folded)
            pl.BlockSpec((1, Cp), lambda n: (0, 0)),          # bias1 / BN1 shift
            pl.BlockSpec((9, Cp, Cp), lambda n: (0, 0, 0)),   # conv2 taps (BN folded)
            pl.BlockSpec((1, Cp), lambda n: (0, 0)),          # bias2 / BN2 shift
        ],
        out_specs=pl.BlockSpec((1, HW, Cp), lambda n: (n, 0, 0)),
        scratch_shapes=[
            pltpu.VMEM((pad_rows, Cp), jnp.float32),          # zero-haloed flattened image
            pltpu.VMEM((HW, Cp), jnp.float32),                # current block input (skip)
        ],
        compiler_params=pltpu.CompilerParams(
            dimension_semantics=("parallel",)),
    )(x_l, w1p, c1p, w2p, c2p)

    out = out[:, :, :C].reshape(N, H, W, C)
    return jnp.transpose(out, (0, 3, 1, 2))


def reference(x, params, number_of_blocks, eps=1e-5):
    """Pure-JAX/XLA reference of MiniResNet.forward (eval-mode BN)."""
    def conv_bn(h, w, g, beta, rm, rv):
        y = lax.conv_general_dilated(
            h, w, window_strides=(1, 1), padding="SAME",
            dimension_numbers=("NCHW", "OIHW", "NCHW"),
            precision=lax.Precision.HIGHEST)
        s = g / jnp.sqrt(rv + eps)
        return y * s[None, :, None, None] + (beta - rm * s)[None, :, None, None]

    for i in range(number_of_blocks):
        skip = x
        h = jnp.maximum(conv_bn(x, params["w1"], params["g1"], params["beta1"],
                                params["rm1"], params["rv1"]), 0.0)
        out = conv_bn(h, params["w2"], params["g2"], params["beta2"],
                      params["rm2"], params["rv2"])
        x = out + skip
        if i != number_of_blocks - 1:
            x = jnp.maximum(x, 0.0)
    return x


if __name__ == "__main__":
    in_channels = out_channels = 4          # residual add requires in == out channels
    number_of_blocks = 2
    N, H, W = 2, 16, 16
    C = out_channels

    key = jax.random.PRNGKey(0)
    ks = jax.random.split(key, 11)
    x = jax.random.normal(ks[0], (N, in_channels, H, W), dtype=jnp.float32)
    params = {
        "w1":    0.1 * jax.random.normal(ks[1], (C, in_channels, 3, 3), jnp.float32),
        "g1":    1.0 + 0.1 * jax.random.normal(ks[2], (C,), jnp.float32),
        "beta1": 0.1 * jax.random.normal(ks[3], (C,), jnp.float32),
        "rm1":   0.1 * jax.random.normal(ks[4], (C,), jnp.float32),
        "rv1":   0.5 + jnp.abs(jax.random.normal(ks[5], (C,), jnp.float32)),
        "w2":    0.1 * jax.random.normal(ks[6], (C, C, 3, 3), jnp.float32),
        "g2":    1.0 + 0.1 * jax.random.normal(ks[7], (C,), jnp.float32),
        "beta2": 0.1 * jax.random.normal(ks[8], (C,), jnp.float32),
        "rm2":   0.1 * jax.random.normal(ks[9], (C,), jnp.float32),
        "rv2":   0.5 + jnp.abs(jax.random.normal(ks[10], (C,), jnp.float32)),
    }

    out = mini_resnet_forward(x, params, number_of_blocks)
    out = jax.block_until_ready(out)

    ref = reference(x, params, number_of_blocks)
    assert out.shape == (N, C, H, W), out.shape
    max_err = jnp.max(jnp.abs(out - ref))
    assert jnp.allclose(out, ref, atol=1e-4, rtol=1e-4), f"max abs err {max_err}"
    print("KERNEL_OK")
</pallas_src>

<mosaic_0001>
module attributes {stable_mosaic.version = 11 : i64} {
  func.func @_mini_resnet_kernel(%arg0: i32, %arg1: memref<1x256x128xf32, #tpu.memory_space<vmem>>, %arg2: memref<9x128x128xf32, #tpu.memory_space<vmem>>, %arg3: memref<1x128xf32, #tpu.memory_space<vmem>>, %arg4: memref<9x128x128xf32, #tpu.memory_space<vmem>>, %arg5: memref<1x128xf32, #tpu.memory_space<vmem>>, %arg6: memref<1x256x128xf32, #tpu.memory_space<vmem>>, %arg7: memref<304x128xf32, #tpu.memory_space<vmem>>, %arg8: memref<256x128xf32, #tpu.memory_space<vmem>>) attributes {dimension_semantics = [#tpu.dimension_semantics<parallel>], iteration_bounds = array<i64: 2>, scalar_prefetch = 0 : i64, scratch_operands = 2 : i64, tpu.core_type = #tpu.core_type<tc>, window_params = [{transform_indices = @transform_0, window_bounds = array<i64: 1, 256, 128>}, {pipeline_mode = #tpu.pipeline_mode<synchronous>, transform_indices = @transform_1, window_bounds = array<i64: 9, 128, 128>}, {pipeline_mode = #tpu.pipeline_mode<synchronous>, transform_indices = @transform_2, window_bounds = array<i64: 1, 128>}, {pipeline_mode = #tpu.pipeline_mode<synchronous>, transform_indices = @transform_3, window_bounds = array<i64: 9, 128, 128>}, {pipeline_mode = #tpu.pipeline_mode<synchronous>, transform_indices = @transform_4, window_bounds = array<i64: 1, 128>}, {transform_indices = @transform_5, window_bounds = array<i64: 1, 256, 128>}]} {
    %cst = arith.constant 0.000000e+00 : f32
    %0 = vector.broadcast %cst : f32 to vector<24x128xf32>
    %c0 = arith.constant 0 : index
    %c0_0 = arith.constant 0 : index
    %1 = vector.load %arg7[%c0, %c0_0] : memref<304x128xf32, #tpu.memory_space<vmem>>, vector<24x128xf32>
    tpu.vector_store %arg7[%c0, %c0_0], %0 {strides = array<i32>} : memref<304x128xf32, #tpu.memory_space<vmem>>, vector<24x128xf32>,
    %cst_1 = arith.constant 0.000000e+00 : f32
    %2 = vector.broadcast %cst_1 : f32 to vector<24x128xf32>
    %c280 = arith.constant 280 : index
    %c0_2 = arith.constant 0 : index
    %3 = vector.load %arg7[%c280, %c0_2] : memref<304x128xf32, #tpu.memory_space<vmem>>, vector<24x128xf32>
    tpu.vector_store %arg7[%c280, %c0_2], %2 {strides = array<i32>} : memref<304x128xf32, #tpu.memory_space<vmem>>, vector<24x128xf32>,
    %c0_3 = arith.constant 0 : index
    %c0_4 = arith.constant 0 : index
    %c0_5 = arith.constant 0 : index
    %4 = vector.load %arg1[%c0_3, %c0_4, %c0_5] : memref<1x256x128xf32, #tpu.memory_space<vmem>>, vector<1x256x128xf32>
    %5 = vector.shape_cast %4 : vector<1x256x128xf32> to vector<256x128xf32>
    %c0_6 = arith.constant 0 : index
    %c0_7 = arith.constant 0 : index
    %6 = vector.load %arg8[%c0_6, %c0_7] : memref<256x128xf32, #tpu.memory_space<vmem>>, vector<256x128xf32>
    tpu.vector_store %arg8[%c0_6, %c0_7], %5 {strides = array<i32>} : memref<256x128xf32, #tpu.memory_space<vmem>>, vector<256x128xf32>,
    %7 = tpu.iota {dimensions = array<i32: 0>} : vector<256x1xi32>
    %c16_i32 = arith.constant 16 : i32
    %c0_i32 = arith.constant 0 : i32
    %8 = arith.cmpi eq, %c16_i32, %c0_i32 : i32
    %c1_i32 = arith.constant 1 : i32
    %9 = arith.select %8, %c1_i32, %c16_i32 : i32
    %10 = vector.broadcast %9 : i32 to vector<256x1xi32>
    %11 = arith.remsi %7, %10 : vector<256x1xi32>
    %c0_i32_8 = arith.constant 0 : i32
    %12 = vector.broadcast %c0_i32_8 : i32 to vector<256x1xi32>
    %13 = arith.cmpi ne, %11, %12 : vector<256x1xi32>
    %c0_i32_9 = arith.constant 0 : i32
    %14 = vector.broadcast %c0_i32_9 : i32 to vector<256x1xi32>
    %15 = arith.cmpi slt, %11, %14 : vector<256x1xi32>
    %c0_i32_10 = arith.constant 0 : i32
    %16 = arith.cmpi slt, %9, %c0_i32_10 : i32
    %17 = vector.broadcast %16 : i1 to vector<256x1xi1>
    %18 = vector.broadcast %17 : vector<256x1xi1> to vector<256x1xi1>
    %19 = arith.xori %15, %18 : vector<256x1xi1>
    %20 = arith.andi %19, %13 : vector<256x1xi1>
    %21 = vector.broadcast %9 : i32 to vector<256x1xi32>
    %22 = arith.addi %11, %21 : vector<256x1xi32>
    %23 = arith.select %20, %22, %11 : vector<256x1xi1>, vector<256x1xi32>
    %c0_i32_11 = arith.constant 0 : i32
    %24 = vector.broadcast %c0_i32_11 : i32 to vector<256x1xi32>
    %25 = arith.cmpi sgt, %23, %24 : vector<256x1xi32>
    %c15_i32 = arith.constant 15 : i32
    %26 = vector.broadcast %c15_i32 : i32 to vector<256x1xi32>
    %27 = arith.cmpi slt, %23, %26 : vector<256x1xi32>
    %c0_12 = arith.constant 0 : index
    %c0_13 = arith.constant 0 : index
    %28 = vector.load %arg8[%c0_12, %c0_13] : memref<256x128xf32, #tpu.memory_space<vmem>>, vector<256x128xf32>
    %c24 = arith.constant 24 : index
    %c0_14 = arith.constant 0 : index
    %29 = vector.load %arg7[%c24, %c0_14] : memref<304x128xf32, #tpu.memory_space<vmem>>, vector<256x128xf32>
    tpu.vector_store %arg7[%c24, %c0_14], %28 {strides = array<i32>} : memref<304x128xf32, #tpu.memory_space<vmem>>, vector<256x128xf32>,
    %c7 = arith.constant 7 : index
    %c0_15 = arith.constant 0 : index
    %30 = vector.load %arg7[%c7, %c0_15] : memref<304x128xf32, #tpu.memory_space<vmem>>, vector<256x128xf32>
    %cst_16 = arith.constant 0.000000e+00 : f32
    %31 = vector.shape_cast %25 : vector<256x1xi1> to vector<256x1xi1>
    %32 = vector.broadcast %31 : vector<256x1xi1> to vector<256x128xi1>
    %33 = vector.broadcast %cst_16 : f32 to vector<256x128xf32>
    %34 = arith.select %32, %30, %33 : vector<256x128xi1>, vector<256x128xf32>
    %c0_17 = arith.constant 0 : index
    %c0_18 = arith.constant 0 : index
    %c0_19 = arith.constant 0 : index
    %35 = vector.load %arg2[%c0_17, %c0_18, %c0_19] : memref<9x128x128xf32, #tpu.memory_space<vmem>>, vector<1x128x128xf32>
    %36 = vector.shape_cast %35 : vector<1x128x128xf32> to vector<128x128xf32>
    %cst_20 = arith.constant dense<0.000000e+00> : vector<256x128xf32>
    %37 = tpu.matmul %34, %36, %cst_20 {dimension_numbers = #tpu.dot_dimension_numbers<[1], [0], [0], [1], [0, 0, 1, 1], [], []>} : vector<256x128xf32>, vector<128x128xf32>, vector<256x128xf32> -> vector<256x128xf32>
    %c8 = arith.constant 8 : index
    %c0_21 = arith.constant 0 : index
    %38 = vector.load %arg7[%c8, %c0_21] : memref<304x128xf32, #tpu.memory_space<vmem>>, vector<256x128xf32>
    %c1 = arith.constant 1 : index
    %c0_22 = arith.constant 0 : index
    %c0_23 = arith.constant 0 : index
    %39 = vector.load %arg2[%c1, %c0_22, %c0_23] : memref<9x128x128xf32, #tpu.memory_space<vmem>>, vector<1x128x128xf32>
    %40 = vector.shape_cast %39 : vector<1x128x128xf32> to vector<128x128xf32>
    %cst_24 = arith.constant dense<0.000000e+00> : vector<256x128xf32>
    %41 = tpu.matmul %38, %40, %cst_24 {dimension_numbers = #tpu.dot_dimension_numbers<[1], [0], [0], [1], [0, 0, 1, 1], [], []>} : vector<256x128xf32>, vector<128x128xf32>, vector<256x128xf32> -> vector<256x128xf32>
    %42 = arith.addf %37, %41 : vector<256x128xf32>
    %c9 = arith.constant 9 : index
    %c0_25 = arith.constant 0 : index
    %43 = vector.load %arg7[%c9, %c0_25] : memref<304x128xf32, #tpu.memory_space<vmem>>, vector<256x128xf32>
    %cst_26 = arith.constant 0.000000e+00 : f32
    %44 = vector.shape_cast %27 : vector<256x1xi1> to vector<256x1xi1>
    %45 = vector.broadcast %44 : vector<256x1xi1> to vector<256x128xi1>
    %46 = vector.broadcast %cst_26 : f32 to vector<256x128xf32>
    %47 = arith.select %45, %43, %46 : vector<256x128xi1>, vector<256x128xf32>
    %c2 = arith.constant 2 : index
    %c0_27 = arith.constant 0 : index
    %c0_28 = arith.constant 0 : index
    %48 = vector.load %arg2[%c2, %c0_27, %c0_28] : memref<9x128x128xf32, #tpu.memory_space<vmem>>, vector<1x128x128xf32>
    %49 = vector.shape_cast %48 : vector<1x128x128xf32> to vector<128x128xf32>
    %cst_29 = arith.constant dense<0.000000e+00> : vector<256x128xf32>
    %50 = tpu.matmul %47, %49, %cst_29 {dimension_numbers = #tpu.dot_dimension_numbers<[1], [0], [0], [1], [0, 0, 1, 1], [], []>} : vector<256x128xf32>, vector<128x128xf32>, vector<256x128xf32> -> vector<256x128xf32>
    %51 = arith.addf %42, %50 : vector<256x128xf32>
    %c23 = arith.constant 23 : index
    %c0_30 = arith.constant 0 : index
    %52 = vector.load %arg7[%c23, %c0_30] : memref<304x128xf32, #tpu.memory_space<vmem>>, vector<256x128xf32>
    %cst_31 = arith.constant 0.000000e+00 : f32
    %53 = vector.shape_cast %25 : vector<256x1xi1> to vector<256x1xi1>
    %54 = vector.broadcast %53 : vector<256x1xi1> to vector<256x128xi1>
    %55 = vector.broadcast %cst_31 : f32 to vector<256x128xf32>
    %56 = arith.select %54, %52, %55 : vector<256x128xi1>, vector<256x128xf32>
    %c3 = arith.constant 3 : index
    %c0_32 = arith.constant 0 : index
    %c0_33 = arith.constant 0 : index
    %57 = vector.load %arg2[%c3, %c0_32, %c0_33] : memref<9x128x128xf32, #tpu.memory_space<vmem>>, vector<1x128x128xf32>
    %58 = vector.shape_cast %57 : vector<1x128x128xf32> to vector<128x128xf32>
    %cst_34 = arith.constant dense<0.000000e+00> : vector<256x128xf32>
    %59 = tpu.matmul %56, %58, %cst_34 {dimension_numbers = #tpu.dot_dimension_numbers<[1], [0], [0], [1], [0, 0, 1, 1], [], []>} : vector<256x128xf32>, vector<128x128xf32>, vector<256x128xf32> -> vector<256x128xf32>
    %60 = arith.addf %51, %59 : vector<256x128xf32>
    %c24_35 = arith.constant 24 : index
    %c0_36 = arith.constant 0 : index
    %61 = vector.load %arg7[%c24_35, %c0_36] : memref<304x128xf32, #tpu.memory_space<vmem>>, vector<256x128xf32>
    %c4 = arith.constant 4 : index
    %c0_37 = arith.constant 0 : index
    %c0_38 = arith.constant 0 : index
    %62 = vector.load %arg2[%c4, %c0_37, %c0_38] : memref<9x128x128xf32, #tpu.memory_space<vmem>>, vector<1x128x128xf32>
    %63 = vector.shape_cast %62 : vector<1x128x128xf32> to vector<128x128xf32>
    %cst_39 = arith.constant dense<0.000000e+00> : vector<256x128xf32>
    %64 = tpu.matmul %61, %63, %cst_39 {dimension_numbers = #tpu.dot_dimension_numbers<[1], [0], [0], [1], [0, 0, 1, 1], [], []>} : vector<256x128xf32>, vector<128x128xf32>, vector<256x128xf32> -> vector<256x128xf32>
    %65 = arith.addf %60, %64 : vector<256x128xf32>
    %c25 = arith.constant 25 : index
    %c0_40 = arith.constant 0 : index
    %66 = vector.load %arg7[%c25, %c0_40] : memref<304x128xf32, #tpu.memory_space<vmem>>, vector<256x128xf32>
    %cst_41 = arith.constant 0.000000e+00 : f32
    %67 = vector.shape_cast %27 : vector<256x1xi1> to vector<256x1xi1>
    %68 = vector.broadcast %67 : vector<256x1xi1> to vector<256x128xi1>
    %69 = vector.broadcast %cst_41 : f32 to vector<256x128xf32>
    %70 = arith.select %68, %66, %69 : vector<256x128xi1>, vector<256x128xf32>
    %c5 = arith.constant 5 : index
    %c0_42 = arith.constant 0 : index
    %c0_43 = arith.constant 0 : index
    %71 = vector.load %arg2[%c5, %c0_42, %c0_43] : memref<9x128x128xf32, #tpu.memory_space<vmem>>, vector<1x128x128xf32>
    %72 = vector.shape_cast %71 : vector<1x128x128xf32> to vector<128x128xf32>
    %cst_44 = arith.constant dense<0.000000e+00> : vector<256x128xf32>
    %73 = tpu.matmul %70, %72, %cst_44 {dimension_numbers = #tpu.dot_dimension_numbers<[1], [0], [0], [1], [0, 0, 1, 1], [], []>} : vector<256x128xf32>, vector<128x128xf32>, vector<256x128xf32> -> vector<256x128xf32>
    %74 = arith.addf %65, %73 : vector<256x128xf32>
    %c39 = arith.constant 39 : index
    %c0_45 = arith.constant 0 : index
    %75 = vector.load %arg7[%c39, %c0_45] : memref<304x128xf32, #tpu.memory_space<vmem>>, vector<256x128xf32>
    %cst_46 = arith.constant 0.000000e+00 : f32
    %76 = vector.shape_cast %25 : vector<256x1xi1> to vector<256x1xi1>
    %77 = vector.broadcast %76 : vector<256x1xi1> to vector<256x128xi1>
    %78 = vector.broadcast %cst_46 : f32 to vector<256x128xf32>
    %79 = arith.select %77, %75, %78 : vector<256x128xi1>, vector<256x128xf32>
    %c6 = arith.constant 6 : index
    %c0_47 = arith.constant 0 : index
    %c0_48 = arith.constant 0 : index
    %80 = vector.load %arg2[%c6, %c0_47, %c0_48] : memref<9x128x128xf32, #tpu.memory_space<vmem>>, vector<1x128x128xf32>
    %81 = vector.shape_cast %80 : vector<1x128x128xf32> to vector<128x128xf32>
    %cst_49 = arith.constant dense<0.000000e+00> : vector<256x128xf32>
    %82 = tpu.matmul %79, %81, %cst_49 {dimension_numbers = #tpu.dot_dimension_numbers<[1], [0], [0], [1], [0, 0, 1, 1], [], []>} : vector<256x128xf32>, vector<128x128xf32>, vector<256x128xf32> -> vector<256x128xf32>
    %83 = arith.addf %74, %82 : vector<256x128xf32>
    %c40 = arith.constant 40 : index
    %c0_50 = arith.constant 0 : index
    %84 = vector.load %arg7[%c40, %c0_50] : memref<304x128xf32, #tpu.memory_space<vmem>>, vector<256x128xf32>
    %c7_51 = arith.constant 7 : index
    %c0_52 = arith.constant 0 : index
    %c0_53 = arith.constant 0 : index
    %85 = vector.load %arg2[%c7_51, %c0_52, %c0_53] : memref<9x128x128xf32, #tpu.memory_space<vmem>>, vector<1x128x128xf32>
    %86 = vector.shape_cast %85 : vector<1x128x128xf32> to vector<128x128xf32>
    %cst_54 = arith.constant dense<0.000000e+00> : vector<256x128xf32>
    %87 = tpu.matmul %84, %86, %cst_54 {dimension_numbers = #tpu.dot_dimension_numbers<[1], [0], [0], [1], [0, 0, 1, 1], [], []>} : vector<256x128xf32>, vector<128x128xf32>, vector<256x128xf32> -> vector<256x128xf32>
    %88 = arith.addf %83, %87 : vector<256x128xf32>
    %c41 = arith.constant 41 : index
    %c0_55 = arith.constant 0 : index
    %89 = vector.load %arg7[%c41, %c0_55] : memref<304x128xf32, #tpu.memory_space<vmem>>, vector<256x128xf32>
    %cst_56 = arith.constant 0.000000e+00 : f32
    %90 = vector.shape_cast %27 : vector<256x1xi1> to vector<256x1xi1>
    %91 = vector.broadcast %90 : vector<256x1xi1> to vector<256x128xi1>
    %92 = vector.broadcast %cst_56 : f32 to vector<256x128xf32>
    %93 = arith.select %91, %89, %92 : vector<256x128xi1>, vector<256x128xf32>
    %c8_57 = arith.constant 8 : index
    %c0_58 = arith.constant 0 : index
    %c0_59 = arith.constant 0 : index
    %94 = vector.load %arg2[%c8_57, %c0_58, %c0_59] : memref<9x128x128xf32, #tpu.memory_space<vmem>>, vector<1x128x128xf32>
    %95 = vector.shape_cast %94 : vector<1x128x128xf32> to vector<128x128xf32>
    %cst_60 = arith.constant dense<0.000000e+00> : vector<256x128xf32>
    %96 = tpu.matmul %93, %95, %cst_60 {dimension_numbers = #tpu.dot_dimension_numbers<[1], [0], [0], [1], [0, 0, 1, 1], [], []>} : vector<256x128xf32>, vector<128x128xf32>, vector<256x128xf32> -> vector<256x128xf32>
    %97 = arith.addf %88, %96 : vector<256x128xf32>
    %c0_61 = arith.constant 0 : index
    %c0_62 = arith.constant 0 : index
    %98 = vector.load %arg3[%c0_61, %c0_62] : memref<1x128xf32, #tpu.memory_space<vmem>>, vector<1x128xf32>
    %99 = vector.broadcast %98 : vector<1x128xf32> to vector<256x128xf32>
    %100 = arith.addf %97, %99 : vector<256x128xf32>
    %cst_63 = arith.constant 0.000000e+00 : f32
    %101 = vector.broadcast %cst_63 : f32 to vector<256x128xf32>
    %102 = arith.maximumf %100, %101 : vector<256x128xf32>
    %c24_64 = arith.constant 24 : index
    %c0_65 = arith.constant 0 : index
    %103 = vector.load %arg7[%c24_64, %c0_65] : memref<304x128xf32, #tpu.memory_space<vmem>>, vector<256x128xf32>
    tpu.vector_store %arg7[%c24_64, %c0_65], %102 {strides = array<i32>} : memref<304x128xf32, #tpu.memory_space<vmem>>, vector<256x128xf32>,
    %c7_66 = arith.constant 7 : index
    %c0_67 = arith.constant 0 : index
    %104 = vector.load %arg7[%c7_66, %c0_67] : memref<304x128xf32, #tpu.memory_space<vmem>>, vector<256x128xf32>
    %cst_68 = arith.constant 0.000000e+00 : f32
    %105 = vector.shape_cast %25 : vector<256x1xi1> to vector<256x1xi1>
    %106 = vector.broadcast %105 : vector<256x1xi1> to vector<256x128xi1>
    %107 = vector.broadcast %cst_68 : f32 to vector<256x128xf32>
    %108 = arith.select %106, %104, %107 : vector<256x128xi1>, vector<256x128xf32>
    %c0_69 = arith.constant 0 : index
    %c0_70 = arith.constant 0 : index
    %c0_71 = arith.constant 0 : index
    %109 = vector.load %arg4[%c0_69, %c0_70, %c0_71] : memref<9x128x128xf32, #tpu.memory_space<vmem>>, vector<1x128x128xf32>
    %110 = vector.shape_cast %109 : vector<1x128x128xf32> to vector<128x128xf32>
    %cst_72 = arith.constant dense<0.000000e+00> : vector<256x128xf32>
    %111 = tpu.matmul %108, %110, %cst_72 {dimension_numbers = #tpu.dot_dimension_numbers<[1], [0], [0], [1], [0, 0, 1, 1], [], []>} : vector<256x128xf32>, vector<128x128xf32>, vector<256x128xf32> -> vector<256x128xf32>
    %c8_73 = arith.constant 8 : index
    %c0_74 = arith.constant 0 : index
    %112 = vector.load %arg7[%c8_73, %c0_74] : memref<304x128xf32, #tpu.memory_space<vmem>>, vector<256x128xf32>
    %c1_75 = arith.constant 1 : index
    %c0_76 = arith.constant 0 : index
    %c0_77 = arith.constant 0 : index
    %113 = vector.load %arg4[%c1_75, %c0_76, %c0_77] : memref<9x128x128xf32, #tpu.memory_space<vmem>>, vector<1x128x128xf32>
    %114 = vector.shape_cast %113 : vector<1x128x128xf32> to vector<128x128xf32>
    %cst_78 = arith.constant dense<0.000000e+00> : vector<256x128xf32>
    %115 = tpu.matmul %112, %114, %cst_78 {dimension_numbers = #tpu.dot_dimension_numbers<[1], [0], [0], [1], [0, 0, 1, 1], [], []>} : vector<256x128xf32>, vector<128x128xf32>, vector<256x128xf32> -> vector<256x128xf32>
    %116 = arith.addf %111, %115 : vector<256x128xf32>
    %c9_79 = arith.constant 9 : index
    %c0_80 = arith.constant 0 : index
    %117 = vector.load %arg7[%c9_79, %c0_80] : memref<304x128xf32, #tpu.memory_space<vmem>>, vector<256x128xf32>
    %cst_81 = arith.constant 0.000000e+00 : f32
    %118 = vector.shape_cast %27 : vector<256x1xi1> to vector<256x1xi1>
    %119 = vector.broadcast %118 : vector<256x1xi1> to vector<256x128xi1>
    %120 = vector.broadcast %cst_81 : f32 to vector<256x128xf32>
    %121 = arith.select %119, %117, %120 : vector<256x128xi1>, vector<256x128xf32>
    %c2_82 = arith.constant 2 : index
    %c0_83 = arith.constant 0 : index
    %c0_84 = arith.constant 0 : index
    %122 = vector.load %arg4[%c2_82, %c0_83, %c0_84] : memref<9x128x128xf32, #tpu.memory_space<vmem>>, vector<1x128x128xf32>
    %123 = vector.shape_cast %122 : vector<1x128x128xf32> to vector<128x128xf32>
    %cst_85 = arith.constant dense<0.000000e+00> : vector<256x128xf32>
    %124 = tpu.matmul %121, %123, %cst_85 {dimension_numbers = #tpu.dot_dimension_numbers<[1], [0], [0], [1], [0, 0, 1, 1], [], []>} : vector<256x128xf32>, vector<128x128xf32>, vector<256x128xf32> -> vector<256x128xf32>
    %125 = arith.addf %116, %124 : vector<256x128xf32>
    %c23_86 = arith.constant 23 : index
    %c0_87 = arith.constant 0 : index
    %126 = vector.load %arg7[%c23_86, %c0_87] : memref<304x128xf32, #tpu.memory_space<vmem>>, vector<256x128xf32>
    %cst_88 = arith.constant 0.000000e+00 : f32
    %127 = vector.shape_cast %25 : vector<256x1xi1> to vector<256x1xi1>
    %128 = vector.broadcast %127 : vector<256x1xi1> to vector<256x128xi1>
    %129 = vector.broadcast %cst_88 : f32 to vector<256x128xf32>
    %130 = arith.select %128, %126, %129 : vector<256x128xi1>, vector<256x128xf32>
    %c3_89 = arith.constant 3 : index
    %c0_90 = arith.constant 0 : index
    %c0_91 = arith.constant 0 : index
    %131 = vector.load %arg4[%c3_89, %c0_90, %c0_91] : memref<9x128x128xf32, #tpu.memory_space<vmem>>, vector<1x128x128xf32>
    %132 = vector.shape_cast %131 : vector<1x128x128xf32> to vector<128x128xf32>
    %cst_92 = arith.constant dense<0.000000e+00> : vector<256x128xf32>
    %133 = tpu.matmul %130, %132, %cst_92 {dimension_numbers = #tpu.dot_dimension_numbers<[1], [0], [0], [1], [0, 0, 1, 1], [], []>} : vector<256x128xf32>, vector<128x128xf32>, vector<256x128xf32> -> vector<256x128xf32>
    %134 = arith.addf %125, %133 : vector<256x128xf32>
    %c24_93 = arith.constant 24 : index
    %c0_94 = arith.constant 0 : index
    %135 = vector.load %arg7[%c24_93, %c0_94] : memref<304x128xf32, #tpu.memory_space<vmem>>, vector<256x128xf32>
    %c4_95 = arith.constant 4 : index
    %c0_96 = arith.constant 0 : index
    %c0_97 = arith.constant 0 : index
    %136 = vector.load %arg4[%c4_95, %c0_96, %c0_97] : memref<9x128x128xf32, #tpu.memory_space<vmem>>, vector<1x128x128xf32>
    %137 = vector.shape_cast %136 : vector<1x128x128xf32> to vector<128x128xf32>
    %cst_98 = arith.constant dense<0.000000e+00> : vector<256x128xf32>
    %138 = tpu.matmul %135, %137, %cst_98 {dimension_numbers = #tpu.dot_dimension_numbers<[1], [0], [0], [1], [0, 0, 1, 1], [], []>} : vector<256x128xf32>, vector<128x128xf32>, vector<256x128xf32> -> vector<256x128xf32>
    %139 = arith.addf %134, %138 : vector<256x128xf32>
    %c25_99 = arith.constant 25 : index
    %c0_100 = arith.constant 0 : index
    %140 = vector.load %arg7[%c25_99, %c0_100] : memref<304x128xf32, #tpu.memory_space<vmem>>, vector<256x128xf32>
    %cst_101 = arith.constant 0.000000e+00 : f32
    %141 = vector.shape_cast %27 : vector<256x1xi1> to vector<256x1xi1>
    %142 = vector.broadcast %141 : vector<256x1xi1> to vector<256x128xi1>
    %143 = vector.broadcast %cst_101 : f32 to vector<256x128xf32>
    %144 = arith.select %142, %140, %143 : vector<256x128xi1>, vector<256x128xf32>
    %c5_102 = arith.constant 5 : index
    %c0_103 = arith.constant 0 : index
    %c0_104 = arith.constant 0 : index
    %145 = vector.load %arg4[%c5_102, %c0_103, %c0_104] : memref<9x128x128xf32, #tpu.memory_space<vmem>>, vector<1x128x128xf32>
    %146 = vector.shape_cast %145 : vector<1x128x128xf32> to vector<128x128xf32>
    %cst_105 = arith.constant dense<0.000000e+00> : vector<256x128xf32>
    %147 = tpu.matmul %144, %146, %cst_105 {dimension_numbers = #tpu.dot_dimension_numbers<[1], [0], [0], [1], [0, 0, 1, 1], [], []>} : vector<256x128xf32>, vector<128x128xf32>, vector<256x128xf32> -> vector<256x128xf32>
    %148 = arith.addf %139, %147 : vector<256x128xf32>
    %c39_106 = arith.constant 39 : index
    %c0_107 = arith.constant 0 : index
    %149 = vector.load %arg7[%c39_106, %c0_107] : memref<304x128xf32, #tpu.memory_space<vmem>>, vector<256x128xf32>
    %cst_108 = arith.constant 0.000000e+00 : f32
    %150 = vector.shape_cast %25 : vector<256x1xi1> to vector<256x1xi1>
    %151 = vector.broadcast %150 : vector<256x1xi1> to vector<256x128xi1>
    %152 = vector.broadcast %cst_108 : f32 to vector<256x128xf32>
    %153 = arith.select %151, %149, %152 : vector<256x128xi1>, vector<256x128xf32>
    %c6_109 = arith.constant 6 : index
    %c0_110 = arith.constant 0 : index
    %c0_111 = arith.constant 0 : index
    %154 = vector.load %arg4[%c6_109, %c0_110, %c0_111] : memref<9x128x128xf32, #tpu.memory_space<vmem>>, vector<1x128x128xf32>
    %155 = vector.shape_cast %154 : vector<1x128x128xf32> to vector<128x128xf32>
    %cst_112 = arith.constant dense<0.000000e+00> : vector<256x128xf32>
    %156 = tpu.matmul %153, %155, %cst_112 {dimension_numbers = #tpu.dot_dimension_numbers<[1], [0], [0], [1], [0, 0, 1, 1], [], []>} : vector<256x128xf32>, vector<128x128xf32>, vector<256x128xf32> -> vector<256x128xf32>
    %157 = arith.addf %148, %156 : vector<256x128xf32>
    %c40_113 = arith.constant 40 : index
    %c0_114 = arith.constant 0 : index
    %158 = vector.load %arg7[%c40_113, %c0_114] : memref<304x128xf32, #tpu.memory_space<vmem>>, vector<256x128xf32>
    %c7_115 = arith.constant 7 : index
    %c0_116 = arith.constant 0 : index
    %c0_117 = arith.constant 0 : index
    %159 = vector.load %arg4[%c7_115, %c0_116, %c0_117] : memref<9x128x128xf32, #tpu.memory_space<vmem>>, vector<1x128x128xf32>
    %160 = vector.shape_cast %159 : vector<1x128x128xf32> to vector<128x128xf32>
    %cst_118 = arith.constant dense<0.000000e+00> : vector<256x128xf32>
    %161 = tpu.matmul %158, %160, %cst_118 {dimension_numbers = #tpu.dot_dimension_numbers<[1], [0], [0], [1], [0, 0, 1, 1], [], []>} : vector<256x128xf32>, vector<128x128xf32>, vector<256x128xf32> -> vector<256x128xf32>
    %162 = arith.addf %157, %161 : vector<256x128xf32>
    %c41_119 = arith.constant 41 : index
    %c0_120 = arith.constant 0 : index
    %163 = vector.load %arg7[%c41_119, %c0_120] : memref<304x128xf32, #tpu.memory_space<vmem>>, vector<256x128xf32>
    %cst_121 = arith.constant 0.000000e+00 : f32
    %164 = vector.shape_cast %27 : vector<256x1xi1> to vector<256x1xi1>
    %165 = vector.broadcast %164 : vector<256x1xi1> to vector<256x128xi1>
    %166 = vector.broadcast %cst_121 : f32 to vector<256x128xf32>
    %167 = arith.select %165, %163, %166 : vector<256x128xi1>, vector<256x128xf32>
    %c8_122 = arith.constant 8 : index
    %c0_123 = arith.constant 0 : index
    %c0_124 = arith.constant 0 : index
    %168 = vector.load %arg4[%c8_122, %c0_123, %c0_124] : memref<9x128x128xf32, #tpu.memory_space<vmem>>, vector<1x128x128xf32>
    %169 = vector.shape_cast %168 : vector<1x128x128xf32> to vector<128x128xf32>
    %cst_125 = arith.constant dense<0.000000e+00> : vector<256x128xf32>
    %170 = tpu.matmul %167, %169, %cst_125 {dimension_numbers = #tpu.dot_dimension_numbers<[1], [0], [0], [1], [0, 0, 1, 1], [], []>} : vector<256x128xf32>, vector<128x128xf32>, vector<256x128xf32> -> vector<256x128xf32>
    %171 = arith.addf %162, %170 : vector<256x128xf32>
    %c0_126 = arith.constant 0 : index
    %c0_127 = arith.constant 0 : index
    %172 = vector.load %arg5[%c0_126, %c0_127] : memref<1x128xf32, #tpu.memory_space<vmem>>, vector<1x128xf32>
    %173 = vector.broadcast %172 : vector<1x128xf32> to vector<256x128xf32>
    %174 = arith.addf %171, %173 : vector<256x128xf32>
    %c0_128 = arith.constant 0 : index
    %c0_129 = arith.constant 0 : index
    %175 = vector.load %arg8[%c0_128, %c0_129] : memref<256x128xf32, #tpu.memory_space<vmem>>, vector<256x128xf32>
    %176 = arith.addf %174, %175 : vector<256x128xf32>
    %cst_130 = arith.constant 0.000000e+00 : f32
    %177 = vector.broadcast %cst_130 : f32 to vector<256x128xf32>
    %178 = arith.maximumf %176, %177 : vector<256x128xf32>
    %c0_131 = arith.constant 0 : index
    %c0_132 = arith.constant 0 : index
    %179 = vector.load %arg8[%c0_131, %c0_132] : memref<256x128xf32, #tpu.memory_space<vmem>>, vector<256x128xf32>
    tpu.vector_store %arg8[%c0_131, %c0_132], %178 {strides = array<i32>} : memref<256x128xf32, #tpu.memory_space<vmem>>, vector<256x128xf32>,
    %c0_133 = arith.constant 0 : index
    %c0_134 = arith.constant 0 : index
    %180 = vector.load %arg8[%c0_133, %c0_134] : memref<256x128xf32, #tpu.memory_space<vmem>>, vector<256x128xf32>
    %c24_135 = arith.constant 24 : index
    %c0_136 = arith.constant 0 : index
    %181 = vector.load %arg7[%c24_135, %c0_136] : memref<304x128xf32, #tpu.memory_space<vmem>>, vector<256x128xf32>
    tpu.vector_store %arg7[%c24_135, %c0_136], %180 {strides = array<i32>} : memref<304x128xf32, #tpu.memory_space<vmem>>, vector<256x128xf32>,
    %c7_137 = arith.constant 7 : index
    %c0_138 = arith.constant 0 : index
    %182 = vector.load %arg7[%c7_137, %c0_138] : memref<304x128xf32, #tpu.memory_space<vmem>>, vector<256x128xf32>
    %cst_139 = arith.constant 0.000000e+00 : f32
    %183 = vector.shape_cast %25 : vector<256x1xi1> to vector<256x1xi1>
    %184 = vector.broadcast %183 : vector<256x1xi1> to vector<256x128xi1>
    %185 = vector.broadcast %cst_139 : f32 to vector<256x128xf32>
    %186 = arith.select %184, %182, %185 : vector<256x128xi1>, vector<256x128xf32>
    %c0_140 = arith.constant 0 : index
    %c0_141 = arith.constant 0 : index
    %c0_142 = arith.constant 0 : index
    %187 = vector.load %arg2[%c0_140, %c0_141, %c0_142] : memref<9x128x128xf32, #tpu.memory_space<vmem>>, vector<1x128x128xf32>
    %188 = vector.shape_cast %187 : vector<1x128x128xf32> to vector<128x128xf32>
    %cst_143 = arith.constant dense<0.000000e+00> : vector<256x128xf32>
    %189 = tpu.matmul %186, %188, %cst_143 {dimension_numbers = #tpu.dot_dimension_numbers<[1], [0], [0], [1], [0, 0, 1, 1], [], []>} : vector<256x128xf32>, vector<128x128xf32>, vector<256x128xf32> -> vector<256x128xf32>
    %c8_144 = arith.constant 8 : index
    %c0_145 = arith.constant 0 : index
    %190 = vector.load %arg7[%c8_144, %c0_145] : memref<304x128xf32, #tpu.memory_space<vmem>>, vector<256x128xf32>
    %c1_146 = arith.constant 1 : index
    %c0_147 = arith.constant 0 : index
    %c0_148 = arith.constant 0 : index
    %191 = vector.load %arg2[%c1_146, %c0_147, %c0_148] : memref<9x128x128xf32, #tpu.memory_space<vmem>>, vector<1x128x128xf32>
    %192 = vector.shape_cast %191 : vector<1x128x128xf32> to vector<128x128xf32>
    %cst_149 = arith.constant dense<0.000000e+00> : vector<256x128xf32>
    %193 = tpu.matmul %190, %192, %cst_149 {dimension_numbers = #tpu.dot_dimension_numbers<[1], [0], [0], [1], [0, 0, 1, 1], [], []>} : vector<256x128xf32>, vector<128x128xf32>, vector<256x128xf32> -> vector<256x128xf32>
    %194 = arith.addf %189, %193 : vector<256x128xf32>
    %c9_150 = arith.constant 9 : index
    %c0_151 = arith.constant 0 : index
    %195 = vector.load %arg7[%c9_150, %c0_151] : memref<304x128xf32, #tpu.memory_space<vmem>>, vector<256x128xf32>
    %cst_152 = arith.constant 0.000000e+00 : f32
    %196 = vector.shape_cast %27 : vector<256x1xi1> to vector<256x1xi1>
    %197 = vector.broadcast %196 : vector<256x1xi1> to vector<256x128xi1>
    %198 = vector.broadcast %cst_152 : f32 to vector<256x128xf32>
    %199 = arith.select %197, %195, %198 : vector<256x128xi1>, vector<256x128xf32>
    %c2_153 = arith.constant 2 : index
    %c0_154 = arith.constant 0 : index
    %c0_155 = arith.constant 0 : index
    %200 = vector.load %arg2[%c2_153, %c0_154, %c0_155] : memref<9x128x128xf32, #tpu.memory_space<vmem>>, vector<1x128x128xf32>
    %201 = vector.shape_cast %200 : vector<1x128x128xf32> to vector<128x128xf32>
    %cst_156 = arith.constant dense<0.000000e+00> : vector<256x128xf32>
    %202 = tpu.matmul %199, %201, %cst_156 {dimension_numbers = #tpu.dot_dimension_numbers<[1], [0], [0], [1], [0, 0, 1, 1], [], []>} : vector<256x128xf32>, vector<128x128xf32>, vector<256x128xf32> -> vector<256x128xf32>
    %203 = arith.addf %194, %202 : vector<256x128xf32>
    %c23_157 = arith.constant 23 : index
    %c0_158 = arith.constant 0 : index
    %204 = vector.load %arg7[%c23_157, %c0_158] : memref<304x128xf32, #tpu.memory_space<vmem>>, vector<256x128xf32>
    %cst_159 = arith.constant 0.000000e+00 : f32
    %205 = vector.shape_cast %25 : vector<256x1xi1> to vector<256x1xi1>
    %206 = vector.broadcast %205 : vector<256x1xi1> to vector<256x128xi1>
    %207 = vector.broadcast %cst_159 : f32 to vector<256x128xf32>
    %208 = arith.select %206, %204, %207 : vector<256x128xi1>, vector<256x128xf32>
    %c3_160 = arith.constant 3 : index
    %c0_161 = arith.constant 0 : index
    %c0_162 = arith.constant 0 : index
    %209 = vector.load %arg2[%c3_160, %c0_161, %c0_162] : memref<9x128x128xf32, #tpu.memory_space<vmem>>, vector<1x128x128xf32>
    %210 = vector.shape_cast %209 : vector<1x128x128xf32> to vector<128x128xf32>
    %cst_163 = arith.constant dense<0.000000e+00> : vector<256x128xf32>
    %211 = tpu.matmul %208, %210, %cst_163 {dimension_numbers = #tpu.dot_dimension_numbers<[1], [0], [0], [1], [0, 0, 1, 1], [], []>} : vector<256x128xf32>, vector<128x128xf32>, vector<256x128xf32> -> vector<256x128xf32>
    %212 = arith.addf %203, %211 : vector<256x128xf32>
    %c24_164 = arith.constant 24 : index
    %c0_165 = arith.constant 0 : index
    %213 = vector.load %arg7[%c24_164, %c0_165] : memref<304x128xf32, #tpu.memory_space<vmem>>, vector<256x128xf32>
    %c4_166 = arith.constant 4 : index
    %c0_167 = arith.constant 0 : index
    %c0_168 = arith.constant 0 : index
    %214 = vector.load %arg2[%c4_166, %c0_167, %c0_168] : memref<9x128x128xf32, #tpu.memory_space<vmem>>, vector<1x128x128xf32>
    %215 = vector.shape_cast %214 : vector<1x128x128xf32> to vector<128x128xf32>
    %cst_169 = arith.constant dense<0.000000e+00> : vector<256x128xf32>
    %216 = tpu.matmul %213, %215, %cst_169 {dimension_numbers = #tpu.dot_dimension_numbers<[1], [0], [0], [1], [0, 0, 1, 1], [], []>} : vector<256x128xf32>, vector<128x128xf32>, vector<256x128xf32> -> vector<256x128xf32>
    %217 = arith.addf %212, %216 : vector<256x128xf32>
    %c25_170 = arith.constant 25 : index
    %c0_171 = arith.constant 0 : index
    %218 = vector.load %arg7[%c25_170, %c0_171] : memref<304x128xf32, #tpu.memory_space<vmem>>, vector<256x128xf32>
    %cst_172 = arith.constant 0.000000e+00 : f32
    %219 = vector.shape_cast %27 : vector<256x1xi1> to vector<256x1xi1>
    %220 = vector.broadcast %219 : vector<256x1xi1> to vector<256x128xi1>
    %221 = vector.broadcast %cst_172 : f32 to vector<256x128xf32>
    %222 = arith.select %220, %218, %221 : vector<256x128xi1>, vector<256x128xf32>
    %c5_173 = arith.constant 5 : index
    %c0_174 = arith.constant 0 : index
    %c0_175 = arith.constant 0 : index
    %223 = vector.load %arg2[%c5_173, %c0_174, %c0_175] : memref<9x128x128xf32, #tpu.memory_space<vmem>>, vector<1x128x128xf32>
    %224 = vector.shape_cast %223 : vector<1x128x128xf32> to vector<128x128xf32>
    %cst_176 = arith.constant dense<0.000000e+00> : vector<256x128xf32>
    %225 = tpu.matmul %222, %224, %cst_176 {dimension_numbers = #tpu.dot_dimension_numbers<[1], [0], [0], [1], [0, 0, 1, 1], [], []>} : vector<256x128xf32>, vector<128x128xf32>, vector<256x128xf32> -> vector<256x128xf32>
    %226 = arith.addf %217, %225 : vector<256x128xf32>
    %c39_177 = arith.constant 39 : index
    %c0_178 = arith.constant 0 : index
    %227 = vector.load %arg7[%c39_177, %c0_178] : memref<304x128xf32, #tpu.memory_space<vmem>>, vector<256x128xf32>
    %cst_179 = arith.constant 0.000000e+00 : f32
    %228 = vector.shape_cast %25 : vector<256x1xi1> to vector<256x1xi1>
    %229 = vector.broadcast %228 : vector<256x1xi1> to vector<256x128xi1>
    %230 = vector.broadcast %cst_179 : f32 to vector<256x128xf32>
    %231 = arith.select %229, %227, %230 : vector<256x128xi1>, vector<256x128xf32>
    %c6_180 = arith.constant 6 : index
    %c0_181 = arith.constant 0 : index
    %c0_182 = arith.constant 0 : index
    %232 = vector.load %arg2[%c6_180, %c0_181, %c0_182] : memref<9x128x128xf32, #tpu.memory_space<vmem>>, vector<1x128x128xf32>
    %233 = vector.shape_cast %232 : vector<1x128x128xf32> to vector<128x128xf32>
    %cst_183 = arith.constant dense<0.000000e+00> : vector<256x128xf32>
    %234 = tpu.matmul %231, %233, %cst_183 {dimension_numbers = #tpu.dot_dimension_numbers<[1], [0], [0], [1], [0, 0, 1, 1], [], []>} : vector<256x128xf32>, vector<128x128xf32>, vector<256x128xf32> -> vector<256x128xf32>
    %235 = arith.addf %226, %234 : vector<256x128xf32>
    %c40_184 = arith.constant 40 : index
    %c0_185 = arith.constant 0 : index
    %236 = vector.load %arg7[%c40_184, %c0_185] : memref<304x128xf32, #tpu.memory_space<vmem>>, vector<256x128xf32>
    %c7_186 = arith.constant 7 : index
    %c0_187 = arith.constant 0 : index
    %c0_188 = arith.constant 0 : index
    %237 = vector.load %arg2[%c7_186, %c0_187, %c0_188] : memref<9x128x128xf32, #tpu.memory_space<vmem>>, vector<1x128x128xf32>
    %238 = vector.shape_cast %237 : vector<1x128x128xf32> to vector<128x128xf32>
    %cst_189 = arith.constant dense<0.000000e+00> : vector<256x128xf32>
    %239 = tpu.matmul %236, %238, %cst_189 {dimension_numbers = #tpu.dot_dimension_numbers<[1], [0], [0], [1], [0, 0, 1, 1], [], []>} : vector<256x128xf32>, vector<128x128xf32>, vector<256x128xf32> -> vector<256x128xf32>
    %240 = arith.addf %235, %239 : vector<256x128xf32>
    %c41_190 = arith.constant 41 : index
    %c0_191 = arith.constant 0 : index
    %241 = vector.load %arg7[%c41_190, %c0_191] : memref<304x128xf32, #tpu.memory_space<vmem>>, vector<256x128xf32>
    %cst_192 = arith.constant 0.000000e+00 : f32
    %242 = vector.shape_cast %27 : vector<256x1xi1> to vector<256x1xi1>
    %243 = vector.broadcast %242 : vector<256x1xi1> to vector<256x128xi1>
    %244 = vector.broadcast %cst_192 : f32 to vector<256x128xf32>
    %245 = arith.select %243, %241, %244 : vector<256x128xi1>, vector<256x128xf32>
    %c8_193 = arith.constant 8 : index
    %c0_194 = arith.constant 0 : index
    %c0_195 = arith.constant 0 : index
    %246 = vector.load %arg2[%c8_193, %c0_194, %c0_195] : memref<9x128x128xf32, #tpu.memory_space<vmem>>, vector<1x128x128xf32>
    %247 = vector.shape_cast %246 : vector<1x128x128xf32> to vector<128x128xf32>
    %cst_196 = arith.constant dense<0.000000e+00> : vector<256x128xf32>
    %248 = tpu.matmul %245, %247, %cst_196 {dimension_numbers = #tpu.dot_dimension_numbers<[1], [0], [0], [1], [0, 0, 1, 1], [], []>} : vector<256x128xf32>, vector<128x128xf32>, vector<256x128xf32> -> vector<256x128xf32>
    %249 = arith.addf %240, %248 : vector<256x128xf32>
    %c0_197 = arith.constant 0 : index
    %c0_198 = arith.constant 0 : index
    %250 = vector.load %arg3[%c0_197, %c0_198] : memref<1x128xf32, #tpu.memory_space<vmem>>, vector<1x128xf32>
    %251 = vector.broadcast %250 : vector<1x128xf32> to vector<256x128xf32>
    %252 = arith.addf %249, %251 : vector<256x128xf32>
    %cst_199 = arith.constant 0.000000e+00 : f32
    %253 = vector.broadcast %cst_199 : f32 to vector<256x128xf32>
    %254 = arith.maximumf %252, %253 : vector<256x128xf32>
    %c24_200 = arith.constant 24 : index
    %c0_201 = arith.constant 0 : index
    %255 = vector.load %arg7[%c24_200, %c0_201] : memref<304x128xf32, #tpu.memory_space<vmem>>, vector<256x128xf32>
    tpu.vector_store %arg7[%c24_200, %c0_201], %254 {strides = array<i32>} : memref<304x128xf32, #tpu.memory_space<vmem>>, vector<256x128xf32>,
    %c7_202 = arith.constant 7 : index
    %c0_203 = arith.constant 0 : index
    %256 = vector.load %arg7[%c7_202, %c0_203] : memref<304x128xf32, #tpu.memory_space<vmem>>, vector<256x128xf32>
    %cst_204 = arith.constant 0.000000e+00 : f32
    %257 = vector.shape_cast %25 : vector<256x1xi1> to vector<256x1xi1>
    %258 = vector.broadcast %257 : vector<256x1xi1> to vector<256x128xi1>
    %259 = vector.broadcast %cst_204 : f32 to vector<256x128xf32>
    %260 = arith.select %258, %256, %259 : vector<256x128xi1>, vector<256x128xf32>
    %c0_205 = arith.constant 0 : index
    %c0_206 = arith.constant 0 : index
    %c0_207 = arith.constant 0 : index
    %261 = vector.load %arg4[%c0_205, %c0_206, %c0_207] : memref<9x128x128xf32, #tpu.memory_space<vmem>>, vector<1x128x128xf32>
    %262 = vector.shape_cast %261 : vector<1x128x128xf32> to vector<128x128xf32>
    %cst_208 = arith.constant dense<0.000000e+00> : vector<256x128xf32>
    %263 = tpu.matmul %260, %262, %cst_208 {dimension_numbers = #tpu.dot_dimension_numbers<[1], [0], [0], [1], [0, 0, 1, 1], [], []>} : vector<256x128xf32>, vector<128x128xf32>, vector<256x128xf32> -> vector<256x128xf32>
    %c8_209 = arith.constant 8 : index
    %c0_210 = arith.constant 0 : index
    %264 = vector.load %arg7[%c8_209, %c0_210] : memref<304x128xf32, #tpu.memory_space<vmem>>, vector<256x128xf32>
    %c1_211 = arith.constant 1 : index
    %c0_212 = arith.constant 0 : index
    %c0_213 = arith.constant 0 : index
    %265 = vector.load %arg4[%c1_211, %c0_212, %c0_213] : memref<9x128x128xf32, #tpu.memory_space<vmem>>, vector<1x128x128xf32>
    %266 = vector.shape_cast %265 : vector<1x128x128xf32> to vector<128x128xf32>
    %cst_214 = arith.constant dense<0.000000e+00> : vector<256x128xf32>
    %267 = tpu.matmul %264, %266, %cst_214 {dimension_numbers = #tpu.dot_dimension_numbers<[1], [0], [0], [1], [0, 0, 1, 1], [], []>} : vector<256x128xf32>, vector<128x128xf32>, vector<256x128xf32> -> vector<256x128xf32>
    %268 = arith.addf %263, %267 : vector<256x128xf32>
    %c9_215 = arith.constant 9 : index
    %c0_216 = arith.constant 0 : index
    %269 = vector.load %arg7[%c9_215, %c0_216] : memref<304x128xf32, #tpu.memory_space<vmem>>, vector<256x128xf32>
    %cst_217 = arith.constant 0.000000e+00 : f32
    %270 = vector.shape_cast %27 : vector<256x1xi1> to vector<256x1xi1>
    %271 = vector.broadcast %270 : vector<256x1xi1> to vector<256x128xi1>
    %272 = vector.broadcast %cst_217 : f32 to vector<256x128xf32>
    %273 = arith.select %271, %269, %272 : vector<256x128xi1>, vector<256x128xf32>
    %c2_218 = arith.constant 2 : index
    %c0_219 = arith.constant 0 : index
    %c0_220 = arith.constant 0 : index
    %274 = vector.load %arg4[%c2_218, %c0_219, %c0_220] : memref<9x128x128xf32, #tpu.memory_space<vmem>>, vector<1x128x128xf32>
    %275 = vector.shape_cast %274 : vector<1x128x128xf32> to vector<128x128xf32>
    %cst_221 = arith.constant dense<0.000000e+00> : vector<256x128xf32>
    %276 = tpu.matmul %273, %275, %cst_221 {dimension_numbers = #tpu.dot_dimension_numbers<[1], [0], [0], [1], [0, 0, 1, 1], [], []>} : vector<256x128xf32>, vector<128x128xf32>, vector<256x128xf32> -> vector<256x128xf32>
    %277 = arith.addf %268, %276 : vector<256x128xf32>
    %c23_222 = arith.constant 23 : index
    %c0_223 = arith.constant 0 : index
    %278 = vector.load %arg7[%c23_222, %c0_223] : memref<304x128xf32, #tpu.memory_space<vmem>>, vector<256x128xf32>
    %cst_224 = arith.constant 0.000000e+00 : f32
    %279 = vector.shape_cast %25 : vector<256x1xi1> to vector<256x1xi1>
    %280 = vector.broadcast %279 : vector<256x1xi1> to vector<256x128xi1>
    %281 = vector.broadcast %cst_224 : f32 to vector<256x128xf32>
    %282 = arith.select %280, %278, %281 : vector<256x128xi1>, vector<256x128xf32>
    %c3_225 = arith.constant 3 : index
    %c0_226 = arith.constant 0 : index
    %c0_227 = arith.constant 0 : index
    %283 = vector.load %arg4[%c3_225, %c0_226, %c0_227] : memref<9x128x128xf32, #tpu.memory_space<vmem>>, vector<1x128x128xf32>
    %284 = vector.shape_cast %283 : vector<1x128x128xf32> to vector<128x128xf32>
    %cst_228 = arith.constant dense<0.000000e+00> : vector<256x128xf32>
    %285 = tpu.matmul %282, %284, %cst_228 {dimension_numbers = #tpu.dot_dimension_numbers<[1], [0], [0], [1], [0, 0, 1, 1], [], []>} : vector<256x128xf32>, vector<128x128xf32>, vector<256x128xf32> -> vector<256x128xf32>
    %286 = arith.addf %277, %285 : vector<256x128xf32>
    %c24_229 = arith.constant 24 : index
    %c0_230 = arith.constant 0 : index
    %287 = vector.load %arg7[%c24_229, %c0_230] : memref<304x128xf32, #tpu.memory_space<vmem>>, vector<256x128xf32>
    %c4_231 = arith.constant 4 : index
    %c0_232 = arith.constant 0 : index
    %c0_233 = arith.constant 0 : index
    %288 = vector.load %arg4[%c4_231, %c0_232, %c0_233] : memref<9x128x128xf32, #tpu.memory_space<vmem>>, vector<1x128x128xf32>
    %289 = vector.shape_cast %288 : vector<1x128x128xf32> to vector<128x128xf32>
    %cst_234 = arith.constant dense<0.000000e+00> : vector<256x128xf32>
    %290 = tpu.matmul %287, %289, %cst_234 {dimension_numbers = #tpu.dot_dimension_numbers<[1], [0], [0], [1], [0, 0, 1, 1], [], []>} : vector<256x128xf32>, vector<128x128xf32>, vector<256x128xf32> -> vector<256x128xf32>
    %291 = arith.addf %286, %290 : vector<256x128xf32>
    %c25_235 = arith.constant 25 : index
    %c0_236 = arith.constant 0 : index
    %292 = vector.load %arg7[%c25_235, %c0_236] : memref<304x128xf32, #tpu.memory_space<vmem>>, vector<256x128xf32>
    %cst_237 = arith.constant 0.000000e+00 : f32
    %293 = vector.shape_cast %27 : vector<256x1xi1> to vector<256x1xi1>
    %294 = vector.broadcast %293 : vector<256x1xi1> to vector<256x128xi1>
    %295 = vector.broadcast %cst_237 : f32 to vector<256x128xf32>
    %296 = arith.select %294, %292, %295 : vector<256x128xi1>, vector<256x128xf32>
    %c5_238 = arith.constant 5 : index
    %c0_239 = arith.constant 0 : index
    %c0_240 = arith.constant 0 : index
    %297 = vector.load %arg4[%c5_238, %c0_239, %c0_240] : memref<9x128x128xf32, #tpu.memory_space<vmem>>, vector<1x128x128xf32>
    %298 = vector.shape_cast %297 : vector<1x128x128xf32> to vector<128x128xf32>
    %cst_241 = arith.constant dense<0.000000e+00> : vector<256x128xf32>
    %299 = tpu.matmul %296, %298, %cst_241 {dimension_numbers = #tpu.dot_dimension_numbers<[1], [0], [0], [1], [0, 0, 1, 1], [], []>} : vector<256x128xf32>, vector<128x128xf32>, vector<256x128xf32> -> vector<256x128xf32>
    %300 = arith.addf %291, %299 : vector<256x128xf32>
    %c39_242 = arith.constant 39 : index
    %c0_243 = arith.constant 0 : index
    %301 = vector.load %arg7[%c39_242, %c0_243] : memref<304x128xf32, #tpu.memory_space<vmem>>, vector<256x128xf32>
    %cst_244 = arith.constant 0.000000e+00 : f32
    %302 = vector.shape_cast %25 : vector<256x1xi1> to vector<256x1xi1>
    %303 = vector.broadcast %302 : vector<256x1xi1> to vector<256x128xi1>
    %304 = vector.broadcast %cst_244 : f32 to vector<256x128xf32>
    %305 = arith.select %303, %301, %304 : vector<256x128xi1>, vector<256x128xf32>
    %c6_245 = arith.constant 6 : index
    %c0_246 = arith.constant 0 : index
    %c0_247 = arith.constant 0 : index
    %306 = vector.load %arg4[%c6_245, %c0_246, %c0_247] : memref<9x128x128xf32, #tpu.memory_space<vmem>>, vector<1x128x128xf32>
    %307 = vector.shape_cast %306 : vector<1x128x128xf32> to vector<128x128xf32>
    %cst_248 = arith.constant dense<0.000000e+00> : vector<256x128xf32>
    %308 = tpu.matmul %305, %307, %cst_248 {dimension_numbers = #tpu.dot_dimension_numbers<[1], [0], [0], [1], [0, 0, 1, 1], [], []>} : vector<256x128xf32>, vector<128x128xf32>, vector<256x128xf32> -> vector<256x128xf32>
    %309 = arith.addf %300, %308 : vector<256x128xf32>
    %c40_249 = arith.constant 40 : index
    %c0_250 = arith.constant 0 : index
    %310 = vector.load %arg7[%c40_249, %c0_250] : memref<304x128xf32, #tpu.memory_space<vmem>>, vector<256x128xf32>
    %c7_251 = arith.constant 7 : index
    %c0_252 = arith.constant 0 : index
    %c0_253 = arith.constant 0 : index
    %311 = vector.load %arg4[%c7_251, %c0_252, %c0_253] : memref<9x128x128xf32, #tpu.memory_space<vmem>>, vector<1x128x128xf32>
    %312 = vector.shape_cast %311 : vector<1x128x128xf32> to vector<128x128xf32>
    %cst_254 = arith.constant dense<0.000000e+00> : vector<256x128xf32>
    %313 = tpu.matmul %310, %312, %cst_254 {dimension_numbers = #tpu.dot_dimension_numbers<[1], [0], [0], [1], [0, 0, 1, 1], [], []>} : vector<256x128xf32>, vector<128x128xf32>, vector<256x128xf32> -> vector<256x128xf32>
    %314 = arith.addf %309, %313 : vector<256x128xf32>
    %c41_255 = arith.constant 41 : index
    %c0_256 = arith.constant 0 : index
    %315 = vector.load %arg7[%c41_255, %c0_256] : memref<304x128xf32, #tpu.memory_space<vmem>>, vector<256x128xf32>
    %cst_257 = arith.constant 0.000000e+00 : f32
    %316 = vector.shape_cast %27 : vector<256x1xi1> to vector<256x1xi1>
    %317 = vector.broadcast %316 : vector<256x1xi1> to vector<256x128xi1>
    %318 = vector.broadcast %cst_257 : f32 to vector<256x128xf32>
    %319 = arith.select %317, %315, %318 : vector<256x128xi1>, vector<256x128xf32>
    %c8_258 = arith.constant 8 : index
    %c0_259 = arith.constant 0 : index
    %c0_260 = arith.constant 0 : index
    %320 = vector.load %arg4[%c8_258, %c0_259, %c0_260] : memref<9x128x128xf32, #tpu.memory_space<vmem>>, vector<1x128x128xf32>
    %321 = vector.shape_cast %320 : vector<1x128x128xf32> to vector<128x128xf32>
    %cst_261 = arith.constant dense<0.000000e+00> : vector<256x128xf32>
    %322 = tpu.matmul %319, %321, %cst_261 {dimension_numbers = #tpu.dot_dimension_numbers<[1], [0], [0], [1], [0, 0, 1, 1], [], []>} : vector<256x128xf32>, vector<128x128xf32>, vector<256x128xf32> -> vector<256x128xf32>
    %323 = arith.addf %314, %322 : vector<256x128xf32>
    %c0_262 = arith.constant 0 : index
    %c0_263 = arith.constant 0 : index
    %324 = vector.load %arg5[%c0_262, %c0_263] : memref<1x128xf32, #tpu.memory_space<vmem>>, vector<1x128xf32>
    %325 = vector.broadcast %324 : vector<1x128xf32> to vector<256x128xf32>
    %326 = arith.addf %323, %325 : vector<256x128xf32>
    %c0_264 = arith.constant 0 : index
    %c0_265 = arith.constant 0 : index
    %327 = vector.load %arg8[%c0_264, %c0_265] : memref<256x128xf32, #tpu.memory_space<vmem>>, vector<256x128xf32>
    %328 = arith.addf %326, %327 : vector<256x128xf32>
    %c0_266 = arith.constant 0 : index
    %c0_267 = arith.constant 0 : index
    %329 = vector.load %arg8[%c0_266, %c0_267] : memref<256x128xf32, #tpu.memory_space<vmem>>, vector<256x128xf32>
    tpu.vector_store %arg8[%c0_266, %c0_267], %328 {strides = array<i32>} : memref<256x128xf32, #tpu.memory_space<vmem>>, vector<256x128xf32>,
    %c0_268 = arith.constant 0 : index
    %c0_269 = arith.constant 0 : index
    %330 = vector.load %arg8[%c0_268, %c0_269] : memref<256x128xf32, #tpu.memory_space<vmem>>, vector<256x128xf32>
    %c0_270 = arith.constant 0 : index
    %c0_271 = arith.constant 0 : index
    %c0_272 = arith.constant 0 : index
    %331 = vector.load %arg6[%c0_270, %c0_271, %c0_272] : memref<1x256x128xf32, #tpu.memory_space<vmem>>, vector<1x256x128xf32>
    %332 = vector.shape_cast %331 : vector<1x256x128xf32> to vector<256x128xf32>
    %333 = vector.shape_cast %330 : vector<256x128xf32> to vector<1x256x128xf32>
    tpu.vector_store %arg6[%c0_270, %c0_271, %c0_272], %333 {strides = array<i32>} : memref<1x256x128xf32, #tpu.memory_space<vmem>>, vector<1x256x128xf32>,
    return
  }
  func.func @transform_0(%arg0: i32) -> (i32, i32, i32) {
    %c0_i32 = arith.constant 0 : i32
    %c0_i32_0 = arith.constant 0 : i32
    %c0_i32_1 = arith.constant 0 : i32
    return %arg0, %c0_i32, %c0_i32_0 : i32, i32, i32
  }
  func.func @transform_1(%arg0: i32) -> (i32, i32, i32) {
    %c0_i32 = arith.constant 0 : i32
    %c0_i32_0 = arith.constant 0 : i32
    %c0_i32_1 = arith.constant 0 : i32
    %c0_i32_2 = arith.constant 0 : i32
    return %c0_i32, %c0_i32_0, %c0_i32_1 : i32, i32, i32
  }
  func.func @transform_2(%arg0: i32) -> (i32, i32) {
    %c0_i32 = arith.constant 0 : i32
    %c0_i32_0 = arith.constant 0 : i32
    %c0_i32_1 = arith.constant 0 : i32
    return %c0_i32, %c0_i32_0 : i32, i32
  }
  func.func @transform_3(%arg0: i32) -> (i32, i32, i32) {
    %c0_i32 = arith.constant 0 : i32
    %c0_i32_0 = arith.constant 0 : i32
    %c0_i32_1 = arith.constant 0 : i32
    %c0_i32_2 = arith.constant 0 : i32
    return %c0_i32, %c0_i32_0, %c0_i32_1 : i32, i32, i32
  }
  func.func @transform_4(%arg0: i32) -> (i32, i32) {
    %c0_i32 = arith.constant 0 : i32
    %c0_i32_0 = arith.constant 0 : i32
    %c0_i32_1 = arith.constant 0 : i32
    return %c0_i32, %c0_i32_0 : i32, i32
  }
  func.func @transform_5(%arg0: i32) -> (i32, i32, i32) {
    %c0_i32 = arith.constant 0 : i32
    %c0_i32_0 = arith.constant 0 : i32
    %c0_i32_1 = arith.constant 0 : i32
    return %arg0, %c0_i32, %c0_i32_0 : i32, i32, i32
  }
}

</mosaic_0001>

<bundles_post_ra>
// kernel: tpu_custom_call.1
= control target key start
LH: loop header
LB: loop body
LE: loop exit
PB: predicated region body
PF: predicated region fallthrough
CT: control target
= control target key end

     0   :  { %10 = vsyncpa [#allocation5], 0  ;;  %s24074_s0 = inlined_call_operand.hbm [shape: f32[2,256,128], index: 0, kind: input, shape index: {}]   ;;  %s24075_s1 = inlined_call_operand.hbm [shape: f32[9,128,128], index: 1, kind: input, shape index: {}]   ;;  %s24076_s2 = inlined_call_operand.vmem [shape: f32[1,128], index: 2, kind: input, shape index: {}]   ;;  %s24077_s3 = inlined_call_operand.hbm [shape: f32[9,128,128], index: 3, kind: input, shape index: {}]   ;;  %s24078_s4 = inlined_call_operand.vmem [shape: f32[1,128], index: 4, kind: input, shape index: {}]   ;;  %s24079_s5 = inlined_call_operand.hbm [shape: f32[2,256,128], index: 5, kind: output, shape index: {}]  }
   0x1   :  { %12 = vsyncpa [#allocation5 + $0x1], 0 }
   0x2   :  { %13 = vsyncpa [#allocation8], 0 }
   0x3   :  { %14 = vsyncpa [#allocation6], 0 }
   0x4   :  { %16 = vsyncpa [#allocation6 + $0x1], 0  ;;  %s20734_s18 = smov 0   ;;  %s20736_s19 = smov 0  }
   0x5   :  { %s20738_s20 = smov 0   ;;  %s20740_s21 = smov 0  }
   0x6 LB: > { %s20755_s22 = sadd.s32 4294967295, %s20693_s21   ;;  %s13265_s23 = sadd.s32 4294967294, %s20693_s21   ;;  %s20693_s21 = sphi %s20740_s21, %s25460_s21   ;;  %s20689_s20 = sphi %s20738_s20, %s25459_s20   ;;  %s20685_s19 = sphi %s20736_s19, %s25458_s19   ;;  %s20681_s18 = sphi %s20734_s18, %s25457_s18  }
   0x7   : > { %p42_p0 = scmp.ne.s32.totalorder %s20685_s19, %s20681_s18  ;;  %p24080_p1 = scmp.eq.s32.totalorder %s20755_s22, 0 }
   0x8   : > { %p156_p3 = scmp.eq.s32.totalorder %s13265_s23, 1  ;;  %p13266_p5 = scmp.ge.s32.totalorder %s20693_s21, 1 }
   0x9   : > { %p20764_p4 = por %p24080_p1, %p42_p0  ;;  %p163_p7 = scmp.lt.s32.totalorder %s20693_s21, 3 }
   0xa   : > { %p20769_p6 = por %p156_p3, %p42_p0  ;;  %s20695_s27 = smov [#allocation7]  }
   0xb   : > { %s24558_s24 = scalar_select %p20764_p4, 1, 0 }
   0xc   : > { %s24559_s25 = scalar_select %p20769_p6, 1, 0 }
   0xd   : > { %p20774_p8 = pnand %p13266_p5, %p163_p7  ;;  %s175_s28 = sshll.u32 %s20695_s27, 4  ;;  %s20778_s28 = int_to_ptr.vmem [resolvable:$true] %s175_s28 }
   0xe   : > { %s20696_s30 = smov [#allocation9]   ;;  %s20537_s9 = scalar_lea.hbm %s24075_s1, 18432 }
   0xf   : > { %p20469_p9 = pneg %p20774_p8  ;;  %s191_s6 = sshll.u32 %s20696_s30, 4  ;;  %s20789_s6 = int_to_ptr.vmem [resolvable:$true] %s191_s6 }
  0x10   : > { %p20538_p12 = scmp.ne.s32.totalorder %s24075_s1, %s20537_s9  ;;  %p20544_p5 = scmp.lt.u32.totalorder %s20537_s9, %s24075_s1 }
  0x11   : > { %p20785_p11 = pnand %p20469_p9, %p24080_p1 }
  0x13   : > { %p20539_p13 = pneg %p20785_p11 }
  0x15   : > { %p20540_p0 = pnand %p20539_p13, %p20538_p12 }
  0x17   : > { %p20541_p3 = pneg %p20540_p0 }
  0x19   : > { %p20546_p7 = pnand %p20544_p5, %p20541_p3 }
  0x1b   : > { %20549 = shalt.err (!%p20546_p7)
}
  0x1c   : > { %s20550_s14 = scalar_lea.vmem %s20778_s28, 18432  ;;  %p20558_p2 = scmp.lt.s32.totalorder %s20778_s28, %s20778_s28 }
  0x1d   : > { %p20551_p9 = scmp.ne.s32.totalorder %s20778_s28, %s20550_s14  ;;  %p20559_p12 = scmp.lt.s32.totalorder %s20550_s14, %s20550_s14 }
  0x1f   : > { %p20553_p10 = pnand %p20551_p9, %p20539_p13  ;;  %p20560_p0 = por %p20559_p12, %p20558_p2 }
  0x21   : > { %p20554_p1 = pneg %p20553_p10 }
  0x23   : > { %p20561_p6 = pnand %p20560_p0, %p20554_p1 }
  0x25   : > { %20564 = shalt.err (!%p20561_p6)
}
  0x26   : > { %s20697_s15 = smov 128   ;;  %s20698_s16 = smov 8  }
  0x27   : > { %20472 = dma.hbm_to_vmem [thread:$0]  (!%p20785_p11), %s24075_s1, 18432, %s20778_s28, [#allocation8], %s20697_s15, %s20697_s15, %s20698_s16  }
  0x28   : > { %s20565_s7 = scalar_lea.hbm %s24077_s3, 18432 }
  0x29   : > { %p20566_p1 = scmp.ne.s32.totalorder %s24077_s3, %s20565_s7  ;;  %p20572_p10 = scmp.lt.u32.totalorder %s20565_s7, %s24077_s3 }
  0x2b   : > { %p20568_p2 = pnand %p20566_p1, %p20539_p13 }
  0x2d   : > { %p20569_p6 = pneg %p20568_p2 }
  0x2f   : > { %p20574_p3 = pnand %p20572_p10, %p20569_p6 }
  0x31   : > { %20577 = shalt.err (!%p20574_p3)
}
  0x32   : > { %s20578_s28 = scalar_lea.vmem %s20789_s6, 18432  ;;  %p20586_p12 = scmp.lt.s32.totalorder %s20789_s6, %s20789_s6 }
  0x33   : > { %p20579_p5 = scmp.ne.s32.totalorder %s20789_s6, %s20578_s28  ;;  %p20587_p0 = scmp.lt.s32.totalorder %s20578_s28, %s20578_s28 }
  0x35   : > { %p20581_p7 = pnand %p20579_p5, %p20539_p13  ;;  %p20588_p1 = por %p20587_p0, %p20586_p12 }
  0x37   : > { %p20582_p9 = pneg %p20581_p7 }
  0x39   : > { %p20589_p2 = pnand %p20588_p1, %p20582_p9 }
  0x3b   : > { %20592 = shalt.err (!%p20589_p2)
}
  0x3c   : > { %20475 = dma.hbm_to_vmem [thread:$0]  (!%p20785_p11), %s24077_s3, 18432, %s20789_s6, [#allocation8], %s20697_s15, %s20697_s15, %s20698_s16  }
  0x3d   : > { %s20850_s29 = sadd.s32 1, %s20693_s21   ;;  %s29_s14 = sadd.s32 1, %s20689_s20 }
  0x3e   : > { %s26_s17 = ssub.s32 %s20693_s21, %s20850_s29  ;;  %p36_p13 = scmp.ne.s32.totalorder %s20689_s20, %s20685_s19 }
  0x3f   : > { %p27_p6 = scmp.eq.s32.totalorder %s26_s17, 0  ;;  %p37_p10 = scmp.eq.s32.totalorder %s20693_s21, 0 }
  0x40   : > { %p24562_p3 = scmp.eq.s32.totalorder %s20755_s22, 1  ;;  %p20486_p7 = scmp.lt.s32.totalorder %s20693_s21, 2 }
  0x41   : > { %s20866_s27 = scalar_select %p27_p6, %s20689_s20, %s29_s14  }
  0x42   : > { %p20860_p5 = por %p24562_p3, %p36_p13  ;;  %p38_p9 = por %p37_p10, %p36_p13 }
  0x43   : > { %s208_s30 = sand.u32 1, %s20689_s20   ;;  %s13671_s6 = sshll.u32 %s20693_s21, 12 }
  0x44   : > { %s24563_s23 = scalar_select %p20860_p5, 1, 0 }
  0x45   : > { %s13270_s7 = sshll.u32 %s208_s30, 8  ;;  %s20873_s10 = scalar_lea.hbm %s24074_s0, %s13671_s6 }
  0x46   : > { %s212_s11 = scalar_lea.vmem [#allocation4], %s13270_s7  ;;  %p20877_p11 = pnand %p20486_p7, %p38_p9 }
  0x47   : > { %s219_s28 = sshll.u32 %s212_s11, 4  ;;  %s20881_s13 = scalar_lea.sflag [#allocation5], %s208_s30  ;;  %s20875_s28 = int_to_ptr.vmem [resolvable:$true] %s219_s28 }
  0x48   : > { %s20593_s14 = scalar_lea.hbm %s20873_s10, 4096  ;;  %p20595_p0 = pneg %p20877_p11 }
  0x49   : > { %p20594_p12 = scmp.ne.s32.totalorder %s20873_s10, %s20593_s14  ;;  %s20598_s6 = scalar_lea.hbm %s24074_s0, 8192 }
  0x4a   : > { %p20599_p13 = scmp.lt.u32.totalorder %s20873_s10, %s24074_s0  ;;  %p20600_p6 = scmp.lt.u32.totalorder %s20598_s6, %s20593_s14 }
  0x4b   : > { %p20596_p1 = pnand %p20595_p0, %p20594_p12  ;;  %p20602_p3 = scmp.lt.u32.totalorder %s20593_s14, %s20873_s10 }
  0x4c   : > { %p20601_p10 = por %p20600_p6, %p20599_p13 }
  0x4d   : > { %p20597_p2 = pneg %p20596_p1 }
  0x4e   : > { %p20603_p7 = por %p20602_p3, %p20601_p10 }
  0x50   : > { %p20604_p9 = pnand %p20603_p7, %p20597_p2 }
  0x52   : > { %20607 = shalt.err (!%p20604_p9)
}
  0x53   : > { %s20608_s30 = scalar_lea.vmem %s20875_s28, 4096  ;;  %s20699_s11 = smov [#allocation4]  }
  0x54   : > { %p20609_p12 = scmp.ne.s32.totalorder %s20875_s28, %s20608_s30  ;;  %s20613_s17 = sshll.u32 %s20699_s11, 4  ;;  %s20614_s17 = int_to_ptr.vmem [resolvable:$false] %s20613_s17 }
  0x55   : > { %s20615_s7 = scalar_lea.vmem %s20614_s17, 8192  ;;  %p20616_p4 = scmp.lt.s32.totalorder %s20875_s28, %s20614_s17 }
  0x56   : > { %p20611_p1 = pnand %p20609_p12, %p20595_p0  ;;  %p20617_p13 = scmp.lt.s32.totalorder %s20615_s7, %s20608_s30 }
  0x58   : > { %p20612_p5 = pneg %p20611_p1  ;;  %p20618_p6 = por %p20617_p13, %p20616_p4 }
  0x5a   : > { %p20619_p10 = pnand %p20618_p6, %p20612_p5 }
  0x5c   : > { %20622 = shalt.err (!%p20619_p10)
}
  0x5d   : > { %20479 = dma.hbm_to_vmem [thread:$0]  (!%p20877_p11), %s20873_s10, 4096, %s20875_s28, %s20881_s13, %s20697_s15, %s20697_s15, %s20698_s16  }
  0x5e   : > { %231 = sbr.rel (%p20774_p8) target bundleno = 3127 (0xc37), region = 40 }
  0x65   : > { %s20915_s14 = sand.u32 1, %s20685_s19   ;;  %p24565_p4 = scmp.ne.s32.totalorder %s24558_s24, 0 }
  0x66   : > { %s13274_s6 = sshll.u32 %s20915_s14, 8  ;;  %s234_s8 = scalar_lea.sflag [#allocation5], %s20915_s14 }
  0x67   : > { %s20921_s12 = scalar_lea.vmem [#allocation4], %s13274_s6 }
  0x68   : > { %20668 = dma.done.wait (%p24565_p4), %s234_s8, 4096  }
  0x69   : > { %20670 = vsyncadd (%p24565_p4), %s234_s8, 4294963200  ;;  %p24566_p5 = scmp.eq.s32.totalorder %s20755_s22, 0 }
  0x6b   : > { %20672 = dma.done.wait (%p24566_p5), [#allocation8], 36864   ;;  %p24567_p8 = pmov %p24566_p5 }
  0x6c   : > { %v20700_v0 = vmov 0.0   ;;  %v1064_v1 = vld [vmem:[#allocation7 + $0x80] sm:$0xff]  ;;  %v1065_v2 = vld [vmem:[#allocation7 + $0x88] sm:$0xff]  ;;  %v1066_v3 = vld [vmem:[#allocation7 + $0x90] sm:$0xff]  ;;  %s23929_s30 = scalar_lea.vmem [#allocation10], %s13274_s6  ;;  %s13672_s11 = sshll.u32 %s20755_s22, 12 }
  0x6d   : > { %20674 = vsyncadd (%p24567_p8), [#allocation8], 4294930432  ;;  %273 = vst [vmem:[#allocation2 + $0x8] sm:$0xff] %v20700_v0  ;;  %15433 = vmatprep.mubr.f32.mxu0 %v20700_v0  ;;  %16153 = vmatprep.mubr.f32.mxu1 %v20700_v0  ;;  %v18281_v4 = vpack.c.bf16 %v1065_v2, %v1064_v1  ;;  %v1067_v5 = vld [vmem:[#allocation7 + $0x98] sm:$0xff]  ;;  %v1068_v7 = vld [vmem:[#allocation7 + $0xa0] sm:$0xff]  ;;  %s13173_s17 = sshll.u32 %s23929_s30, 4  ;;  %s24025_s8 = scalar_lea.hbm %s24079_s5, %s13672_s11  ;;  %s24027_s17 = int_to_ptr.vmem [resolvable:$true] %s13173_s17 }
  0x6e   : > { %272 = vst [vmem:[#allocation2] sm:$0xff] %v20700_v0  ;;  %274 = vst [vmem:[#allocation2 + $0x10] sm:$0xff] %v20700_v0  ;;  %v18285_v6 = vpack.c.bf16 %v1067_v5, %v1066_v3  ;;  %v1069_v8 = vld [vmem:[#allocation7 + $0xa8] sm:$0xff]  ;;  %v1070_v10 = vld [vmem:[#allocation7 + $0xb0] sm:$0xff]  ;;  %s13160_s22 = scalar_lea.sflag [#allocation6], %s20915_s14  ;;  %p25454_p0 = scmp.ne.s32.totalorder %s24563_s23, 0 }
  0x6f   : > { %275 = vst [vmem:[#allocation2 + $0x118] sm:$0xff] %v20700_v0  ;;  %276 = vst [vmem:[#allocation2 + $0x120] sm:$0xff] %v20700_v0  ;;  %18282 = vmatprep.subr.bf16.mxu0 %v18281_v4  ;;  %v18289_v9 = vpack.c.bf16 %v1069_v8, %v1068_v7  ;;  %v1071_v11 = vld [vmem:[#allocation7 + $0xb8] sm:$0xff]  ;;  %v20940_v12 = vld [vmem:[%s20921_s12] sm:$0xff]  ;;  %s20701_s24 = smov [#allocation10]  }
  0x70   : > { %277 = vst [vmem:[#allocation2 + $0x128] sm:$0xff] %v20700_v0  ;;  %18284 = vmatpush3.bf16.msra.mxu0 %v18281_v4  ;;  %24568 = vst [vmem:[#allocation14_spill] sm:$0xff] %v20940_v12  ;;  %v20943_v13 = vld [vmem:[%s20921_s12 + $0x8] sm:$0xff]  ;;  %v20946_v14 = vld [vmem:[%s20921_s12 + $0x10] sm:$0xff]  ;;  %v18293_v19 = vpack.c.bf16 %v1071_v11, %v1070_v10  ;;  %s20627_s26 = sshll.u32 %s20701_s24, 4  ;;  %s20628_s26 = int_to_ptr.vmem [resolvable:$false] %s20627_s26 }
  0x71   : > { %18286 = vmatprep.subr.bf16.mxu0 %v18285_v6  ;;  %24569 = vst [vmem:[#allocation15_spill] sm:$0xff] %v20943_v13  ;;  %24570 = vst [vmem:[#allocation16_spill] sm:$0xff] %v20946_v14  ;;  %v20952_v15 = vld [vmem:[%s20921_s12 + $0x18] sm:$0xff]  ;;  %v20956_v16 = vld [vmem:[%s20921_s12 + $0x20] sm:$0xff]  ;;  %s20629_s15 = scalar_lea.vmem %s20628_s26, 8192  ;;  %p20630_p7 = scmp.lt.s32.totalorder %s24027_s17, %s20628_s26 }
  0x72   : > { %855 = vst [vmem:[#allocation2 + $0x18] sm:$0xff] %v20940_v12  ;;  %856 = vst [vmem:[#allocation2 + $0x20] sm:$0xff] %v20943_v13  ;;  %v20959_v17 = vld [vmem:[%s20921_s12 + $0x28] sm:$0xff]  ;;  %v20962_v18 = vld [vmem:[%s20921_s12 + $0x30] sm:$0xff] }
  0x73   : > { %857 = vst [vmem:[#allocation2 + $0x28] sm:$0xff] %v20946_v14  ;;  %24571 = vst [vmem:[#allocation17_spill] sm:$0xff] %v20952_v15  ;;  %v1072_v20 = vld [vmem:[#allocation7 + $0xc0] sm:$0xff]  ;;  %v1073_v21 = vld [vmem:[#allocation7 + $0xc8] sm:$0xff] }
  0x74   : > { %18288 = vmatpush3.bf16.msra.mxu0 %v18285_v6  ;;  %858 = vst [vmem:[#allocation2 + $0x30] sm:$0xff] %v20952_v15  ;;  %24572 = vst [vmem:[#allocation18_spill] sm:$0xff] %v20956_v16  ;;  %v20968_v22 = vld [vmem:[%s20921_s12 + $0x38] sm:$0xff]  ;;  %v20972_v23 = vld [vmem:[%s20921_s12 + $0x40] sm:$0xff]  ;;  %v18297_v30 = vpack.c.bf16 %v1073_v21, %v1072_v20 }
  0x75   : > { %24573 = vst [vmem:[#allocation19_spill] sm:$0xff] %v20959_v17  ;;  %24574 = vst [vmem:[#allocation20_spill] sm:$0xff] %v20962_v18  ;;  %18290 = vmatprep.subr.bf16.mxu0 %v18289_v9  ;;  %v20975_v24 = vld [vmem:[%s20921_s12 + $0x48] sm:$0xff]  ;;  %v20978_v25 = vld [vmem:[%s20921_s12 + $0x50] sm:$0xff] }
  0x76   : > { %859 = vst [vmem:[#allocation2 + $0x38] sm:$0xff] %v20956_v16  ;;  %860 = vst [vmem:[#allocation2 + $0x40] sm:$0xff] %v20959_v17  ;;  %v20984_v26 = vld [vmem:[%s20921_s12 + $0x58] sm:$0xff]  ;;  %v20988_v27 = vld [vmem:[%s20921_s12 + $0x60] sm:$0xff] }
  0x77   : > { %861 = vst [vmem:[#allocation2 + $0x48] sm:$0xff] %v20962_v18  ;;  %24575 = vst [vmem:[#allocation21_spill] sm:$0xff] %v20968_v22  ;;  %v20991_v28 = vld [vmem:[%s20921_s12 + $0x68] sm:$0xff]  ;;  %v20994_v29 = vld [vmem:[%s20921_s12 + $0x70] sm:$0xff] }
  0x78   : > { %862 = vst [vmem:[#allocation2 + $0x50] sm:$0xff] %v20968_v22  ;;  %24576 = vst [vmem:[#allocation22_spill] sm:$0xff] %v20972_v23  ;;  %18292 = vmatpush3.bf16.msra.mxu0 %v18289_v9  ;;  %v1074_v31 = vld [vmem:[#allocation7 + $0xd0] sm:$0xff]  ;;  %v1075_v32 = vld [vmem:[#allocation7 + $0xd8] sm:$0xff] }
  0x79   : > { %24577 = vst [vmem:[#allocation23_spill] sm:$0xff] %v20975_v24  ;;  %24578 = vst [vmem:[#allocation24_spill] sm:$0xff] %v20978_v25  ;;  %18294 = vmatprep.subr.bf16.mxu0 %v18293_v19  ;;  %v21000_v33 = vld [vmem:[%s20921_s12 + $0x78] sm:$0xff]  ;;  %v21004_v34 = vld [vmem:[%s20921_s12 + $0x80] sm:$0xff]  ;;  %v18301_v41 = vpack.c.bf16 %v1075_v32, %v1074_v31 }
  0x7a   : > { %863 = vst [vmem:[#allocation2 + $0x58] sm:$0xff] %v20972_v23  ;;  %864 = vst [vmem:[#allocation2 + $0x60] sm:$0xff] %v20975_v24  ;;  %v21007_v35 = vld [vmem:[%s20921_s12 + $0x88] sm:$0xff]  ;;  %v21010_v36 = vld [vmem:[%s20921_s12 + $0x90] sm:$0xff] }
  0x7b   : > { %865 = vst [vmem:[#allocation2 + $0x68] sm:$0xff] %v20978_v25  ;;  %24579 = vst [vmem:[#allocation25_spill] sm:$0xff] %v20984_v26  ;;  %v21016_v37 = vld [vmem:[%s20921_s12 + $0x98] sm:$0xff]  ;;  %v21020_v38 = vld [vmem:[%s20921_s12 + $0xa0] sm:$0xff] }
  0x7c   : > { %866 = vst [vmem:[#allocation2 + $0x70] sm:$0xff] %v20984_v26  ;;  %24580 = vst [vmem:[#allocation26_spill] sm:$0xff] %v20988_v27  ;;  %18296 = vmatpush3.bf16.msra.mxu0 %v18293_v19  ;;  %v21023_v39 = vld [vmem:[%s20921_s12 + $0xa8] sm:$0xff]  ;;  %v21026_v40 = vld [vmem:[%s20921_s12 + $0xb0] sm:$0xff] }
  0x7d   : > { %24581 = vst [vmem:[#allocation27_spill] sm:$0xff] %v20991_v28  ;;  %24582 = vst [vmem:[#allocation28_spill] sm:$0xff] %v20994_v29  ;;  %18298 = vmatprep.subr.bf16.mxu0 %v18297_v30  ;;  %v1076_v42 = vld [vmem:[#allocation7 + $0xe0] sm:$0xff]  ;;  %v1077_v43 = vld [vmem:[#allocation7 + $0xe8] sm:$0xff] }
  0x7e   : > { %867 = vst [vmem:[#allocation2 + $0x78] sm:$0xff] %v20988_v27  ;;  %868 = vst [vmem:[#allocation2 + $0x80] sm:$0xff] %v20991_v28  ;;  %v21032_v44 = vld [vmem:[%s20921_s12 + $0xb8] sm:$0xff]  ;;  %v21036_v45 = vld [vmem:[%s20921_s12 + $0xc0] sm:$0xff]  ;;  %v18305_v51 = vpack.c.bf16 %v1077_v43, %v1076_v42 }
  0x7f   : > { %869 = vst [vmem:[#allocation2 + $0x88] sm:$0xff] %v20994_v29  ;;  %24583 = vst [vmem:[#allocation29_spill] sm:$0xff] %v21000_v33  ;;  %v21039_v46 = vld [vmem:[%s20921_s12 + $0xc8] sm:$0xff]  ;;  %v21042_v47 = vld [vmem:[%s20921_s12 + $0xd0] sm:$0xff] }
  0x80   : > { %870 = vst [vmem:[#allocation2 + $0x90] sm:$0xff] %v21000_v33  ;;  %24584 = vst [vmem:[#allocation30_spill] sm:$0xff] %v21004_v34  ;;  %v21048_v48 = vld [vmem:[%s20921_s12 + $0xd8] sm:$0xff]  ;;  %18300 = vmatpush3.bf16.msra.mxu0 %v18297_v30  ;;  %v21052_v49 = vld [vmem:[%s20921_s12 + $0xe0] sm:$0xff] }
  0x81   : > { %24585 = vst [vmem:[#allocation31_spill] sm:$0xff] %v21007_v35  ;;  %24586 = vst [vmem:[#allocation32_spill] sm:$0xff] %v21010_v36  ;;  %v21055_v50 = vld [vmem:[%s20921_s12 + $0xe8] sm:$0xff]  ;;  %18302 = vmatprep.subr.bf16.mxu0 %v18301_v41  ;;  %v1078_v52 = vld [vmem:[#allocation7 + $0xf0] sm:$0xff] }
  0x82   : > { %871 = vst [vmem:[#allocation2 + $0x98] sm:$0xff] %v21004_v34  ;;  %872 = vst [vmem:[#allocation2 + $0xa0] sm:$0xff] %v21007_v35  ;;  %v1079_v53 = vld [vmem:[#allocation7 + $0xf8] sm:$0xff]  ;;  %v1015_v55 = vld [vmem:[#allocation7] sm:$0xff] }
  0x83   : > { %873 = vst [vmem:[#allocation2 + $0xa8] sm:$0xff] %v21010_v36  ;;  %24587 = vst [vmem:[#allocation33_spill] sm:$0xff] %v21016_v37  ;;  %v18309_v54 = vpack.c.bf16 %v1079_v53, %v1078_v52  ;;  %v1016_v56 = vld [vmem:[#allocation7 + $0x8] sm:$0xff]  ;;  %v1017_v58 = vld [vmem:[#allocation7 + $0x10] sm:$0xff]  ;;  %v24597_v53 = vmov 0 }
  0x84   : > { %874 = vst [vmem:[#allocation2 + $0xb0] sm:$0xff] %v21016_v37  ;;  %24588 = vst [vmem:[#allocation34_spill] sm:$0xff] %v21020_v38  ;;  %18304 = vmatpush3.bf16.msra.mxu0 %v18301_v41  ;;  %v18313_v57 = vpack.c.bf16 %v1016_v56, %v1015_v55  ;;  %v1018_v59 = vld [vmem:[#allocation7 + $0x18] sm:$0xff]  ;;  %v1019_v61 = vld [vmem:[#allocation7 + $0x20] sm:$0xff]  ;;  %v342_v41 = vlaneseq }
  0x85   : > { %24589 = vst [vmem:[#allocation35_spill] sm:$0xff] %v21023_v39  ;;  %24590 = vst [vmem:[#allocation36_spill] sm:$0xff] %v21026_v40  ;;  %18306 = vmatprep.subr.bf16.mxu0 %v18305_v51  ;;  %v18317_v60 = vpack.c.bf16 %v1018_v59, %v1017_v58  ;;  %v1020_v62 = vld [vmem:[#allocation7 + $0x28] sm:$0xff]  ;;  %v1021_v1 = vld [vmem:[#allocation7 + $0x30] sm:$0xff] }
  0x86   : > { %875 = vst [vmem:[#allocation2 + $0xb8] sm:$0xff] %v21020_v38  ;;  %876 = vst [vmem:[#allocation2 + $0xc0] sm:$0xff] %v21023_v39  ;;  %v18321_v63 = vpack.c.bf16 %v1020_v62, %v1019_v61  ;;  %v1022_v2 = vld [vmem:[#allocation7 + $0x38] sm:$0xff]  ;;  %v1023_v4 = vld [vmem:[#allocation7 + $0x40] sm:$0xff]  ;;  %v21085_v42 = vshrl.u32 %v342_v41, 7  ;;  %v24606_v41 = vmov 0 }
  0x87   : > { %877 = vst [vmem:[#allocation2 + $0xc8] sm:$0xff] %v21026_v40  ;;  %24591 = vst [vmem:[#allocation37_spill] sm:$0xff] %v21032_v44  ;;  %v18325_v3 = vpack.c.bf16 %v1022_v2, %v1021_v1  ;;  %v1024_v5 = vld [vmem:[#allocation7 + $0x48] sm:$0xff]  ;;  %v1025_v6 = vld [vmem:[#allocation7 + $0x50] sm:$0xff] }
  0x88   : > { %878 = vst [vmem:[#allocation2 + $0xd0] sm:$0xff] %v21032_v44  ;;  %24592 = vst [vmem:[#allocation38_spill] sm:$0xff] %v21036_v45  ;;  %18308 = vmatpush3.bf16.msra.mxu0 %v18305_v51  ;;  %v1026_v7 = vld [vmem:[#allocation7 + $0x58] sm:$0xff]  ;;  %v1027_v9 = vld [vmem:[#allocation7 + $0x60] sm:$0xff]  ;;  %v379_v51 = vand.u32 15, %v21085_v42  ;;  %v345_v52 = vadd.s32 16, %v21085_v42 }
  0x89   : > { %24593 = vst [vmem:[#allocation39_spill] sm:$0xff] %v21039_v46  ;;  %24594 = vst [vmem:[#allocation40_spill] sm:$0xff] %v21042_v47  ;;  %18310 = vmatprep.subr.bf16.mxu0 %v18309_v54  ;;  %v18333_v8 = vpack.c.bf16 %v1026_v7, %v1025_v6  ;;  %v1028_v10 = vld [vmem:[#allocation7 + $0x68] sm:$0xff]  ;;  %v1029_v19 = vld [vmem:[#allocation7 + $0x70] sm:$0xff]  ;;  %v347_v56 = vadd.s32 32, %v21085_v42 }
  0x8a   : > { %879 = vst [vmem:[#allocation2 + $0xd8] sm:$0xff] %v21036_v45  ;;  %880 = vst [vmem:[#allocation2 + $0xe0] sm:$0xff] %v21039_v46  ;;  %v18337_v11 = vpack.c.bf16 %v1028_v10, %v1027_v9  ;;  %v1030_v20 = vld [vmem:[#allocation7 + $0x78] sm:$0xff]  ;;  %v1659_v30 = vld [vmem:[#allocation7 + $0x100] sm:$0xff]  ;;  %vm21097_vm0 = vcmp.gt.s32.totalorder %v379_v51, 0  ;;  %v393_v55 = vand.u32 15, %v345_v52 }
  0x8b   : > { %881 = vst [vmem:[#allocation2 + $0xe8] sm:$0xff] %v21042_v47  ;;  %24595 = vst [vmem:[#allocation41_spill] sm:$0xff] %v21048_v48  ;;  %v18341_v21 = vpack.c.bf16 %v1030_v20, %v1029_v19  ;;  %v1660_v31 = vld [vmem:[#allocation7 + $0x108] sm:$0xff]  ;;  %v21088_v43 = vld [vmem:[%s20921_s12 + $0xf0] sm:$0xff]  ;;  %v24598_v53 = vsel %vm21097_vm0, 4294967295, %v24597_v53  ;;  %v407_v61 = vand.u32 15, %v347_v56 }
  0x8c   : > { %882 = vst [vmem:[#allocation2 + $0xf0] sm:$0xff] %v21048_v48  ;;  %883 = vst [vmem:[#allocation2 + $0xf8] sm:$0xff] %v21052_v49  ;;  %18312 = vmatpush3.bf16.msra.mxu0 %v18309_v54  ;;  %v18345_v32 = vpack.c.bf16 %v1660_v31, %v1659_v30  ;;  %v887_v54 = vld [vmem:[#allocation2 + $0x7] sm:$0xff]  ;;  %v888_v59 = vld [vmem:[#allocation2 + $0xf] sm:$0xff]  ;;  %vm21105_vm1 = vcmp.gt.s32.totalorder %v393_v55, 0  ;;  %v24604_v10 = vmov 0 }
  0x8d   : > { %884 = vst [vmem:[#allocation2 + $0x100] sm:$0xff] %v21055_v50  ;;  %18314 = vmatprep.subr.bf16.mxu0 %v18313_v57  ;;  %24596 = vst [vmem:[#allocation42_spill] sm:$0xff] %v21088_v43  ;;  %v1662_v58 = vld [vmem:[#allocation7 + $0x118] sm:$0xff]  ;;  %v1663_v1 = vld [vmem:[#allocation7 + $0x120] sm:$0xff]  ;;  %vm21117_vm2 = vcmp.gt.s32.totalorder %v407_v61, 0  ;;  %v353_v20 = vadd.s32 80, %v21085_v42 }
  0x8e   : > { %885 = vst [vmem:[#allocation2 + $0x108] sm:$0xff] %v21088_v43  ;;  %v1664_v2 = vld [vmem:[#allocation7 + $0x128] sm:$0xff]  ;;  %v1665_v7 = vld [vmem:[#allocation7 + $0x130] sm:$0xff]  ;;  %v21128_v9 = vld [vmem:[#allocation2 + $0x2f] sm:$0xff] }
  0x8f   : > { %15434 = vmatmul.mubr.f32.vlgmr.msra.gmra.mrb[0].mxu0 %v20700_v0  ;;  %v18329_v0 = vpack.c.bf16 %v1024_v5, %v1023_v4  ;;  %v21121_v4 = vld [vmem:[#allocation2 + $0x27] sm:$0xff]  ;;  %v18353_v6 = vpack.c.bf16 %v1664_v2, %v1663_v1  ;;  %v1667_v30 = vld [vmem:[#allocation7 + $0x140] sm:$0xff]  ;;  %v1668_v31 = vld [vmem:[#allocation7 + $0x148] sm:$0xff]  ;;  %v449_v52 = vand.u32 15, %v353_v20 }
  0x90   : > { %18316 = vmatpush3.bf16.msra.mxu0 %v18313_v57  ;;  %15436 = vmatprep.mubr.f32.mxu0 %v20940_v12  ;;  %v1661_v57 = vld [vmem:[#allocation7 + $0x110] sm:$0xff]  ;;  %v18361_v55 = vpack.c.bf16 %v1668_v31, %v1667_v30  ;;  %v21160_v61 = vld [vmem:[#allocation2 + $0x57] sm:$0xff]  ;;  %v1674_v30 = vld [vmem:[#allocation7 + $0x178] sm:$0xff] }
  0x91   : > { %18318 = vmatprep.subr.bf16.mxu0 %v18317_v60  ;;  %v18349_v62 = vpack.c.bf16 %v1662_v58, %v1661_v57  ;;  %v21147_v51 = vld [vmem:[#allocation2 + $0x47] sm:$0xff]  ;;  %v21154_v58 = vld [vmem:[#allocation2 + $0x4f] sm:$0xff]  ;;  %vm21156_vm5 = vcmp.gt.s32.totalorder %v449_v52, 0  ;;  %v24612_v52 = vmov 0  ;;  %v2002_v12 = vld [vmem:[#allocation7 + $0x1a8] sm:$0xff] }
  0x92   : > { %v1669_v56 = vld [vmem:[#allocation7 + $0x150] sm:$0xff]  ;;  %v1670_v57 = vld [vmem:[#allocation7 + $0x158] sm:$0xff]  ;;  %v1671_v2 = vld [vmem:[#allocation7 + $0x160] sm:$0xff] }
  0x93   : > { %15437 = vmatmul.mubr.f32.gmra.mrb[2].mxu0 %v20943_v13  ;;  %v18365_v1 = vpack.c.bf16 %v1670_v57, %v1669_v56  ;;  %v21180_v31 = vld [vmem:[#allocation2 + $0x6f] sm:$0xff]  ;;  %v361_v56 = vadd.s32 144, %v21085_v42  ;;  %v350_v13 = vadd.s32 56, %v21085_v42  ;;  %v2006_v43 = vld [vmem:[#allocation7 + $0x1c8] sm:$0xff] }
  0x94   : > { %15439 = vmatprep.mubr.f32.mxu0 %v20946_v14  ;;  %18320 = vmatpush3.bf16.msra.mxu0 %v18317_v60  ;;  %v24599_v60 = vmov 0  ;;  %v21312_v14 = vld [vmem:[#allocation2 + $0x19] sm:$0xff] }
  0x95   : > { %18322 = vmatprep.subr.bf16.mxu0 %v18321_v63  ;;  %v24600_v60 = vsel %vm21105_vm1, 4294967295, %v24599_v60  ;;  %24640 = vst [vmem:[#allocation52_spill] sm:$0xff] %v21312_v14 }
  0x96   : > { %24601 = vst [vmem:[#allocation43_spill] sm:$0xff] %v24600_v60  ;;  %v3296_v60 = vld [vmem:[#allocation7 + $0x3d8] sm:$0xff] }
  0x97   : > { %15440 = vmatmul.mubr.f32.gmra.mrb[4].mxu0 %v20952_v15 }
  0x98   : > { %15442 = vmatprep.mubr.f32.mxu0 %v20956_v16  ;;  %18324 = vmatpush3.bf16.msra.mxu0 %v18321_v63  ;;  %v349_v63 = vadd.s32 48, %v21085_v42 }
  0x99   : > { %18326 = vmatprep.subr.bf16.mxu0 %v18325_v3 }
  0x9a   : > { %v421_v5 = vand.u32 15, %v349_v63  ;;  %v357_v63 = vadd.s32 112, %v21085_v42 }
  0x9b   : > { %15443 = vmatmul.mubr.f32.gmra.mrb[6].mxu0 %v20959_v17  ;;  %v348_v17 = vadd.s32 40, %v21085_v42 }
  0x9c   : > { %15445 = vmatprep.mubr.f32.mxu0 %v20962_v18  ;;  %18328 = vmatpush3.bf16.msra.mxu0 %v18325_v3  ;;  %v24602_v3 = vmov 0  ;;  %vm21130_vm3 = vcmp.gt.s32.totalorder %v421_v5, 0  ;;  %v1672_v5 = vld [vmem:[#allocation7 + $0x168] sm:$0xff]  ;;  %v2000_v18 = vld [vmem:[#allocation7 + $0x198] sm:$0xff] }
  0x9d   : > { %18330 = vmatprep.subr.bf16.mxu0 %v18329_v0  ;;  %v24603_v3 = vsel %vm21117_vm2, 4294967295, %v24602_v3  ;;  %v24605_v10 = vsel %vm21130_vm3, 4294967295, %v24604_v10  ;;  %v18369_v20 = vpack.c.bf16 %v1672_v5, %v1671_v2  ;;  %v24614_v2 = vmov 0  ;;  %v21199_v5 = vld [vmem:[#allocation2 + $0x87] sm:$0xff] }
  0x9f   : > { %15446 = vmatmul.mubr.f32.gmra.mrb[8].mxu0 %v20968_v22  ;;  %v1531_v22 = vld [vmem:[#allocation2 + $0x11] sm:$0xff] }
  0xa0   : > { %15448 = vmatprep.mubr.f32.mxu0 %v20972_v23  ;;  %18332 = vmatpush3.bf16.msra.mxu0 %v18329_v0  ;;  %v351_v0 = vadd.s32 64, %v21085_v42  ;;  %v1530_v23 = vld [vmem:[#allocation2 + $0x9] sm:$0xff] }
  0xa1   : > { %18334 = vmatprep.subr.bf16.mxu0 %v18333_v8 }
  0xa2   : > { %v435_v19 = vand.u32 15, %v351_v0  ;;  %v21167_v0 = vld [vmem:[#allocation2 + $0x5f] sm:$0xff] }
  0xa3   : > { %15449 = vmatmul.mubr.f32.gmra.mrb[10].mxu0 %v20975_v24  ;;  %v1999_v24 = vld [vmem:[#allocation7 + $0x190] sm:$0xff] }
  0xa4   : > { %15451 = vmatprep.mubr.f32.mxu0 %v20978_v25  ;;  %18336 = vmatpush3.bf16.msra.mxu0 %v18333_v8  ;;  %v1666_v8 = vld [vmem:[#allocation7 + $0x138] sm:$0xff]  ;;  %vm21143_vm4 = vcmp.gt.s32.totalorder %v435_v19, 0  ;;  %v359_v19 = vadd.s32 128, %v21085_v42  ;;  %v18381_v15 = vpack.c.bf16 %v2000_v18, %v1999_v24  ;;  %v2003_v24 = vld [vmem:[#allocation7 + $0x1b0] sm:$0xff] }
  0xa5   : > { %18338 = vmatprep.subr.bf16.mxu0 %v18337_v11  ;;  %v24607_v41 = vsel %vm21143_vm4, 4294967295, %v24606_v41 }
  0xa7   : > { %15452 = vmatmul.mubr.f32.gmra.mrb[12].mxu0 %v20984_v26  ;;  %v346_v26 = vadd.s32 24, %v21085_v42 }
  0xa8   : > { %15454 = vmatprep.mubr.f32.mxu0 %v20988_v27  ;;  %18340 = vmatpush3.bf16.msra.mxu0 %v18337_v11  ;;  %v21134_v11 = vld [vmem:[#allocation2 + $0x37] sm:$0xff]  ;;  %v24634_v27 = vmov 0 }
  0xa9   : > { %18342 = vmatprep.subr.bf16.mxu0 %v18341_v21  ;;  %v400_v16 = vand.u32 15, %v346_v26  ;;  %v414_v26 = vand.u32 15, %v348_v17  ;;  %v428_v17 = vand.u32 15, %v350_v13 }
  0xab   : > { %15455 = vmatmul.mubr.f32.gmra.mrb[14].mxu0 %v20991_v28  ;;  %v21297_v28 = vld [vmem:[#allocation2 + $0xf7] sm:$0xff] }
  0xac   : > { %15457 = vmatprep.mubr.f32.mxu0 %v20994_v29  ;;  %18344 = vmatpush3.bf16.msra.mxu0 %v18341_v21  ;;  %v18357_v21 = vpack.c.bf16 %v1666_v8, %v1665_v7  ;;  %v21173_v7 = vld [vmem:[#allocation2 + $0x67] sm:$0xff]  ;;  %v477_v8 = vand.u32 15, %v357_v63  ;;  %v1998_v63 = vld [vmem:[#allocation7 + $0x188] sm:$0xff] }
  0xad   : > { %18346 = vmatprep.subr.bf16.mxu0 %v18345_v32 }
  0xae   : > { %vm21182_vm7 = vcmp.gt.s32.totalorder %v477_v8, 0  ;;  %v505_v8 = vand.u32 15, %v361_v56 }
  0xaf   : > { %15458 = vmatmul.mubr.f32.gmra.mrb[16].mxu0 %v21000_v33  ;;  %v24613_v52 = vsel %vm21182_vm7, 4294967295, %v24612_v52  ;;  %v21283_v33 = vld [vmem:[%s20921_s12 + $0xf8] sm:$0xff]  ;;  %s20623_s12 = scalar_lea.vmem %s24027_s17, 4096 }
  0xb0   : > { %15460 = vmatprep.mubr.f32.mxu0 %v21004_v34  ;;  %vm21210_vm9 = vcmp.gt.s32.totalorder %v505_v8, 0  ;;  %v373_v34 = vadd.s32 240, %v21085_v42  ;;  %24633 = vst [vmem:[#allocation49_spill] sm:$0xff] %v21283_v33  ;;  %886 = vst [vmem:[#allocation2 + $0x110] sm:$0xff] %v21283_v33  ;;  %v21325_v33 = vld [vmem:[#allocation2 + $0x29] sm:$0xff]  ;;  %p20624_p11 = scmp.ne.s32.totalorder %s24027_s17, %s20623_s12  ;;  %p20631_p9 = scmp.lt.s32.totalorder %s20629_s15, %s20623_s12 }
  0xb1   : > { %24645 = vst [vmem:[#allocation55_spill] sm:$0xff] %v21325_v33 }
  0xb2   : > { %v589_v29 = vand.u32 15, %v373_v34  ;;  %v21303_v34 = vld [vmem:[#allocation2 + $0xff] sm:$0xff]  ;;  %p20625_p2 = pnand %p20624_p11, %p25454_p0  ;;  %p20632_p12 = por %p20631_p9, %p20630_p7 }
  0xb3   : > { %15461 = vmatmul.mubr.f32.gmra.mrb[18].mxu0 %v21007_v35  ;;  %v24630_v35 = vmov 0 }
  0xb4   : > { %15463 = vmatprep.mubr.f32.mxu0 %v21010_v36  ;;  %v24627_v36 = vmov 0  ;;  %vm21293_vm15 = vcmp.gt.s32.totalorder %v589_v29, 0  ;;  %v24637_v29 = vmov 0  ;;  %p20626_p3 = pneg %p20625_p2 }
  0xb5   : > { %v24635_v27 = vsel %vm21293_vm15, 4294967295, %v24634_v27 }
  0xb6   : > { %24636 = vst [vmem:[#allocation50_spill] sm:$0xff] %v24635_v27  ;;  %p20633_p1 = pnand %p20632_p12, %p20626_p3 }
  0xb7   : > { %15464 = vmatmul.mubr.f32.gmra.mrb[20].mxu0 %v21016_v37 }
  0xb8   : > { %15466 = vmatprep.mubr.f32.mxu0 %v21020_v38 }
  0xbb   : > { %15467 = vmatmul.mubr.f32.gmra.mrb[22].mxu0 %v21023_v39  ;;  %v21261_v39 = vld [vmem:[#allocation2 + $0xcf] sm:$0xff] }
  0xbc   : > { %15469 = vmatprep.mubr.f32.mxu0 %v21026_v40  ;;  %v369_v40 = vadd.s32 208, %v21085_v42 }
  0xbe   : > { %v561_v38 = vand.u32 15, %v369_v40  ;;  %v21274_v40 = vld [vmem:[#allocation2 + $0xdf] sm:$0xff] }
  0xbf   : > { %15470 = vmatmul.mubr.f32.gmra.mrb[24].mxu0 %v21032_v44  ;;  %v24624_v44 = vmov 0 }
  0xc0   : > { %15472 = vmatprep.mubr.f32.mxu0 %v21036_v45  ;;  %v24621_v45 = vmov 0  ;;  %vm21263_vm13 = vcmp.gt.s32.totalorder %v561_v38, 0  ;;  %v21280_v38 = vld [vmem:[#allocation2 + $0xe7] sm:$0xff] }
  0xc1   : > { %v24628_v36 = vsel %vm21263_vm13, 4294967295, %v24627_v36 }
  0xc2   : > { %24629 = vst [vmem:[#allocation47_spill] sm:$0xff] %v24628_v36 }
  0xc3   : > { %15473 = vmatmul.mubr.f32.gmra.mrb[26].mxu0 %v21039_v46 }
  0xc4   : > { %15475 = vmatprep.mubr.f32.mxu0 %v21042_v47  ;;  %v365_v47 = vadd.s32 176, %v21085_v42 }
  0xc6   : > { %v533_v8 = vand.u32 15, %v365_v47  ;;  %v21248_v47 = vld [vmem:[#allocation2 + $0xbf] sm:$0xff] }
  0xc7   : > { %15476 = vmatmul.mubr.f32.gmra.mrb[28].mxu0 %v21048_v48  ;;  %v21235_v48 = vld [vmem:[#allocation2 + $0xaf] sm:$0xff] }
  0xc8   : > { %15478 = vmatprep.mubr.f32.mxu0 %v21052_v49  ;;  %v21109_v49 = vld [vmem:[#allocation2 + $0x17] sm:$0xff]  ;;  %vm21237_vm11 = vcmp.gt.s32.totalorder %v533_v8, 0  ;;  %v21254_v8 = vld [vmem:[#allocation2 + $0xc7] sm:$0xff] }
  0xc9   : > { %v24622_v45 = vsel %vm21237_vm11, 4294967295, %v24621_v45 }
  0xca   : > { %24623 = vst [vmem:[#allocation45_spill] sm:$0xff] %v24622_v45 }
  0xcb   : > { %15479 = vmatmul.mubr.f32.gmra.mrb[30].mxu0 %v21055_v50  ;;  %v21115_v50 = vld [vmem:[#allocation2 + $0x1f] sm:$0xff] }
  0xcc   : > { %15513 = vmatprep.mubr.msk.f32.mxu0 %vm21097_vm0, %v887_v54  ;;  %v355_v54 = vadd.s32 96, %v21085_v42 }
  0xcf   : > { %15514 = vmatmul.mubr.f32.vlgmr.msra.gmra.mrb[0].mxu0 %v888_v59  ;;  %v24608_v59 = vmov 0 }
  0xd0   : > { %18348 = vmatpush3.bf16.msra.mxu0 %v18345_v32  ;;  %15516 = vmatprep.mubr.msk.f32.mxu0 %vm21105_vm1, %v21109_v49  ;;  %v21141_v32 = vld [vmem:[#allocation2 + $0x3f] sm:$0xff]  ;;  %v24609_v59 = vsel %vm21156_vm5, 4294967295, %v24608_v59 }
  0xd1   : > { %18350 = vmatprep.subr.bf16.mxu0 %v18349_v62 }
  0xd3   : > { %15517 = vmatmul.mubr.f32.gmra.mrb[2].mxu0 %v21115_v50 }
  0xd4   : > { %15519 = vmatprep.mubr.msk.f32.mxu0 %vm21117_vm2, %v21121_v4  ;;  %18352 = vmatpush3.bf16.msra.mxu0 %v18349_v62  ;;  %v463_v62 = vand.u32 15, %v355_v54  ;;  %v21186_v54 = vld [vmem:[#allocation2 + $0x77] sm:$0xff] }
  0xd5   : > { %18354 = vmatprep.subr.bf16.mxu0 %v18353_v6 }
  0xd6   : > { %vm21169_vm6 = vcmp.gt.s32.totalorder %v463_v62, 0  ;;  %v1997_v62 = vld [vmem:[#allocation7 + $0x180] sm:$0xff] }
  0xd7   : > { %15520 = vmatmul.mubr.f32.gmra.mrb[4].mxu0 %v21128_v9 }
  0xd8   : > { %15522 = vmatprep.mubr.msk.f32.mxu0 %vm21130_vm3, %v21134_v11  ;;  %18356 = vmatpush3.bf16.msra.mxu0 %v18353_v6  ;;  %v24610_v6 = vmov 0 }
  0xd9   : > { %18358 = vmatprep.subr.bf16.mxu0 %v18357_v21  ;;  %v24611_v6 = vsel %vm21169_vm6, 4294967295, %v24610_v6 }
  0xdb   : > { %15523 = vmatmul.mubr.f32.gmra.mrb[6].mxu0 %v21141_v32 }
  0xdc   : > { %15525 = vmatprep.mubr.msk.f32.mxu0 %vm21143_vm4, %v21147_v51  ;;  %18360 = vmatpush3.bf16.msra.mxu0 %v18357_v21  ;;  %v1673_v21 = vld [vmem:[#allocation7 + $0x170] sm:$0xff] }
  0xdd   : > { %18362 = vmatprep.subr.bf16.mxu0 %v18361_v55  ;;  %v18373_v57 = vpack.c.bf16 %v1674_v30, %v1673_v21  ;;  %v21202_v21 = vpack.c.bf16 %v1998_v63, %v1997_v62  ;;  %v21208_v30 = vld [vmem:[#allocation2 + $0x8f] sm:$0xff]  ;;  %v21222_v62 = vld [vmem:[#allocation2 + $0x9f] sm:$0xff]  ;;  %v21228_v63 = vld [vmem:[#allocation2 + $0xa7] sm:$0xff] }
  0xdf   : > { %15526 = vmatmul.mubr.f32.gmra.mrb[8].mxu0 %v21154_v58 }
  0xe0   : > { %15528 = vmatprep.mubr.msk.f32.mxu0 %vm21156_vm5, %v21160_v61  ;;  %18364 = vmatpush3.bf16.msra.mxu0 %v18361_v55  ;;  %v491_v55 = vand.u32 15, %v359_v19  ;;  %v363_v19 = vadd.s32 160, %v21085_v42 }
  0xe1   : > { %18366 = vmatprep.subr.bf16.mxu0 %v18365_v1 }
  0xe2   : > { %vm21195_vm8 = vcmp.gt.s32.totalorder %v491_v55, 0  ;;  %v21214_v55 = vld [vmem:[#allocation2 + $0x97] sm:$0xff]  ;;  %v519_v56 = vand.u32 15, %v363_v19  ;;  %v367_v19 = vadd.s32 192, %v21085_v42 }
  0xe3   : > { %15529 = vmatmul.mubr.f32.gmra.mrb[10].mxu0 %v21167_v0  ;;  %v24615_v2 = vsel %vm21195_vm8, 4294967295, %v24614_v2 }
  0xe4   : > { %15531 = vmatprep.mubr.msk.f32.mxu0 %vm21169_vm6, %v21173_v7  ;;  %18368 = vmatpush3.bf16.msra.mxu0 %v18365_v1  ;;  %v21193_v1 = vld [vmem:[#allocation2 + $0x7f] sm:$0xff]  ;;  %vm21224_vm10 = vcmp.gt.s32.totalorder %v519_v56, 0  ;;  %v21241_v56 = vld [vmem:[#allocation2 + $0xb7] sm:$0xff]  ;;  %v547_v46 = vand.u32 15, %v367_v19  ;;  %v371_v19 = vadd.s32 224, %v21085_v42 }
  0xe5   : > { %18370 = vmatprep.subr.bf16.mxu0 %v18369_v20 }
  0xe6   : > { %vm21250_vm12 = vcmp.gt.s32.totalorder %v547_v46, 0  ;;  %v21267_v46 = vld [vmem:[#allocation2 + $0xd7] sm:$0xff]  ;;  %v575_v37 = vand.u32 15, %v371_v19  ;;  %v21290_v19 = vld [vmem:[#allocation2 + $0xef] sm:$0xff] }
  0xe7   : > { %15532 = vmatmul.mubr.f32.gmra.mrb[12].mxu0 %v21180_v31  ;;  %v24625_v44 = vsel %vm21250_vm12, 4294967295, %v24624_v44 }
  0xe8   : > { %15534 = vmatprep.mubr.msk.f32.mxu0 %vm21182_vm7, %v21186_v54  ;;  %18372 = vmatpush3.bf16.msra.mxu0 %v18369_v20  ;;  %v24616_v20 = vmov 0  ;;  %24626 = vst [vmem:[#allocation46_spill] sm:$0xff] %v24625_v44  ;;  %vm21276_vm14 = vcmp.gt.s32.totalorder %v575_v37, 0  ;;  %v344_v37 = vadd.s32 8, %v21085_v42 }
  0xe9   : > { %18374 = vmatprep.subr.bf16.mxu0 %v18373_v57  ;;  %v24617_v20 = vsel %vm21210_vm9, 4294967295, %v24616_v20  ;;  %v24631_v35 = vsel %vm21276_vm14, 4294967295, %v24630_v35 }
  0xea   : > { %24632 = vst [vmem:[#allocation48_spill] sm:$0xff] %v24631_v35  ;;  %v386_v25 = vand.u32 15, %v344_v37  ;;  %v2001_v37 = vld [vmem:[#allocation7 + $0x1a0] sm:$0xff] }
  0xeb   : > { %15535 = vmatmul.mubr.f32.gmra.mrb[14].mxu0 %v21193_v1  ;;  %v18385_v18 = vpack.c.bf16 %v2002_v12, %v2001_v37  ;;  %v2005_v37 = vld [vmem:[#allocation7 + $0x1c0] sm:$0xff] }
  0xec   : > { %15537 = vmatprep.mubr.msk.f32.mxu0 %vm21195_vm8, %v21199_v5  ;;  %18376 = vmatpush3.bf16.msra.mxu0 %v18373_v57  ;;  %v24618_v57 = vmov 0 }
  0xed   : > { %18378 = vmatprep.subr.bf16.mxu0 %v21202_v21  ;;  %v24619_v57 = vsel %vm21224_vm10, 4294967295, %v24618_v57 }
  0xee   : > { %24620 = vst [vmem:[#allocation44_spill] sm:$0xff] %v24619_v57 }
  0xef   : > { %15538 = vmatmul.mubr.f32.gmra.mrb[16].mxu0 %v21208_v30 }
  0xf0   : > { %15540 = vmatprep.mubr.msk.f32.mxu0 %vm21210_vm9, %v21214_v55 }
  0xf3   : > { %15541 = vmatmul.mubr.f32.gmra.mrb[18].mxu0 %v21222_v62 }
  0xf4   : > { %15543 = vmatprep.mubr.msk.f32.mxu0 %vm21224_vm10, %v21228_v63 }
  0xf7   : > { %15544 = vmatmul.mubr.f32.gmra.mrb[20].mxu0 %v21235_v48 }
  0xf8   : > { %15546 = vmatprep.mubr.msk.f32.mxu0 %vm21237_vm11, %v21241_v56 }
  0xfb   : > { %15547 = vmatmul.mubr.f32.gmra.mrb[22].mxu0 %v21248_v47 }
  0xfc   : > { %15549 = vmatprep.mubr.msk.f32.mxu0 %vm21250_vm12, %v21254_v8 }
  0xff   : > { %15550 = vmatmul.mubr.f32.gmra.mrb[24].mxu0 %v21261_v39 }
 0x100   : > { %15552 = vmatprep.mubr.msk.f32.mxu0 %vm21263_vm13, %v21267_v46 }
 0x103   : > { %15553 = vmatmul.mubr.f32.gmra.mrb[26].mxu0 %v21274_v40 }
 0x104   : > { %15555 = vmatprep.mubr.msk.f32.mxu0 %vm21276_vm14, %v21280_v38  ;;  %vm21307_vm14 = vcmp.lt.s32.totalorder %v386_v25, 15  ;;  %v21322_v25 = vld [vmem:[#allocation2 + $0x21] sm:$0xff] }
 0x105   : > { %v24638_v29 = vsel %vm21307_vm14, 4294967295, %v24637_v29  ;;  %24644 = vst [vmem:[#allocation54_spill] sm:$0xff] %v21322_v25 }
 0x106   : > { %24639 = vst [vmem:[#allocation51_spill] sm:$0xff] %v24638_v29  ;;  %v2004_v29 = vld [vmem:[#allocation7 + $0x1b8] sm:$0xff] }
 0x107   : > { %15556 = vmatmul.mubr.f32.gmra.mrb[28].mxu0 %v21290_v19  ;;  %v18389_v12 = vpack.c.bf16 %v2004_v29, %v2003_v24  ;;  %v18393_v29 = vpack.c.bf16 %v2006_v43, %v2005_v37  ;;  %v2007_v24 = vld [vmem:[#allocation7 + $0x1d0] sm:$0xff]  ;;  %v2009_v37 = vld [vmem:[#allocation7 + $0x1e0] sm:$0xff] }
 0x108   : > { %15558 = vmatprep.mubr.msk.f32.mxu0 %vm21293_vm15, %v21297_v28  ;;  %vm21318_vm15 = vcmp.lt.s32.totalorder %v400_v16, 15  ;;  %v24646_v16 = vmov 0 }
 0x10b   : > { %15559 = vmatmul.mubr.f32.gmra.mrb[30].mxu0 %v21303_v34 }
 0x10c   : > { %15593 = vmatprep.mubr.f32.mxu0 %v1530_v23  ;;  %v24641_v23 = vmov 0 }
 0x10d   : > { %v24642_v23 = vsel %vm21318_vm15, 4294967295, %v24641_v23 }
 0x10e   : > { %24643 = vst [vmem:[#allocation53_spill] sm:$0xff] %v24642_v23  ;;  %v354_v23 = vadd.s32 88, %v21085_v42 }
 0x10f   : > { %15594 = vmatmul.mubr.msk.f32.vlgmr.msra.gmra.mrb[0].mxu0 %vm21307_vm14, %v1531_v22  ;;  %vm21331_vm14 = vcmp.lt.s32.totalorder %v414_v26, 15  ;;  %v21335_v22 = vld [vmem:[#allocation2 + $0x31] sm:$0xff]  ;;  %v24651_v26 = vmov 0 }
 0x110   : > { %18380 = vmatpush3.bf16.msra.mxu0 %v21202_v21  ;;  %15596 = vmatprep.mubr.f32.mxu0 %v21312_v14  ;;  %v24647_v16 = vsel %vm21331_vm14, 4294967295, %v24646_v16  ;;  %24649 = vst [vmem:[#allocation57_spill] sm:$0xff] %v21335_v22  ;;  %v352_v21 = vadd.s32 72, %v21085_v42  ;;  %v21338_v14 = vld [vmem:[#allocation2 + $0x39] sm:$0xff] }
 0x111   : > { %18382 = vmatprep.subr.bf16.mxu0 %v18381_v15  ;;  %24648 = vst [vmem:[#allocation56_spill] sm:$0xff] %v24647_v16  ;;  %24650 = vst [vmem:[#allocation58_spill] sm:$0xff] %v21338_v14  ;;  %v356_v16 = vadd.s32 104, %v21085_v42 }
 0x112   : > { %v442_v13 = vand.u32 15, %v352_v21  ;;  %v21361_v21 = vld [vmem:[#allocation2 + $0x51] sm:$0xff] }
 0x113   : > { %15597 = vmatmul.mubr.msk.f32.gmra.mrb[2].mxu0 %vm21318_vm15, %v21322_v25  ;;  %vm21344_vm15 = vcmp.lt.s32.totalorder %v428_v17, 15  ;;  %v2008_v25 = vld [vmem:[#allocation7 + $0x1d8] sm:$0xff]  ;;  %v24656_v17 = vmov 0  ;;  %24659 = vst [vmem:[#allocation63_spill] sm:$0xff] %v21361_v21 }
 0x114   : > { %15599 = vmatprep.mubr.f32.mxu0 %v21325_v33  ;;  %18384 = vmatpush3.bf16.msra.mxu0 %v18381_v15  ;;  %v24652_v26 = vsel %vm21344_vm15, 4294967295, %v24651_v26  ;;  %v21348_v15 = vld [vmem:[#allocation2 + $0x41] sm:$0xff]  ;;  %v21351_v33 = vld [vmem:[#allocation2 + $0x49] sm:$0xff]  ;;  %v18397_v43 = vpack.c.bf16 %v2008_v25, %v2007_v24 }
 0x115   : > { %18386 = vmatprep.subr.bf16.mxu0 %v18385_v18  ;;  %24653 = vst [vmem:[#allocation59_spill] sm:$0xff] %v24652_v26  ;;  %24654 = vst [vmem:[#allocation60_spill] sm:$0xff] %v21348_v15  ;;  %v470_v26 = vand.u32 15, %v356_v16  ;;  %v2011_v24 = vld [vmem:[#allocation7 + $0x1f0] sm:$0xff]  ;;  %v21387_v16 = vld [vmem:[#allocation2 + $0x71] sm:$0xff] }
 0x116   : > { %24655 = vst [vmem:[#allocation61_spill] sm:$0xff] %v21351_v33 }
 0x117   : > { %15600 = vmatmul.mubr.msk.f32.gmra.mrb[4].mxu0 %vm21331_vm14, %v21335_v22  ;;  %vm21357_vm14 = vcmp.lt.s32.totalorder %v442_v13, 15  ;;  %v2010_v22 = vld [vmem:[#allocation7 + $0x1e8] sm:$0xff]  ;;  %v24661_v13 = vmov 0 }
 0x118   : > { %15602 = vmatprep.mubr.f32.mxu0 %v21338_v14  ;;  %18388 = vmatpush3.bf16.msra.mxu0 %v18385_v18  ;;  %v24657_v17 = vsel %vm21357_vm14, 4294967295, %v24656_v17  ;;  %v456_v18 = vand.u32 15, %v354_v23  ;;  %v21364_v14 = vld [vmem:[#allocation2 + $0x59] sm:$0xff]  ;;  %v21374_v23 = vld [vmem:[#allocation2 + $0x61] sm:$0xff]  ;;  %v18401_v25 = vpack.c.bf16 %v2010_v22, %v2009_v37  ;;  %v2303_v37 = vld [vmem:[#allocation7 + $0x200] sm:$0xff] }
 0x119   : > { %18390 = vmatprep.subr.bf16.mxu0 %v18389_v12  ;;  %24658 = vst [vmem:[#allocation62_spill] sm:$0xff] %v24657_v17  ;;  %24660 = vst [vmem:[#allocation64_spill] sm:$0xff] %v21364_v14 }
 0x11b   : > { %15603 = vmatmul.mubr.msk.f32.gmra.mrb[6].mxu0 %vm21344_vm15, %v21348_v15  ;;  %vm21370_vm15 = vcmp.lt.s32.totalorder %v456_v18, 15  ;;  %v2012_v15 = vld [vmem:[#allocation7 + $0x1f8] sm:$0xff]  ;;  %v24665_v18 = vmov 0 }
 0x11c   : > { %15605 = vmatprep.mubr.f32.mxu0 %v21351_v33  ;;  %18392 = vmatpush3.bf16.msra.mxu0 %v18389_v12  ;;  %v24662_v13 = vsel %vm21370_vm15, 4294967295, %v24661_v13  ;;  %v358_v12 = vadd.s32 120, %v21085_v42  ;;  %v21377_v33 = vld [vmem:[#allocation2 + $0x69] sm:$0xff]  ;;  %v18405_v22 = vpack.c.bf16 %v2012_v15, %v2011_v24  ;;  %v21413_v24 = vld [vmem:[#allocation2 + $0x91] sm:$0xff] }
 0x11d   : > { %18394 = vmatprep.subr.bf16.mxu0 %v18393_v29  ;;  %24663 = vst [vmem:[#allocation65_spill] sm:$0xff] %v24662_v13  ;;  %24664 = vst [vmem:[#allocation66_spill] sm:$0xff] %v21377_v33 }
 0x11e   : > { %v484_v17 = vand.u32 15, %v358_v12  ;;  %v21400_v12 = vld [vmem:[#allocation2 + $0x81] sm:$0xff] }
 0x11f   : > { %15606 = vmatmul.mubr.msk.f32.gmra.mrb[8].mxu0 %vm21357_vm14, %v21361_v21  ;;  %vm21383_vm14 = vcmp.lt.s32.totalorder %v470_v26, 15  ;;  %v2304_v21 = vld [vmem:[#allocation7 + $0x208] sm:$0xff]  ;;  %v24668_v26 = vmov 0 }
 0x120   : > { %15608 = vmatprep.mubr.f32.mxu0 %v21364_v14  ;;  %18396 = vmatpush3.bf16.msra.mxu0 %v18393_v29  ;;  %v24666_v18 = vsel %vm21383_vm14, 4294967295, %v24665_v18  ;;  %v360_v29 = vadd.s32 136, %v21085_v42  ;;  %v21390_v14 = vld [vmem:[#allocation2 + $0x79] sm:$0xff]  ;;  %v18409_v15 = vpack.c.bf16 %v2304_v21, %v2303_v37  ;;  %v24675_v21 = vmov 0 }
 0x121   : > { %18398 = vmatprep.subr.bf16.mxu0 %v18397_v43  ;;  %24667 = vst [vmem:[#allocation67_spill] sm:$0xff] %v24666_v18  ;;  %v364_v18 = vadd.s32 168, %v21085_v42 }
 0x122   : > { %v498_v13 = vand.u32 15, %v360_v29 }
 0x123   : > { %15609 = vmatmul.mubr.msk.f32.gmra.mrb[10].mxu0 %vm21370_vm15, %v21374_v23  ;;  %vm21396_vm15 = vcmp.lt.s32.totalorder %v484_v17, 15  ;;  %v24671_v17 = vmov 0  ;;  %v526_v37 = vand.u32 15, %v364_v18  ;;  %v21442_v18 = vld [vmem:[#allocation2 + $0xb9] sm:$0xff] }
 0x124   : > { %15611 = vmatprep.mubr.f32.mxu0 %v21377_v33  ;;  %18400 = vmatpush3.bf16.msra.mxu0 %v18397_v43  ;;  %v24669_v26 = vsel %vm21396_vm15, 4294967295, %v24668_v26  ;;  %v362_v43 = vadd.s32 152, %v21085_v42  ;;  %v21403_v33 = vld [vmem:[#allocation2 + $0x89] sm:$0xff]  ;;  %24684 = vst [vmem:[#allocation76_spill] sm:$0xff] %v21442_v18 }
 0x125   : > { %18402 = vmatprep.subr.bf16.mxu0 %v18401_v25  ;;  %24670 = vst [vmem:[#allocation68_spill] sm:$0xff] %v24669_v26  ;;  %v21429_v26 = vld [vmem:[#allocation2 + $0xa9] sm:$0xff] }
 0x126   : > { %v512_v29 = vand.u32 15, %v362_v43  ;;  %v366_v43 = vadd.s32 184, %v21085_v42  ;;  %24679 = vst [vmem:[#allocation73_spill] sm:$0xff] %v21429_v26 }
 0x127   : > { %15612 = vmatmul.mubr.msk.f32.gmra.mrb[12].mxu0 %vm21383_vm14, %v21387_v16  ;;  %vm21409_vm14 = vcmp.lt.s32.totalorder %v498_v13, 15  ;;  %v21426_v13 = vld [vmem:[#allocation2 + $0xa1] sm:$0xff] }
 0x128   : > { %15614 = vmatprep.mubr.f32.mxu0 %v21390_v14  ;;  %18404 = vmatpush3.bf16.msra.mxu0 %v18401_v25  ;;  %v24672_v17 = vsel %vm21409_vm14, 4294967295, %v24671_v17  ;;  %v21416_v25 = vld [vmem:[#allocation2 + $0x99] sm:$0xff]  ;;  %24678 = vst [vmem:[#allocation72_spill] sm:$0xff] %v21426_v13 }
 0x129   : > { %18406 = vmatprep.subr.bf16.mxu0 %v18405_v22  ;;  %24673 = vst [vmem:[#allocation69_spill] sm:$0xff] %v24672_v17  ;;  %24674 = vst [vmem:[#allocation70_spill] sm:$0xff] %v21416_v25  ;;  %v540_v17 = vand.u32 15, %v366_v43  ;;  %v21455_v43 = vld [vmem:[#allocation2 + $0xc9] sm:$0xff] }
 0x12a   : > { %24689 = vst [vmem:[#allocation79_spill] sm:$0xff] %v21455_v43 }
 0x12b   : > { %15615 = vmatmul.mubr.msk.f32.gmra.mrb[14].mxu0 %vm21396_vm15, %v21400_v12  ;;  %vm21422_vm15 = vcmp.lt.s32.totalorder %v512_v29, 15  ;;  %v21439_v29 = vld [vmem:[#allocation2 + $0xb1] sm:$0xff] }
 0x12c   : > { %15617 = vmatprep.mubr.f32.mxu0 %v21403_v33  ;;  %18408 = vmatpush3.bf16.msra.mxu0 %v18405_v22  ;;  %v24676_v21 = vsel %vm21422_vm15, 4294967295, %v24675_v21  ;;  %v24680_v22 = vmov 0  ;;  %24683 = vst [vmem:[#allocation75_spill] sm:$0xff] %v21439_v29 }
 0x12d   : > { %18410 = vmatprep.subr.bf16.mxu0 %v18409_v15  ;;  %24677 = vst [vmem:[#allocation71_spill] sm:$0xff] %v24676_v21  ;;  %v24685_v21 = vmov 0 }
 0x12f   : > { %15618 = vmatmul.mubr.msk.f32.gmra.mrb[16].mxu0 %vm21409_vm14, %v21413_v24  ;;  %vm21435_vm14 = vcmp.lt.s32.totalorder %v526_v37, 15  ;;  %v21452_v37 = vld [vmem:[#allocation2 + $0xc1] sm:$0xff] }
 0x130   : > { %15620 = vmatprep.mubr.f32.mxu0 %v21416_v25  ;;  %v24681_v22 = vsel %vm21435_vm14, 4294967295, %v24680_v22  ;;  %v368_v25 = vadd.s32 200, %v21085_v42  ;;  %24688 = vst [vmem:[#allocation78_spill] sm:$0xff] %v21452_v37 }
 0x131   : > { %24682 = vst [vmem:[#allocation74_spill] sm:$0xff] %v24681_v22  ;;  %v24690_v22 = vmov 0 }
 0x133   : > { %15621 = vmatmul.mubr.msk.f32.gmra.mrb[18].mxu0 %vm21422_vm15, %v21426_v13  ;;  %vm21448_vm15 = vcmp.lt.s32.totalorder %v540_v17, 15  ;;  %v370_v13 = vadd.s32 216, %v21085_v42  ;;  %v21465_v17 = vld [vmem:[#allocation2 + $0xd1] sm:$0xff] }
 0x134   : > { %15623 = vmatprep.mubr.f32.mxu0 %v21429_v26  ;;  %v24686_v21 = vsel %vm21448_vm15, 4294967295, %v24685_v21  ;;  %v554_v26 = vand.u32 15, %v368_v25  ;;  %24693 = vst [vmem:[#allocation81_spill] sm:$0xff] %v21465_v17  ;;  %v21468_v25 = vld [vmem:[#allocation2 + $0xd9] sm:$0xff] }
 0x135   : > { %24687 = vst [vmem:[#allocation77_spill] sm:$0xff] %v24686_v21  ;;  %24694 = vst [vmem:[#allocation82_spill] sm:$0xff] %v21468_v25  ;;  %v24695_v21 = vmov 0 }
 0x137   : > { %15624 = vmatmul.mubr.msk.f32.gmra.mrb[20].mxu0 %vm21435_vm14, %v21439_v29  ;;  %vm21461_vm14 = vcmp.lt.s32.totalorder %v554_v26, 15  ;;  %v372_v29 = vadd.s32 232, %v21085_v42  ;;  %v21478_v26 = vld [vmem:[#allocation2 + $0xe1] sm:$0xff] }
 0x138   : > { %15626 = vmatprep.mubr.f32.mxu0 %v21442_v18  ;;  %v24691_v22 = vsel %vm21461_vm14, 4294967295, %v24690_v22  ;;  %v568_v18 = vand.u32 15, %v370_v13  ;;  %v21481_v13 = vld [vmem:[#allocation2 + $0xe9] sm:$0xff] }
 0x139   : > { %24692 = vst [vmem:[#allocation80_spill] sm:$0xff] %v24691_v22  ;;  %24698 = vst [vmem:[#allocation84_spill] sm:$0xff] %v21481_v13  ;;  %v24699_v22 = vmov 0 }
 0x13b   : > { %15627 = vmatmul.mubr.msk.f32.gmra.mrb[22].mxu0 %vm21448_vm15, %v21452_v37  ;;  %vm21474_vm15 = vcmp.lt.s32.totalorder %v568_v18, 15  ;;  %v374_v37 = vadd.s32 248, %v21085_v42  ;;  %v21491_v18 = vld [vmem:[#allocation2 + $0xf1] sm:$0xff]  ;;  %v24704_v42 = vmov 0 }
 0x13c   : > { %15629 = vmatprep.mubr.f32.mxu0 %v21455_v43  ;;  %v24696_v21 = vsel %vm21474_vm15, 4294967295, %v24695_v21  ;;  %v582_v43 = vand.u32 15, %v372_v29  ;;  %24702 = vst [vmem:[#allocation86_spill] sm:$0xff] %v21491_v18  ;;  %v21503_v29 = vld [vmem:[#allocation2 + $0x101] sm:$0xff] }
 0x13d   : > { %24697 = vst [vmem:[#allocation83_spill] sm:$0xff] %v24696_v21  ;;  %v2306_v21 = vld [vmem:[#allocation7 + $0x218] sm:$0xff] }
 0x13f   : > { %15630 = vmatmul.mubr.msk.f32.gmra.mrb[24].mxu0 %vm21461_vm14, %v21465_v17  ;;  %vm21487_vm14 = vcmp.lt.s32.totalorder %v582_v43, 15  ;;  %v21493_v17 = vld [vmem:[#allocation2 + $0xf9] sm:$0xff] }
 0x140   : > { %15632 = vmatprep.mubr.f32.mxu0 %v21468_v25  ;;  %v24700_v22 = vsel %vm21487_vm14, 4294967295, %v24699_v22  ;;  %v596_v25 = vand.u32 15, %v374_v37  ;;  %24703 = vst [vmem:[#allocation87_spill] sm:$0xff] %v21493_v17  ;;  %v2305_v43 = vld [vmem:[#allocation7 + $0x210] sm:$0xff] }
 0x141   : > { %24701 = vst [vmem:[#allocation85_spill] sm:$0xff] %v24700_v22  ;;  %v18413_v37 = vpack.c.bf16 %v2306_v21, %v2305_v43  ;;  %v2307_v22 = vld [vmem:[#allocation7 + $0x220] sm:$0xff] }
 0x142   : > { %vm21499_vm13 = vcmp.lt.s32.totalorder %v596_v25, 15  ;;  %v2311_v21 = vld [vmem:[#allocation7 + $0x240] sm:$0xff] }
 0x143   : > { %15633 = vmatmul.mubr.msk.f32.gmra.mrb[26].mxu0 %vm21474_vm15, %v21478_v26  ;;  %v24705_v42 = vsel %vm21499_vm13, 4294967295, %v24704_v42  ;;  %v21591_v43 = vld [vmem:[#allocation2 + $0x50] sm:$0xff] }
 0x144   : > { %15635 = vmatprep.mubr.f32.mxu0 %v21481_v13  ;;  %24706 = vst [vmem:[#allocation88_spill] sm:$0xff] %v24705_v42  ;;  %v2310_v13 = vld [vmem:[#allocation7 + $0x238] sm:$0xff] }
 0x145   : > { %v3292_v42 = vld [vmem:[#allocation7 + $0x3b8] sm:$0xff] }
 0x147   : > { %15636 = vmatmul.mubr.msk.f32.gmra.mrb[28].mxu0 %vm21487_vm14, %v21491_v18  ;;  %v2308_v18 = vld [vmem:[#allocation7 + $0x228] sm:$0xff] }
 0x148   : > { %15638 = vmatprep.mubr.f32.mxu0 %v21493_v17  ;;  %v18417_v25 = vpack.c.bf16 %v2308_v18, %v2307_v22  ;;  %v2309_v17 = vld [vmem:[#allocation7 + $0x230] sm:$0xff]  ;;  %v2315_v22 = vld [vmem:[#allocation7 + $0x260] sm:$0xff]  ;;  %v2650_v18 = vld [vmem:[#allocation7 + $0x2c8] sm:$0xff] }
 0x14b   : > { %15639 = vmatmul.mubr.msk.f32.gmra.mrb[30].mxu0 %vm21499_vm13, %v21503_v29 }
 0x14c   : > { %15673 = vmatprep.mubr.msk.f32.mxu0 %vm21097_vm0, %v21109_v49  ;;  %v18421_v49 = vpack.c.bf16 %v2310_v13, %v2309_v17  ;;  %v2317_v17 = vld [vmem:[#allocation7 + $0x270] sm:$0xff]  ;;  %v2641_v13 = vld [vmem:[#allocation7 + $0x280] sm:$0xff] }
 0x14f   : > { %15674 = vmatmul.mubr.f32.vlgmr.msra.gmra.mrb[0].mxu0 %v21115_v50  ;;  %v2312_v50 = vld [vmem:[#allocation7 + $0x248] sm:$0xff] }
 0x150   : > { %18412 = vmatpush3.bf16.msra.mxu0 %v18409_v15  ;;  %15676 = vmatprep.mubr.msk.f32.mxu0 %vm21105_vm1, %v21121_v4  ;;  %v18425_v4 = vpack.c.bf16 %v2312_v50, %v2311_v21  ;;  %v2313_v15 = vld [vmem:[#allocation7 + $0x250] sm:$0xff]  ;;  %v2652_v21 = vld [vmem:[#allocation7 + $0x2d8] sm:$0xff] }
 0x151   : > { %18414 = vmatprep.subr.bf16.mxu0 %v18413_v37  ;;  %v21597_v50 = vld [vmem:[#allocation2 + $0x60] sm:$0xff] }
 0x153   : > { %15677 = vmatmul.mubr.f32.gmra.mrb[2].mxu0 %v21128_v9  ;;  %v2314_v9 = vld [vmem:[#allocation7 + $0x258] sm:$0xff] }
 0x154   : > { %15679 = vmatprep.mubr.msk.f32.mxu0 %vm21117_vm2, %v21134_v11  ;;  %18416 = vmatpush3.bf16.msra.mxu0 %v18413_v37  ;;  %v18429_v11 = vpack.c.bf16 %v2314_v9, %v2313_v15  ;;  %v21593_v37 = vld [vmem:[#allocation2 + $0x58] sm:$0xff]  ;;  %v2653_v9 = vld [vmem:[#allocation7 + $0x2e0] sm:$0xff] }
 0x155   : > { %18418 = vmatprep.subr.bf16.mxu0 %v18417_v25 }
 0x157   : > { %15680 = vmatmul.mubr.f32.gmra.mrb[4].mxu0 %v21141_v32  ;;  %v2316_v32 = vld [vmem:[#allocation7 + $0x268] sm:$0xff] }
 0x158   : > { %15682 = vmatprep.mubr.msk.f32.mxu0 %vm21130_vm3, %v21147_v51  ;;  %18420 = vmatpush3.bf16.msra.mxu0 %v18417_v25  ;;  %v18433_v51 = vpack.c.bf16 %v2316_v32, %v2315_v22  ;;  %v21603_v22 = vld [vmem:[#allocation2 + $0x70] sm:$0xff]  ;;  %v21605_v32 = vld [vmem:[#allocation2 + $0x78] sm:$0xff] }
 0x159   : > { %18422 = vmatprep.subr.bf16.mxu0 %v18421_v49 }
 0x15b   : > { %15683 = vmatmul.mubr.f32.gmra.mrb[6].mxu0 %v21154_v58  ;;  %v2318_v58 = vld [vmem:[#allocation7 + $0x278] sm:$0xff] }
 0x15c   : > { %15685 = vmatprep.mubr.msk.f32.mxu0 %vm21143_vm4, %v21160_v61  ;;  %18424 = vmatpush3.bf16.msra.mxu0 %v18421_v49  ;;  %v18437_v61 = vpack.c.bf16 %v2318_v58, %v2317_v17  ;;  %v2651_v49 = vld [vmem:[#allocation7 + $0x2d0] sm:$0xff]  ;;  %v2656_v58 = vld [vmem:[#allocation7 + $0x2f8] sm:$0xff] }
 0x15d   : > { %18426 = vmatprep.subr.bf16.mxu0 %v18425_v4  ;;  %v18461_v15 = vpack.c.bf16 %v2652_v21, %v2651_v49  ;;  %v2655_v17 = vld [vmem:[#allocation7 + $0x2f0] sm:$0xff]  ;;  %v21651_v49 = vld [vmem:[#allocation2 + $0xf0] sm:$0xff]  ;;  %v21654_v21 = vld [vmem:[#allocation2 + $0xf8] sm:$0xff] }
 0x15e   : > { %24714 = vst [vmem:[#allocation93_spill] sm:$0xff] %v21651_v49  ;;  %24715 = vst [vmem:[#allocation94_spill] sm:$0xff] %v21654_v21 }
 0x15f   : > { %15686 = vmatmul.mubr.f32.gmra.mrb[8].mxu0 %v21167_v0  ;;  %v2642_v0 = vld [vmem:[#allocation7 + $0x288] sm:$0xff] }
 0x160   : > { %15688 = vmatprep.mubr.msk.f32.mxu0 %vm21156_vm5, %v21173_v7  ;;  %18428 = vmatpush3.bf16.msra.mxu0 %v18425_v4  ;;  %v18441_v7 = vpack.c.bf16 %v2642_v0, %v2641_v13  ;;  %v21599_v4 = vld [vmem:[#allocation2 + $0x68] sm:$0xff]  ;;  %v18469_v0 = vpack.c.bf16 %v2656_v58, %v2655_v17  ;;  %v24719_v58 = vld [vmem:[#allocation52_spill] sm:$0xff] }
 0x161   : > { %18430 = vmatprep.subr.bf16.mxu0 %v18429_v11  ;;  %v21611_v13 = vld [vmem:[#allocation2 + $0x88] sm:$0xff] }
 0x162   : > { %v24718_v17 = vld [vmem:[#allocation49_spill] sm:$0xff] }
 0x163   : > { %15689 = vmatmul.mubr.f32.gmra.mrb[10].mxu0 %v21180_v31  ;;  %v2270_v31 = vld [vmem:[#allocation2 + $0x18] sm:$0xff] }
 0x164   : > { %15691 = vmatprep.mubr.msk.f32.mxu0 %vm21169_vm6, %v21186_v54  ;;  %18432 = vmatpush3.bf16.msra.mxu0 %v18429_v11  ;;  %v2643_v54 = vld [vmem:[#allocation7 + $0x290] sm:$0xff]  ;;  %v2654_v11 = vld [vmem:[#allocation7 + $0x2e8] sm:$0xff] }
 0x165   : > { %18434 = vmatprep.subr.bf16.mxu0 %v18433_v51 }
 0x167   : > { %15692 = vmatmul.mubr.f32.gmra.mrb[12].mxu0 %v21193_v1  ;;  %v2644_v1 = vld [vmem:[#allocation7 + $0x298] sm:$0xff] }
 0x168   : > { %15694 = vmatprep.mubr.msk.f32.mxu0 %vm21182_vm7, %v21199_v5  ;;  %18436 = vmatpush3.bf16.msra.mxu0 %v18433_v51  ;;  %v2271_v5 = vld [vmem:[#allocation2 + $0x20] sm:$0xff]  ;;  %v18465_v51 = vpack.c.bf16 %v2654_v11, %v2653_v9  ;;  %v24717_v9 = vld [vmem:[#allocation42_spill] sm:$0xff] }
 0x169   : > { %18438 = vmatprep.subr.bf16.mxu0 %v18437_v61  ;;  %v2981_v11 = vld [vmem:[#allocation7 + $0x310] sm:$0xff] }
 0x16b   : > { %15695 = vmatmul.mubr.f32.gmra.mrb[14].mxu0 %v21208_v30  ;;  %v21576_v30 = vld [vmem:[#allocation2 + $0x28] sm:$0xff] }
 0x16c   : > { %15697 = vmatprep.mubr.msk.f32.mxu0 %vm21195_vm8, %v21214_v55  ;;  %18440 = vmatpush3.bf16.msra.mxu0 %v18437_v61  ;;  %v2645_v55 = vld [vmem:[#allocation7 + $0x2a0] sm:$0xff]  ;;  %v21609_v61 = vld [vmem:[#allocation2 + $0x80] sm:$0xff] }
 0x16d   : > { %18442 = vmatprep.subr.bf16.mxu0 %v18441_v7 }
 0x16f   : > { %15698 = vmatmul.mubr.f32.gmra.mrb[16].mxu0 %v21222_v62  ;;  %v2646_v62 = vld [vmem:[#allocation7 + $0x2a8] sm:$0xff] }
 0x170   : > { %15700 = vmatprep.mubr.msk.f32.mxu0 %vm21210_vm9, %v21228_v63  ;;  %vm24707_vm9 = vnez %v24628_v36  ;;  %v21579_v63 = vld [vmem:[#allocation2 + $0x30] sm:$0xff] }
 0x173   : > { %15701 = vmatmul.mubr.f32.gmra.mrb[18].mxu0 %v21235_v48  ;;  %v21567_v48 = vld [vmem:[#allocation2 + $0x107] sm:$0xff] }
 0x174   : > { %15703 = vmatprep.mubr.msk.f32.mxu0 %vm21224_vm10, %v21241_v56  ;;  %vm24708_vm10 = vnez %v24631_v35  ;;  %v21581_v56 = vld [vmem:[#allocation2 + $0x38] sm:$0xff] }
 0x177   : > { %15704 = vmatmul.mubr.f32.gmra.mrb[20].mxu0 %v21248_v47  ;;  %v18449_v47 = vpack.c.bf16 %v2646_v62, %v2645_v55  ;;  %v21623_v55 = vld [vmem:[#allocation2 + $0xa8] sm:$0xff]  ;;  %v21627_v62 = vld [vmem:[#allocation2 + $0xb0] sm:$0xff] }
 0x178   : > { %15706 = vmatprep.mubr.msk.f32.mxu0 %vm21237_vm11, %v21254_v8  ;;  %vm24709_vm11 = vnez %v24635_v27  ;;  %v2647_v8 = vld [vmem:[#allocation7 + $0x2b0] sm:$0xff] }
 0x17b   : > { %15707 = vmatmul.mubr.f32.gmra.mrb[22].mxu0 %v21261_v39  ;;  %v21573_v39 = vld [vmem:[#allocation2 + $0x10f] sm:$0xff] }
 0x17c   : > { %15709 = vmatprep.mubr.msk.f32.mxu0 %vm21250_vm12, %v21267_v46  ;;  %v2648_v46 = vld [vmem:[#allocation7 + $0x2b8] sm:$0xff] }
 0x17f   : > { %15710 = vmatmul.mubr.f32.gmra.mrb[24].mxu0 %v21274_v40  ;;  %v21585_v40 = vld [vmem:[#allocation2 + $0x40] sm:$0xff] }
 0x180   : > { %15712 = vmatprep.mubr.msk.f32.mxu0 %vm24707_vm9, %v21280_v38  ;;  %v21587_v38 = vld [vmem:[#allocation2 + $0x48] sm:$0xff] }
 0x183   : > { %15713 = vmatmul.mubr.f32.gmra.mrb[26].mxu0 %v21290_v19  ;;  %v18453_v19 = vpack.c.bf16 %v2648_v46, %v2647_v8  ;;  %v21633_v8 = vld [vmem:[#allocation2 + $0xc0] sm:$0xff]  ;;  %v21635_v46 = vld [vmem:[#allocation2 + $0xc8] sm:$0xff] }
 0x184   : > { %15715 = vmatprep.mubr.msk.f32.mxu0 %vm24708_vm10, %v21297_v28  ;;  %v18445_v28 = vpack.c.bf16 %v2644_v1, %v2643_v54  ;;  %v21615_v54 = vld [vmem:[#allocation2 + $0x90] sm:$0xff]  ;;  %v21617_v1 = vld [vmem:[#allocation2 + $0x98] sm:$0xff] }
 0x187   : > { %15716 = vmatmul.mubr.f32.gmra.mrb[28].mxu0 %v21303_v34  ;;  %v2649_v34 = vld [vmem:[#allocation7 + $0x2c0] sm:$0xff] }
 0x188   : > { %15718 = vmatprep.mubr.msk.f32.mxu0 %vm24709_vm11, %v21567_v48  ;;  %v18457_v25 = vpack.c.bf16 %v2650_v18, %v2649_v34  ;;  %v21641_v34 = vld [vmem:[#allocation2 + $0xd8] sm:$0xff]  ;;  %v21645_v18 = vld [vmem:[#allocation2 + $0xe0] sm:$0xff] }
 0x189   : > { %24711 = vst [vmem:[#allocation90_spill] sm:$0xff] %v21641_v34  ;;  %24712 = vst [vmem:[#allocation91_spill] sm:$0xff] %v21645_v18 }
 0x18b   : > { %15719 = vmatmul.mubr.f32.gmra.mrb[30].mxu0 %v21573_v39 }
 0x18c   : > { %15753 = vmatprep.mubr.f32.mxu0 %v2270_v31  ;;  %v2980_v31 = vld [vmem:[#allocation7 + $0x308] sm:$0xff] }
 0x18f   : > { %15754 = vmatmul.mubr.f32.vlgmr.msra.gmra.mrb[0].mxu0 %v2271_v5 }
 0x190   : > { %18444 = vmatpush3.bf16.msra.mxu0 %v18441_v7  ;;  %15756 = vmatprep.mubr.f32.mxu0 %v21576_v30  ;;  %v2979_v7 = vld [vmem:[#allocation7 + $0x300] sm:$0xff] }
 0x191   : > { %18446 = vmatprep.subr.bf16.mxu0 %v18445_v28  ;;  %v18473_v5 = vpack.c.bf16 %v2980_v31, %v2979_v7  ;;  %v2983_v7 = vld [vmem:[#allocation7 + $0x320] sm:$0xff]  ;;  %v2984_v31 = vld [vmem:[#allocation7 + $0x328] sm:$0xff] }
 0x193   : > { %15757 = vmatmul.mubr.f32.gmra.mrb[2].mxu0 %v21579_v63 }
 0x194   : > { %15759 = vmatprep.mubr.f32.mxu0 %v21581_v56  ;;  %18448 = vmatpush3.bf16.msra.mxu0 %v18445_v28  ;;  %v21621_v28 = vld [vmem:[#allocation2 + $0xa0] sm:$0xff] }
 0x195   : > { %18450 = vmatprep.subr.bf16.mxu0 %v18449_v47 }
 0x197   : > { %15760 = vmatmul.mubr.f32.gmra.mrb[4].mxu0 %v21585_v40 }
 0x198   : > { %15762 = vmatprep.mubr.f32.mxu0 %v21587_v38  ;;  %18452 = vmatpush3.bf16.msra.mxu0 %v18449_v47  ;;  %v21629_v47 = vld [vmem:[#allocation2 + $0xb8] sm:$0xff] }
 0x199   : > { %18454 = vmatprep.subr.bf16.mxu0 %v18453_v19 }
 0x19b   : > { %15763 = vmatmul.mubr.f32.gmra.mrb[6].mxu0 %v21591_v43 }
 0x19c   : > { %15765 = vmatprep.mubr.f32.mxu0 %v21593_v37  ;;  %18456 = vmatpush3.bf16.msra.mxu0 %v18453_v19  ;;  %v21639_v19 = vld [vmem:[#allocation2 + $0xd0] sm:$0xff] }
 0x19d   : > { %18458 = vmatprep.subr.bf16.mxu0 %v18457_v25  ;;  %24710 = vst [vmem:[#allocation89_spill] sm:$0xff] %v21639_v19 }
 0x19f   : > { %15766 = vmatmul.mubr.f32.gmra.mrb[8].mxu0 %v21597_v50 }
 0x1a0   : > { %15768 = vmatprep.mubr.f32.mxu0 %v21599_v4  ;;  %18460 = vmatpush3.bf16.msra.mxu0 %v18457_v25  ;;  %v21647_v25 = vld [vmem:[#allocation2 + $0xe8] sm:$0xff] }
 0x1a1   : > { %18462 = vmatprep.subr.bf16.mxu0 %v18461_v15  ;;  %24713 = vst [vmem:[#allocation92_spill] sm:$0xff] %v21647_v25 }
 0x1a3   : > { %15769 = vmatmul.mubr.f32.gmra.mrb[10].mxu0 %v21603_v22 }
 0x1a4   : > { %15771 = vmatprep.mubr.f32.mxu0 %v21605_v32  ;;  %18464 = vmatpush3.bf16.msra.mxu0 %v18461_v15  ;;  %v21657_v15 = vld [vmem:[#allocation2 + $0x100] sm:$0xff] }
 0x1a5   : > { %18466 = vmatprep.subr.bf16.mxu0 %v18465_v51  ;;  %24716 = vst [vmem:[#allocation95_spill] sm:$0xff] %v21657_v15 }
 0x1a7   : > { %15772 = vmatmul.mubr.f32.gmra.mrb[12].mxu0 %v21609_v61 }
 0x1a8   : > { %15774 = vmatprep.mubr.f32.mxu0 %v21611_v13  ;;  %18468 = vmatpush3.bf16.msra.mxu0 %v18465_v51  ;;  %v2982_v51 = vld [vmem:[#allocation7 + $0x318] sm:$0xff] }
 0x1a9   : > { %18470 = vmatprep.subr.bf16.mxu0 %v18469_v0 }
 0x1ab   : > { %15775 = vmatmul.mubr.f32.gmra.mrb[14].mxu0 %v21615_v54 }
 0x1ac   : > { %15777 = vmatprep.mubr.f32.mxu0 %v21617_v1  ;;  %18472 = vmatpush3.bf16.msra.mxu0 %v18469_v0  ;;  %v18477_v0 = vpack.c.bf16 %v2982_v51, %v2981_v11  ;;  %v2987_v51 = vld [vmem:[#allocation7 + $0x340] sm:$0xff] }
 0x1ad   : > { %18474 = vmatprep.subr.bf16.mxu0 %v18473_v5 }
 0x1af   : > { %15778 = vmatmul.mubr.f32.gmra.mrb[16].mxu0 %v21621_v28 }
 0x1b0   : > { %15780 = vmatprep.mubr.f32.mxu0 %v21623_v55 }
 0x1b3   : > { %15781 = vmatmul.mubr.f32.gmra.mrb[18].mxu0 %v21627_v62 }
 0x1b4   : > { %15783 = vmatprep.mubr.f32.mxu0 %v21629_v47 }
 0x1b7   : > { %15784 = vmatmul.mubr.f32.gmra.mrb[20].mxu0 %v21633_v8 }
 0x1b8   : > { %15786 = vmatprep.mubr.f32.mxu0 %v21635_v46 }
 0x1bb   : > { %15787 = vmatmul.mubr.f32.gmra.mrb[22].mxu0 %v21639_v19  ;;  %v24725_v19 = vld [vmem:[#allocation53_spill] sm:$0xff] }
 0x1bc   : > { %15789 = vmatprep.mubr.f32.mxu0 %v21641_v34  ;;  %v24724_v34 = vld [vmem:[#allocation57_spill] sm:$0xff]  ;;  %vm24726_vm10 = vnez %v24725_v19  ;;  %v24732_v19 = vld [vmem:[#allocation63_spill] sm:$0xff] }
 0x1bf   : > { %15790 = vmatmul.mubr.f32.gmra.mrb[24].mxu0 %v21645_v18  ;;  %v2985_v18 = vld [vmem:[#allocation7 + $0x330] sm:$0xff] }
 0x1c0   : > { %15792 = vmatprep.mubr.f32.mxu0 %v21647_v25  ;;  %v24721_v25 = vld [vmem:[#allocation51_spill] sm:$0xff] }
 0x1c1   : > { %vm24722_vm11 = vnez %v24721_v25  ;;  %v24728_v25 = vld [vmem:[#allocation60_spill] sm:$0xff] }
 0x1c3   : > { %15793 = vmatmul.mubr.f32.gmra.mrb[26].mxu0 %v21651_v49  ;;  %v24720_v49 = vld [vmem:[#allocation54_spill] sm:$0xff] }
 0x1c4   : > { %15795 = vmatprep.mubr.f32.mxu0 %v21654_v21  ;;  %v24723_v21 = vld [vmem:[#allocation55_spill] sm:$0xff] }
 0x1c7   : > { %15796 = vmatmul.mubr.f32.gmra.mrb[28].mxu0 %v21657_v15  ;;  %v18481_v15 = vpack.c.bf16 %v2984_v31, %v2983_v7  ;;  %v2989_v7 = vld [vmem:[#allocation7 + $0x350] sm:$0xff]  ;;  %v2990_v31 = vld [vmem:[#allocation7 + $0x358] sm:$0xff] }
 0x1c8   : > { %15798 = vmatprep.mubr.f32.mxu0 %v24717_v9  ;;  %v2986_v9 = vld [vmem:[#allocation7 + $0x338] sm:$0xff] }
 0x1c9   : > { %v18485_v11 = vpack.c.bf16 %v2986_v9, %v2985_v18  ;;  %v18493_v18 = vpack.c.bf16 %v2990_v31, %v2989_v7  ;;  %v2991_v9 = vld [vmem:[#allocation7 + $0x360] sm:$0xff]  ;;  %v3286_v31 = vld [vmem:[#allocation7 + $0x388] sm:$0xff] }
 0x1ca   : > { %v3285_v7 = vld [vmem:[#allocation7 + $0x380] sm:$0xff] }
 0x1cb   : > { %15799 = vmatmul.mubr.f32.gmra.mrb[30].mxu0 %v24718_v17  ;;  %v24727_v17 = vld [vmem:[#allocation58_spill] sm:$0xff] }
 0x1cc   : > { %15833 = vmatprep.mubr.f32.mxu0 %v24719_v58  ;;  %v2988_v58 = vld [vmem:[#allocation7 + $0x348] sm:$0xff] }
 0x1cf   : > { %15834 = vmatmul.mubr.msk.f32.vlgmr.msra.gmra.mrb[0].mxu0 %vm24722_vm11, %v24720_v49  ;;  %v24729_v49 = vld [vmem:[#allocation56_spill] sm:$0xff] }
 0x1d0   : > { %18476 = vmatpush3.bf16.msra.mxu0 %v18473_v5  ;;  %15836 = vmatprep.mubr.f32.mxu0 %v24723_v21  ;;  %vm24730_vm11 = vnez %v24729_v49  ;;  %v24731_v5 = vld [vmem:[#allocation61_spill] sm:$0xff]  ;;  %v18489_v21 = vpack.c.bf16 %v2988_v58, %v2987_v51  ;;  %v2993_v58 = vld [vmem:[#allocation7 + $0x370] sm:$0xff] }
 0x1d1   : > { %18478 = vmatprep.subr.bf16.mxu0 %v18477_v0 }
 0x1d3   : > { %15837 = vmatmul.mubr.msk.f32.gmra.mrb[2].mxu0 %vm24726_vm10, %v24724_v34  ;;  %v24733_v34 = vld [vmem:[#allocation59_spill] sm:$0xff] }
 0x1d4   : > { %15839 = vmatprep.mubr.f32.mxu0 %v24727_v17  ;;  %18480 = vmatpush3.bf16.msra.mxu0 %v18477_v0  ;;  %vm24734_vm10 = vnez %v24733_v34  ;;  %v24735_v0 = vld [vmem:[#allocation64_spill] sm:$0xff]  ;;  %v2992_v17 = vld [vmem:[#allocation7 + $0x368] sm:$0xff] }
 0x1d5   : > { %18482 = vmatprep.subr.bf16.mxu0 %v18481_v15  ;;  %v18497_v51 = vpack.c.bf16 %v2992_v17, %v2991_v9  ;;  %v24749_v9 = vld [vmem:[#allocation73_spill] sm:$0xff]  ;;  %v24751_v17 = vld [vmem:[#allocation71_spill] sm:$0xff] }
 0x1d7   : > { %15840 = vmatmul.mubr.msk.f32.gmra.mrb[4].mxu0 %vm24730_vm11, %v24728_v25  ;;  %v24736_v25 = vld [vmem:[#allocation62_spill] sm:$0xff] }
 0x1d8   : > { %15842 = vmatprep.mubr.f32.mxu0 %v24731_v5  ;;  %18484 = vmatpush3.bf16.msra.mxu0 %v18481_v15  ;;  %vm24737_vm11 = vnez %v24736_v25  ;;  %v24738_v15 = vld [vmem:[#allocation66_spill] sm:$0xff]  ;;  %v2994_v5 = vld [vmem:[#allocation7 + $0x378] sm:$0xff] }
 0x1d9   : > { %18486 = vmatprep.subr.bf16.mxu0 %v18485_v11 }
 0x1db   : > { %15843 = vmatmul.mubr.msk.f32.gmra.mrb[6].mxu0 %vm24734_vm10, %v24732_v19  ;;  %v24739_v19 = vld [vmem:[#allocation65_spill] sm:$0xff] }
 0x1dc   : > { %15845 = vmatprep.mubr.f32.mxu0 %v24735_v0  ;;  %18488 = vmatpush3.bf16.msra.mxu0 %v18485_v11  ;;  %vm24740_vm10 = vnez %v24739_v19  ;;  %v18501_v11 = vpack.c.bf16 %v2994_v5, %v2993_v58  ;;  %v24743_v0 = vld [vmem:[#allocation68_spill] sm:$0xff]  ;;  %v24758_v58 = vld [vmem:[#allocation81_spill] sm:$0xff] }
 0x1dd   : > { %18490 = vmatprep.subr.bf16.mxu0 %v18489_v21  ;;  %vm24744_vm9 = vnez %v24743_v0  ;;  %v24759_v5 = vld [vmem:[#allocation77_spill] sm:$0xff] }
 0x1df   : > { %15846 = vmatmul.mubr.msk.f32.gmra.mrb[8].mxu0 %vm24737_vm11, %v21374_v23  ;;  %v24741_v23 = vld [vmem:[#allocation67_spill] sm:$0xff] }
 0x1e0   : > { %15848 = vmatprep.mubr.f32.mxu0 %v24738_v15  ;;  %18492 = vmatpush3.bf16.msra.mxu0 %v18489_v21  ;;  %vm24742_vm11 = vnez %v24741_v23  ;;  %v18505_v21 = vpack.c.bf16 %v3286_v31, %v3285_v7  ;;  %v24754_v15 = vld [vmem:[#allocation78_spill] sm:$0xff]  ;;  %v24762_v7 = vld [vmem:[#allocation80_spill] sm:$0xff] }
 0x1e1   : > { %18494 = vmatprep.subr.bf16.mxu0 %v18493_v18  ;;  %v24764_v31 = vld [vmem:[#allocation84_spill] sm:$0xff] }
 0x1e3   : > { %15849 = vmatmul.mubr.msk.f32.gmra.mrb[10].mxu0 %vm24740_vm10, %v21387_v16  ;;  %v24745_v16 = vld [vmem:[#allocation70_spill] sm:$0xff] }
 0x1e4   : > { %15851 = vmatprep.mubr.f32.mxu0 %v21390_v14  ;;  %18496 = vmatpush3.bf16.msra.mxu0 %v18493_v18  ;;  %v24746_v14 = vld [vmem:[#allocation72_spill] sm:$0xff]  ;;  %v24747_v18 = vld [vmem:[#allocation69_spill] sm:$0xff] }
 0x1e5   : > { %18498 = vmatprep.subr.bf16.mxu0 %v18497_v51  ;;  %vm24748_vm10 = vnez %v24747_v18 }
 0x1e7   : > { %15852 = vmatmul.mubr.msk.f32.gmra.mrb[12].mxu0 %vm24742_vm11, %v21400_v12  ;;  %v24750_v12 = vld [vmem:[#allocation75_spill] sm:$0xff]  ;;  %vm24752_vm11 = vnez %v24751_v17 }
 0x1e8   : > { %15854 = vmatprep.mubr.f32.mxu0 %v21403_v33  ;;  %18500 = vmatpush3.bf16.msra.mxu0 %v18497_v51  ;;  %v24753_v33 = vld [vmem:[#allocation76_spill] sm:$0xff]  ;;  %v24755_v51 = vld [vmem:[#allocation74_spill] sm:$0xff] }
 0x1e9   : > { %18502 = vmatprep.subr.bf16.mxu0 %v18501_v11  ;;  %vm24756_vm12 = vnez %v24755_v51 }
 0x1eb   : > { %15855 = vmatmul.mubr.msk.f32.gmra.mrb[14].mxu0 %vm24744_vm9, %v21413_v24  ;;  %v24757_v24 = vld [vmem:[#allocation79_spill] sm:$0xff]  ;;  %vm24760_vm9 = vnez %v24759_v5 }
 0x1ec   : > { %15857 = vmatprep.mubr.f32.mxu0 %v24745_v16  ;;  %18504 = vmatpush3.bf16.msra.mxu0 %v18501_v11  ;;  %v24761_v11 = vld [vmem:[#allocation82_spill] sm:$0xff] }
 0x1ed   : > { %18506 = vmatprep.subr.bf16.mxu0 %v18505_v21  ;;  %v24765_v16 = vld [vmem:[#allocation86_spill] sm:$0xff] }
 0x1ef   : > { %15858 = vmatmul.mubr.msk.f32.gmra.mrb[16].mxu0 %vm24748_vm10, %v24746_v14  ;;  %vm24763_vm10 = vnez %v24762_v7  ;;  %v3291_v7 = vld [vmem:[#allocation7 + $0x3b0] sm:$0xff] }
 0x1f0   : > { %15860 = vmatprep.mubr.f32.mxu0 %v24749_v9  ;;  %v24767_v9 = vld [vmem:[#allocation87_spill] sm:$0xff] }
 0x1f3   : > { %15861 = vmatmul.mubr.msk.f32.gmra.mrb[18].mxu0 %vm24752_vm11, %v24750_v12  ;;  %v21719_v12 = vld [vmem:[#allocation2 + $0x109] sm:$0xff] }
 0x1f4   : > { %15863 = vmatprep.mubr.f32.mxu0 %v24753_v33  ;;  %24768 = vst [vmem:[#allocation42_spill] sm:$0xff] %v21719_v12  ;;  %v3290_v33 = vld [vmem:[#allocation7 + $0x3a8] sm:$0xff] }
 0x1f7   : > { %15864 = vmatmul.mubr.msk.f32.gmra.mrb[20].mxu0 %vm24756_vm12, %v24754_v15  ;;  %v21725_v15 = vld [vmem:[#allocation2 + $0x111] sm:$0xff] }
 0x1f8   : > { %15866 = vmatprep.mubr.f32.mxu0 %v24757_v24  ;;  %v2914_v24 = vld [vmem:[#allocation2 + $0x27] sm:$0xff] }
 0x1fb   : > { %15867 = vmatmul.mubr.msk.f32.gmra.mrb[22].mxu0 %vm24760_vm9, %v24758_v58  ;;  %v3288_v58 = vld [vmem:[#allocation7 + $0x398] sm:$0xff] }
 0x1fc   : > { %15869 = vmatprep.mubr.f32.mxu0 %v24761_v11  ;;  %v2915_v11 = vld [vmem:[#allocation2 + $0x2f] sm:$0xff] }
 0x1ff   : > { %15870 = vmatmul.mubr.msk.f32.gmra.mrb[24].mxu0 %vm24763_vm10, %v21478_v26  ;;  %v3287_v26 = vld [vmem:[#allocation7 + $0x390] sm:$0xff] }
 0x200   : > { %15872 = vmatprep.mubr.f32.mxu0 %v24764_v31  ;;  %v2916_v31 = vld [vmem:[#allocation2 + $0x37] sm:$0xff] }
 0x203   : > { %15873 = vmatmul.mubr.msk.f32.gmra.mrb[26].mxu0 %vm21474_vm15, %v24765_v16  ;;  %v18509_v16 = vpack.c.bf16 %v3288_v58, %v3287_v26  ;;  %v2920_v26 = vld [vmem:[#allocation2 + $0x57] sm:$0xff]  ;;  %v18517_v58 = vpack.c.bf16 %v3292_v42, %v3291_v7 }
 0x204   : > { %15875 = vmatprep.mubr.f32.mxu0 %v24767_v9  ;;  %v3289_v9 = vld [vmem:[#allocation7 + $0x3a0] sm:$0xff] }
 0x205   : > { %v18513_v14 = vpack.c.bf16 %v3290_v33, %v3289_v9  ;;  %v2922_v33 = vld [vmem:[#allocation2 + $0x67] sm:$0xff]  ;;  %v2924_v42 = vld [vmem:[#allocation2 + $0x77] sm:$0xff] }
 0x207   : > { %15876 = vmatmul.mubr.msk.f32.gmra.mrb[28].mxu0 %vm21487_vm14, %v21503_v29  ;;  %v2917_v29 = vld [vmem:[#allocation2 + $0x3f] sm:$0xff] }
 0x208   : > { %15878 = vmatprep.mubr.f32.mxu0 %v21719_v12  ;;  %v2918_v12 = vld [vmem:[#allocation2 + $0x47] sm:$0xff] }
 0x20b   : > { %15879 = vmatmul.mubr.msk.f32.gmra.mrb[30].mxu0 %vm21499_vm13, %v21725_v15 }
 0x20c   : > { %15913 = vmatprep.mubr.msk.f32.mxu0 %vm21097_vm0, %v2914_v24  ;;  %v2919_v24 = vld [vmem:[#allocation2 + $0x4f] sm:$0xff] }
 0x20f   : > { %15914 = vmatmul.mubr.f32.vlgmr.msra.gmra.mrb[0].mxu0 %v2915_v11  ;;  %v3293_v11 = vld [vmem:[#allocation7 + $0x3c0] sm:$0xff] }
 0x210   : > { %18508 = vmatpush3.bf16.msra.mxu0 %v18505_v21  ;;  %15916 = vmatprep.mubr.msk.f32.mxu0 %vm21105_vm1, %v2916_v31  ;;  %v3294_v21 = vld [vmem:[#allocation7 + $0x3c8] sm:$0xff] }
 0x211   : > { %18510 = vmatprep.subr.bf16.mxu0 %v18509_v16  ;;  %v2921_v31 = vld [vmem:[#allocation2 + $0x5f] sm:$0xff]  ;;  %v18521_v9 = vpack.c.bf16 %v3294_v21, %v3293_v11 }
 0x212   : > { %v3299_v21 = vld [vmem:[#allocation7 + $0x3f0] sm:$0xff] }
 0x213   : > { %15917 = vmatmul.mubr.f32.gmra.mrb[2].mxu0 %v2917_v29  ;;  %v3295_v29 = vld [vmem:[#allocation7 + $0x3d0] sm:$0xff] }
 0x214   : > { %15919 = vmatprep.mubr.msk.f32.mxu0 %vm21117_vm2, %v2918_v12  ;;  %18512 = vmatpush3.bf16.msra.mxu0 %v18509_v16  ;;  %v2923_v12 = vld [vmem:[#allocation2 + $0x6f] sm:$0xff]  ;;  %v18525_v7 = vpack.c.bf16 %v3296_v60, %v3295_v29  ;;  %v2928_v60 = vld [vmem:[#allocation2 + $0x97] sm:$0xff] }
 0x215   : > { %18514 = vmatprep.subr.bf16.mxu0 %v18513_v14  ;;  %v3297_v16 = vld [vmem:[#allocation7 + $0x3e0] sm:$0xff] }
 0x216   : > { %v3623_v29 = vld [vmem:[#allocation7 + $0x400] sm:$0xff] }
 0x217   : > { %15920 = vmatmul.mubr.f32.gmra.mrb[4].mxu0 %v2919_v24  ;;  %v3298_v24 = vld [vmem:[#allocation7 + $0x3e8] sm:$0xff] }
 0x218   : > { %15922 = vmatprep.mubr.msk.f32.mxu0 %vm21130_vm3, %v2920_v26  ;;  %18516 = vmatpush3.bf16.msra.mxu0 %v18513_v14  ;;  %v2925_v14 = vld [vmem:[#allocation2 + $0x7f] sm:$0xff]  ;;  %v2926_v26 = vld [vmem:[#allocation2 + $0x87] sm:$0xff]  ;;  %v18529_v11 = vpack.c.bf16 %v3298_v24, %v3297_v16  ;;  %v2931_v24 = vld [vmem:[#allocation2 + $0xaf] sm:$0xff] }
 0x219   : > { %18518 = vmatprep.subr.bf16.mxu0 %v18517_v58 }
 0x21b   : > { %15923 = vmatmul.mubr.f32.gmra.mrb[6].mxu0 %v2921_v31  ;;  %v3300_v31 = vld [vmem:[#allocation7 + $0x3f8] sm:$0xff] }
 0x21c   : > { %15925 = vmatprep.mubr.msk.f32.mxu0 %vm21143_vm4, %v2922_v33  ;;  %18520 = vmatpush3.bf16.msra.mxu0 %v18517_v58  ;;  %v2927_v58 = vld [vmem:[#allocation2 + $0x8f] sm:$0xff]  ;;  %v18533_v33 = vpack.c.bf16 %v3300_v31, %v3299_v21  ;;  %v2936_v21 = vld [vmem:[#allocation2 + $0xd7] sm:$0xff]  ;;  %v2937_v31 = vld [vmem:[#allocation2 + $0xdf] sm:$0xff] }
 0x21d   : > { %18522 = vmatprep.subr.bf16.mxu0 %v18521_v9 }
 0x21f   : > { %15926 = vmatmul.mubr.f32.gmra.mrb[8].mxu0 %v2923_v12  ;;  %v3624_v12 = vld [vmem:[#allocation7 + $0x408] sm:$0xff] }
 0x220   : > { %15928 = vmatprep.mubr.msk.f32.mxu0 %vm21156_vm5, %v2924_v42  ;;  %18524 = vmatpush3.bf16.msra.mxu0 %v18521_v9  ;;  %v2929_v9 = vld [vmem:[#allocation2 + $0x9f] sm:$0xff]  ;;  %v2930_v42 = vld [vmem:[#allocation2 + $0xa7] sm:$0xff]  ;;  %v18537_v16 = vpack.c.bf16 %v3624_v12, %v3623_v29  ;;  %vm24772_vm5 = vnez %v24622_v45  ;;  %v2944_v12 = vld [vmem:[#allocation2 + $0x117] sm:$0xff] }
 0x221   : > { %18526 = vmatprep.subr.bf16.mxu0 %v18525_v7  ;;  %v2941_v29 = vld [vmem:[#allocation2 + $0xff] sm:$0xff] }
 0x223   : > { %15929 = vmatmul.mubr.f32.gmra.mrb[10].mxu0 %v2925_v14  ;;  %v2933_v14 = vld [vmem:[#allocation2 + $0xbf] sm:$0xff] }
 0x224   : > { %15931 = vmatprep.mubr.msk.f32.mxu0 %vm21169_vm6, %v2926_v26  ;;  %18528 = vmatpush3.bf16.msra.mxu0 %v18525_v7  ;;  %v2932_v7 = vld [vmem:[#allocation2 + $0xb7] sm:$0xff]  ;;  %vm24770_vm6 = vnez %v24617_v20  ;;  %v2934_v26 = vld [vmem:[#allocation2 + $0xc7] sm:$0xff] }
 0x225   : > { %18530 = vmatprep.subr.bf16.mxu0 %v18529_v11 }
 0x227   : > { %15932 = vmatmul.mubr.f32.gmra.mrb[12].mxu0 %v2927_v58  ;;  %v2938_v58 = vld [vmem:[#allocation2 + $0xe7] sm:$0xff] }
 0x228   : > { %15934 = vmatprep.mubr.msk.f32.mxu0 %vm21182_vm7, %v2928_v60  ;;  %18532 = vmatpush3.bf16.msra.mxu0 %v18529_v11  ;;  %vm24771_vm7 = vnez %v24619_v57  ;;  %v2935_v11 = vld [vmem:[#allocation2 + $0xcf] sm:$0xff] }
 0x229   : > { %18534 = vmatprep.subr.bf16.mxu0 %v18533_v33  ;;  %v2939_v60 = vld [vmem:[#allocation2 + $0xef] sm:$0xff] }
 0x22b   : > { %15935 = vmatmul.mubr.f32.gmra.mrb[14].mxu0 %v2929_v9  ;;  %v2945_v9 = vld [vmem:[#allocation2 + $0x11f] sm:$0xff] }
 0x22c   : > { %15937 = vmatprep.mubr.msk.f32.mxu0 %vm21195_vm8, %v2930_v42  ;;  %18536 = vmatpush3.bf16.msra.mxu0 %v18533_v33  ;;  %vm24773_vm8 = vnez %v24625_v44  ;;  %v2940_v33 = vld [vmem:[#allocation2 + $0xf7] sm:$0xff]  ;;  %v3625_v42 = vld [vmem:[#allocation7 + $0x410] sm:$0xff] }
 0x22d   : > { %18538 = vmatprep.subr.bf16.mxu0 %v18537_v16 }
 0x22f   : > { %15938 = vmatmul.mubr.f32.gmra.mrb[16].mxu0 %v2931_v24  ;;  %v3626_v24 = vld [vmem:[#allocation7 + $0x418] sm:$0xff] }
 0x230   : > { %15940 = vmatprep.mubr.msk.f32.mxu0 %vm24770_vm6, %v2932_v7  ;;  %vm24774_vm6 = vnez %v24628_v36  ;;  %v4112_v7 = vld [vmem:[#allocation9 + $0x80] sm:$0xff] }
 0x233   : > { %15941 = vmatmul.mubr.f32.gmra.mrb[18].mxu0 %v2933_v14  ;;  %v4113_v14 = vld [vmem:[#allocation9 + $0x88] sm:$0xff] }
 0x234   : > { %15943 = vmatprep.mubr.msk.f32.mxu0 %vm24771_vm7, %v2934_v26  ;;  %vm24775_vm7 = vnez %v24631_v35  ;;  %v4114_v26 = vld [vmem:[#allocation9 + $0x90] sm:$0xff] }
 0x237   : > { %15944 = vmatmul.mubr.f32.gmra.mrb[20].mxu0 %v2935_v11  ;;  %v18569_v11 = vpack.c.bf16 %v4113_v14, %v4112_v7  ;;  %v4118_v7 = vld [vmem:[#allocation9 + $0xb0] sm:$0xff]  ;;  %v4120_v14 = vld [vmem:[#allocation9 + $0xc0] sm:$0xff] }
 0x238   : > { %15946 = vmatprep.mubr.msk.f32.mxu0 %vm24772_vm5, %v2936_v21  ;;  %vm24776_vm5 = vnez %v24635_v27  ;;  %v4115_v21 = vld [vmem:[#allocation9 + $0x98] sm:$0xff] }
 0x239   : > { %18570 = vmatprep.subr.bf16.mxu1 %v18569_v11 }
 0x23a   : > { %18572 = vmatpush3.bf16.msra.mxu1 %v18569_v11  ;;  %v3633_v11 = vld [vmem:[#allocation7 + $0x450] sm:$0xff] }
 0x23b   : > { %15947 = vmatmul.mubr.f32.gmra.mrb[22].mxu0 %v2937_v31  ;;  %v18541_v31 = vpack.c.bf16 %v3626_v24, %v3625_v42  ;;  %v4119_v42 = vld [vmem:[#allocation9 + $0xb8] sm:$0xff]  ;;  %v3631_v24 = vld [vmem:[#allocation7 + $0x440] sm:$0xff] }
 0x23c   : > { %15949 = vmatprep.mubr.msk.f32.mxu0 %vm24773_vm8, %v2938_v58  ;;  %v3627_v58 = vld [vmem:[#allocation7 + $0x420] sm:$0xff]  ;;  %vm24789_vm8 = vnez %v24733_v34 }
 0x23f   : > { %15950 = vmatmul.mubr.f32.gmra.mrb[24].mxu0 %v2939_v60  ;;  %v3628_v60 = vld [vmem:[#allocation7 + $0x428] sm:$0xff] }
 0x240   : > { %15952 = vmatprep.mubr.msk.f32.mxu0 %vm24774_vm6, %v2940_v33  ;;  %v4117_v33 = vld [vmem:[#allocation9 + $0xa8] sm:$0xff]  ;;  %vm24788_vm6 = vnez %v24729_v49 }
 0x243   : > { %15953 = vmatmul.mubr.f32.gmra.mrb[26].mxu0 %v2941_v29  ;;  %v18545_v29 = vpack.c.bf16 %v3628_v60, %v3627_v58  ;;  %v4123_v58 = vld [vmem:[#allocation9 + $0xd8] sm:$0xff]  ;;  %v3636_v60 = vld [vmem:[#allocation7 + $0x468] sm:$0xff] }
 0x244   : > { %15955 = vmatprep.mubr.msk.f32.mxu0 %vm24775_vm7, %v21567_v48  ;;  %v18573_v48 = vpack.c.bf16 %v4115_v21, %v4114_v26  ;;  %v4121_v26 = vld [vmem:[#allocation9 + $0xc8] sm:$0xff]  ;;  %v3634_v21 = vld [vmem:[#allocation7 + $0x458] sm:$0xff] }
 0x246   : > { %18574 = vmatprep.subr.bf16.mxu1 %v18573_v48 }
 0x247   : > { %15956 = vmatmul.mubr.f32.gmra.mrb[28].mxu0 %v21573_v39  ;;  %v4116_v39 = vld [vmem:[#allocation9 + $0xa0] sm:$0xff]  ;;  %18576 = vmatpush3.bf16.msra.mxu1 %v18573_v48 }
 0x248   : > { %15958 = vmatprep.mubr.msk.f32.mxu0 %vm24776_vm5, %v2944_v12  ;;  %v3629_v12 = vld [vmem:[#allocation7 + $0x430] sm:$0xff] }
 0x24b   : > { %15959 = vmatmul.mubr.f32.gmra.mrb[30].mxu0 %v2945_v9  ;;  %v3630_v9 = vld [vmem:[#allocation7 + $0x438] sm:$0xff] }
 0x24c   : > { %15993 = vmatprep.mubr.f32.mxu0 %v21576_v30  ;;  %v18577_v30 = vpack.c.bf16 %v4117_v33, %v4116_v39  ;;  %v3638_v33 = vld [vmem:[#allocation7 + $0x478] sm:$0xff] }
 0x24e   : > { %18578 = vmatprep.subr.bf16.mxu1 %v18577_v30 }
 0x24f   : > { %15994 = vmatmul.mubr.f32.vlgmr.msra.gmra.mrb[0].mxu0 %v21579_v63  ;;  %v18549_v63 = vpack.c.bf16 %v3630_v9, %v3629_v12  ;;  %18580 = vmatpush3.bf16.msra.mxu1 %v18577_v30  ;;  %v24784_v12 = vld [vmem:[#allocation51_spill] sm:$0xff]  ;;  %v3561_v30 = vld [vmem:[#allocation2 + $0x41] sm:$0xff]  ;;  %v3562_v9 = vld [vmem:[#allocation2 + $0x49] sm:$0xff] }
 0x250   : > { %18540 = vmatpush3.bf16.msra.mxu0 %v18537_v16  ;;  %15996 = vmatprep.mubr.f32.mxu0 %v21581_v56  ;;  %v18581_v16 = vpack.c.bf16 %v4119_v42, %v4118_v7  ;;  %v3632_v56 = vld [vmem:[#allocation7 + $0x448] sm:$0xff]  ;;  %vm24785_vm5 = vnez %v24784_v12  ;;  %v24786_v7 = vld [vmem:[#allocation53_spill] sm:$0xff] }
 0x251   : > { %18542 = vmatprep.subr.bf16.mxu0 %v18541_v31  ;;  %vm24787_vm7 = vnez %v24786_v7  ;;  %v3563_v42 = vld [vmem:[#allocation2 + $0x51] sm:$0xff] }
 0x252   : > { %18582 = vmatprep.subr.bf16.mxu1 %v18581_v16 }
 0x253   : > { %15997 = vmatmul.mubr.f32.gmra.mrb[2].mxu0 %v21585_v40  ;;  %v18553_v40 = vpack.c.bf16 %v3632_v56, %v3631_v24  ;;  %18584 = vmatpush3.bf16.msra.mxu1 %v18581_v16  ;;  %v3565_v24 = vld [vmem:[#allocation2 + $0x61] sm:$0xff]  ;;  %v3566_v16 = vld [vmem:[#allocation2 + $0x69] sm:$0xff]  ;;  %v3567_v56 = vld [vmem:[#allocation2 + $0x71] sm:$0xff] }
 0x254   : > { %15999 = vmatprep.mubr.f32.mxu0 %v21587_v38  ;;  %18544 = vmatpush3.bf16.msra.mxu0 %v18541_v31  ;;  %v18585_v38 = vpack.c.bf16 %v4121_v26, %v4120_v14  ;;  %v4122_v31 = vld [vmem:[#allocation9 + $0xd0] sm:$0xff] }
 0x255   : > { %18546 = vmatprep.subr.bf16.mxu0 %v18545_v29  ;;  %v18589_v48 = vpack.c.bf16 %v4123_v58, %v4122_v31  ;;  %v3568_v14 = vld [vmem:[#allocation2 + $0x79] sm:$0xff]  ;;  %v3569_v26 = vld [vmem:[#allocation2 + $0x81] sm:$0xff]  ;;  %v3574_v31 = vld [vmem:[#allocation2 + $0xa9] sm:$0xff] }
 0x256   : > { %18586 = vmatprep.subr.bf16.mxu1 %v18585_v38  ;;  %v3575_v58 = vld [vmem:[#allocation2 + $0xb1] sm:$0xff] }
 0x257   : > { %16000 = vmatmul.mubr.f32.gmra.mrb[4].mxu0 %v21591_v43  ;;  %v18557_v43 = vpack.c.bf16 %v3634_v21, %v3633_v11  ;;  %18588 = vmatpush3.bf16.msra.mxu1 %v18585_v38  ;;  %v3571_v11 = vld [vmem:[#allocation2 + $0x91] sm:$0xff]  ;;  %v3572_v38 = vld [vmem:[#allocation2 + $0x99] sm:$0xff]  ;;  %v3573_v21 = vld [vmem:[#allocation2 + $0xa1] sm:$0xff] }
 0x258   : > { %16002 = vmatprep.mubr.f32.mxu0 %v21593_v37  ;;  %18548 = vmatpush3.bf16.msra.mxu0 %v18545_v29  ;;  %v3635_v37 = vld [vmem:[#allocation7 + $0x460] sm:$0xff]  ;;  %v3560_v29 = vld [vmem:[#allocation2 + $0x39] sm:$0xff] }
 0x259   : > { %18550 = vmatprep.subr.bf16.mxu0 %v18549_v63  ;;  %v18561_v39 = vpack.c.bf16 %v3636_v60, %v3635_v37  ;;  %18590 = vmatprep.subr.bf16.mxu1 %v18589_v48  ;;  %v3578_v37 = vld [vmem:[#allocation2 + $0xc9] sm:$0xff]  ;;  %v3579_v60 = vld [vmem:[#allocation2 + $0xd1] sm:$0xff] }
 0x25b   : > { %16003 = vmatmul.mubr.f32.gmra.mrb[6].mxu0 %v21597_v50  ;;  %v3637_v50 = vld [vmem:[#allocation7 + $0x470] sm:$0xff]  ;;  %18592 = vmatpush3.bf16.msra.mxu1 %v18589_v48 }
 0x25c   : > { %16005 = vmatprep.mubr.f32.mxu0 %v21599_v4  ;;  %18552 = vmatpush3.bf16.msra.mxu0 %v18549_v63  ;;  %v18565_v4 = vpack.c.bf16 %v3638_v33, %v3637_v50  ;;  %v3564_v63 = vld [vmem:[#allocation2 + $0x59] sm:$0xff]  ;;  %v3577_v48 = vld [vmem:[#allocation2 + $0xc1] sm:$0xff]  ;;  %v3582_v33 = vld [vmem:[#allocation2 + $0xe9] sm:$0xff] }
 0x25d   : > { %18554 = vmatprep.subr.bf16.mxu0 %v18553_v40  ;;  %v3581_v50 = vld [vmem:[#allocation2 + $0xe1] sm:$0xff] }
 0x25f   : > { %16006 = vmatmul.mubr.f32.gmra.mrb[8].mxu0 %v21603_v22  ;;  %v24777_v22 = vld [vmem:[#allocation89_spill] sm:$0xff] }
 0x260   : > { %16008 = vmatprep.mubr.f32.mxu0 %v21605_v32  ;;  %18556 = vmatpush3.bf16.msra.mxu0 %v18553_v40  ;;  %v24778_v32 = vld [vmem:[#allocation90_spill] sm:$0xff] }
 0x261   : > { %18558 = vmatprep.subr.bf16.mxu0 %v18557_v43  ;;  %v3570_v40 = vld [vmem:[#allocation2 + $0x89] sm:$0xff] }
 0x263   : > { %16009 = vmatmul.mubr.f32.gmra.mrb[10].mxu0 %v21609_v61  ;;  %v24779_v61 = vld [vmem:[#allocation91_spill] sm:$0xff] }
 0x264   : > { %16011 = vmatprep.mubr.f32.mxu0 %v21611_v13  ;;  %18560 = vmatpush3.bf16.msra.mxu0 %v18557_v43  ;;  %v24780_v13 = vld [vmem:[#allocation92_spill] sm:$0xff] }
 0x265   : > { %18562 = vmatprep.subr.bf16.mxu0 %v18561_v39  ;;  %v3576_v43 = vld [vmem:[#allocation2 + $0xb9] sm:$0xff] }
 0x267   : > { %16012 = vmatmul.mubr.f32.gmra.mrb[12].mxu0 %v21615_v54  ;;  %v3278_v54 = vld [vmem:[#allocation2 + $0xf8] sm:$0xff] }
 0x268   : > { %16014 = vmatprep.mubr.f32.mxu0 %v21617_v1  ;;  %18564 = vmatpush3.bf16.msra.mxu0 %v18561_v39  ;;  %v24781_v1 = vld [vmem:[#allocation93_spill] sm:$0xff]  ;;  %v3580_v39 = vld [vmem:[#allocation2 + $0xd9] sm:$0xff] }
 0x269   : > { %18566 = vmatprep.subr.bf16.mxu0 %v18565_v4 }
 0x26b   : > { %16015 = vmatmul.mubr.f32.gmra.mrb[14].mxu0 %v21621_v28  ;;  %v3279_v28 = vld [vmem:[#allocation2 + $0x100] sm:$0xff] }
 0x26c   : > { %16017 = vmatprep.mubr.f32.mxu0 %v21623_v55  ;;  %18568 = vmatpush3.bf16.msra.mxu0 %v18565_v4  ;;  %v21790_v55 = vld [vmem:[#allocation2 + $0x108] sm:$0xff]  ;;  %v3583_v4 = vld [vmem:[#allocation2 + $0xf1] sm:$0xff] }
 0x26d   : > { %24782 = vst [vmem:[#allocation49_spill] sm:$0xff] %v21790_v55 }
 0x26f   : > { %16018 = vmatmul.mubr.f32.gmra.mrb[16].mxu0 %v21627_v62  ;;  %v21793_v62 = vld [vmem:[#allocation2 + $0x110] sm:$0xff] }
 0x270   : > { %16020 = vmatprep.mubr.f32.mxu0 %v21629_v47  ;;  %24783 = vst [vmem:[#allocation52_spill] sm:$0xff] %v21793_v62  ;;  %v21796_v47 = vld [vmem:[#allocation2 + $0x8] sm:$0xff] }
 0x273   : > { %16021 = vmatmul.mubr.f32.gmra.mrb[18].mxu0 %v21633_v8  ;;  %v3558_v8 = vld [vmem:[#allocation2 + $0x29] sm:$0xff] }
 0x274   : > { %16023 = vmatprep.mubr.f32.mxu0 %v21635_v46  ;;  %v3559_v46 = vld [vmem:[#allocation2 + $0x31] sm:$0xff] }
 0x277   : > { %16024 = vmatmul.mubr.f32.gmra.mrb[20].mxu0 %v24777_v22  ;;  %v3584_v22 = vld [vmem:[#allocation2 + $0xf9] sm:$0xff] }
 0x278   : > { %16026 = vmatprep.mubr.f32.mxu0 %v24778_v32 }
 0x27b   : > { %16027 = vmatmul.mubr.f32.gmra.mrb[22].mxu0 %v24779_v61  ;;  %v3585_v61 = vld [vmem:[#allocation2 + $0x101] sm:$0xff] }
 0x27c   : > { %16029 = vmatprep.mubr.f32.mxu0 %v24780_v13 }
 0x27f   : > { %16030 = vmatmul.mubr.f32.gmra.mrb[24].mxu0 %v24781_v1  ;;  %v3588_v1 = vld [vmem:[#allocation2 + $0x119] sm:$0xff] }
 0x280   : > { %16032 = vmatprep.mubr.f32.mxu0 %v3278_v54  ;;  %v24797_v54 = vld [vmem:[#allocation42_spill] sm:$0xff] }
 0x283   : > { %16033 = vmatmul.mubr.f32.gmra.mrb[26].mxu0 %v3279_v28  ;;  %v5292_v28 = vld [vmem:[#allocation9 + $0x228] sm:$0xff] }
 0x284   : > { %16035 = vmatprep.mubr.f32.mxu0 %v21790_v55 }
 0x287   : > { %16036 = vmatmul.mubr.f32.gmra.mrb[28].mxu0 %v21793_v62  ;;  %v24821_v62 = vld [vmem:[#allocation43_spill] sm:$0xff] }
 0x288   : > { %16038 = vmatprep.mubr.f32.mxu0 %v21796_v47 }
 0x28b   : > { %16039 = vmatmul.mubr.f32.gmra.mrb[30].mxu0 %v21796_v47 }
 0x28c   : > { %16073 = vmatprep.mubr.f32.mxu0 %v3558_v8  ;;  %v3589_v8 = vld [vmem:[#allocation2 + $0x121] sm:$0xff] }
 0x28f   : > { %16074 = vmatmul.mubr.msk.f32.vlgmr.msra.gmra.mrb[0].mxu0 %vm24785_vm5, %v3559_v46  ;;  %vm24790_vm5 = vnez %v24736_v25  ;;  %v24799_v46 = vld [vmem:[#allocation88_spill] sm:$0xff] }
 0x290   : > { %16076 = vmatprep.mubr.f32.mxu0 %v3560_v29  ;;  %v4124_v29 = vld [vmem:[#allocation9 + $0xe0] sm:$0xff] }
 0x293   : > { %16077 = vmatmul.mubr.msk.f32.gmra.mrb[2].mxu0 %vm24787_vm7, %v3561_v30  ;;  %vm24791_vm7 = vnez %v24739_v19  ;;  %v4125_v30 = vld [vmem:[#allocation9 + $0xe8] sm:$0xff] }
 0x294   : > { %16079 = vmatprep.mubr.f32.mxu0 %v3562_v9  ;;  %v18593_v9 = vpack.c.bf16 %v4125_v30, %v4124_v29  ;;  %v4644_v29 = vld [vmem:[#allocation9 + $0x108] sm:$0xff] }
 0x296   : > { %18594 = vmatprep.subr.bf16.mxu1 %v18593_v9 }
 0x297   : > { %16080 = vmatmul.mubr.msk.f32.gmra.mrb[4].mxu0 %vm24788_vm6, %v3563_v42  ;;  %vm24792_vm6 = vnez %v24741_v23  ;;  %18596 = vmatpush3.bf16.msra.mxu1 %v18593_v9  ;;  %v4126_v42 = vld [vmem:[#allocation9 + $0xf0] sm:$0xff] }
 0x298   : > { %16082 = vmatprep.mubr.f32.mxu0 %v3564_v63  ;;  %v4127_v63 = vld [vmem:[#allocation9 + $0xf8] sm:$0xff]  ;;  %v21842_v9 = vld [vmem:[%s24076_s2] ss:$0 sm:$0xff] }
 0x29b   : > { %16083 = vmatmul.mubr.msk.f32.gmra.mrb[6].mxu0 %vm24789_vm8, %v3565_v24  ;;  %vm24793_vm8 = vnez %v24743_v0  ;;  %v18597_v24 = vpack.c.bf16 %v4127_v63, %v4126_v42 }
 0x29c   : > { %16085 = vmatprep.mubr.f32.mxu0 %v3566_v16  ;;  %v4064_v16 = vld [vmem:[#allocation9 + $0x8] sm:$0xff] }
 0x29d   : > { %18598 = vmatprep.subr.bf16.mxu1 %v18597_v24 }
 0x29e   : > { %18600 = vmatpush3.bf16.msra.mxu1 %v18597_v24 }
 0x29f   : > { %16086 = vmatmul.mubr.msk.f32.gmra.mrb[8].mxu0 %vm24790_vm5, %v3567_v56  ;;  %vm24794_vm5 = vnez %v24747_v18 }
 0x2a0   : > { %16088 = vmatprep.mubr.f32.mxu0 %v3568_v14  ;;  %v4065_v14 = vld [vmem:[#allocation9 + $0x10] sm:$0xff] }
 0x2a1   : > { %16154 = vmatmul.mubr.f32.vlgmr.msra.gmra.mrb[0].mxu1 %v21796_v47 }
 0x2a3   : > { %16089 = vmatmul.mubr.msk.f32.gmra.mrb[10].mxu0 %vm24791_vm7, %v3569_v26  ;;  %v4066_v26 = vld [vmem:[#allocation9 + $0x18] sm:$0xff] }
 0x2a4   : > { %16091 = vmatprep.mubr.f32.mxu0 %v3570_v40  ;;  %v18605_v40 = vpack.c.bf16 %v4066_v26, %v4065_v14 }
 0x2a7   : > { %16092 = vmatmul.mubr.msk.f32.gmra.mrb[12].mxu0 %vm24792_vm6, %v3571_v11  ;;  %v4067_v11 = vld [vmem:[#allocation9 + $0x20] sm:$0xff] }
 0x2a8   : > { %16094 = vmatprep.mubr.f32.mxu0 %v3572_v38  ;;  %v4068_v38 = vld [vmem:[#allocation9 + $0x28] sm:$0xff] }
 0x2ab   : > { %16095 = vmatmul.mubr.msk.f32.gmra.mrb[14].mxu0 %vm24793_vm8, %v3573_v21  ;;  %v18609_v21 = vpack.c.bf16 %v4068_v38, %v4067_v11 }
 0x2ac   : > { %16097 = vmatprep.mubr.f32.mxu0 %v3574_v31  ;;  %v4069_v31 = vld [vmem:[#allocation9 + $0x30] sm:$0xff] }
 0x2af   : > { %16098 = vmatmul.mubr.msk.f32.gmra.mrb[16].mxu0 %vm24794_vm5, %v3575_v58  ;;  %v4070_v58 = vld [vmem:[#allocation9 + $0x38] sm:$0xff] }
 0x2b0   : > { %16100 = vmatprep.mubr.f32.mxu0 %v3576_v43  ;;  %v18613_v43 = vpack.c.bf16 %v4070_v58, %v4069_v31 }
 0x2b3   : > { %16101 = vmatmul.mubr.msk.f32.gmra.mrb[18].mxu0 %vm24752_vm11, %v3577_v48  ;;  %v4072_v48 = vld [vmem:[#allocation9 + $0x48] sm:$0xff] }
 0x2b4   : > { %16103 = vmatprep.mubr.f32.mxu0 %v3578_v37 }
 0x2b7   : > { %16104 = vmatmul.mubr.msk.f32.gmra.mrb[20].mxu0 %vm24756_vm12, %v3579_v60  ;;  %v4073_v60 = vld [vmem:[#allocation9 + $0x50] sm:$0xff] }
 0x2b8   : > { %16106 = vmatprep.mubr.f32.mxu0 %v3580_v39  ;;  %v4074_v39 = vld [vmem:[#allocation9 + $0x58] sm:$0xff] }
 0x2bb   : > { %16107 = vmatmul.mubr.msk.f32.gmra.mrb[22].mxu0 %vm24760_vm9, %v3581_v50  ;;  %v18621_v50 = vpack.c.bf16 %v4074_v39, %v4073_v60 }
 0x2bc   : > { %16109 = vmatprep.mubr.f32.mxu0 %v3582_v33  ;;  %v4075_v33 = vld [vmem:[#allocation9 + $0x60] sm:$0xff] }
 0x2bf   : > { %16110 = vmatmul.mubr.msk.f32.gmra.mrb[24].mxu0 %vm24763_vm10, %v3583_v4  ;;  %v4076_v4 = vld [vmem:[#allocation9 + $0x68] sm:$0xff] }
 0x2c0   : > { %16112 = vmatprep.mubr.f32.mxu0 %v3584_v22  ;;  %v18625_v22 = vpack.c.bf16 %v4076_v4, %v4075_v33 }
 0x2c3   : > { %16113 = vmatmul.mubr.msk.f32.gmra.mrb[26].mxu0 %vm21474_vm15, %v3585_v61  ;;  %v4077_v61 = vld [vmem:[#allocation9 + $0x70] sm:$0xff] }
 0x2c4   : > { %16115 = vmatprep.mubr.f32.mxu0 %v24797_v54  ;;  %v4078_v54 = vld [vmem:[#allocation9 + $0x78] sm:$0xff] }
 0x2c7   : > { %16116 = vmatmul.mubr.msk.f32.gmra.mrb[28].mxu0 %vm21487_vm14, %v21725_v15  ;;  %v4063_v15 = vld [vmem:[#allocation9] sm:$0xff] }
 0x2c8   : > { %16118 = vmatprep.mubr.f32.mxu0 %v3588_v1  ;;  %v18601_v56 = vpack.c.bf16 %v4064_v16, %v4063_v15  ;;  %v18629_v1 = vpack.c.bf16 %v4078_v54, %v4077_v61 }
 0x2ca   : > { %18602 = vmatprep.subr.bf16.mxu1 %v18601_v56 }
 0x2cb   : > { %16119 = vmatmul.mubr.msk.f32.gmra.mrb[30].mxu0 %vm21499_vm13, %v3589_v8  ;;  %18604 = vmatpush3.bf16.msra.mxu1 %v18601_v56  ;;  %v4643_v8 = vld [vmem:[#allocation9 + $0x100] sm:$0xff] }
 0x2cc   : > { %16873 = vmatprep.mubr.f32.mxu0 %v21796_v47  ;;  %18606 = vmatprep.subr.bf16.mxu1 %v18605_v40  ;;  %v4071_v47 = vld [vmem:[#allocation9 + $0x40] sm:$0xff]  ;;  %v21836_v30 = vpack.c.bf16 %v4644_v29, %v4643_v8 }
 0x2cd   : > { %v18617_v37 = vpack.c.bf16 %v4072_v48, %v4071_v47 }
 0x2cf   : > { %18608 = vmatpush3.bf16.msra.mxu1 %v18605_v40 }
 0x2d0   : > { %18610 = vmatprep.subr.bf16.mxu1 %v18609_v21 }
 0x2d3   : > { %18612 = vmatpush3.bf16.msra.mxu1 %v18609_v21 }
 0x2d4   : > { %18614 = vmatprep.subr.bf16.mxu1 %v18613_v43 }
 0x2d7   : > { %18616 = vmatpush3.bf16.msra.mxu1 %v18613_v43 }
 0x2d8   : > { %18618 = vmatprep.subr.bf16.mxu1 %v18617_v37 }
 0x2db   : > { %18620 = vmatpush3.bf16.msra.mxu1 %v18617_v37 }
 0x2dc   : > { %18622 = vmatprep.subr.bf16.mxu1 %v18621_v50 }
 0x2df   : > { %18624 = vmatpush3.bf16.msra.mxu1 %v18621_v50 }
 0x2e0   : > { %18626 = vmatprep.subr.bf16.mxu1 %v18625_v22 }
 0x2e3   : > { %18628 = vmatpush3.bf16.msra.mxu1 %v18625_v22 }
 0x2e4   : > { %18630 = vmatprep.subr.bf16.mxu1 %v18629_v1 }
 0x2e7   : > { %18632 = vmatpush3.bf16.msra.mxu1 %v18629_v1 }
 0x2e8   : > { %18634 = vmatprep.subr.bf16.mxu1 %v21836_v30 }
 0x362   : > { %v16075_v42 = vpop.f32.mrb[0].mxu0 }
 0x363   : > { %v3904_v63 = vadd.f32 %v16075_v42, %v21842_v9  ;;  %v3705_v24 = vpop.f32.mrb[1].mxu0 }
 0x364   : > { %v3903_v15 = vadd.f32 %v21842_v9, %v3705_v24 }
 0x365   : > { %v3936_v16 = vmax.f32 %v3904_v63, 0.0 }
 0x366   : > { %v3935_v56 = vmax.f32 %v3903_v15, 0.0  ;;  %v16078_v14 = vpop.f32.mrb[2].mxu0 }
 0x367   : > { %3968 = vst [vmem:[#allocation2 + $0x20] sm:$0xff] %v3936_v16  ;;  %v3906_v26 = vadd.f32 %v16078_v14, %v21842_v9  ;;  %v3715_v40 = vpop.f32.mrb[3].mxu0 }
 0x368   : > { %3967 = vst [vmem:[#allocation2 + $0x18] sm:$0xff] %v3935_v56  ;;  %v3905_v11 = vadd.f32 %v21842_v9, %v3715_v40  ;;  %16156 = vmatprep.mubr.f32.mxu1 %v3935_v56 }
 0x369   : > { %v3938_v38 = vmax.f32 %v3906_v26, 0.0  ;;  %16157 = vmatmul.mubr.f32.gmra.mrb[2].mxu1 %v3936_v16 }
 0x36a   : > { %v3937_v21 = vmax.f32 %v3905_v11, 0.0  ;;  %v16081_v31 = vpop.f32.mrb[4].mxu0 }
 0x36b   : > { %3970 = vst [vmem:[#allocation2 + $0x30] sm:$0xff] %v3938_v38  ;;  %v3908_v58 = vadd.f32 %v16081_v31, %v21842_v9  ;;  %v3725_v43 = vpop.f32.mrb[5].mxu0 }
 0x36c   : > { %3969 = vst [vmem:[#allocation2 + $0x28] sm:$0xff] %v3937_v21  ;;  %v3907_v47 = vadd.f32 %v21842_v9, %v3725_v43  ;;  %16159 = vmatprep.mubr.f32.mxu1 %v3937_v21 }
 0x36d   : > { %v3940_v48 = vmax.f32 %v3908_v58, 0.0  ;;  %16160 = vmatmul.mubr.f32.gmra.mrb[4].mxu1 %v3938_v38 }
 0x36e   : > { %v3939_v37 = vmax.f32 %v3907_v47, 0.0  ;;  %v16084_v60 = vpop.f32.mrb[6].mxu0 }
 0x36f   : > { %3972 = vst [vmem:[#allocation2 + $0x40] sm:$0xff] %v3940_v48  ;;  %v3910_v39 = vadd.f32 %v16084_v60, %v21842_v9  ;;  %v3735_v50 = vpop.f32.mrb[7].mxu0  ;;  %v21964_v55 = vld [vmem:[#allocation2 + $0x17] sm:$0xff] }
 0x370   : > { %3971 = vst [vmem:[#allocation2 + $0x38] sm:$0xff] %v3939_v37  ;;  %v3909_v33 = vadd.f32 %v21842_v9, %v3735_v50  ;;  %16162 = vmatprep.mubr.f32.mxu1 %v3939_v37 }
 0x371   : > { %v3942_v4 = vmax.f32 %v3910_v39, 0.0  ;;  %16163 = vmatmul.mubr.f32.gmra.mrb[6].mxu1 %v3940_v48 }
 0x372   : > { %v3941_v22 = vmax.f32 %v3909_v33, 0.0  ;;  %v16087_v61 = vpop.f32.mrb[8].mxu0 }
 0x373   : > { %3974 = vst [vmem:[#allocation2 + $0x50] sm:$0xff] %v3942_v4  ;;  %v3912_v54 = vadd.f32 %v16087_v61, %v21842_v9  ;;  %v3745_v1 = vpop.f32.mrb[9].mxu0 }
 0x374   : > { %3973 = vst [vmem:[#allocation2 + $0x48] sm:$0xff] %v3941_v22  ;;  %v3911_v8 = vadd.f32 %v21842_v9, %v3745_v1  ;;  %16165 = vmatprep.mubr.f32.mxu1 %v3941_v22 }
 0x375   : > { %v3944_v29 = vmax.f32 %v3912_v54, 0.0  ;;  %16166 = vmatmul.mubr.f32.gmra.mrb[8].mxu1 %v3942_v4 }
 0x376   : > { %v3943_v42 = vmax.f32 %v3911_v8, 0.0  ;;  %v16090_v63 = vpop.f32.mrb[10].mxu0 }
 0x377   : > { %3976 = vst [vmem:[#allocation2 + $0x60] sm:$0xff] %v3944_v29  ;;  %v3914_v24 = vadd.f32 %v16090_v63, %v21842_v9  ;;  %v3755_v15 = vpop.f32.mrb[11].mxu0 }
 0x378   : > { %3975 = vst [vmem:[#allocation2 + $0x58] sm:$0xff] %v3943_v42  ;;  %v3913_v16 = vadd.f32 %v21842_v9, %v3755_v15  ;;  %16168 = vmatprep.mubr.f32.mxu1 %v3943_v42 }
 0x379   : > { %v3946_v56 = vmax.f32 %v3914_v24, 0.0  ;;  %16169 = vmatmul.mubr.f32.gmra.mrb[10].mxu1 %v3944_v29 }
 0x37a   : > { %v21856_v14 = vmax.f32 %v3913_v16, 0.0  ;;  %v16093_v26 = vpop.f32.mrb[12].mxu0 }
 0x37b   : > { %3978 = vst [vmem:[#allocation2 + $0x70] sm:$0xff] %v3946_v56  ;;  %v3916_v40 = vadd.f32 %v16093_v26, %v21842_v9  ;;  %v3765_v11 = vpop.f32.mrb[13].mxu0 }
 0x37c   : > { %24800 = vst [vmem:[#allocation54_spill] sm:$0xff] %v21856_v14  ;;  %3977 = vst [vmem:[#allocation2 + $0x68] sm:$0xff] %v21856_v14  ;;  %v3915_v38 = vadd.f32 %v21842_v9, %v3765_v11  ;;  %16171 = vmatprep.mubr.f32.mxu1 %v21856_v14 }
 0x37d   : > { %v21862_v21 = vmax.f32 %v3916_v40, 0.0  ;;  %16172 = vmatmul.mubr.f32.gmra.mrb[12].mxu1 %v3946_v56 }
 0x37e   : > { %v21864_v31 = vmax.f32 %v3915_v38, 0.0  ;;  %v16096_v58 = vpop.f32.mrb[14].mxu0 }
 0x37f   : > { %24801 = vst [vmem:[#allocation55_spill] sm:$0xff] %v21862_v21  ;;  %3980 = vst [vmem:[#allocation2 + $0x80] sm:$0xff] %v21862_v21  ;;  %v3918_v43 = vadd.f32 %v16096_v58, %v21842_v9  ;;  %v3775_v47 = vpop.f32.mrb[15].mxu0 }
 0x380   : > { %24802 = vst [vmem:[#allocation57_spill] sm:$0xff] %v21864_v31  ;;  %3979 = vst [vmem:[#allocation2 + $0x78] sm:$0xff] %v21864_v31  ;;  %v3917_v48 = vadd.f32 %v21842_v9, %v3775_v47  ;;  %16174 = vmatprep.mubr.f32.mxu1 %v21864_v31  ;;  %v4578_v31 = vld [vmem:[#allocation2 + $0x9] sm:$0xff] }
 0x381   : > { %v21871_v37 = vmax.f32 %v3918_v43, 0.0  ;;  %16175 = vmatmul.mubr.f32.gmra.mrb[14].mxu1 %v21862_v21 }
 0x382   : > { %v21874_v60 = vmax.f32 %v3917_v48, 0.0  ;;  %v16099_v39 = vpop.f32.mrb[16].mxu0 }
 0x383   : > { %24803 = vst [vmem:[#allocation58_spill] sm:$0xff] %v21871_v37  ;;  %3982 = vst [vmem:[#allocation2 + $0x90] sm:$0xff] %v21871_v37  ;;  %v3920_v50 = vadd.f32 %v16099_v39, %v21842_v9  ;;  %v3785_v33 = vpop.f32.mrb[17].mxu0 }
 0x384   : > { %24804 = vst [vmem:[#allocation60_spill] sm:$0xff] %v21874_v60  ;;  %3981 = vst [vmem:[#allocation2 + $0x88] sm:$0xff] %v21874_v60  ;;  %v3919_v4 = vadd.f32 %v21842_v9, %v3785_v33  ;;  %16177 = vmatprep.mubr.f32.mxu1 %v21874_v60 }
 0x385   : > { %v21881_v22 = vmax.f32 %v3920_v50, 0.0  ;;  %16178 = vmatmul.mubr.f32.gmra.mrb[16].mxu1 %v21871_v37 }
 0x386   : > { %v21884_v61 = vmax.f32 %v3919_v4, 0.0  ;;  %v16102_v54 = vpop.f32.mrb[18].mxu0 }
 0x387   : > { %24805 = vst [vmem:[#allocation61_spill] sm:$0xff] %v21881_v22  ;;  %3984 = vst [vmem:[#allocation2 + $0xa0] sm:$0xff] %v21881_v22  ;;  %v3922_v1 = vadd.f32 %v16102_v54, %v21842_v9  ;;  %v3795_v8 = vpop.f32.mrb[19].mxu0 }
 0x388   : > { %24806 = vst [vmem:[#allocation63_spill] sm:$0xff] %v21884_v61  ;;  %3983 = vst [vmem:[#allocation2 + $0x98] sm:$0xff] %v21884_v61  ;;  %v3921_v29 = vadd.f32 %v21842_v9, %v3795_v8  ;;  %16180 = vmatprep.mubr.f32.mxu1 %v21884_v61 }
 0x389   : > { %v21891_v42 = vmax.f32 %v3922_v1, 0.0  ;;  %16181 = vmatmul.mubr.f32.gmra.mrb[18].mxu1 %v21881_v22 }
 0x38a   : > { %v21894_v63 = vmax.f32 %v3921_v29, 0.0  ;;  %v16105_v24 = vpop.f32.mrb[20].mxu0 }
 0x38b   : > { %24807 = vst [vmem:[#allocation64_spill] sm:$0xff] %v21891_v42  ;;  %3986 = vst [vmem:[#allocation2 + $0xb0] sm:$0xff] %v21891_v42  ;;  %v3924_v15 = vadd.f32 %v16105_v24, %v21842_v9  ;;  %v3805_v16 = vpop.f32.mrb[21].mxu0  ;;  %v22138_v19 = vld [vmem:[#allocation2 + $0x81] sm:$0xff] }
 0x38c   : > { %24808 = vst [vmem:[#allocation66_spill] sm:$0xff] %v21894_v63  ;;  %3985 = vst [vmem:[#allocation2 + $0xa8] sm:$0xff] %v21894_v63  ;;  %v3923_v56 = vadd.f32 %v21842_v9, %v3805_v16  ;;  %16183 = vmatprep.mubr.f32.mxu1 %v21894_v63 }
 0x38d   : > { %v21901_v26 = vmax.f32 %v3924_v15, 0.0  ;;  %16184 = vmatmul.mubr.f32.gmra.mrb[20].mxu1 %v21891_v42 }
 0x38e   : > { %v21904_v40 = vmax.f32 %v3923_v56, 0.0  ;;  %v16108_v11 = vpop.f32.mrb[22].mxu0 }
 0x38f   : > { %24809 = vst [vmem:[#allocation67_spill] sm:$0xff] %v21901_v26  ;;  %3988 = vst [vmem:[#allocation2 + $0xc0] sm:$0xff] %v21901_v26  ;;  %v3926_v38 = vadd.f32 %v16108_v11, %v21842_v9  ;;  %v3815_v58 = vpop.f32.mrb[23].mxu0 }
 0x390   : > { %24810 = vst [vmem:[#allocation68_spill] sm:$0xff] %v21904_v40  ;;  %3987 = vst [vmem:[#allocation2 + $0xb8] sm:$0xff] %v21904_v40  ;;  %v3925_v43 = vadd.f32 %v21842_v9, %v3815_v58  ;;  %16186 = vmatprep.mubr.f32.mxu1 %v21904_v40 }
 0x391   : > { %v21911_v47 = vmax.f32 %v3926_v38, 0.0  ;;  %16187 = vmatmul.mubr.f32.gmra.mrb[22].mxu1 %v21901_v26  ;;  %v22018_v26 = vld [vmem:[#allocation2 + $0x7f] sm:$0xff] }
 0x392   : > { %v21914_v48 = vmax.f32 %v3925_v43, 0.0  ;;  %v16111_v39 = vpop.f32.mrb[24].mxu0 }
 0x393   : > { %24811 = vst [vmem:[#allocation70_spill] sm:$0xff] %v21911_v47  ;;  %3990 = vst [vmem:[#allocation2 + $0xd0] sm:$0xff] %v21911_v47  ;;  %v3928_v50 = vadd.f32 %v16111_v39, %v21842_v9  ;;  %v3825_v33 = vpop.f32.mrb[25].mxu0 }
 0x394   : > { %24812 = vst [vmem:[#allocation72_spill] sm:$0xff] %v21914_v48  ;;  %3989 = vst [vmem:[#allocation2 + $0xc8] sm:$0xff] %v21914_v48  ;;  %v3927_v4 = vadd.f32 %v21842_v9, %v3825_v33  ;;  %16189 = vmatprep.mubr.f32.mxu1 %v21914_v48  ;;  %v4982_v48 = vld [vmem:[#allocation9 + $0x188] sm:$0xff] }
 0x395   : > { %v21921_v54 = vmax.f32 %v3928_v50, 0.0  ;;  %16190 = vmatmul.mubr.f32.gmra.mrb[24].mxu1 %v21911_v47  ;;  %v22010_v47 = vld [vmem:[#allocation2 + $0x6f] sm:$0xff] }
 0x396   : > { %v21924_v1 = vmax.f32 %v3927_v4, 0.0  ;;  %v16114_v8 = vpop.f32.mrb[26].mxu0 }
 0x397   : > { %24813 = vst [vmem:[#allocation73_spill] sm:$0xff] %v21921_v54  ;;  %3992 = vst [vmem:[#allocation2 + $0xe0] sm:$0xff] %v21921_v54  ;;  %v3930_v29 = vadd.f32 %v16114_v8, %v21842_v9  ;;  %v3835_v24 = vpop.f32.mrb[27].mxu0  ;;  %v22050_v40 = vld [vmem:[#allocation2 + $0xbf] sm:$0xff] }
 0x398   : > { %24814 = vst [vmem:[#allocation75_spill] sm:$0xff] %v21924_v1  ;;  %3991 = vst [vmem:[#allocation2 + $0xd8] sm:$0xff] %v21924_v1  ;;  %v3929_v15 = vadd.f32 %v21842_v9, %v3835_v24  ;;  %16192 = vmatprep.mubr.f32.mxu1 %v21924_v1  ;;  %v4658_v1 = vld [vmem:[#allocation9 + $0x178] sm:$0xff] }
 0x399   : > { %v21931_v16 = vmax.f32 %v3930_v29, 0.0  ;;  %16193 = vmatmul.mubr.f32.gmra.mrb[26].mxu1 %v21921_v54  ;;  %v3999_v29 = vld [vmem:[#allocation2 + $0x7] sm:$0xff]  ;;  %v22002_v54 = vld [vmem:[#allocation2 + $0x5f] sm:$0xff]  ;;  %24829 = vst [vmem:[#allocation86_spill] sm:$0xff] %v22050_v40 }
 0x39a   : > { %v21934_v56 = vmax.f32 %v3929_v15, 0.0  ;;  %v16117_v11 = vpop.f32.mrb[28].mxu0  ;;  %v4645_v15 = vld [vmem:[#allocation9 + $0x110] sm:$0xff] }
 0x39b   : > { %24815 = vst [vmem:[#allocation76_spill] sm:$0xff] %v21931_v16  ;;  %3994 = vst [vmem:[#allocation2 + $0xf0] sm:$0xff] %v21931_v16  ;;  %v3932_v38 = vadd.f32 %v16117_v11, %v21842_v9  ;;  %v3845_v58 = vpop.f32.mrb[29].mxu0  ;;  %v4646_v11 = vld [vmem:[#allocation9 + $0x118] sm:$0xff] }
 0x39c   : > { %24816 = vst [vmem:[#allocation78_spill] sm:$0xff] %v21934_v56  ;;  %3993 = vst [vmem:[#allocation2 + $0xe8] sm:$0xff] %v21934_v56  ;;  %v3931_v43 = vadd.f32 %v21842_v9, %v3845_v58  ;;  %16195 = vmatprep.mubr.f32.mxu1 %v21934_v56  ;;  %v4656_v56 = vld [vmem:[#allocation9 + $0x168] sm:$0xff]  ;;  %v22053_v42 = vld [vmem:[#allocation2 + $0xc7] sm:$0xff] }
 0x39d   : > { %v21941_v39 = vmax.f32 %v3932_v38, 0.0  ;;  %16196 = vmatmul.mubr.f32.gmra.mrb[28].mxu1 %v21931_v16  ;;  %v21994_v16 = vld [vmem:[#allocation2 + $0x4f] sm:$0xff]  ;;  %24830 = vst [vmem:[#allocation87_spill] sm:$0xff] %v22053_v42  ;;  %v22170_v18 = vld [vmem:[#allocation2 + $0xc1] sm:$0xff] }
 0x39e   : > { %v21944_v50 = vmax.f32 %v3931_v43, 0.0  ;;  %v16120_v33 = vpop.f32.mrb[30].mxu0  ;;  %v4000_v43 = vld [vmem:[#allocation2 + $0xf] sm:$0xff]  ;;  %24853 = vst [vmem:[#allocation100_spill] sm:$0xff] %v22170_v18 }
 0x39f   : > { %24817 = vst [vmem:[#allocation79_spill] sm:$0xff] %v21941_v39  ;;  %3996 = vst [vmem:[#allocation2 + $0x100] sm:$0xff] %v21941_v39  ;;  %v21948_v4 = vadd.f32 %v16120_v33, %v21842_v9  ;;  %v3855_v8 = vpop.f32.mrb[31].mxu0  ;;  %v18637_v33 = vpack.c.bf16 %v4646_v11, %v4645_v15  ;;  %v4650_v15 = vld [vmem:[#allocation9 + $0x138] sm:$0xff]  ;;  %v22061_v22 = vld [vmem:[#allocation2 + $0xd7] sm:$0xff] }
 0x3a0   : > { %24818 = vst [vmem:[#allocation81_spill] sm:$0xff] %v21944_v50  ;;  %3995 = vst [vmem:[#allocation2 + $0xf8] sm:$0xff] %v21944_v50  ;;  %v21952_v24 = vadd.f32 %v21842_v9, %v3855_v8  ;;  %16198 = vmatprep.mubr.f32.mxu1 %v21944_v50  ;;  %v4647_v9 = vld [vmem:[#allocation9 + $0x120] sm:$0xff]  ;;  %v4648_v8 = vld [vmem:[#allocation9 + $0x128] sm:$0xff] }
 0x3a1   : > { %24819 = vst [vmem:[#allocation82_spill] sm:$0xff] %v21948_v4  ;;  %v24228_v38 = vmax.f32 %v21948_v4, 0.0  ;;  %16199 = vmatmul.mubr.f32.gmra.mrb[30].mxu1 %v21941_v39  ;;  %v21970_v39 = vld [vmem:[#allocation2 + $0x1f] sm:$0xff]  ;;  %v21973_v11 = vld [vmem:[#allocation2 + $0x27] sm:$0xff]  ;;  %v22058_v63 = vld [vmem:[#allocation2 + $0xcf] sm:$0xff] }
 0x3a2   : > { %24820 = vst [vmem:[#allocation84_spill] sm:$0xff] %v21952_v24  ;;  %v24229_v58 = vmax.f32 %v21952_v24, 0.0  ;;  %16233 = vmatprep.mubr.msk.f32.mxu1 %vm21097_vm0, %v3999_v29  ;;  %v18641_v29 = vpack.c.bf16 %v4648_v8, %v4647_v9  ;;  %v4652_v4 = vld [vmem:[#allocation9 + $0x148] sm:$0xff]  ;;  %v4654_v50 = vld [vmem:[#allocation9 + $0x158] sm:$0xff]  ;;  %24832 = vst [vmem:[#allocation89_spill] sm:$0xff] %v22058_v63 }
 0x3a3   : > { %3998 = vst [vmem:[#allocation2 + $0x110] sm:$0xff] %v24228_v38  ;;  %v4649_v38 = vld [vmem:[#allocation9 + $0x130] sm:$0xff]  ;;  %v21981_v9 = vld [vmem:[#allocation2 + $0x37] sm:$0xff]  ;;  %24833 = vst [vmem:[#allocation90_spill] sm:$0xff] %v22061_v22 }
 0x3a4   : > { %3997 = vst [vmem:[#allocation2 + $0x108] sm:$0xff] %v24229_v58  ;;  %v21978_v58 = vld [vmem:[#allocation2 + $0x2f] sm:$0xff]  ;;  %v21986_v24 = vld [vmem:[#allocation2 + $0x3f] sm:$0xff]  ;;  %v22069_v37 = vld [vmem:[#allocation2 + $0xe7] sm:$0xff] }
 0x3a5   : > { %16234 = vmatmul.mubr.f32.vlgmr.msra.gmra.mrb[0].mxu1 %v4000_v43  ;;  %v18645_v43 = vpack.c.bf16 %v4650_v15, %v4649_v38  ;;  %v21989_v38 = vld [vmem:[#allocation2 + $0x47] sm:$0xff]  ;;  %v22066_v61 = vld [vmem:[#allocation2 + $0xdf] sm:$0xff]  ;;  %24836 = vst [vmem:[#allocation92_spill] sm:$0xff] %v22069_v37  ;;  %v22074_v60 = vld [vmem:[#allocation2 + $0xef] sm:$0xff] }
 0x3a6   : > { %16236 = vmatprep.mubr.msk.f32.mxu1 %vm21105_vm1, %v21964_v55  ;;  %18636 = vmatpush3.bf16.msra.mxu1 %v21836_v30  ;;  %v4651_v30 = vld [vmem:[#allocation9 + $0x140] sm:$0xff]  ;;  %24835 = vst [vmem:[#allocation91_spill] sm:$0xff] %v22066_v61  ;;  %24838 = vst [vmem:[#allocation93_spill] sm:$0xff] %v22074_v60  ;;  %v22183_v51 = vld [vmem:[#allocation2 + $0xd9] sm:$0xff] }
 0x3a7   : > { %18638 = vmatprep.subr.bf16.mxu1 %v18637_v33  ;;  %v18649_v8 = vpack.c.bf16 %v4652_v4, %v4651_v30  ;;  %v21997_v4 = vld [vmem:[#allocation2 + $0x57] sm:$0xff]  ;;  %v22082_v14 = vld [vmem:[#allocation2 + $0xff] sm:$0xff]  ;;  %v22175_v17 = vld [vmem:[#allocation2 + $0xc9] sm:$0xff]  ;;  %24856 = vst [vmem:[#allocation103_spill] sm:$0xff] %v22183_v51 }
 0x3a8   : > { %v22077_v21 = vld [vmem:[#allocation2 + $0xf7] sm:$0xff]  ;;  %24841 = vst [vmem:[#allocation42_spill] sm:$0xff] %v22082_v14  ;;  %24854 = vst [vmem:[#allocation101_spill] sm:$0xff] %v22175_v17  ;;  %v22191_v5 = vld [vmem:[#allocation2 + $0xe9] sm:$0xff] }
 0x3a9   : > { %16237 = vmatmul.mubr.f32.gmra.mrb[2].mxu1 %v21970_v39  ;;  %24839 = vst [vmem:[#allocation51_spill] sm:$0xff] %v22077_v21  ;;  %24858 = vst [vmem:[#allocation105_spill] sm:$0xff] %v22191_v5  ;;  %v22199_v32 = vld [vmem:[#allocation2 + $0xf9] sm:$0xff] }
 0x3aa   : > { %16239 = vmatprep.mubr.msk.f32.mxu1 %vm21117_vm2, %v21973_v11  ;;  %18640 = vmatpush3.bf16.msra.mxu1 %v18637_v33  ;;  %v4653_v33 = vld [vmem:[#allocation9 + $0x150] sm:$0xff]  ;;  %vm24828_vm2 = vnez %v24622_v45  ;;  %v4988_v45 = vld [vmem:[#allocation9 + $0x1b8] sm:$0xff]  ;;  %24860 = vst [vmem:[#allocation107_spill] sm:$0xff] %v22199_v32 }
 0x3ab   : > { %18642 = vmatprep.subr.bf16.mxu1 %v18641_v29  ;;  %v18653_v15 = vpack.c.bf16 %v4654_v50, %v4653_v33  ;;  %v22005_v50 = vld [vmem:[#allocation2 + $0x67] sm:$0xff] }
 0x3ad   : > { %16240 = vmatmul.mubr.f32.gmra.mrb[4].mxu1 %v21978_v58 }
 0x3ae   : > { %16242 = vmatprep.mubr.msk.f32.mxu1 %vm21130_vm3, %v21981_v9  ;;  %18644 = vmatpush3.bf16.msra.mxu1 %v18641_v29  ;;  %v4655_v29 = vld [vmem:[#allocation9 + $0x160] sm:$0xff]  ;;  %vm24822_vm3 = vnez %v24609_v59 }
 0x3af   : > { %18646 = vmatprep.subr.bf16.mxu1 %v18645_v43  ;;  %v18657_v30 = vpack.c.bf16 %v4656_v56, %v4655_v29  ;;  %v22013_v56 = vld [vmem:[#allocation2 + $0x77] sm:$0xff] }
 0x3b1   : > { %16243 = vmatmul.mubr.f32.gmra.mrb[6].mxu1 %v21986_v24 }
 0x3b2   : > { %16245 = vmatprep.mubr.msk.f32.mxu1 %vm21143_vm4, %v21989_v38  ;;  %18648 = vmatpush3.bf16.msra.mxu1 %v18645_v43  ;;  %v4657_v43 = vld [vmem:[#allocation9 + $0x170] sm:$0xff]  ;;  %vm24823_vm4 = vnez %v24611_v6 }
 0x3b3   : > { %18650 = vmatprep.subr.bf16.mxu1 %v18649_v8  ;;  %v18661_v33 = vpack.c.bf16 %v4658_v1, %v4657_v43  ;;  %v22021_v1 = vld [vmem:[#allocation2 + $0x87] sm:$0xff]  ;;  %v22029_v43 = vld [vmem:[#allocation2 + $0x97] sm:$0xff] }
 0x3b5   : > { %16246 = vmatmul.mubr.f32.gmra.mrb[8].mxu1 %v21994_v16 }
 0x3b6   : > { %16248 = vmatprep.mubr.msk.f32.mxu1 %vm24822_vm3, %v21997_v4  ;;  %18652 = vmatpush3.bf16.msra.mxu1 %v18649_v8  ;;  %v4981_v8 = vld [vmem:[#allocation9 + $0x180] sm:$0xff]  ;;  %vm24824_vm3 = vnez %v24613_v52 }
 0x3b7   : > { %18654 = vmatprep.subr.bf16.mxu1 %v18653_v15  ;;  %v18665_v29 = vpack.c.bf16 %v4982_v48, %v4981_v8  ;;  %v22034_v48 = vld [vmem:[#allocation2 + $0x9f] sm:$0xff]  ;;  %v22045_v8 = vld [vmem:[#allocation2 + $0xb7] sm:$0xff] }
 0x3b9   : > { %16249 = vmatmul.mubr.f32.gmra.mrb[10].mxu1 %v22002_v54 }
 0x3ba   : > { %16251 = vmatprep.mubr.msk.f32.mxu1 %vm24823_vm4, %v22005_v50  ;;  %18656 = vmatpush3.bf16.msra.mxu1 %v18653_v15  ;;  %vm24825_vm4 = vnez %v24615_v2  ;;  %v22026_v15 = vld [vmem:[#allocation2 + $0x8f] sm:$0xff] }
 0x3bb   : > { %18658 = vmatprep.subr.bf16.mxu1 %v18657_v30 }
 0x3bd   : > { %16252 = vmatmul.mubr.f32.gmra.mrb[12].mxu1 %v22010_v47 }
 0x3be   : > { %16254 = vmatprep.mubr.msk.f32.mxu1 %vm24824_vm3, %v22013_v56  ;;  %18660 = vmatpush3.bf16.msra.mxu1 %v18657_v30  ;;  %vm24826_vm3 = vnez %v24617_v20  ;;  %v22037_v30 = vld [vmem:[#allocation2 + $0xa7] sm:$0xff] }
 0x3bf   : > { %18662 = vmatprep.subr.bf16.mxu1 %v18661_v33 }
 0x3c1   : > { %16255 = vmatmul.mubr.f32.gmra.mrb[14].mxu1 %v22018_v26 }
 0x3c2   : > { %16257 = vmatprep.mubr.msk.f32.mxu1 %vm24825_vm4, %v22021_v1  ;;  %18664 = vmatpush3.bf16.msra.mxu1 %v18661_v33  ;;  %vm24827_vm4 = vnez %v24619_v57  ;;  %v22042_v33 = vld [vmem:[#allocation2 + $0xaf] sm:$0xff] }
 0x3c3   : > { %18666 = vmatprep.subr.bf16.mxu1 %v18665_v29 }
 0x3c5   : > { %16258 = vmatmul.mubr.f32.gmra.mrb[16].mxu1 %v22026_v15 }
 0x3c6   : > { %16260 = vmatprep.mubr.msk.f32.mxu1 %vm24826_vm3, %v22029_v43  ;;  %vm24831_vm3 = vnez %v24625_v44  ;;  %v4985_v44 = vld [vmem:[#allocation9 + $0x1a0] sm:$0xff] }
 0x3c9   : > { %16261 = vmatmul.mubr.f32.gmra.mrb[18].mxu1 %v22034_v48 }
 0x3ca   : > { %16263 = vmatprep.mubr.msk.f32.mxu1 %vm24827_vm4, %v22037_v30  ;;  %vm24834_vm4 = vnez %v24628_v36  ;;  %v4983_v36 = vld [vmem:[#allocation9 + $0x190] sm:$0xff] }
 0x3cd   : > { %16264 = vmatmul.mubr.f32.gmra.mrb[20].mxu1 %v22042_v33 }
 0x3ce   : > { %16266 = vmatprep.mubr.msk.f32.mxu1 %vm24828_vm2, %v22045_v8  ;;  %vm24837_vm2 = vnez %v24631_v35 }
 0x3d1   : > { %16267 = vmatmul.mubr.f32.gmra.mrb[22].mxu1 %v22050_v40 }
 0x3d2   : > { %16269 = vmatprep.mubr.msk.f32.mxu1 %vm24831_vm3, %v22053_v42  ;;  %vm24840_vm3 = vnez %v24635_v27 }
 0x3d5   : > { %16270 = vmatmul.mubr.f32.gmra.mrb[24].mxu1 %v22058_v63  ;;  %v4987_v63 = vld [vmem:[#allocation9 + $0x1b0] sm:$0xff] }
 0x3d6   : > { %16272 = vmatprep.mubr.msk.f32.mxu1 %vm24834_vm4, %v22061_v22  ;;  %v4986_v22 = vld [vmem:[#allocation9 + $0x1a8] sm:$0xff] }
 0x3d7   : > { %v18673_v27 = vpack.c.bf16 %v4986_v22, %v4985_v44  ;;  %v22103_v44 = vld [vmem:[#allocation2 + $0x39] sm:$0xff] }
 0x3d8   : > { %24846 = vst [vmem:[#allocation43_spill] sm:$0xff] %v22103_v44 }
 0x3d9   : > { %16273 = vmatmul.mubr.f32.gmra.mrb[26].mxu1 %v22066_v61  ;;  %v4984_v61 = vld [vmem:[#allocation9 + $0x198] sm:$0xff] }
 0x3da   : > { %16275 = vmatprep.mubr.msk.f32.mxu1 %vm24837_vm2, %v22069_v37  ;;  %v18669_v35 = vpack.c.bf16 %v4984_v61, %v4983_v36  ;;  %v4579_v37 = vld [vmem:[#allocation2 + $0x11] sm:$0xff]  ;;  %vm24842_vm2 = vnez %v24784_v12  ;;  %v22095_v36 = vld [vmem:[#allocation2 + $0x29] sm:$0xff] }
 0x3db   : > { %24844 = vst [vmem:[#allocation88_spill] sm:$0xff] %v22095_v36  ;;  %v4989_v61 = vld [vmem:[#allocation9 + $0x1c0] sm:$0xff] }
 0x3dd   : > { %16276 = vmatmul.mubr.f32.gmra.mrb[28].mxu1 %v22074_v60  ;;  %v22087_v60 = vld [vmem:[#allocation2 + $0x19] sm:$0xff] }
 0x3de   : > { %16278 = vmatprep.mubr.msk.f32.mxu1 %vm24840_vm3, %v22077_v21  ;;  %v22090_v21 = vld [vmem:[#allocation2 + $0x21] sm:$0xff]  ;;  %vm24843_vm3 = vnez %v24786_v7 }
 0x3df   : > { %v22106_v7 = vld [vmem:[#allocation2 + $0x41] sm:$0xff] }
 0x3e1   : > { %16279 = vmatmul.mubr.f32.gmra.mrb[30].mxu1 %v22082_v14 }
 0x3e2   : > { %16313 = vmatprep.mubr.f32.mxu1 %v4578_v31  ;;  %v18677_v31 = vpack.c.bf16 %v4988_v45, %v4987_v63  ;;  %v22111_v45 = vld [vmem:[#allocation2 + $0x49] sm:$0xff] }
 0x3e3   : > { %24848 = vst [vmem:[#allocation96_spill] sm:$0xff] %v22111_v45 }
 0x3e5   : > { %16314 = vmatmul.mubr.msk.f32.vlgmr.msra.gmra.mrb[0].mxu1 %vm24842_vm2, %v4579_v37  ;;  %v22098_v37 = vld [vmem:[#allocation2 + $0x31] sm:$0xff]  ;;  %vm24845_vm2 = vnez %v24729_v49 }
 0x3e6   : > { %16316 = vmatprep.mubr.f32.mxu1 %v22087_v60  ;;  %18668 = vmatpush3.bf16.msra.mxu1 %v18665_v29  ;;  %v4990_v29 = vld [vmem:[#allocation9 + $0x1c8] sm:$0xff] }
 0x3e7   : > { %18670 = vmatprep.subr.bf16.mxu1 %v18669_v35  ;;  %v18681_v22 = vpack.c.bf16 %v4990_v29, %v4989_v61  ;;  %v22114_v49 = vld [vmem:[#allocation2 + $0x51] sm:$0xff]  ;;  %v22119_v61 = vld [vmem:[#allocation2 + $0x59] sm:$0xff] }
 0x3e8   : > { %24850 = vst [vmem:[#allocation97_spill] sm:$0xff] %v22119_v61 }
 0x3e9   : > { %16317 = vmatmul.mubr.msk.f32.gmra.mrb[2].mxu1 %vm24843_vm3, %v22090_v21  ;;  %vm24847_vm3 = vnez %v24733_v34  ;;  %v22122_v34 = vld [vmem:[#allocation2 + $0x61] sm:$0xff] }
 0x3ea   : > { %16319 = vmatprep.mubr.f32.mxu1 %v22095_v36  ;;  %18672 = vmatpush3.bf16.msra.mxu1 %v18669_v35  ;;  %v4991_v35 = vld [vmem:[#allocation9 + $0x1d0] sm:$0xff]  ;;  %v4992_v36 = vld [vmem:[#allocation9 + $0x1d8] sm:$0xff] }
 0x3eb   : > { %18674 = vmatprep.subr.bf16.mxu1 %v18673_v27  ;;  %v18685_v63 = vpack.c.bf16 %v4992_v36, %v4991_v35  ;;  %v22127_v36 = vld [vmem:[#allocation2 + $0x69] sm:$0xff] }
 0x3ed   : > { %16320 = vmatmul.mubr.msk.f32.gmra.mrb[4].mxu1 %vm24845_vm2, %v22098_v37  ;;  %vm24849_vm2 = vnez %v24736_v25  ;;  %v22130_v25 = vld [vmem:[#allocation2 + $0x71] sm:$0xff] }
 0x3ee   : > { %16322 = vmatprep.mubr.f32.mxu1 %v22103_v44  ;;  %18676 = vmatpush3.bf16.msra.mxu1 %v18673_v27  ;;  %v4993_v27 = vld [vmem:[#allocation9 + $0x1e0] sm:$0xff]  ;;  %v4994_v44 = vld [vmem:[#allocation9 + $0x1e8] sm:$0xff] }
 0x3ef   : > { %18678 = vmatprep.subr.bf16.mxu1 %v18677_v31  ;;  %v18689_v29 = vpack.c.bf16 %v4994_v44, %v4993_v27  ;;  %v22135_v44 = vld [vmem:[#allocation2 + $0x79] sm:$0xff] }
 0x3f1   : > { %16323 = vmatmul.mubr.msk.f32.gmra.mrb[6].mxu1 %vm24847_vm3, %v22106_v7 }
 0x3f2   : > { %16325 = vmatprep.mubr.f32.mxu1 %v22111_v45  ;;  %18680 = vmatpush3.bf16.msra.mxu1 %v18677_v31  ;;  %v4995_v31 = vld [vmem:[#allocation9 + $0x1f0] sm:$0xff]  ;;  %v4996_v45 = vld [vmem:[#allocation9 + $0x1f8] sm:$0xff] }
 0x3f3   : > { %18682 = vmatprep.subr.bf16.mxu1 %v18681_v22  ;;  %v18693_v35 = vpack.c.bf16 %v4996_v45, %v4995_v31  ;;  %v22143_v45 = vld [vmem:[#allocation2 + $0x89] sm:$0xff] }
 0x3f4   : > { %v22159_v31 = vld [vmem:[#allocation2 + $0xa9] sm:$0xff] }
 0x3f5   : > { %16326 = vmatmul.mubr.msk.f32.gmra.mrb[8].mxu1 %vm24849_vm2, %v22114_v49  ;;  %24851 = vst [vmem:[#allocation98_spill] sm:$0xff] %v22159_v31 }
 0x3f6   : > { %16328 = vmatprep.mubr.f32.mxu1 %v22119_v61  ;;  %18684 = vmatpush3.bf16.msra.mxu1 %v18681_v22  ;;  %v5287_v22 = vld [vmem:[#allocation9 + $0x200] sm:$0xff]  ;;  %v5288_v61 = vld [vmem:[#allocation9 + $0x208] sm:$0xff] }
 0x3f7   : > { %18686 = vmatprep.subr.bf16.mxu1 %v18685_v63  ;;  %v18697_v27 = vpack.c.bf16 %v5288_v61, %v5287_v22  ;;  %v22154_v61 = vld [vmem:[#allocation2 + $0xa1] sm:$0xff]  ;;  %v22167_v22 = vld [vmem:[#allocation2 + $0xb9] sm:$0xff] }
 0x3f8   : > { %24852 = vst [vmem:[#allocation99_spill] sm:$0xff] %v22167_v22 }
 0x3f9   : > { %16329 = vmatmul.mubr.msk.f32.gmra.mrb[10].mxu1 %vm24791_vm7, %v22122_v34 }
 0x3fa   : > { %16331 = vmatprep.mubr.f32.mxu1 %v22127_v36  ;;  %18688 = vmatpush3.bf16.msra.mxu1 %v18685_v63  ;;  %v22146_v63 = vld [vmem:[#allocation2 + $0x91] sm:$0xff] }
 0x3fb   : > { %18690 = vmatprep.subr.bf16.mxu1 %v18689_v29 }
 0x3fd   : > { %16332 = vmatmul.mubr.msk.f32.gmra.mrb[12].mxu1 %vm24792_vm6, %v22130_v25 }
 0x3fe   : > { %16334 = vmatprep.mubr.f32.mxu1 %v22135_v44  ;;  %18692 = vmatpush3.bf16.msra.mxu1 %v18689_v29  ;;  %v22151_v29 = vld [vmem:[#allocation2 + $0x99] sm:$0xff] }
 0x3ff   : > { %18694 = vmatprep.subr.bf16.mxu1 %v18693_v35 }
 0x401   : > { %16335 = vmatmul.mubr.msk.f32.gmra.mrb[14].mxu1 %vm24793_vm8, %v22138_v19 }
 0x402   : > { %16337 = vmatprep.mubr.f32.mxu1 %v22143_v45  ;;  %18696 = vmatpush3.bf16.msra.mxu1 %v18693_v35  ;;  %v22162_v35 = vld [vmem:[#allocation2 + $0xb1] sm:$0xff] }
 0x403   : > { %18698 = vmatprep.subr.bf16.mxu1 %v18697_v27 }
 0x405   : > { %16338 = vmatmul.mubr.msk.f32.gmra.mrb[16].mxu1 %vm24794_vm5, %v22146_v63 }
 0x406   : > { %16340 = vmatprep.mubr.f32.mxu1 %v22151_v29 }
 0x409   : > { %16341 = vmatmul.mubr.msk.f32.gmra.mrb[18].mxu1 %vm24752_vm11, %v22154_v61 }
 0x40a   : > { %16343 = vmatprep.mubr.f32.mxu1 %v22159_v31  ;;  %v22178_v31 = vld [vmem:[#allocation2 + $0xd1] sm:$0xff] }
 0x40b   : > { %24855 = vst [vmem:[#allocation102_spill] sm:$0xff] %v22178_v31 }
 0x40d   : > { %16344 = vmatmul.mubr.msk.f32.gmra.mrb[20].mxu1 %vm24756_vm12, %v22162_v35 }
 0x40e   : > { %16346 = vmatprep.mubr.f32.mxu1 %v22167_v22  ;;  %v22186_v22 = vld [vmem:[#allocation2 + $0xe1] sm:$0xff] }
 0x40f   : > { %24857 = vst [vmem:[#allocation104_spill] sm:$0xff] %v22186_v22 }
 0x411   : > { %16347 = vmatmul.mubr.msk.f32.gmra.mrb[22].mxu1 %vm24760_vm9, %v22170_v18  ;;  %v5290_v18 = vld [vmem:[#allocation9 + $0x218] sm:$0xff] }
 0x412   : > { %16349 = vmatprep.mubr.f32.mxu1 %v22175_v17  ;;  %v22194_v17 = vld [vmem:[#allocation2 + $0xf1] sm:$0xff] }
 0x413   : > { %24859 = vst [vmem:[#allocation106_spill] sm:$0xff] %v22194_v17 }
 0x415   : > { %16350 = vmatmul.mubr.msk.f32.gmra.mrb[24].mxu1 %vm24763_vm10, %v22178_v31  ;;  %v5289_v31 = vld [vmem:[#allocation9 + $0x210] sm:$0xff] }
 0x416   : > { %16352 = vmatprep.mubr.f32.mxu1 %v22183_v51  ;;  %v22202_v51 = vld [vmem:[#allocation2 + $0x101] sm:$0xff]  ;;  %v18701_v13 = vpack.c.bf16 %v5290_v18, %v5289_v31  ;;  %v5300_v31 = vld [vmem:[#allocation9 + $0x268] sm:$0xff] }
 0x419   : > { %16353 = vmatmul.mubr.msk.f32.gmra.mrb[26].mxu1 %vm21474_vm15, %v22186_v22  ;;  %v5294_v22 = vld [vmem:[#allocation9 + $0x238] sm:$0xff] }
 0x41a   : > { %16355 = vmatprep.mubr.f32.mxu1 %v22191_v5  ;;  %v5291_v5 = vld [vmem:[#allocation9 + $0x220] sm:$0xff] }
 0x41d   : > { %16356 = vmatmul.mubr.msk.f32.gmra.mrb[28].mxu1 %vm21487_vm14, %v22194_v17  ;;  %v5293_v17 = vld [vmem:[#allocation9 + $0x230] sm:$0xff] }
 0x41e   : > { %16358 = vmatprep.mubr.f32.mxu1 %v22199_v32  ;;  %v18705_v32 = vpack.c.bf16 %v5292_v28, %v5291_v5  ;;  %v18709_v18 = vpack.c.bf16 %v5294_v22, %v5293_v17  ;;  %v5297_v28 = vld [vmem:[#allocation9 + $0x250] sm:$0xff] }
 0x41f   : > { %v5301_v22 = vld [vmem:[#allocation9 + $0x270] sm:$0xff] }
 0x421   : > { %16359 = vmatmul.mubr.msk.f32.gmra.mrb[30].mxu1 %vm21499_vm13, %v22202_v51  ;;  %vm24861_vm13 = vnez %v24603_v3 }
 0x422   : > { %16393 = vmatprep.mubr.msk.f32.mxu1 %vm21097_vm0, %v21964_v55  ;;  %v5295_v55 = vld [vmem:[#allocation9 + $0x240] sm:$0xff]  ;;  %vm24867_vm0 = vnez %v24615_v2 }
 0x425   : > { %16394 = vmatmul.mubr.f32.vlgmr.msra.gmra.mrb[0].mxu1 %v21970_v39  ;;  %v5296_v39 = vld [vmem:[#allocation9 + $0x248] sm:$0xff] }
 0x426   : > { %16396 = vmatprep.mubr.msk.f32.mxu1 %vm21105_vm1, %v21973_v11  ;;  %18700 = vmatpush3.bf16.msra.mxu1 %v18697_v27  ;;  %vm24862_vm1 = vnez %v24605_v10  ;;  %v18713_v5 = vpack.c.bf16 %v5296_v39, %v5295_v55  ;;  %v5298_v27 = vld [vmem:[#allocation9 + $0x258] sm:$0xff]  ;;  %v5625_v39 = vld [vmem:[#allocation9 + $0x280] sm:$0xff] }
 0x427   : > { %18702 = vmatprep.subr.bf16.mxu1 %v18701_v13  ;;  %v18717_v17 = vpack.c.bf16 %v5298_v27, %v5297_v28  ;;  %v5302_v55 = vld [vmem:[#allocation9 + $0x278] sm:$0xff]  ;;  %v5626_v28 = vld [vmem:[#allocation9 + $0x288] sm:$0xff] }
 0x428   : > { %v24870_v27 = vld [vmem:[#allocation45_spill] sm:$0xff] }
 0x429   : > { %16397 = vmatmul.mubr.f32.gmra.mrb[2].mxu1 %v21978_v58  ;;  %vm24871_vm14 = vnez %v24870_v27  ;;  %v22267_v27 = vld [vmem:[#allocation2 + $0x107] sm:$0xff] }
 0x42a   : > { %16399 = vmatprep.mubr.msk.f32.mxu1 %vm24861_vm13, %v21981_v9  ;;  %18704 = vmatpush3.bf16.msra.mxu1 %v18701_v13  ;;  %vm24863_vm13 = vnez %v24607_v41  ;;  %v5299_v13 = vld [vmem:[#allocation9 + $0x260] sm:$0xff]  ;;  %24883 = vst [vmem:[#allocation108_spill] sm:$0xff] %v22267_v27 }
 0x42b   : > { %18706 = vmatprep.subr.bf16.mxu1 %v18705_v32 }
 0x42d   : > { %16400 = vmatmul.mubr.f32.gmra.mrb[4].mxu1 %v21986_v24 }
 0x42e   : > { %16402 = vmatprep.mubr.msk.f32.mxu1 %vm24862_vm1, %v21989_v38  ;;  %18708 = vmatpush3.bf16.msra.mxu1 %v18705_v32  ;;  %vm24864_vm1 = vnez %v24609_v59  ;;  %v18721_v32 = vpack.c.bf16 %v5300_v31, %v5299_v13  ;;  %v24873_v13 = vld [vmem:[#allocation90_spill] sm:$0xff] }
 0x42f   : > { %18710 = vmatprep.subr.bf16.mxu1 %v18709_v18  ;;  %v24874_v31 = vld [vmem:[#allocation46_spill] sm:$0xff] }
 0x431   : > { %16403 = vmatmul.mubr.f32.gmra.mrb[6].mxu1 %v21994_v16 }
 0x432   : > { %16405 = vmatprep.mubr.msk.f32.mxu1 %vm24863_vm13, %v21997_v4  ;;  %18712 = vmatpush3.bf16.msra.mxu1 %v18709_v18  ;;  %vm24865_vm13 = vnez %v24611_v6  ;;  %v18725_v18 = vpack.c.bf16 %v5302_v55, %v5301_v22  ;;  %v24877_v22 = vld [vmem:[#allocation92_spill] sm:$0xff]  ;;  %v5254_v55 = vld [vmem:[#allocation2 + $0x18] sm:$0xff] }
 0x433   : > { %18714 = vmatprep.subr.bf16.mxu1 %v18713_v5 }
 0x435   : > { %16406 = vmatmul.mubr.f32.gmra.mrb[8].mxu1 %v22002_v54 }
 0x436   : > { %16408 = vmatprep.mubr.msk.f32.mxu1 %vm24864_vm1, %v22005_v50  ;;  %18716 = vmatpush3.bf16.msra.mxu1 %v18713_v5  ;;  %vm24866_vm1 = vnez %v24613_v52  ;;  %v18729_v5 = vpack.c.bf16 %v5626_v28, %v5625_v39  ;;  %v24880_v39 = vld [vmem:[#allocation51_spill] sm:$0xff]  ;;  %v24881_v28 = vld [vmem:[#allocation48_spill] sm:$0xff] }
 0x437   : > { %18718 = vmatprep.subr.bf16.mxu1 %v18717_v17 }
 0x439   : > { %16409 = vmatmul.mubr.f32.gmra.mrb[10].mxu1 %v22010_v47 }
 0x43a   : > { %16411 = vmatprep.mubr.msk.f32.mxu1 %vm24865_vm13, %v22013_v56  ;;  %18720 = vmatpush3.bf16.msra.mxu1 %v18717_v17  ;;  %vm24868_vm13 = vnez %v24617_v20  ;;  %v24872_v17 = vld [vmem:[#allocation89_spill] sm:$0xff] }
 0x43b   : > { %18722 = vmatprep.subr.bf16.mxu1 %v18721_v32 }
 0x43d   : > { %16412 = vmatmul.mubr.f32.gmra.mrb[12].mxu1 %v22018_v26 }
 0x43e   : > { %16414 = vmatprep.mubr.msk.f32.mxu1 %vm24866_vm1, %v22021_v1  ;;  %18724 = vmatpush3.bf16.msra.mxu1 %v18721_v32  ;;  %vm24869_vm1 = vnez %v24619_v57  ;;  %v24876_v32 = vld [vmem:[#allocation91_spill] sm:$0xff]  ;;  %v5631_v57 = vld [vmem:[#allocation9 + $0x2b0] sm:$0xff] }
 0x43f   : > { %18726 = vmatprep.subr.bf16.mxu1 %v18725_v18 }
 0x441   : > { %16415 = vmatmul.mubr.f32.gmra.mrb[14].mxu1 %v22026_v15 }
 0x442   : > { %16417 = vmatprep.mubr.msk.f32.mxu1 %vm24867_vm0, %v22029_v43  ;;  %18728 = vmatpush3.bf16.msra.mxu1 %v18725_v18  ;;  %vm24875_vm0 = vnez %v24874_v31  ;;  %v24879_v18 = vld [vmem:[#allocation93_spill] sm:$0xff] }
 0x443   : > { %18730 = vmatprep.subr.bf16.mxu1 %v18729_v5  ;;  %v22272_v31 = vld [vmem:[#allocation2 + $0x10f] sm:$0xff] }
 0x444   : > { %24886 = vst [vmem:[#allocation109_spill] sm:$0xff] %v22272_v31 }
 0x445   : > { %16418 = vmatmul.mubr.f32.gmra.mrb[16].mxu1 %v22034_v48 }
 0x446   : > { %16420 = vmatprep.mubr.msk.f32.mxu1 %vm24868_vm13, %v22037_v30 }
 0x449   : > { %16421 = vmatmul.mubr.f32.gmra.mrb[18].mxu1 %v22042_v33 }
 0x44a   : > { %16423 = vmatprep.mubr.msk.f32.mxu1 %vm24869_vm1, %v22045_v8  ;;  %vm24882_vm1 = vnez %v24881_v28  ;;  %v5629_v28 = vld [vmem:[#allocation9 + $0x2a0] sm:$0xff] }
 0x44d   : > { %16424 = vmatmul.mubr.f32.gmra.mrb[20].mxu1 %v22050_v40  ;;  %v24897_v40 = vld [vmem:[#allocation55_spill] sm:$0xff] }
 0x44e   : > { %16426 = vmatprep.mubr.msk.f32.mxu1 %vm24871_vm14, %v22053_v42  ;;  %v5632_v42 = vld [vmem:[#allocation9 + $0x2b8] sm:$0xff] }
 0x451   : > { %16427 = vmatmul.mubr.f32.gmra.mrb[22].mxu1 %v24872_v17  ;;  %v24884_v17 = vld [vmem:[#allocation50_spill] sm:$0xff] }
 0x452   : > { %16429 = vmatprep.mubr.msk.f32.mxu1 %vm24875_vm0, %v24873_v13  ;;  %vm24885_vm14 = vnez %v24884_v17  ;;  %v5628_v13 = vld [vmem:[#allocation9 + $0x298] sm:$0xff] }
 0x455   : > { %16430 = vmatmul.mubr.f32.gmra.mrb[24].mxu1 %v24876_v32  ;;  %v5627_v32 = vld [vmem:[#allocation9 + $0x290] sm:$0xff] }
 0x456   : > { %16432 = vmatprep.mubr.msk.f32.mxu1 %vm24834_vm4, %v24877_v22  ;;  %v5255_v22 = vld [vmem:[#allocation2 + $0x20] sm:$0xff] }
 0x459   : > { %16433 = vmatmul.mubr.f32.gmra.mrb[26].mxu1 %v24879_v18  ;;  %v18733_v18 = vpack.c.bf16 %v5628_v13, %v5627_v32  ;;  %v18741_v13 = vpack.c.bf16 %v5632_v42, %v5631_v57  ;;  %v22284_v32 = vld [vmem:[#allocation2 + $0x40] sm:$0xff]  ;;  %v22293_v57 = vld [vmem:[#allocation2 + $0x58] sm:$0xff] }
 0x45a   : > { %16435 = vmatprep.mubr.msk.f32.mxu1 %vm24882_vm1, %v24880_v39  ;;  %v5630_v39 = vld [vmem:[#allocation9 + $0x2a8] sm:$0xff]  ;;  %24890 = vst [vmem:[#allocation113_spill] sm:$0xff] %v22284_v32  ;;  %24893 = vst [vmem:[#allocation116_spill] sm:$0xff] %v22293_v57 }
 0x45b   : > { %v18737_v17 = vpack.c.bf16 %v5630_v39, %v5629_v28  ;;  %v22290_v28 = vld [vmem:[#allocation2 + $0x50] sm:$0xff] }
 0x45c   : > { %24892 = vst [vmem:[#allocation115_spill] sm:$0xff] %v22290_v28 }
 0x45d   : > { %16436 = vmatmul.mubr.f32.gmra.mrb[28].mxu1 %v22082_v14  ;;  %v22275_v14 = vld [vmem:[#allocation2 + $0x28] sm:$0xff] }
 0x45e   : > { %16438 = vmatprep.mubr.msk.f32.mxu1 %vm24885_vm14, %v22267_v27  ;;  %24887 = vst [vmem:[#allocation110_spill] sm:$0xff] %v22275_v14  ;;  %v22278_v27 = vld [vmem:[#allocation2 + $0x30] sm:$0xff]  ;;  %vm24918_vm14 = vnez %v24784_v12 }
 0x45f   : > { %24888 = vst [vmem:[#allocation111_spill] sm:$0xff] %v22278_v27 }
 0x461   : > { %16439 = vmatmul.mubr.f32.gmra.mrb[30].mxu1 %v22272_v31  ;;  %v22281_v31 = vld [vmem:[#allocation2 + $0x38] sm:$0xff] }
 0x462   : > { %16473 = vmatprep.mubr.f32.mxu1 %v5254_v55  ;;  %24889 = vst [vmem:[#allocation112_spill] sm:$0xff] %v22281_v31  ;;  %v5634_v55 = vld [vmem:[#allocation9 + $0x2c8] sm:$0xff] }
 0x465   : > { %16474 = vmatmul.mubr.f32.vlgmr.msra.gmra.mrb[0].mxu1 %v5255_v22  ;;  %v5633_v22 = vld [vmem:[#allocation9 + $0x2c0] sm:$0xff] }
 0x466   : > { %16476 = vmatprep.mubr.f32.mxu1 %v22275_v14  ;;  %18732 = vmatpush3.bf16.msra.mxu1 %v18729_v5  ;;  %v22287_v5 = vld [vmem:[#allocation2 + $0x48] sm:$0xff]  ;;  %v18745_v39 = vpack.c.bf16 %v5634_v55, %v5633_v22  ;;  %v22300_v55 = vld [vmem:[#allocation2 + $0x70] sm:$0xff] }
 0x467   : > { %18734 = vmatprep.subr.bf16.mxu1 %v18733_v18  ;;  %24891 = vst [vmem:[#allocation114_spill] sm:$0xff] %v22287_v5  ;;  %v5640_v14 = vld [vmem:[#allocation9 + $0x2f8] sm:$0xff] }
 0x469   : > { %16477 = vmatmul.mubr.f32.gmra.mrb[2].mxu1 %v22278_v27  ;;  %v5635_v27 = vld [vmem:[#allocation9 + $0x2d0] sm:$0xff] }
 0x46a   : > { %16479 = vmatprep.mubr.f32.mxu1 %v22281_v31  ;;  %18736 = vmatpush3.bf16.msra.mxu1 %v18733_v18  ;;  %v5636_v31 = vld [vmem:[#allocation9 + $0x2d8] sm:$0xff]  ;;  %v22296_v18 = vld [vmem:[#allocation2 + $0x60] sm:$0xff] }
 0x46b   : > { %18738 = vmatprep.subr.bf16.mxu1 %v18737_v17  ;;  %v18749_v42 = vpack.c.bf16 %v5636_v31, %v5635_v27  ;;  %24894 = vst [vmem:[#allocation117_spill] sm:$0xff] %v22296_v18  ;;  %v5963_v31 = vld [vmem:[#allocation9 + $0x300] sm:$0xff] }
 0x46d   : > { %16480 = vmatmul.mubr.f32.gmra.mrb[4].mxu1 %v22284_v32  ;;  %v5637_v32 = vld [vmem:[#allocation9 + $0x2e0] sm:$0xff] }
 0x46e   : > { %16482 = vmatprep.mubr.f32.mxu1 %v22287_v5  ;;  %18740 = vmatpush3.bf16.msra.mxu1 %v18737_v17  ;;  %v5638_v5 = vld [vmem:[#allocation9 + $0x2e8] sm:$0xff]  ;;  %v24895_v17 = vld [vmem:[#allocation54_spill] sm:$0xff] }
 0x46f   : > { %18742 = vmatprep.subr.bf16.mxu1 %v18741_v13  ;;  %v18753_v22 = vpack.c.bf16 %v5638_v5, %v5637_v32  ;;  %v24899_v5 = vld [vmem:[#allocation58_spill] sm:$0xff] }
 0x471   : > { %16483 = vmatmul.mubr.f32.gmra.mrb[6].mxu1 %v22290_v28  ;;  %v5639_v28 = vld [vmem:[#allocation9 + $0x2f0] sm:$0xff] }
 0x472   : > { %16485 = vmatprep.mubr.f32.mxu1 %v22293_v57  ;;  %18744 = vmatpush3.bf16.msra.mxu1 %v18741_v13  ;;  %v24896_v13 = vld [vmem:[#allocation57_spill] sm:$0xff]  ;;  %v18757_v27 = vpack.c.bf16 %v5640_v14, %v5639_v28  ;;  %v5964_v57 = vld [vmem:[#allocation9 + $0x308] sm:$0xff]  ;;  %v24903_v14 = vld [vmem:[#allocation64_spill] sm:$0xff] }
 0x473   : > { %18746 = vmatprep.subr.bf16.mxu1 %v18745_v39  ;;  %v18761_v32 = vpack.c.bf16 %v5964_v57, %v5963_v31  ;;  %v24904_v28 = vld [vmem:[#allocation68_spill] sm:$0xff]  ;;  %v24908_v57 = vld [vmem:[#allocation75_spill] sm:$0xff] }
 0x474   : > { %v24911_v31 = vld [vmem:[#allocation76_spill] sm:$0xff] }
 0x475   : > { %16486 = vmatmul.mubr.f32.gmra.mrb[8].mxu1 %v22296_v18  ;;  %v24898_v18 = vld [vmem:[#allocation60_spill] sm:$0xff] }
 0x476   : > { %16488 = vmatprep.mubr.f32.mxu1 %v24895_v17  ;;  %18748 = vmatpush3.bf16.msra.mxu1 %v18745_v39  ;;  %v24900_v39 = vld [vmem:[#allocation63_spill] sm:$0xff]  ;;  %v24901_v17 = vld [vmem:[#allocation61_spill] sm:$0xff] }
 0x477   : > { %18750 = vmatprep.subr.bf16.mxu1 %v18749_v42 }
 0x479   : > { %16489 = vmatmul.mubr.f32.gmra.mrb[10].mxu1 %v22300_v55 }
 0x47a   : > { %16491 = vmatprep.mubr.f32.mxu1 %v24896_v13  ;;  %18752 = vmatpush3.bf16.msra.mxu1 %v18749_v42  ;;  %v24902_v42 = vld [vmem:[#allocation66_spill] sm:$0xff]  ;;  %v24909_v13 = vld [vmem:[#allocation73_spill] sm:$0xff] }
 0x47b   : > { %18754 = vmatprep.subr.bf16.mxu1 %v18753_v22 }
 0x47d   : > { %16492 = vmatmul.mubr.f32.gmra.mrb[12].mxu1 %v24897_v40  ;;  %v24905_v40 = vld [vmem:[#allocation67_spill] sm:$0xff] }
 0x47e   : > { %16494 = vmatprep.mubr.f32.mxu1 %v24898_v18  ;;  %18756 = vmatpush3.bf16.msra.mxu1 %v18753_v22  ;;  %v24906_v18 = vld [vmem:[#allocation72_spill] sm:$0xff]  ;;  %v24907_v22 = vld [vmem:[#allocation70_spill] sm:$0xff] }
 0x47f   : > { %18758 = vmatprep.subr.bf16.mxu1 %v18757_v27 }
 0x481   : > { %16495 = vmatmul.mubr.f32.gmra.mrb[14].mxu1 %v24899_v5  ;;  %v24912_v5 = vld [vmem:[#allocation81_spill] sm:$0xff] }
 0x482   : > { %16497 = vmatprep.mubr.f32.mxu1 %v24900_v39  ;;  %18760 = vmatpush3.bf16.msra.mxu1 %v18757_v27  ;;  %v24910_v27 = vld [vmem:[#allocation78_spill] sm:$0xff]  ;;  %v24913_v39 = vld [vmem:[#allocation79_spill] sm:$0xff] }
 0x483   : > { %18762 = vmatprep.subr.bf16.mxu1 %v18761_v32 }
 0x485   : > { %16498 = vmatmul.mubr.f32.gmra.mrb[16].mxu1 %v24901_v17  ;;  %v24914_v17 = vld [vmem:[#allocation84_spill] sm:$0xff] }
 0x486   : > { %16500 = vmatprep.mubr.f32.mxu1 %v24902_v42  ;;  %v24915_v42 = vmax.f32 %v24914_v17, 0.0  ;;  %v24920_v17 = vld [vmem:[#allocation53_spill] sm:$0xff] }
 0x487   : > { %vm24921_vm1 = vnez %v24920_v17 }
 0x489   : > { %16501 = vmatmul.mubr.f32.gmra.mrb[18].mxu1 %v24903_v14  ;;  %v5965_v14 = vld [vmem:[#allocation9 + $0x310] sm:$0xff] }
 0x48a   : > { %16503 = vmatprep.mubr.f32.mxu1 %v24904_v28  ;;  %v5966_v28 = vld [vmem:[#allocation9 + $0x318] sm:$0xff] }
 0x48d   : > { %16504 = vmatmul.mubr.f32.gmra.mrb[20].mxu1 %v24905_v40  ;;  %v24916_v40 = vld [vmem:[#allocation82_spill] sm:$0xff] }
 0x48e   : > { %16506 = vmatprep.mubr.f32.mxu1 %v24906_v18  ;;  %v24917_v18 = vmax.f32 %v24916_v40, 0.0 }
 0x491   : > { %16507 = vmatmul.mubr.f32.gmra.mrb[22].mxu1 %v24907_v22  ;;  %v18765_v22 = vpack.c.bf16 %v5966_v28, %v5965_v14  ;;  %v5971_v14 = vld [vmem:[#allocation9 + $0x340] sm:$0xff]  ;;  %v5972_v28 = vld [vmem:[#allocation9 + $0x348] sm:$0xff] }
 0x492   : > { %16509 = vmatprep.mubr.f32.mxu1 %v24908_v57  ;;  %v5967_v57 = vld [vmem:[#allocation9 + $0x320] sm:$0xff]  ;;  %v18777_v40 = vpack.c.bf16 %v5972_v28, %v5971_v14  ;;  %v6270_v28 = vld [vmem:[#allocation9 + $0x388] sm:$0xff] }
 0x493   : > { %v6269_v14 = vld [vmem:[#allocation9 + $0x380] sm:$0xff] }
 0x495   : > { %16510 = vmatmul.mubr.f32.gmra.mrb[24].mxu1 %v24909_v13  ;;  %v5968_v13 = vld [vmem:[#allocation9 + $0x328] sm:$0xff] }
 0x496   : > { %16512 = vmatprep.mubr.f32.mxu1 %v24910_v27  ;;  %v24919_v27 = vld [vmem:[#allocation88_spill] sm:$0xff] }
 0x499   : > { %16513 = vmatmul.mubr.f32.gmra.mrb[26].mxu1 %v24911_v31  ;;  %v18769_v31 = vpack.c.bf16 %v5968_v13, %v5967_v57  ;;  %v5974_v57 = vld [vmem:[#allocation9 + $0x358] sm:$0xff] }
 0x49a   : > { %16515 = vmatprep.mubr.f32.mxu1 %v24912_v5  ;;  %v5969_v5 = vld [vmem:[#allocation9 + $0x330] sm:$0xff] }
 0x49d   : > { %16516 = vmatmul.mubr.f32.gmra.mrb[28].mxu1 %v24913_v39  ;;  %v5970_v39 = vld [vmem:[#allocation9 + $0x338] sm:$0xff] }
 0x49e   : > { %16518 = vmatprep.mubr.f32.mxu1 %v24915_v42  ;;  %v24922_v42 = vld [vmem:[#allocation43_spill] sm:$0xff] }
 0x4a1   : > { %16519 = vmatmul.mubr.f32.gmra.mrb[30].mxu1 %v24917_v18  ;;  %v5973_v18 = vld [vmem:[#allocation9 + $0x350] sm:$0xff] }
 0x4a2   : > { %16553 = vmatprep.mubr.f32.mxu1 %v22087_v60  ;;  %v18773_v60 = vpack.c.bf16 %v5970_v39, %v5969_v5  ;;  %v18781_v13 = vpack.c.bf16 %v5974_v57, %v5973_v18  ;;  %v5976_v5 = vld [vmem:[#allocation9 + $0x368] sm:$0xff]  ;;  %v5977_v39 = vld [vmem:[#allocation9 + $0x370] sm:$0xff] }
 0x4a3   : > { %v24939_v18 = vld [vmem:[#allocation103_spill] sm:$0xff]  ;;  %v24941_v57 = vld [vmem:[#allocation80_spill] sm:$0xff] }
 0x4a5   : > { %16554 = vmatmul.mubr.msk.f32.vlgmr.msra.gmra.mrb[0].mxu1 %vm24918_vm14, %v22090_v21  ;;  %v24923_v21 = vld [vmem:[#allocation56_spill] sm:$0xff] }
 0x4a6   : > { %16556 = vmatprep.mubr.f32.mxu1 %v24919_v27  ;;  %18764 = vmatpush3.bf16.msra.mxu1 %v18761_v32  ;;  %vm24924_vm14 = vnez %v24923_v21  ;;  %v24925_v32 = vld [vmem:[#allocation96_spill] sm:$0xff]  ;;  %v5975_v27 = vld [vmem:[#allocation9 + $0x360] sm:$0xff] }
 0x4a7   : > { %18766 = vmatprep.subr.bf16.mxu1 %v18765_v22 }
 0x4a9   : > { %16557 = vmatmul.mubr.msk.f32.gmra.mrb[2].mxu1 %vm24921_vm1, %v22098_v37 }
 0x4aa   : > { %16559 = vmatprep.mubr.f32.mxu1 %v24922_v42  ;;  %18768 = vmatpush3.bf16.msra.mxu1 %v18765_v22  ;;  %v24927_v22 = vld [vmem:[#allocation97_spill] sm:$0xff] }
 0x4ab   : > { %18770 = vmatprep.subr.bf16.mxu1 %v18769_v31  ;;  %v5978_v42 = vld [vmem:[#allocation9 + $0x378] sm:$0xff] }
 0x4ad   : > { %16560 = vmatmul.mubr.msk.f32.gmra.mrb[4].mxu1 %vm24924_vm14, %v22106_v7 }
 0x4ae   : > { %16562 = vmatprep.mubr.f32.mxu1 %v24925_v32  ;;  %18772 = vmatpush3.bf16.msra.mxu1 %v18769_v31  ;;  %v18785_v31 = vpack.c.bf16 %v5976_v5, %v5975_v27  ;;  %v24935_v32 = vld [vmem:[#allocation74_spill] sm:$0xff]  ;;  %v24945_v27 = vld [vmem:[#allocation107_spill] sm:$0xff]  ;;  %v24946_v5 = vld [vmem:[#allocation85_spill] sm:$0xff] }
 0x4af   : > { %18774 = vmatprep.subr.bf16.mxu1 %v18773_v60 }
 0x4b1   : > { %16563 = vmatmul.mubr.msk.f32.gmra.mrb[6].mxu1 %vm24847_vm3, %v22114_v49 }
 0x4b2   : > { %16565 = vmatprep.mubr.f32.mxu1 %v24927_v22  ;;  %18776 = vmatpush3.bf16.msra.mxu1 %v18773_v60  ;;  %v18789_v60 = vpack.c.bf16 %v5978_v42, %v5977_v39  ;;  %v24942_v22 = vld [vmem:[#allocation105_spill] sm:$0xff]  ;;  %v22388_v39 = vld [vmem:[#allocation2 + $0x111] sm:$0xff]  ;;  %v6271_v42 = vld [vmem:[#allocation9 + $0x390] sm:$0xff] }
 0x4b3   : > { %18778 = vmatprep.subr.bf16.mxu1 %v18777_v40 }
 0x4b5   : > { %16566 = vmatmul.mubr.msk.f32.gmra.mrb[8].mxu1 %vm24849_vm2, %v22122_v34  ;;  %v18793_v34 = vpack.c.bf16 %v6270_v28, %v6269_v14  ;;  %v6273_v28 = vld [vmem:[#allocation9 + $0x3a0] sm:$0xff] }
 0x4b6   : > { %16568 = vmatprep.mubr.f32.mxu1 %v22127_v36  ;;  %18780 = vmatpush3.bf16.msra.mxu1 %v18777_v40  ;;  %v24931_v36 = vld [vmem:[#allocation98_spill] sm:$0xff]  ;;  %v24938_v40 = vld [vmem:[#allocation77_spill] sm:$0xff] }
 0x4b7   : > { %18782 = vmatprep.subr.bf16.mxu1 %v18781_v13 }
 0x4b9   : > { %16569 = vmatmul.mubr.msk.f32.gmra.mrb[10].mxu1 %vm24791_vm7, %v22130_v25  ;;  %v24930_v25 = vld [vmem:[#allocation69_spill] sm:$0xff] }
 0x4ba   : > { %16571 = vmatprep.mubr.f32.mxu1 %v22135_v44  ;;  %18784 = vmatpush3.bf16.msra.mxu1 %v18781_v13  ;;  %v24933_v44 = vld [vmem:[#allocation99_spill] sm:$0xff] }
 0x4bb   : > { %18786 = vmatprep.subr.bf16.mxu1 %v18785_v31  ;;  %v24944_v13 = vld [vmem:[#allocation83_spill] sm:$0xff] }
 0x4bd   : > { %16572 = vmatmul.mubr.msk.f32.gmra.mrb[12].mxu1 %vm24792_vm6, %v22138_v19  ;;  %v24932_v19 = vld [vmem:[#allocation71_spill] sm:$0xff] }
 0x4be   : > { %16574 = vmatprep.mubr.f32.mxu1 %v22143_v45  ;;  %18788 = vmatpush3.bf16.msra.mxu1 %v18785_v31  ;;  %v24934_v45 = vld [vmem:[#allocation100_spill] sm:$0xff]  ;;  %v22385_v31 = vld [vmem:[#allocation2 + $0x109] sm:$0xff] }
 0x4bf   : > { %18790 = vmatprep.subr.bf16.mxu1 %v18789_v60 }
 0x4c1   : > { %16575 = vmatmul.mubr.msk.f32.gmra.mrb[14].mxu1 %vm24793_vm8, %v22146_v63  ;;  %v24936_v63 = vld [vmem:[#allocation101_spill] sm:$0xff] }
 0x4c2   : > { %16577 = vmatprep.mubr.f32.mxu1 %v22151_v29  ;;  %18792 = vmatpush3.bf16.msra.mxu1 %v18789_v60  ;;  %v24937_v29 = vld [vmem:[#allocation102_spill] sm:$0xff]  ;;  %v6272_v60 = vld [vmem:[#allocation9 + $0x398] sm:$0xff] }
 0x4c3   : > { %18794 = vmatprep.subr.bf16.mxu1 %v18793_v34  ;;  %v18797_v14 = vpack.c.bf16 %v6272_v60, %v6271_v42  ;;  %v24972_v60 = vld [vmem:[#allocation42_spill] sm:$0xff]  ;;  %v8092_v42 = vld [vmem:[#allocation7 + $0x190] sm:$0xff] }
 0x4c5   : > { %16578 = vmatmul.mubr.msk.f32.gmra.mrb[16].mxu1 %vm24794_vm5, %v22154_v61  ;;  %v24940_v61 = vld [vmem:[#allocation104_spill] sm:$0xff] }
 0x4c6   : > { %16580 = vmatprep.mubr.f32.mxu1 %v24931_v36  ;;  %v6274_v36 = vld [vmem:[#allocation9 + $0x3a8] sm:$0xff] }
 0x4c9   : > { %16581 = vmatmul.mubr.msk.f32.gmra.mrb[18].mxu1 %vm24752_vm11, %v22162_v35  ;;  %v24943_v35 = vld [vmem:[#allocation106_spill] sm:$0xff] }
 0x4ca   : > { %16583 = vmatprep.mubr.f32.mxu1 %v24933_v44  ;;  %v6275_v44 = vld [vmem:[#allocation9 + $0x3b0] sm:$0xff] }
 0x4cd   : > { %16584 = vmatmul.mubr.msk.f32.gmra.mrb[20].mxu1 %vm24756_vm12, %v24934_v45  ;;  %vm24947_vm12 = vnez %v24946_v5  ;;  %v6276_v45 = vld [vmem:[#allocation9 + $0x3b8] sm:$0xff] }
 0x4ce   : > { %16586 = vmatprep.mubr.f32.mxu1 %v24936_v63  ;;  %v6277_v63 = vld [vmem:[#allocation9 + $0x3c0] sm:$0xff] }
 0x4d1   : > { %16587 = vmatmul.mubr.msk.f32.gmra.mrb[22].mxu1 %vm24760_vm9, %v24937_v29  ;;  %v6281_v29 = vld [vmem:[#allocation9 + $0x3e0] sm:$0xff] }
 0x4d2   : > { %16589 = vmatprep.mubr.f32.mxu1 %v24939_v18  ;;  %v6283_v18 = vld [vmem:[#allocation9 + $0x3f0] sm:$0xff] }
 0x4d5   : > { %16590 = vmatmul.mubr.msk.f32.gmra.mrb[24].mxu1 %vm24763_vm10, %v24940_v61  ;;  %vm24948_vm10 = vnez %v24799_v46  ;;  %v6607_v61 = vld [vmem:[#allocation9 + $0x400] sm:$0xff] }
 0x4d6   : > { %16592 = vmatprep.mubr.f32.mxu1 %v24942_v22  ;;  %v24964_v22 = vld [vmem:[#allocation45_spill] sm:$0xff] }
 0x4d9   : > { %16593 = vmatmul.mubr.msk.f32.gmra.mrb[26].mxu1 %vm21474_vm15, %v24943_v35  ;;  %vm24949_vm15 = vnez %v24598_v53  ;;  %v24967_v35 = vld [vmem:[#allocation92_spill] sm:$0xff] }
 0x4da   : > { %16595 = vmatprep.mubr.f32.mxu1 %v24945_v27  ;;  %v24969_v27 = vld [vmem:[#allocation93_spill] sm:$0xff] }
 0x4dd   : > { %16596 = vmatmul.mubr.msk.f32.gmra.mrb[28].mxu1 %vm24947_vm12, %v22202_v51  ;;  %vm24950_vm12 = vnez %v24821_v62  ;;  %v18801_v51 = vpack.c.bf16 %v6274_v36, %v6273_v28  ;;  %v24974_v28 = vld [vmem:[#allocation48_spill] sm:$0xff]  ;;  %v24976_v36 = vld [vmem:[#allocation109_spill] sm:$0xff] }
 0x4de   : > { %16598 = vmatprep.mubr.f32.mxu1 %v22385_v31 }
 0x4e1   : > { %16599 = vmatmul.mubr.msk.f32.gmra.mrb[30].mxu1 %vm24948_vm10, %v22388_v39  ;;  %vm24951_vm10 = vnez %v24603_v3 }
 0x4e2   : > { %16633 = vmatprep.mubr.msk.f32.mxu1 %vm24949_vm15, %v21973_v11  ;;  %v18805_v11 = vpack.c.bf16 %v6276_v45, %v6275_v44  ;;  %vm24957_vm15 = vnez %v24615_v2  ;;  %v24977_v44 = vld [vmem:[#allocation50_spill] sm:$0xff]  ;;  %v5929_v45 = vld [vmem:[#allocation2 + $0x11f] sm:$0xff] }
 0x4e5   : > { %16634 = vmatmul.mubr.f32.vlgmr.msra.gmra.mrb[0].mxu1 %v21978_v58  ;;  %v6278_v58 = vld [vmem:[#allocation9 + $0x3c8] sm:$0xff] }
 0x4e6   : > { %16636 = vmatprep.mubr.msk.f32.mxu1 %vm24950_vm12, %v21981_v9  ;;  %18796 = vmatpush3.bf16.msra.mxu1 %v18793_v34  ;;  %vm24952_vm12 = vnez %v24605_v10  ;;  %v18809_v9 = vpack.c.bf16 %v6278_v58, %v6277_v63  ;;  %v6279_v34 = vld [vmem:[#allocation9 + $0x3d0] sm:$0xff]  ;;  %v6610_v63 = vld [vmem:[#allocation9 + $0x418] sm:$0xff]  ;;  %v7223_v58 = vld [vmem:[#allocation7 + $0x80] sm:$0xff] }
 0x4e7   : > { %18798 = vmatprep.subr.bf16.mxu1 %v18797_v14 }
 0x4e9   : > { %16637 = vmatmul.mubr.f32.gmra.mrb[2].mxu1 %v21986_v24  ;;  %v6280_v24 = vld [vmem:[#allocation9 + $0x3d8] sm:$0xff] }
 0x4ea   : > { %16639 = vmatprep.mubr.msk.f32.mxu1 %vm24951_vm10, %v21989_v38  ;;  %18800 = vmatpush3.bf16.msra.mxu1 %v18797_v14  ;;  %vm24953_vm10 = vnez %v24607_v41  ;;  %v18813_v38 = vpack.c.bf16 %v6280_v24, %v6279_v34  ;;  %v24973_v14 = vld [vmem:[#allocation108_spill] sm:$0xff]  ;;  %v24979_v24 = vld [vmem:[#allocation110_spill] sm:$0xff] }
 0x4eb   : > { %18802 = vmatprep.subr.bf16.mxu1 %v18801_v51  ;;  %v7225_v34 = vld [vmem:[#allocation7 + $0x90] sm:$0xff] }
 0x4ed   : > { %16640 = vmatmul.mubr.f32.gmra.mrb[4].mxu1 %v21994_v16  ;;  %v6282_v16 = vld [vmem:[#allocation9 + $0x3e8] sm:$0xff] }
 0x4ee   : > { %16642 = vmatprep.mubr.msk.f32.mxu1 %vm24952_vm12, %v21997_v4  ;;  %18804 = vmatpush3.bf16.msra.mxu1 %v18801_v51  ;;  %vm24954_vm12 = vnez %v24609_v59  ;;  %v18817_v4 = vpack.c.bf16 %v6282_v16, %v6281_v29  ;;  %v5928_v51 = vld [vmem:[#allocation2 + $0x117] sm:$0xff]  ;;  %v7226_v29 = vld [vmem:[#allocation7 + $0x98] sm:$0xff] }
 0x4ef   : > { %18806 = vmatprep.subr.bf16.mxu1 %v18805_v11 }
 0x4f1   : > { %16643 = vmatmul.mubr.f32.gmra.mrb[6].mxu1 %v22002_v54  ;;  %v6284_v54 = vld [vmem:[#allocation9 + $0x3f8] sm:$0xff] }
 0x4f2   : > { %16645 = vmatprep.mubr.msk.f32.mxu1 %vm24953_vm10, %v22005_v50  ;;  %18808 = vmatpush3.bf16.msra.mxu1 %v18805_v11  ;;  %vm24955_vm10 = vnez %v24611_v6  ;;  %v18821_v50 = vpack.c.bf16 %v6284_v54, %v6283_v18  ;;  %v6609_v11 = vld [vmem:[#allocation9 + $0x410] sm:$0xff]  ;;  %v18861_v18 = vpack.c.bf16 %v7226_v29, %v7225_v34  ;;  %v6612_v54 = vld [vmem:[#allocation9 + $0x428] sm:$0xff] }
 0x4f3   : > { %18810 = vmatprep.subr.bf16.mxu1 %v18809_v9  ;;  %v18829_v16 = vpack.c.bf16 %v6610_v63, %v6609_v11  ;;  %v7232_v11 = vld [vmem:[#allocation7 + $0xc8] sm:$0xff]  ;;  %v6617_v34 = vld [vmem:[#allocation9 + $0x450] sm:$0xff] }
 0x4f4   : > { %v24984_v63 = vld [vmem:[#allocation115_spill] sm:$0xff]  ;;  %v7233_v29 = vld [vmem:[#allocation7 + $0xd0] sm:$0xff] }
 0x4f5   : > { %16646 = vmatmul.mubr.f32.gmra.mrb[8].mxu1 %v22010_v47  ;;  %v6608_v47 = vld [vmem:[#allocation9 + $0x408] sm:$0xff] }
 0x4f6   : > { %16648 = vmatprep.mubr.msk.f32.mxu1 %vm24954_vm12, %v22013_v56  ;;  %18812 = vmatpush3.bf16.msra.mxu1 %v18809_v9  ;;  %vm24956_vm12 = vnez %v24613_v52  ;;  %v18825_v56 = vpack.c.bf16 %v6608_v47, %v6607_v61  ;;  %v7224_v9 = vld [vmem:[#allocation7 + $0x88] sm:$0xff] }
 0x4f7   : > { %18814 = vmatprep.subr.bf16.mxu1 %v18813_v38  ;;  %v7228_v61 = vld [vmem:[#allocation7 + $0xa8] sm:$0xff] }
 0x4f8   : > { %v24980_v47 = vld [vmem:[#allocation111_spill] sm:$0xff] }
 0x4f9   : > { %16649 = vmatmul.mubr.f32.gmra.mrb[10].mxu1 %v22018_v26  ;;  %v24958_v26 = vld [vmem:[#allocation86_spill] sm:$0xff] }
 0x4fa   : > { %16651 = vmatprep.mubr.msk.f32.mxu1 %vm24955_vm10, %v22021_v1  ;;  %18816 = vmatpush3.bf16.msra.mxu1 %v18813_v38  ;;  %v24959_v1 = vld [vmem:[#allocation87_spill] sm:$0xff]  ;;  %vm24965_vm10 = vnez %v24964_v22  ;;  %v18857_v38 = vpack.c.bf16 %v7224_v9, %v7223_v58  ;;  %v24985_v58 = vld [vmem:[#allocation116_spill] sm:$0xff] }
 0x4fb   : > { %18818 = vmatprep.subr.bf16.mxu1 %v18817_v4 }
 0x4fc   : > { %18858 = vmatprep.subr.bf16.mxu0 %v18857_v38 }
 0x4fd   : > { %16652 = vmatmul.mubr.f32.gmra.mrb[12].mxu1 %v22026_v15  ;;  %v24960_v15 = vld [vmem:[#allocation44_spill] sm:$0xff]  ;;  %18860 = vmatpush3.bf16.msra.mxu0 %v18857_v38  ;;  %v6618_v38 = vld [vmem:[#allocation9 + $0x458] sm:$0xff] }
 0x4fe   : > { %16654 = vmatprep.mubr.msk.f32.mxu1 %vm24956_vm12, %v22029_v43  ;;  %18820 = vmatpush3.bf16.msra.mxu1 %v18817_v4  ;;  %vm24961_vm12 = vnez %v24960_v15  ;;  %v24962_v43 = vld [vmem:[#allocation89_spill] sm:$0xff]  ;;  %v6611_v4 = vld [vmem:[#allocation9 + $0x420] sm:$0xff] }
 0x4ff   : > { %18822 = vmatprep.subr.bf16.mxu1 %v18821_v50  ;;  %18862 = vmatprep.subr.bf16.mxu0 %v18861_v18 }
 0x501   : > { %16655 = vmatmul.mubr.f32.gmra.mrb[14].mxu1 %v22034_v48  ;;  %v24963_v48 = vld [vmem:[#allocation90_spill] sm:$0xff]  ;;  %18864 = vmatpush3.bf16.msra.mxu0 %v18861_v18  ;;  %v6244_v18 = vld [vmem:[#allocation2 + $0x68] sm:$0xff] }
 0x502   : > { %16657 = vmatprep.mubr.msk.f32.mxu1 %vm24957_vm15, %v22037_v30  ;;  %18824 = vmatpush3.bf16.msra.mxu1 %v18821_v50  ;;  %v24966_v30 = vld [vmem:[#allocation91_spill] sm:$0xff]  ;;  %v7227_v50 = vld [vmem:[#allocation7 + $0xa0] sm:$0xff] }
 0x503   : > { %18826 = vmatprep.subr.bf16.mxu1 %v18825_v56 }
 0x505   : > { %16658 = vmatmul.mubr.f32.gmra.mrb[16].mxu1 %v22042_v33  ;;  %v8094_v33 = vld [vmem:[#allocation7 + $0x1a0] sm:$0xff] }
 0x506   : > { %16660 = vmatprep.mubr.msk.f32.mxu1 %vm24868_vm13, %v22045_v8  ;;  %v24970_v8 = vld [vmem:[#allocation51_spill] sm:$0xff] }
 0x509   : > { %16661 = vmatmul.mubr.f32.gmra.mrb[18].mxu1 %v24958_v26  ;;  %v24981_v26 = vld [vmem:[#allocation112_spill] sm:$0xff] }
 0x50a   : > { %16663 = vmatprep.mubr.msk.f32.mxu1 %vm24961_vm12, %v24959_v1  ;;  %vm24975_vm12 = vnez %v24974_v28  ;;  %v18833_v1 = vpack.c.bf16 %v6612_v54, %v6611_v4  ;;  %v24986_v4 = vld [vmem:[#allocation117_spill] sm:$0xff]  ;;  %v18845_v54 = vpack.c.bf16 %v6618_v38, %v6617_v34  ;;  %v6258_v34 = vld [vmem:[#allocation2 + $0xd8] sm:$0xff] }
 0x50b   : > { %v6260_v38 = vld [vmem:[#allocation2 + $0xe8] sm:$0xff] }
 0x50d   : > { %16664 = vmatmul.mubr.f32.gmra.mrb[20].mxu1 %v24962_v43  ;;  %v6613_v43 = vld [vmem:[#allocation9 + $0x430] sm:$0xff] }
 0x50e   : > { %16666 = vmatprep.mubr.msk.f32.mxu1 %vm24965_vm10, %v24963_v48  ;;  %vm24978_vm10 = vnez %v24977_v44  ;;  %v18865_v48 = vpack.c.bf16 %v7228_v61, %v7227_v50  ;;  %v6619_v50 = vld [vmem:[#allocation9 + $0x460] sm:$0xff] }
 0x510   : > { %18866 = vmatprep.subr.bf16.mxu0 %v18865_v48 }
 0x511   : > { %16667 = vmatmul.mubr.f32.gmra.mrb[22].mxu1 %v24966_v30  ;;  %v6614_v30 = vld [vmem:[#allocation9 + $0x438] sm:$0xff]  ;;  %18868 = vmatpush3.bf16.msra.mxu0 %v18865_v48 }
 0x512   : > { %16669 = vmatprep.mubr.msk.f32.mxu1 %vm24875_vm0, %v24967_v35  ;;  %v7229_v35 = vld [vmem:[#allocation7 + $0xb0] sm:$0xff] }
 0x515   : > { %16670 = vmatmul.mubr.f32.gmra.mrb[24].mxu1 %v24969_v27  ;;  %v7230_v27 = vld [vmem:[#allocation7 + $0xb8] sm:$0xff] }
 0x516   : > { %16672 = vmatprep.mubr.msk.f32.mxu1 %vm24834_vm4, %v24970_v8  ;;  %v24982_v8 = vld [vmem:[#allocation113_spill] sm:$0xff] }
 0x519   : > { %16673 = vmatmul.mubr.f32.gmra.mrb[26].mxu1 %v24972_v60  ;;  %v24983_v60 = vld [vmem:[#allocation114_spill] sm:$0xff] }
 0x51a   : > { %16675 = vmatprep.mubr.msk.f32.mxu1 %vm24975_vm12, %v24973_v14  ;;  %v18837_v14 = vpack.c.bf16 %v6614_v30, %v6613_v43  ;;  %v6246_v43 = vld [vmem:[#allocation2 + $0x78] sm:$0xff] }
 0x51d   : > { %16676 = vmatmul.mubr.f32.gmra.mrb[28].mxu1 %v24976_v36  ;;  %v6615_v36 = vld [vmem:[#allocation9 + $0x440] sm:$0xff] }
 0x51e   : > { %16678 = vmatprep.mubr.msk.f32.mxu1 %vm24978_vm10, %v5928_v51  ;;  %v18869_v51 = vpack.c.bf16 %v7230_v27, %v7229_v35  ;;  %v6247_v35 = vld [vmem:[#allocation2 + $0x80] sm:$0xff]  ;;  %vm24987_vm10 = vnez %v24784_v12 }
 0x51f   : > { %v6621_v27 = vld [vmem:[#allocation9 + $0x470] sm:$0xff] }
 0x520   : > { %18870 = vmatprep.subr.bf16.mxu0 %v18869_v51 }
 0x521   : > { %16679 = vmatmul.mubr.f32.gmra.mrb[30].mxu1 %v5929_v45  ;;  %v7231_v45 = vld [vmem:[#allocation7 + $0xc0] sm:$0xff]  ;;  %18872 = vmatpush3.bf16.msra.mxu0 %v18869_v51  ;;  %v6251_v51 = vld [vmem:[#allocation2 + $0xa0] sm:$0xff] }
 0x522   : > { %16713 = vmatprep.mubr.f32.mxu1 %v24979_v24  ;;  %v18873_v24 = vpack.c.bf16 %v7232_v11, %v7231_v45  ;;  %v6253_v45 = vld [vmem:[#allocation2 + $0xb0] sm:$0xff]  ;;  %v6254_v11 = vld [vmem:[#allocation2 + $0xb8] sm:$0xff] }
 0x524   : > { %18874 = vmatprep.subr.bf16.mxu0 %v18873_v24 }
 0x525   : > { %16714 = vmatmul.mubr.f32.vlgmr.msra.gmra.mrb[0].mxu1 %v24980_v47  ;;  %v6620_v47 = vld [vmem:[#allocation9 + $0x468] sm:$0xff]  ;;  %18876 = vmatpush3.bf16.msra.mxu0 %v18873_v24  ;;  %v6259_v24 = vld [vmem:[#allocation2 + $0xe0] sm:$0xff] }
 0x526   : > { %16716 = vmatprep.mubr.f32.mxu1 %v24981_v26  ;;  %18828 = vmatpush3.bf16.msra.mxu1 %v18825_v56  ;;  %v6616_v56 = vld [vmem:[#allocation9 + $0x448] sm:$0xff]  ;;  %v7235_v26 = vld [vmem:[#allocation7 + $0xe0] sm:$0xff]  ;;  %v18849_v48 = vpack.c.bf16 %v6620_v47, %v6619_v50  ;;  %v22464_v50 = vld [vmem:[#allocation2 + $0x8] sm:$0xff] }
 0x527   : > { %18830 = vmatprep.subr.bf16.mxu1 %v18829_v16  ;;  %v18841_v9 = vpack.c.bf16 %v6616_v56, %v6615_v36  ;;  %v6250_v36 = vld [vmem:[#allocation2 + $0x98] sm:$0xff]  ;;  %v6252_v56 = vld [vmem:[#allocation2 + $0xa8] sm:$0xff] }
 0x528   : > { %v6543_v47 = vld [vmem:[#allocation2 + $0x31] sm:$0xff] }
 0x529   : > { %16717 = vmatmul.mubr.f32.gmra.mrb[2].mxu1 %v24982_v8  ;;  %v6622_v8 = vld [vmem:[#allocation9 + $0x478] sm:$0xff] }
 0x52a   : > { %16719 = vmatprep.mubr.f32.mxu1 %v24983_v60  ;;  %18832 = vmatpush3.bf16.msra.mxu1 %v18829_v16  ;;  %v7234_v16 = vld [vmem:[#allocation7 + $0xd8] sm:$0xff] }
 0x52b   : > { %18834 = vmatprep.subr.bf16.mxu1 %v18833_v1  ;;  %v18877_v61 = vpack.c.bf16 %v7234_v16, %v7233_v29  ;;  %v6248_v60 = vld [vmem:[#allocation2 + $0x88] sm:$0xff]  ;;  %v6261_v29 = vld [vmem:[#allocation2 + $0xf0] sm:$0xff]  ;;  %v6262_v16 = vld [vmem:[#allocation2 + $0xf8] sm:$0xff] }
 0x52d   : > { %16720 = vmatmul.mubr.f32.gmra.mrb[4].mxu1 %v24984_v63  ;;  %18878 = vmatprep.subr.bf16.mxu0 %v18877_v61  ;;  %v6255_v63 = vld [vmem:[#allocation2 + $0xc0] sm:$0xff] }
 0x52e   : > { %16722 = vmatprep.mubr.f32.mxu1 %v24985_v58  ;;  %18836 = vmatpush3.bf16.msra.mxu1 %v18833_v1  ;;  %v7236_v1 = vld [vmem:[#allocation7 + $0xe8] sm:$0xff]  ;;  %v6256_v58 = vld [vmem:[#allocation2 + $0xc8] sm:$0xff] }
 0x52f   : > { %18838 = vmatprep.subr.bf16.mxu1 %v18837_v14  ;;  %v18881_v30 = vpack.c.bf16 %v7236_v1, %v7235_v26  ;;  %18880 = vmatpush3.bf16.msra.mxu0 %v18877_v61  ;;  %v6542_v61 = vld [vmem:[#allocation2 + $0x29] sm:$0xff]  ;;  %v6544_v26 = vld [vmem:[#allocation2 + $0x39] sm:$0xff]  ;;  %v6545_v1 = vld [vmem:[#allocation2 + $0x41] sm:$0xff] }
 0x531   : > { %16723 = vmatmul.mubr.f32.gmra.mrb[6].mxu1 %v24986_v4  ;;  %18882 = vmatprep.subr.bf16.mxu0 %v18881_v30  ;;  %v6263_v4 = vld [vmem:[#allocation2 + $0x100] sm:$0xff] }
 0x532   : > { %16725 = vmatprep.mubr.f32.mxu1 %v6244_v18  ;;  %18840 = vmatpush3.bf16.msra.mxu1 %v18837_v14  ;;  %v18853_v14 = vpack.c.bf16 %v6622_v8, %v6621_v27  ;;  %v6264_v18 = vld [vmem:[#allocation2 + $0x108] sm:$0xff]  ;;  %v6551_v8 = vld [vmem:[#allocation2 + $0x71] sm:$0xff] }
 0x533   : > { %18842 = vmatprep.subr.bf16.mxu1 %v18841_v9  ;;  %18884 = vmatpush3.bf16.msra.mxu0 %v18881_v30  ;;  %v6548_v30 = vld [vmem:[#allocation2 + $0x59] sm:$0xff]  ;;  %v6550_v27 = vld [vmem:[#allocation2 + $0x69] sm:$0xff] }
 0x535   : > { %16726 = vmatmul.mubr.f32.gmra.mrb[8].mxu1 %v22300_v55  ;;  %v6249_v55 = vld [vmem:[#allocation2 + $0x90] sm:$0xff] }
 0x536   : > { %16728 = vmatprep.mubr.f32.mxu1 %v6246_v43  ;;  %18844 = vmatpush3.bf16.msra.mxu1 %v18841_v9  ;;  %v6257_v9 = vld [vmem:[#allocation2 + $0xd0] sm:$0xff] }
 0x537   : > { %18846 = vmatprep.subr.bf16.mxu1 %v18845_v54  ;;  %v6546_v43 = vld [vmem:[#allocation2 + $0x49] sm:$0xff] }
 0x539   : > { %16729 = vmatmul.mubr.f32.gmra.mrb[10].mxu1 %v6247_v35  ;;  %v6549_v35 = vld [vmem:[#allocation2 + $0x61] sm:$0xff] }
 0x53a   : > { %16731 = vmatprep.mubr.f32.mxu1 %v6248_v60  ;;  %18848 = vmatpush3.bf16.msra.mxu1 %v18845_v54  ;;  %v6265_v54 = vld [vmem:[#allocation2 + $0x110] sm:$0xff]  ;;  %v6552_v60 = vld [vmem:[#allocation2 + $0x79] sm:$0xff] }
 0x53b   : > { %18850 = vmatprep.subr.bf16.mxu1 %v18849_v48 }
 0x53d   : > { %16732 = vmatmul.mubr.f32.gmra.mrb[12].mxu1 %v6249_v55  ;;  %v6554_v55 = vld [vmem:[#allocation2 + $0x89] sm:$0xff] }
 0x53e   : > { %16734 = vmatprep.mubr.f32.mxu1 %v6250_v36  ;;  %18852 = vmatpush3.bf16.msra.mxu1 %v18849_v48  ;;  %v6547_v48 = vld [vmem:[#allocation2 + $0x51] sm:$0xff] }
 0x53f   : > { %18854 = vmatprep.subr.bf16.mxu1 %v18853_v14  ;;  %v6555_v36 = vld [vmem:[#allocation2 + $0x91] sm:$0xff] }
 0x541   : > { %16735 = vmatmul.mubr.f32.gmra.mrb[14].mxu1 %v6251_v51  ;;  %v6556_v51 = vld [vmem:[#allocation2 + $0x99] sm:$0xff] }
 0x542   : > { %16737 = vmatprep.mubr.f32.mxu1 %v6252_v56  ;;  %18856 = vmatpush3.bf16.msra.mxu1 %v18853_v14  ;;  %v6553_v14 = vld [vmem:[#allocation2 + $0x81] sm:$0xff] }
 0x543   : > { %v6557_v56 = vld [vmem:[#allocation2 + $0xa1] sm:$0xff] }
 0x545   : > { %16738 = vmatmul.mubr.f32.gmra.mrb[16].mxu1 %v6253_v45  ;;  %v6558_v45 = vld [vmem:[#allocation2 + $0xa9] sm:$0xff] }
 0x546   : > { %16740 = vmatprep.mubr.f32.mxu1 %v6254_v11  ;;  %v6559_v11 = vld [vmem:[#allocation2 + $0xb1] sm:$0xff] }
 0x549   : > { %16741 = vmatmul.mubr.f32.gmra.mrb[18].mxu1 %v6255_v63  ;;  %v6560_v63 = vld [vmem:[#allocation2 + $0xb9] sm:$0xff] }
 0x54a   : > { %16743 = vmatprep.mubr.f32.mxu1 %v6256_v58  ;;  %v6561_v58 = vld [vmem:[#allocation2 + $0xc1] sm:$0xff] }
 0x54d   : > { %16744 = vmatmul.mubr.f32.gmra.mrb[20].mxu1 %v6257_v9  ;;  %v6562_v9 = vld [vmem:[#allocation2 + $0xc9] sm:$0xff] }
 0x54e   : > { %16746 = vmatprep.mubr.f32.mxu1 %v6258_v34  ;;  %v6563_v34 = vld [vmem:[#allocation2 + $0xd1] sm:$0xff] }
 0x551   : > { %16747 = vmatmul.mubr.f32.gmra.mrb[22].mxu1 %v6259_v24  ;;  %v6564_v24 = vld [vmem:[#allocation2 + $0xd9] sm:$0xff] }
 0x552   : > { %16749 = vmatprep.mubr.f32.mxu1 %v6260_v38  ;;  %v6565_v38 = vld [vmem:[#allocation2 + $0xe1] sm:$0xff] }
 0x555   : > { %16750 = vmatmul.mubr.f32.gmra.mrb[24].mxu1 %v6261_v29  ;;  %v6566_v29 = vld [vmem:[#allocation2 + $0xe9] sm:$0xff] }
 0x556   : > { %16752 = vmatprep.mubr.f32.mxu1 %v6262_v16  ;;  %v6567_v16 = vld [vmem:[#allocation2 + $0xf1] sm:$0xff] }
 0x559   : > { %16753 = vmatmul.mubr.f32.gmra.mrb[26].mxu1 %v6263_v4  ;;  %v6568_v4 = vld [vmem:[#allocation2 + $0xf9] sm:$0xff] }
 0x55a   : > { %16755 = vmatprep.mubr.f32.mxu1 %v6264_v18  ;;  %v6569_v18 = vld [vmem:[#allocation2 + $0x101] sm:$0xff] }
 0x55d   : > { %16756 = vmatmul.mubr.f32.gmra.mrb[28].mxu1 %v6265_v54  ;;  %v6572_v54 = vld [vmem:[#allocation2 + $0x119] sm:$0xff] }
 0x55e   : > { %16758 = vmatprep.mubr.f32.mxu1 %v22464_v50 }
 0x561   : > { %16759 = vmatmul.mubr.f32.gmra.mrb[30].mxu1 %v22464_v50 }
 0x562   : > { %16793 = vmatprep.mubr.f32.mxu1 %v6542_v61  ;;  %v6573_v61 = vld [vmem:[#allocation2 + $0x121] sm:$0xff] }
 0x565   : > { %16794 = vmatmul.mubr.msk.f32.vlgmr.msra.gmra.mrb[0].mxu1 %vm24987_vm10, %v6543_v47  ;;  %v7237_v47 = vld [vmem:[#allocation7 + $0xf0] sm:$0xff] }
 0x566   : > { %16796 = vmatprep.mubr.f32.mxu1 %v6544_v26  ;;  %v7238_v26 = vld [vmem:[#allocation7 + $0xf8] sm:$0xff] }
 0x569   : > { %16797 = vmatmul.mubr.msk.f32.gmra.mrb[2].mxu1 %vm24921_vm1, %v6545_v1  ;;  %v18885_v1 = vpack.c.bf16 %v7238_v26, %v7237_v47 }
 0x56a   : > { %16799 = vmatprep.mubr.f32.mxu1 %v6546_v43  ;;  %v7176_v43 = vld [vmem:[#allocation7 + $0x8] sm:$0xff] }
 0x56b   : > { %18886 = vmatprep.subr.bf16.mxu0 %v18885_v1 }
 0x56c   : > { %18888 = vmatpush3.bf16.msra.mxu0 %v18885_v1 }
 0x56d   : > { %16800 = vmatmul.mubr.msk.f32.gmra.mrb[4].mxu1 %vm24924_vm14, %v6547_v48 }
 0x56e   : > { %16802 = vmatprep.mubr.f32.mxu1 %v6548_v30  ;;  %v7178_v30 = vld [vmem:[#allocation7 + $0x18] sm:$0xff] }
 0x56f   : > { %16874 = vmatmul.mubr.f32.vlgmr.msra.gmra.mrb[32].mxu0 %v22464_v50 }
 0x571   : > { %16803 = vmatmul.mubr.msk.f32.gmra.mrb[6].mxu1 %vm24847_vm3, %v6549_v35 }
 0x572   : > { %16805 = vmatprep.mubr.f32.mxu1 %v6550_v27  ;;  %v7179_v27 = vld [vmem:[#allocation7 + $0x20] sm:$0xff] }
 0x575   : > { %16806 = vmatmul.mubr.msk.f32.gmra.mrb[8].mxu1 %vm24849_vm2, %v6551_v8  ;;  %v7180_v8 = vld [vmem:[#allocation7 + $0x28] sm:$0xff] }
 0x576   : > { %16808 = vmatprep.mubr.f32.mxu1 %v6552_v60  ;;  %v18897_v60 = vpack.c.bf16 %v7180_v8, %v7179_v27 }
 0x579   : > { %16809 = vmatmul.mubr.msk.f32.gmra.mrb[10].mxu1 %vm24791_vm7, %v6553_v14  ;;  %v7181_v14 = vld [vmem:[#allocation7 + $0x30] sm:$0xff] }
 0x57a   : > { %16811 = vmatprep.mubr.f32.mxu1 %v6554_v55  ;;  %v7182_v55 = vld [vmem:[#allocation7 + $0x38] sm:$0xff] }
 0x57d   : > { %16812 = vmatmul.mubr.msk.f32.gmra.mrb[12].mxu1 %vm24792_vm6, %v6555_v36  ;;  %vm24988_vm6 = vnez %v24935_v32  ;;  %v18901_v36 = vpack.c.bf16 %v7182_v55, %v7181_v14  ;;  %v24997_v55 = vld [vmem:[#allocation17_spill] sm:$0xff] }
 0x57e   : > { %16814 = vmatprep.mubr.f32.mxu1 %v6556_v51  ;;  %v7184_v51 = vld [vmem:[#allocation7 + $0x48] sm:$0xff] }
 0x581   : > { %16815 = vmatmul.mubr.msk.f32.gmra.mrb[14].mxu1 %vm24793_vm8, %v6557_v56 }
 0x582   : > { %16817 = vmatprep.mubr.f32.mxu1 %v6558_v45  ;;  %v7185_v45 = vld [vmem:[#allocation7 + $0x50] sm:$0xff] }
 0x585   : > { %16818 = vmatmul.mubr.msk.f32.gmra.mrb[16].mxu1 %vm24794_vm5, %v6559_v11  ;;  %vm24989_vm5 = vnez %v24941_v57  ;;  %v7186_v11 = vld [vmem:[#allocation7 + $0x58] sm:$0xff] }
 0x586   : > { %16820 = vmatprep.mubr.f32.mxu1 %v6560_v63  ;;  %v18909_v63 = vpack.c.bf16 %v7186_v11, %v7185_v45 }
 0x589   : > { %16821 = vmatmul.mubr.msk.f32.gmra.mrb[18].mxu1 %vm24752_vm11, %v6561_v58  ;;  %vm24990_vm11 = vnez %v24944_v13  ;;  %v7187_v58 = vld [vmem:[#allocation7 + $0x60] sm:$0xff] }
 0x58a   : > { %16823 = vmatprep.mubr.f32.mxu1 %v6562_v9  ;;  %v7188_v9 = vld [vmem:[#allocation7 + $0x68] sm:$0xff] }
 0x58d   : > { %16824 = vmatmul.mubr.msk.f32.gmra.mrb[20].mxu1 %vm24988_vm6, %v6563_v34  ;;  %vm24991_vm6 = vnez %v24946_v5  ;;  %v18913_v34 = vpack.c.bf16 %v7188_v9, %v7187_v58 }
 0x58e   : > { %16826 = vmatprep.mubr.f32.mxu1 %v6564_v24  ;;  %v7189_v24 = vld [vmem:[#allocation7 + $0x70] sm:$0xff] }
 0x591   : > { %16827 = vmatmul.mubr.msk.f32.gmra.mrb[22].mxu1 %vm24760_vm9, %v6565_v38  ;;  %vm24992_vm9 = vnez %v24799_v46  ;;  %v7190_v38 = vld [vmem:[#allocation7 + $0x78] sm:$0xff] }
 0x592   : > { %16829 = vmatprep.mubr.f32.mxu1 %v6566_v29  ;;  %v18917_v29 = vpack.c.bf16 %v7190_v38, %v7189_v24  ;;  %v25002_v38 = vld [vmem:[#allocation18_spill] sm:$0xff] }
 0x595   : > { %16830 = vmatmul.mubr.msk.f32.gmra.mrb[24].mxu1 %vm24989_vm5, %v6567_v16  ;;  %v7753_v16 = vld [vmem:[#allocation7 + $0x100] sm:$0xff] }
 0x596   : > { %16832 = vmatprep.mubr.f32.mxu1 %v6568_v4  ;;  %v7754_v4 = vld [vmem:[#allocation7 + $0x108] sm:$0xff] }
 0x599   : > { %16833 = vmatmul.mubr.msk.f32.gmra.mrb[26].mxu1 %vm24990_vm11, %v6569_v18  ;;  %v22504_v18 = vpack.c.bf16 %v7754_v4, %v7753_v16 }
 0x59a   : > { %16835 = vmatprep.mubr.f32.mxu1 %v22385_v31  ;;  %v7175_v31 = vld [vmem:[#allocation7] sm:$0xff] }
 0x59b   : > { %v18889_v48 = vpack.c.bf16 %v7176_v43, %v7175_v31  ;;  %v24993_v31 = vld [vmem:[#allocation15_spill] sm:$0xff] }
 0x59d   : > { %16836 = vmatmul.mubr.msk.f32.gmra.mrb[28].mxu1 %vm24991_vm6, %v22388_v39  ;;  %18890 = vmatprep.subr.bf16.mxu0 %v18889_v48  ;;  %v7177_v39 = vld [vmem:[#allocation7 + $0x10] sm:$0xff]  ;;  %vm25058_vm6 = vnez %v24821_v62 }
 0x59e   : > { %16838 = vmatprep.mubr.f32.mxu1 %v6572_v54  ;;  %18892 = vmatpush3.bf16.msra.mxu0 %v18889_v48  ;;  %v18893_v35 = vpack.c.bf16 %v7178_v30, %v7177_v39  ;;  %v22510_v54 = vld [vmem:[%s24078_s4] ss:$0 sm:$0xff]  ;;  %v24994_v48 = vld [vmem:[#allocation14_spill] sm:$0xff] }
 0x5a0   : > { %18894 = vmatprep.subr.bf16.mxu0 %v18893_v35 }
 0x5a1   : > { %16839 = vmatmul.mubr.msk.f32.gmra.mrb[30].mxu1 %vm24992_vm9, %v6573_v61  ;;  %vm25057_vm9 = vnez %v24598_v53 }
 0x5a2   : > { %17593 = vmatprep.mubr.f32.mxu1 %v22464_v50  ;;  %18896 = vmatpush3.bf16.msra.mxu0 %v18893_v35  ;;  %v7183_v50 = vld [vmem:[#allocation7 + $0x40] sm:$0xff] }
 0x5a3   : > { %18898 = vmatprep.subr.bf16.mxu0 %v18897_v60  ;;  %v18905_v56 = vpack.c.bf16 %v7184_v51, %v7183_v50  ;;  %v24998_v50 = vld [vmem:[#allocation16_spill] sm:$0xff] }
 0x5a6   : > { %18900 = vmatpush3.bf16.msra.mxu0 %v18897_v60 }
 0x5a7   : > { %18902 = vmatprep.subr.bf16.mxu0 %v18901_v36 }
 0x5aa   : > { %18904 = vmatpush3.bf16.msra.mxu0 %v18901_v36 }
 0x5ab   : > { %18906 = vmatprep.subr.bf16.mxu0 %v18905_v56 }
 0x5ae   : > { %18908 = vmatpush3.bf16.msra.mxu0 %v18905_v56 }
 0x5af   : > { %18910 = vmatprep.subr.bf16.mxu0 %v18909_v63 }
 0x5b2   : > { %18912 = vmatpush3.bf16.msra.mxu0 %v18909_v63 }
 0x5b3   : > { %18914 = vmatprep.subr.bf16.mxu0 %v18913_v34 }
 0x5b6   : > { %18916 = vmatpush3.bf16.msra.mxu0 %v18913_v34  ;;  %v25001_v34 = vld [vmem:[#allocation19_spill] sm:$0xff] }
 0x5b7   : > { %18918 = vmatprep.subr.bf16.mxu0 %v18917_v29 }
 0x5ba   : > { %18920 = vmatpush3.bf16.msra.mxu0 %v18917_v29 }
 0x5bb   : > { %18922 = vmatprep.subr.bf16.mxu0 %v22504_v18 }
 0x638   : > { %v16795_v61 = vpop.f32.mrb[0].mxu1 }
 0x639   : > { %v6888_v47 = vadd.f32 %v16795_v61, %v22510_v54  ;;  %v6689_v26 = vpop.f32.mrb[1].mxu1 }
 0x63a   : > { %v6887_v1 = vadd.f32 %v22510_v54, %v6689_v26 }
 0x63b   : > { %v6952_v43 = vadd.f32 %v6888_v47, %v24993_v31  ;;  %v25005_v31 = vld [vmem:[#allocation21_spill] sm:$0xff] }
 0x63c   : > { %v6951_v39 = vadd.f32 %v6887_v1, %v24994_v48  ;;  %v16798_v30 = vpop.f32.mrb[2].mxu1  ;;  %v25006_v48 = vld [vmem:[#allocation20_spill] sm:$0xff] }
 0x63d   : > { %v22516_v35 = vmax.f32 %v6952_v43, 0.0  ;;  %v6890_v27 = vadd.f32 %v16798_v30, %v22510_v54  ;;  %v6699_v8 = vpop.f32.mrb[3].mxu1 }
 0x63e   : > { %v22519_v60 = vmax.f32 %v6951_v39, 0.0  ;;  %v6889_v14 = vadd.f32 %v22510_v54, %v6699_v8 }
 0x63f   : > { %24995 = vst [vmem:[#allocation54_spill] sm:$0xff] %v22516_v35  ;;  %7080 = vst [vmem:[#allocation2 + $0x20] sm:$0xff] %v22516_v35  ;;  %v6954_v36 = vadd.f32 %v6890_v27, %v24997_v55 }
 0x640   : > { %24996 = vst [vmem:[#allocation57_spill] sm:$0xff] %v22519_v60  ;;  %7079 = vst [vmem:[#allocation2 + $0x18] sm:$0xff] %v22519_v60  ;;  %v6953_v51 = vadd.f32 %v6889_v14, %v24998_v50  ;;  %v16801_v56 = vpop.f32.mrb[4].mxu1  ;;  %16876 = vmatprep.mubr.f32.mxu0 %v22519_v60  ;;  %v25009_v50 = vld [vmem:[#allocation23_spill] sm:$0xff]  ;;  %v7764_v60 = vld [vmem:[#allocation7 + $0x158] sm:$0xff] }
 0x641   : > { %v22527_v45 = vmax.f32 %v6954_v36, 0.0  ;;  %v6892_v11 = vadd.f32 %v16801_v56, %v22510_v54  ;;  %v6709_v63 = vpop.f32.mrb[5].mxu1  ;;  %16877 = vmatmul.mubr.f32.gmra.mrb[34].mxu0 %v22516_v35  ;;  %v25010_v56 = vld [vmem:[#allocation22_spill] sm:$0xff] }
 0x642   : > { %v22531_v58 = vmax.f32 %v6953_v51, 0.0  ;;  %v6891_v9 = vadd.f32 %v22510_v54, %v6709_v63 }
 0x643   : > { %24999 = vst [vmem:[#allocation55_spill] sm:$0xff] %v22527_v45  ;;  %7082 = vst [vmem:[#allocation2 + $0x30] sm:$0xff] %v22527_v45  ;;  %v6956_v24 = vadd.f32 %v6892_v11, %v25001_v34 }
 0x644   : > { %25000 = vst [vmem:[#allocation60_spill] sm:$0xff] %v22531_v58  ;;  %7081 = vst [vmem:[#allocation2 + $0x28] sm:$0xff] %v22531_v58  ;;  %v6955_v29 = vadd.f32 %v6891_v9, %v25002_v38  ;;  %v16804_v16 = vpop.f32.mrb[6].mxu1  ;;  %16879 = vmatprep.mubr.f32.mxu0 %v22531_v58  ;;  %v7762_v58 = vld [vmem:[#allocation7 + $0x148] sm:$0xff] }
 0x645   : > { %v22539_v4 = vmax.f32 %v6956_v24, 0.0  ;;  %v6894_v61 = vadd.f32 %v16804_v16, %v22510_v54  ;;  %v6719_v47 = vpop.f32.mrb[7].mxu1  ;;  %16880 = vmatmul.mubr.f32.gmra.mrb[36].mxu0 %v22527_v45  ;;  %v25013_v16 = vld [vmem:[#allocation25_spill] sm:$0xff] }
 0x646   : > { %v22543_v26 = vmax.f32 %v6955_v29, 0.0  ;;  %v6893_v1 = vadd.f32 %v22510_v54, %v6719_v47  ;;  %v25014_v47 = vld [vmem:[#allocation24_spill] sm:$0xff] }
 0x647   : > { %25003 = vst [vmem:[#allocation58_spill] sm:$0xff] %v22539_v4  ;;  %7084 = vst [vmem:[#allocation2 + $0x40] sm:$0xff] %v22539_v4  ;;  %v6958_v43 = vadd.f32 %v6894_v61, %v25005_v31 }
 0x648   : > { %25004 = vst [vmem:[#allocation63_spill] sm:$0xff] %v22543_v26  ;;  %7083 = vst [vmem:[#allocation2 + $0x38] sm:$0xff] %v22543_v26  ;;  %v6957_v39 = vadd.f32 %v6893_v1, %v25006_v48  ;;  %v16807_v30 = vpop.f32.mrb[8].mxu1  ;;  %16882 = vmatprep.mubr.f32.mxu0 %v22543_v26  ;;  %v7111_v26 = vld [vmem:[#allocation2 + $0x7] sm:$0xff] }
 0x649   : > { %v22551_v27 = vmax.f32 %v6958_v43, 0.0  ;;  %v6896_v8 = vadd.f32 %v16807_v30, %v22510_v54  ;;  %v6729_v14 = vpop.f32.mrb[9].mxu1  ;;  %16883 = vmatmul.mubr.f32.gmra.mrb[38].mxu0 %v22539_v4 }
 0x64a   : > { %v22555_v55 = vmax.f32 %v6957_v39, 0.0  ;;  %v6895_v36 = vadd.f32 %v22510_v54, %v6729_v14  ;;  %v25017_v14 = vld [vmem:[#allocation27_spill] sm:$0xff] }
 0x64b   : > { %25007 = vst [vmem:[#allocation61_spill] sm:$0xff] %v22551_v27  ;;  %7086 = vst [vmem:[#allocation2 + $0x50] sm:$0xff] %v22551_v27  ;;  %v6960_v51 = vadd.f32 %v6896_v8, %v25009_v50  ;;  %v25018_v50 = vld [vmem:[#allocation26_spill] sm:$0xff] }
 0x64c   : > { %25008 = vst [vmem:[#allocation66_spill] sm:$0xff] %v22555_v55  ;;  %7085 = vst [vmem:[#allocation2 + $0x48] sm:$0xff] %v22555_v55  ;;  %v6959_v11 = vadd.f32 %v6895_v36, %v25010_v56  ;;  %v16810_v63 = vpop.f32.mrb[10].mxu1  ;;  %16885 = vmatprep.mubr.f32.mxu0 %v22555_v55 }
 0x64d   : > { %v22563_v9 = vmax.f32 %v6960_v51, 0.0  ;;  %v6898_v34 = vadd.f32 %v16810_v63, %v22510_v54  ;;  %v6739_v24 = vpop.f32.mrb[11].mxu1  ;;  %16886 = vmatmul.mubr.f32.gmra.mrb[40].mxu0 %v22551_v27 }
 0x64e   : > { %v22567_v38 = vmax.f32 %v6959_v11, 0.0  ;;  %v6897_v29 = vadd.f32 %v22510_v54, %v6739_v24 }
 0x64f   : > { %25011 = vst [vmem:[#allocation64_spill] sm:$0xff] %v22563_v9  ;;  %7088 = vst [vmem:[#allocation2 + $0x60] sm:$0xff] %v22563_v9  ;;  %v6962_v61 = vadd.f32 %v6898_v34, %v25013_v16  ;;  %v25021_v16 = vld [vmem:[#allocation29_spill] sm:$0xff]  ;;  %v22726_v45 = vld [vmem:[#allocation2 + $0x3f] sm:$0xff] }
 0x650   : > { %25012 = vst [vmem:[#allocation68_spill] sm:$0xff] %v22567_v38  ;;  %7087 = vst [vmem:[#allocation2 + $0x58] sm:$0xff] %v22567_v38  ;;  %v6961_v1 = vadd.f32 %v6897_v29, %v25014_v47  ;;  %v16813_v31 = vpop.f32.mrb[12].mxu1  ;;  %16888 = vmatprep.mubr.f32.mxu0 %v22567_v38  ;;  %v25022_v47 = vld [vmem:[#allocation28_spill] sm:$0xff] }
 0x651   : > { %v22575_v43 = vmax.f32 %v6962_v61, 0.0  ;;  %v6900_v48 = vadd.f32 %v16813_v31, %v22510_v54  ;;  %v6749_v39 = vpop.f32.mrb[13].mxu1  ;;  %16889 = vmatmul.mubr.f32.gmra.mrb[42].mxu0 %v22563_v9 }
 0x652   : > { %v22579_v30 = vmax.f32 %v6961_v1, 0.0  ;;  %v6899_v8 = vadd.f32 %v22510_v54, %v6749_v39 }
 0x653   : > { %25015 = vst [vmem:[#allocation67_spill] sm:$0xff] %v22575_v43  ;;  %7090 = vst [vmem:[#allocation2 + $0x70] sm:$0xff] %v22575_v43  ;;  %v6964_v36 = vadd.f32 %v6900_v48, %v25017_v14  ;;  %v22734_v35 = vld [vmem:[#allocation2 + $0x4f] sm:$0xff]  ;;  %v22846_v17 = vld [vmem:[#allocation2 + $0x41] sm:$0xff] }
 0x654   : > { %25016 = vst [vmem:[#allocation72_spill] sm:$0xff] %v22579_v30  ;;  %7089 = vst [vmem:[#allocation2 + $0x68] sm:$0xff] %v22579_v30  ;;  %v6963_v51 = vadd.f32 %v6899_v8, %v25018_v50  ;;  %v16816_v56 = vpop.f32.mrb[14].mxu1  ;;  %16891 = vmatprep.mubr.f32.mxu0 %v22579_v30  ;;  %v25025_v50 = vld [vmem:[#allocation31_spill] sm:$0xff] }
 0x655   : > { %v22587_v11 = vmax.f32 %v6964_v36, 0.0  ;;  %v6902_v63 = vadd.f32 %v16816_v56, %v22510_v54  ;;  %v6759_v34 = vpop.f32.mrb[15].mxu1  ;;  %16892 = vmatmul.mubr.f32.gmra.mrb[44].mxu0 %v22575_v43  ;;  %v25026_v56 = vld [vmem:[#allocation30_spill] sm:$0xff] }
 0x656   : > { %v22591_v24 = vmax.f32 %v6963_v51, 0.0  ;;  %v6901_v29 = vadd.f32 %v22510_v54, %v6759_v34 }
 0x657   : > { %25019 = vst [vmem:[#allocation70_spill] sm:$0xff] %v22587_v11  ;;  %7092 = vst [vmem:[#allocation2 + $0x80] sm:$0xff] %v22587_v11  ;;  %v6966_v61 = vadd.f32 %v6902_v63, %v25021_v16  ;;  %v22854_v21 = vld [vmem:[#allocation2 + $0x51] sm:$0xff] }
 0x658   : > { %25020 = vst [vmem:[#allocation75_spill] sm:$0xff] %v22591_v24  ;;  %7091 = vst [vmem:[#allocation2 + $0x78] sm:$0xff] %v22591_v24  ;;  %v6965_v1 = vadd.f32 %v6901_v29, %v25022_v47  ;;  %v16819_v31 = vpop.f32.mrb[16].mxu1  ;;  %16894 = vmatprep.mubr.f32.mxu0 %v22591_v24 }
 0x659   : > { %v22599_v48 = vmax.f32 %v6966_v61, 0.0  ;;  %v6904_v39 = vadd.f32 %v16819_v31, %v22510_v54  ;;  %v6769_v8 = vpop.f32.mrb[17].mxu1  ;;  %16895 = vmatmul.mubr.f32.gmra.mrb[46].mxu0 %v22587_v11  ;;  %v25029_v31 = vld [vmem:[#allocation33_spill] sm:$0xff] }
 0x65a   : > { %v22603_v14 = vmax.f32 %v6965_v1, 0.0  ;;  %v6903_v36 = vadd.f32 %v22510_v54, %v6769_v8  ;;  %v25030_v8 = vld [vmem:[#allocation32_spill] sm:$0xff] }
 0x65b   : > { %25023 = vst [vmem:[#allocation73_spill] sm:$0xff] %v22599_v48  ;;  %7094 = vst [vmem:[#allocation2 + $0x90] sm:$0xff] %v22599_v48  ;;  %v6968_v51 = vadd.f32 %v6904_v39, %v25025_v50  ;;  %v22862_v37 = vld [vmem:[#allocation2 + $0x61] sm:$0xff] }
 0x65c   : > { %25024 = vst [vmem:[#allocation78_spill] sm:$0xff] %v22603_v14  ;;  %7093 = vst [vmem:[#allocation2 + $0x88] sm:$0xff] %v22603_v14  ;;  %v6967_v63 = vadd.f32 %v6903_v36, %v25026_v56  ;;  %v16822_v34 = vpop.f32.mrb[18].mxu1  ;;  %16897 = vmatprep.mubr.f32.mxu0 %v22603_v14 }
 0x65d   : > { %v22611_v29 = vmax.f32 %v6968_v51, 0.0  ;;  %v6906_v16 = vadd.f32 %v16822_v34, %v22510_v54  ;;  %v6779_v61 = vpop.f32.mrb[19].mxu1  ;;  %16898 = vmatmul.mubr.f32.gmra.mrb[48].mxu0 %v22599_v48 }
 0x65e   : > { %v22615_v47 = vmax.f32 %v6967_v63, 0.0  ;;  %v6905_v1 = vadd.f32 %v22510_v54, %v6779_v61 }
 0x65f   : > { %25027 = vst [vmem:[#allocation76_spill] sm:$0xff] %v22611_v29  ;;  %7096 = vst [vmem:[#allocation2 + $0xa0] sm:$0xff] %v22611_v29  ;;  %v6970_v39 = vadd.f32 %v6906_v16, %v25029_v31  ;;  %v25033_v16 = vld [vmem:[#allocation35_spill] sm:$0xff] }
 0x660   : > { %25028 = vst [vmem:[#allocation81_spill] sm:$0xff] %v22615_v47  ;;  %7095 = vst [vmem:[#allocation2 + $0x98] sm:$0xff] %v22615_v47  ;;  %v6969_v36 = vadd.f32 %v6905_v1, %v25030_v8  ;;  %v16825_v50 = vpop.f32.mrb[20].mxu1  ;;  %16900 = vmatprep.mubr.f32.mxu0 %v22615_v47  ;;  %v25034_v1 = vld [vmem:[#allocation34_spill] sm:$0xff] }
 0x661   : > { %v22623_v51 = vmax.f32 %v6970_v39, 0.0  ;;  %v6908_v56 = vadd.f32 %v16825_v50, %v22510_v54  ;;  %v6789_v34 = vpop.f32.mrb[21].mxu1  ;;  %16901 = vmatmul.mubr.f32.gmra.mrb[50].mxu0 %v22611_v29  ;;  %v7689_v29 = vld [vmem:[#allocation2 + $0x9] sm:$0xff]  ;;  %v22870_v7 = vld [vmem:[#allocation2 + $0x71] sm:$0xff] }
 0x662   : > { %v22627_v63 = vmax.f32 %v6969_v36, 0.0  ;;  %v6907_v61 = vadd.f32 %v22510_v54, %v6789_v34 }
 0x663   : > { %25031 = vst [vmem:[#allocation79_spill] sm:$0xff] %v22623_v51  ;;  %7098 = vst [vmem:[#allocation2 + $0xb0] sm:$0xff] %v22623_v51  ;;  %v6972_v31 = vadd.f32 %v6908_v56, %v25033_v16  ;;  %v25037_v56 = vld [vmem:[#allocation37_spill] sm:$0xff] }
 0x664   : > { %25032 = vst [vmem:[#allocation84_spill] sm:$0xff] %v22627_v63  ;;  %7097 = vst [vmem:[#allocation2 + $0xa8] sm:$0xff] %v22627_v63  ;;  %v6971_v8 = vadd.f32 %v6907_v61, %v25034_v1  ;;  %v16828_v14 = vpop.f32.mrb[22].mxu1  ;;  %16903 = vmatprep.mubr.f32.mxu0 %v22627_v63  ;;  %v25038_v61 = vld [vmem:[#allocation36_spill] sm:$0xff] }
 0x665   : > { %v22635_v39 = vmax.f32 %v6972_v31, 0.0  ;;  %v6910_v50 = vadd.f32 %v16828_v14, %v22510_v54  ;;  %v6799_v48 = vpop.f32.mrb[23].mxu1  ;;  %16904 = vmatmul.mubr.f32.gmra.mrb[52].mxu0 %v22623_v51  ;;  %v22878_v49 = vld [vmem:[#allocation2 + $0x81] sm:$0xff] }
 0x666   : > { %v22639_v36 = vmax.f32 %v6971_v8, 0.0  ;;  %v6909_v34 = vadd.f32 %v22510_v54, %v6799_v48 }
 0x667   : > { %25035 = vst [vmem:[#allocation82_spill] sm:$0xff] %v22635_v39  ;;  %7100 = vst [vmem:[#allocation2 + $0xc0] sm:$0xff] %v22635_v39  ;;  %v6974_v16 = vadd.f32 %v6910_v50, %v25037_v56  ;;  %v25041_v50 = vld [vmem:[#allocation39_spill] sm:$0xff] }
 0x668   : > { %25036 = vst [vmem:[#allocation88_spill] sm:$0xff] %v22639_v36  ;;  %7099 = vst [vmem:[#allocation2 + $0xb8] sm:$0xff] %v22639_v36  ;;  %v6973_v1 = vadd.f32 %v6909_v34, %v25038_v61  ;;  %v16831_v24 = vpop.f32.mrb[24].mxu1  ;;  %16906 = vmatprep.mubr.f32.mxu0 %v22639_v36  ;;  %v25042_v34 = vld [vmem:[#allocation38_spill] sm:$0xff] }
 0x669   : > { %v22647_v31 = vmax.f32 %v6974_v16, 0.0  ;;  %v6912_v14 = vadd.f32 %v16831_v24, %v22510_v54  ;;  %v6809_v11 = vpop.f32.mrb[25].mxu1  ;;  %16907 = vmatmul.mubr.f32.gmra.mrb[54].mxu0 %v22635_v39 }
 0x66a   : > { %v22651_v8 = vmax.f32 %v6973_v1, 0.0  ;;  %v6911_v48 = vadd.f32 %v22510_v54, %v6809_v11 }
 0x66b   : > { %25039 = vst [vmem:[#allocation43_spill] sm:$0xff] %v22647_v31  ;;  %7102 = vst [vmem:[#allocation2 + $0xd0] sm:$0xff] %v22647_v31  ;;  %v6976_v56 = vadd.f32 %v6912_v14, %v25041_v50  ;;  %v25045_v14 = vld [vmem:[#allocation41_spill] sm:$0xff] }
 0x66c   : > { %25040 = vst [vmem:[#allocation96_spill] sm:$0xff] %v22651_v8  ;;  %7101 = vst [vmem:[#allocation2 + $0xc8] sm:$0xff] %v22651_v8  ;;  %v6975_v61 = vadd.f32 %v6911_v48, %v25042_v34  ;;  %v16834_v30 = vpop.f32.mrb[26].mxu1  ;;  %16909 = vmatprep.mubr.f32.mxu0 %v22651_v8  ;;  %v25046_v48 = vld [vmem:[#allocation40_spill] sm:$0xff] }
 0x66d   : > { %v22659_v16 = vmax.f32 %v6976_v56, 0.0  ;;  %v6914_v24 = vadd.f32 %v16834_v30, %v22510_v54  ;;  %v6819_v43 = vpop.f32.mrb[27].mxu1  ;;  %16910 = vmatmul.mubr.f32.gmra.mrb[56].mxu0 %v22647_v31 }
 0x66e   : > { %v22663_v1 = vmax.f32 %v6975_v61, 0.0  ;;  %v6913_v11 = vadd.f32 %v22510_v54, %v6819_v43 }
 0x66f   : > { %25043 = vst [vmem:[#allocation97_spill] sm:$0xff] %v22659_v16  ;;  %7104 = vst [vmem:[#allocation2 + $0xe0] sm:$0xff] %v22659_v16  ;;  %v6978_v50 = vadd.f32 %v6914_v24, %v25045_v14  ;;  %v25049_v24 = vld [vmem:[#allocation95_spill] sm:$0xff] }
 0x670   : > { %25044 = vst [vmem:[#allocation98_spill] sm:$0xff] %v22663_v1  ;;  %7103 = vst [vmem:[#allocation2 + $0xd8] sm:$0xff] %v22663_v1  ;;  %v6977_v34 = vadd.f32 %v6913_v11, %v25046_v48  ;;  %v16837_v38 = vpop.f32.mrb[28].mxu1  ;;  %16912 = vmatprep.mubr.f32.mxu0 %v22663_v1  ;;  %v25050_v11 = vld [vmem:[#allocation94_spill] sm:$0xff] }
 0x671   : > { %v22671_v56 = vmax.f32 %v6978_v50, 0.0  ;;  %v6916_v30 = vadd.f32 %v16837_v38, %v22510_v54  ;;  %v6829_v9 = vpop.f32.mrb[29].mxu1  ;;  %16913 = vmatmul.mubr.f32.gmra.mrb[58].mxu0 %v22659_v16  ;;  %v22790_v16 = vld [vmem:[#allocation2 + $0xbf] sm:$0xff] }
 0x672   : > { %v22675_v61 = vmax.f32 %v6977_v34, 0.0  ;;  %v6915_v43 = vadd.f32 %v22510_v54, %v6829_v9 }
 0x673   : > { %25047 = vst [vmem:[#allocation99_spill] sm:$0xff] %v22671_v56  ;;  %7106 = vst [vmem:[#allocation2 + $0xf0] sm:$0xff] %v22671_v56  ;;  %v6980_v14 = vadd.f32 %v25049_v24, %v6916_v30  ;;  %v25053_v30 = vld [vmem:[#allocation52_spill] sm:$0xff]  ;;  %v22798_v31 = vld [vmem:[#allocation2 + $0xcf] sm:$0xff] }
 0x674   : > { %25048 = vst [vmem:[#allocation100_spill] sm:$0xff] %v22675_v61  ;;  %7105 = vst [vmem:[#allocation2 + $0xe8] sm:$0xff] %v22675_v61  ;;  %v6979_v48 = vadd.f32 %v25050_v11, %v6915_v43  ;;  %v16840_v55 = vpop.f32.mrb[30].mxu1  ;;  %16915 = vmatprep.mubr.f32.mxu0 %v22675_v61  ;;  %v25054_v43 = vld [vmem:[#allocation49_spill] sm:$0xff]  ;;  %v22758_v61 = vld [vmem:[#allocation2 + $0x7f] sm:$0xff] }
 0x675   : > { %v22683_v50 = vmax.f32 %v6980_v14, 0.0  ;;  %v6918_v38 = vadd.f32 %v16840_v55, %v22510_v54  ;;  %v6839_v27 = vpop.f32.mrb[31].mxu1  ;;  %16916 = vmatmul.mubr.f32.gmra.mrb[60].mxu0 %v22671_v56  ;;  %v7755_v14 = vld [vmem:[#allocation7 + $0x110] sm:$0xff]  ;;  %v7756_v55 = vld [vmem:[#allocation7 + $0x118] sm:$0xff]  ;;  %v8091_v56 = vld [vmem:[#allocation7 + $0x188] sm:$0xff]  ;;  %25068 = vst [vmem:[#allocation106_spill] sm:$0xff] %v22798_v31 }
 0x676   : > { %v22687_v34 = vmax.f32 %v6979_v48, 0.0  ;;  %v6917_v9 = vadd.f32 %v22510_v54, %v6839_v27  ;;  %v7112_v54 = vld [vmem:[#allocation2 + $0xf] sm:$0xff]  ;;  %v18925_v27 = vpack.c.bf16 %v7756_v55, %v7755_v14  ;;  %v22713_v14 = vld [vmem:[#allocation2 + $0x27] sm:$0xff] }
 0x677   : > { %25051 = vst [vmem:[#allocation101_spill] sm:$0xff] %v22683_v50  ;;  %7108 = vst [vmem:[#allocation2 + $0x100] sm:$0xff] %v22683_v50  ;;  %v6982_v24 = vadd.f32 %v25053_v30, %v6918_v38  ;;  %v7757_v38 = vld [vmem:[#allocation7 + $0x120] sm:$0xff]  ;;  %v22793_v1 = vld [vmem:[#allocation2 + $0xc7] sm:$0xff] }
 0x678   : > { %25052 = vst [vmem:[#allocation102_spill] sm:$0xff] %v22687_v34  ;;  %7107 = vst [vmem:[#allocation2 + $0xf8] sm:$0xff] %v22687_v34  ;;  %v6981_v11 = vadd.f32 %v25054_v43, %v6917_v9  ;;  %16918 = vmatprep.mubr.f32.mxu0 %v22687_v34  ;;  %v7758_v9 = vld [vmem:[#allocation7 + $0x128] sm:$0xff]  ;;  %v7759_v43 = vld [vmem:[#allocation7 + $0x130] sm:$0xff] }
 0x679   : > { %v22695_v4 = vmax.f32 %v6982_v24, 0.0  ;;  %16919 = vmatmul.mubr.f32.gmra.mrb[62].mxu0 %v22683_v50  ;;  %v22704_v30 = vld [vmem:[#allocation2 + $0x17] sm:$0xff]  ;;  %v18929_v24 = vpack.c.bf16 %v7758_v9, %v7757_v38  ;;  %v7768_v50 = vld [vmem:[#allocation7 + $0x178] sm:$0xff]  ;;  %25067 = vst [vmem:[#allocation105_spill] sm:$0xff] %v22793_v1  ;;  %v22806_v39 = vld [vmem:[#allocation2 + $0xdf] sm:$0xff] }
 0x67a   : > { %v22698_v48 = vmax.f32 %v6981_v11, 0.0  ;;  %16953 = vmatprep.mubr.msk.f32.mxu0 %vm25057_vm9, %v7111_v26  ;;  %v22710_v26 = vld [vmem:[#allocation2 + $0x1f] sm:$0xff]  ;;  %v7760_v11 = vld [vmem:[#allocation7 + $0x138] sm:$0xff]  ;;  %vm25059_vm9 = vnez %v24603_v3  ;;  %v22721_v38 = vld [vmem:[#allocation2 + $0x37] sm:$0xff]  ;;  %25070 = vst [vmem:[#allocation86_spill] sm:$0xff] %v22806_v39 }
 0x67b   : > { %25055 = vst [vmem:[#allocation103_spill] sm:$0xff] %v22695_v4  ;;  %7110 = vst [vmem:[#allocation2 + $0x110] sm:$0xff] %v22695_v4  ;;  %v18933_v55 = vpack.c.bf16 %v7760_v11, %v7759_v43  ;;  %v22729_v43 = vld [vmem:[#allocation2 + $0x47] sm:$0xff]  ;;  %v7766_v4 = vld [vmem:[#allocation7 + $0x168] sm:$0xff] }
 0x67c   : > { %25056 = vst [vmem:[#allocation104_spill] sm:$0xff] %v22698_v48  ;;  %7109 = vst [vmem:[#allocation2 + $0x108] sm:$0xff] %v22698_v48  ;;  %v22742_v48 = vld [vmem:[#allocation2 + $0x5f] sm:$0xff]  ;;  %v22750_v34 = vld [vmem:[#allocation2 + $0x6f] sm:$0xff] }
 0x67d   : > { %16954 = vmatmul.mubr.f32.vlgmr.msra.gmra.mrb[32].mxu0 %v7112_v54  ;;  %v22718_v54 = vld [vmem:[#allocation2 + $0x2f] sm:$0xff]  ;;  %v22801_v8 = vld [vmem:[#allocation2 + $0xd7] sm:$0xff]  ;;  %v22809_v36 = vld [vmem:[#allocation2 + $0xe7] sm:$0xff] }
 0x67e   : > { %16956 = vmatprep.mubr.msk.f32.mxu0 %vm25058_vm6, %v22704_v30  ;;  %18924 = vmatpush3.bf16.msra.mxu0 %v22504_v18  ;;  %v7761_v18 = vld [vmem:[#allocation7 + $0x140] sm:$0xff]  ;;  %vm25060_vm6 = vnez %v24605_v10  ;;  %25069 = vst [vmem:[#allocation107_spill] sm:$0xff] %v22801_v8  ;;  %25071 = vst [vmem:[#allocation87_spill] sm:$0xff] %v22809_v36 }
 0x67f   : > { %18926 = vmatprep.subr.bf16.mxu0 %v18925_v27  ;;  %v18937_v9 = vpack.c.bf16 %v7762_v58, %v7761_v18  ;;  %v22737_v58 = vld [vmem:[#allocation2 + $0x57] sm:$0xff]  ;;  %v22814_v51 = vld [vmem:[#allocation2 + $0xef] sm:$0xff]  ;;  %v22822_v47 = vld [vmem:[#allocation2 + $0xff] sm:$0xff] }
 0x680   : > { %25072 = vst [vmem:[#allocation89_spill] sm:$0xff] %v22814_v51  ;;  %v22817_v63 = vld [vmem:[#allocation2 + $0xf7] sm:$0xff]  ;;  %25075 = vst [vmem:[#allocation91_spill] sm:$0xff] %v22822_v47 }
 0x681   : > { %16957 = vmatmul.mubr.f32.gmra.mrb[34].mxu0 %v22710_v26  ;;  %25073 = vst [vmem:[#allocation90_spill] sm:$0xff] %v22817_v63  ;;  %v22939_v57 = vld [vmem:[#allocation2 + $0xf9] sm:$0xff] }
 0x682   : > { %16959 = vmatprep.mubr.msk.f32.mxu0 %vm25059_vm9, %v22713_v14  ;;  %18928 = vmatpush3.bf16.msra.mxu0 %v18925_v27  ;;  %v7763_v27 = vld [vmem:[#allocation7 + $0x150] sm:$0xff]  ;;  %vm25061_vm9 = vnez %v24607_v41  ;;  %25095 = vst [vmem:[#allocation117_spill] sm:$0xff] %v22939_v57 }
 0x683   : > { %18930 = vmatprep.subr.bf16.mxu0 %v18929_v24  ;;  %v18941_v11 = vpack.c.bf16 %v7764_v60, %v7763_v27  ;;  %v22745_v60 = vld [vmem:[#allocation2 + $0x67] sm:$0xff] }
 0x685   : > { %16960 = vmatmul.mubr.f32.gmra.mrb[36].mxu0 %v22718_v54 }
 0x686   : > { %16962 = vmatprep.mubr.msk.f32.mxu0 %vm25060_vm6, %v22721_v38  ;;  %18932 = vmatpush3.bf16.msra.mxu0 %v18929_v24  ;;  %v7765_v24 = vld [vmem:[#allocation7 + $0x160] sm:$0xff]  ;;  %vm25062_vm6 = vnez %v24609_v59 }
 0x687   : > { %18934 = vmatprep.subr.bf16.mxu0 %v18933_v55  ;;  %v18945_v18 = vpack.c.bf16 %v7766_v4, %v7765_v24  ;;  %v22753_v4 = vld [vmem:[#allocation2 + $0x77] sm:$0xff] }
 0x689   : > { %16963 = vmatmul.mubr.f32.gmra.mrb[38].mxu0 %v22726_v45 }
 0x68a   : > { %16965 = vmatprep.mubr.msk.f32.mxu0 %vm25061_vm9, %v22729_v43  ;;  %18936 = vmatpush3.bf16.msra.mxu0 %v18933_v55  ;;  %v7767_v55 = vld [vmem:[#allocation7 + $0x170] sm:$0xff]  ;;  %vm25063_vm9 = vnez %v24611_v6 }
 0x68b   : > { %18938 = vmatprep.subr.bf16.mxu0 %v18937_v9  ;;  %v18949_v27 = vpack.c.bf16 %v7768_v50, %v7767_v55  ;;  %v22761_v50 = vld [vmem:[#allocation2 + $0x87] sm:$0xff]  ;;  %v22769_v55 = vld [vmem:[#allocation2 + $0x97] sm:$0xff] }
 0x68d   : > { %16966 = vmatmul.mubr.f32.gmra.mrb[40].mxu0 %v22734_v35 }
 0x68e   : > { %16968 = vmatprep.mubr.msk.f32.mxu0 %vm25062_vm6, %v22737_v58  ;;  %18940 = vmatpush3.bf16.msra.mxu0 %v18937_v9  ;;  %v8090_v9 = vld [vmem:[#allocation7 + $0x180] sm:$0xff]  ;;  %vm25064_vm6 = vnez %v24613_v52 }
 0x68f   : > { %18942 = vmatprep.subr.bf16.mxu0 %v18941_v11  ;;  %v18953_v24 = vpack.c.bf16 %v8091_v56, %v8090_v9  ;;  %v22774_v56 = vld [vmem:[#allocation2 + $0x9f] sm:$0xff]  ;;  %v22785_v9 = vld [vmem:[#allocation2 + $0xb7] sm:$0xff] }
 0x691   : > { %16969 = vmatmul.mubr.f32.gmra.mrb[42].mxu0 %v22742_v48 }
 0x692   : > { %16971 = vmatprep.mubr.msk.f32.mxu0 %vm25063_vm9, %v22745_v60  ;;  %18944 = vmatpush3.bf16.msra.mxu0 %v18941_v11  ;;  %v22766_v11 = vld [vmem:[#allocation2 + $0x8f] sm:$0xff] }
 0x693   : > { %18946 = vmatprep.subr.bf16.mxu0 %v18945_v18 }
 0x695   : > { %16972 = vmatmul.mubr.f32.gmra.mrb[44].mxu0 %v22750_v34 }
 0x696   : > { %16974 = vmatprep.mubr.msk.f32.mxu0 %vm25064_vm6, %v22753_v4  ;;  %18948 = vmatpush3.bf16.msra.mxu0 %v18945_v18  ;;  %v22777_v18 = vld [vmem:[#allocation2 + $0xa7] sm:$0xff]  ;;  %vm25066_vm6 = vnez %v24964_v22 }
 0x697   : > { %18950 = vmatprep.subr.bf16.mxu0 %v18949_v27  ;;  %v8097_v22 = vld [vmem:[#allocation7 + $0x1b8] sm:$0xff] }
 0x699   : > { %16975 = vmatmul.mubr.f32.gmra.mrb[46].mxu0 %v22758_v61 }
 0x69a   : > { %16977 = vmatprep.mubr.msk.f32.mxu0 %vm24957_vm15, %v22761_v50  ;;  %18952 = vmatpush3.bf16.msra.mxu0 %v18949_v27  ;;  %vm25065_vm15 = vnez %v24960_v15  ;;  %v22782_v27 = vld [vmem:[#allocation2 + $0xaf] sm:$0xff]  ;;  %v8738_v15 = vld [vmem:[#allocation7 + $0x2b0] sm:$0xff] }
 0x69b   : > { %18954 = vmatprep.subr.bf16.mxu0 %v18953_v24 }
 0x69d   : > { %16978 = vmatmul.mubr.f32.gmra.mrb[48].mxu0 %v22766_v11 }
 0x69e   : > { %16980 = vmatprep.mubr.msk.f32.mxu0 %vm24868_vm13, %v22769_v55 }
 0x6a1   : > { %16981 = vmatmul.mubr.f32.gmra.mrb[50].mxu0 %v22774_v56 }
 0x6a2   : > { %16983 = vmatprep.mubr.msk.f32.mxu0 %vm25065_vm15, %v22777_v18 }
 0x6a5   : > { %16984 = vmatmul.mubr.f32.gmra.mrb[52].mxu0 %v22782_v27 }
 0x6a6   : > { %16986 = vmatprep.mubr.msk.f32.mxu0 %vm25066_vm6, %v22785_v9 }
 0x6a9   : > { %16987 = vmatmul.mubr.f32.gmra.mrb[54].mxu0 %v22790_v16 }
 0x6aa   : > { %16989 = vmatprep.mubr.msk.f32.mxu0 %vm24875_vm0, %v22793_v1  ;;  %vm25074_vm0 = vnez %v24977_v44 }
 0x6ad   : > { %16990 = vmatmul.mubr.f32.gmra.mrb[56].mxu0 %v22798_v31  ;;  %v8096_v31 = vld [vmem:[#allocation7 + $0x1b0] sm:$0xff] }
 0x6ae   : > { %16992 = vmatprep.mubr.msk.f32.mxu0 %vm24834_vm4, %v22801_v8  ;;  %v8095_v8 = vld [vmem:[#allocation7 + $0x1a8] sm:$0xff] }
 0x6af   : > { %v18961_v44 = vpack.c.bf16 %v8095_v8, %v8094_v33  ;;  %v22843_v33 = vld [vmem:[#allocation2 + $0x39] sm:$0xff] }
 0x6b0   : > { %25077 = vst [vmem:[#allocation93_spill] sm:$0xff] %v22843_v33 }
 0x6b1   : > { %16993 = vmatmul.mubr.f32.gmra.mrb[58].mxu0 %v22806_v39  ;;  %v8093_v39 = vld [vmem:[#allocation7 + $0x198] sm:$0xff] }
 0x6b2   : > { %16995 = vmatprep.mubr.msk.f32.mxu0 %vm24975_vm12, %v22809_v36  ;;  %v18957_v28 = vpack.c.bf16 %v8093_v39, %v8092_v42  ;;  %v7690_v36 = vld [vmem:[#allocation2 + $0x11] sm:$0xff]  ;;  %v22835_v42 = vld [vmem:[#allocation2 + $0x29] sm:$0xff] }
 0x6b3   : > { %25076 = vst [vmem:[#allocation92_spill] sm:$0xff] %v22835_v42  ;;  %v22838_v39 = vld [vmem:[#allocation2 + $0x31] sm:$0xff] }
 0x6b5   : > { %16996 = vmatmul.mubr.f32.gmra.mrb[60].mxu0 %v22814_v51  ;;  %v22827_v51 = vld [vmem:[#allocation2 + $0x19] sm:$0xff] }
 0x6b6   : > { %16998 = vmatprep.mubr.msk.f32.mxu0 %vm25074_vm0, %v22817_v63  ;;  %v22830_v63 = vld [vmem:[#allocation2 + $0x21] sm:$0xff] }
 0x6b9   : > { %16999 = vmatmul.mubr.f32.gmra.mrb[62].mxu0 %v22822_v47 }
 0x6ba   : > { %17033 = vmatprep.mubr.f32.mxu0 %v7689_v29  ;;  %v18965_v29 = vpack.c.bf16 %v8097_v22, %v8096_v31  ;;  %v22851_v22 = vld [vmem:[#allocation2 + $0x49] sm:$0xff] }
 0x6bb   : > { %25078 = vst [vmem:[#allocation51_spill] sm:$0xff] %v22851_v22 }
 0x6bd   : > { %17034 = vmatmul.mubr.msk.f32.vlgmr.msra.gmra.mrb[32].mxu0 %vm24987_vm10, %v7690_v36  ;;  %v8098_v36 = vld [vmem:[#allocation7 + $0x1c0] sm:$0xff] }
 0x6be   : > { %17036 = vmatprep.mubr.f32.mxu0 %v22827_v51  ;;  %18956 = vmatpush3.bf16.msra.mxu0 %v18953_v24  ;;  %v8099_v24 = vld [vmem:[#allocation7 + $0x1c8] sm:$0xff] }
 0x6bf   : > { %18958 = vmatprep.subr.bf16.mxu0 %v18957_v28  ;;  %v18969_v8 = vpack.c.bf16 %v8099_v24, %v8098_v36  ;;  %v22859_v36 = vld [vmem:[#allocation2 + $0x59] sm:$0xff] }
 0x6c0   : > { %25079 = vst [vmem:[#allocation42_spill] sm:$0xff] %v22859_v36 }
 0x6c1   : > { %17037 = vmatmul.mubr.msk.f32.gmra.mrb[34].mxu0 %vm24921_vm1, %v22830_v63 }
 0x6c2   : > { %17039 = vmatprep.mubr.f32.mxu0 %v22835_v42  ;;  %18960 = vmatpush3.bf16.msra.mxu0 %v18957_v28  ;;  %v8100_v28 = vld [vmem:[#allocation7 + $0x1d0] sm:$0xff]  ;;  %v8101_v42 = vld [vmem:[#allocation7 + $0x1d8] sm:$0xff] }
 0x6c3   : > { %18962 = vmatprep.subr.bf16.mxu0 %v18961_v44  ;;  %v18973_v31 = vpack.c.bf16 %v8101_v42, %v8100_v28  ;;  %v22867_v42 = vld [vmem:[#allocation2 + $0x69] sm:$0xff] }
 0x6c5   : > { %17040 = vmatmul.mubr.msk.f32.gmra.mrb[36].mxu0 %vm24924_vm14, %v22838_v39 }
 0x6c6   : > { %17042 = vmatprep.mubr.f32.mxu0 %v22843_v33  ;;  %18964 = vmatpush3.bf16.msra.mxu0 %v18961_v44  ;;  %v8102_v44 = vld [vmem:[#allocation7 + $0x1e0] sm:$0xff]  ;;  %v8103_v33 = vld [vmem:[#allocation7 + $0x1e8] sm:$0xff] }
 0x6c7   : > { %18966 = vmatprep.subr.bf16.mxu0 %v18965_v29  ;;  %v18977_v24 = vpack.c.bf16 %v8103_v33, %v8102_v44  ;;  %v22875_v33 = vld [vmem:[#allocation2 + $0x79] sm:$0xff] }
 0x6c9   : > { %17043 = vmatmul.mubr.msk.f32.gmra.mrb[38].mxu0 %vm24847_vm3, %v22846_v17 }
 0x6ca   : > { %17045 = vmatprep.mubr.f32.mxu0 %v22851_v22  ;;  %18968 = vmatpush3.bf16.msra.mxu0 %v18965_v29  ;;  %v8104_v29 = vld [vmem:[#allocation7 + $0x1f0] sm:$0xff]  ;;  %v8105_v22 = vld [vmem:[#allocation7 + $0x1f8] sm:$0xff] }
 0x6cb   : > { %18970 = vmatprep.subr.bf16.mxu0 %v18969_v8  ;;  %v18981_v28 = vpack.c.bf16 %v8105_v22, %v8104_v29  ;;  %v22883_v22 = vld [vmem:[#allocation2 + $0x89] sm:$0xff] }
 0x6cc   : > { %v22899_v29 = vld [vmem:[#allocation2 + $0xa9] sm:$0xff] }
 0x6cd   : > { %17046 = vmatmul.mubr.msk.f32.gmra.mrb[40].mxu0 %vm24849_vm2, %v22854_v21  ;;  %vm25080_vm2 = vnez %v24741_v23  ;;  %25083 = vst [vmem:[#allocation108_spill] sm:$0xff] %v22899_v29 }
 0x6ce   : > { %17048 = vmatprep.mubr.f32.mxu0 %v22859_v36  ;;  %18972 = vmatpush3.bf16.msra.mxu0 %v18969_v8  ;;  %v8395_v8 = vld [vmem:[#allocation7 + $0x200] sm:$0xff]  ;;  %v8396_v36 = vld [vmem:[#allocation7 + $0x208] sm:$0xff] }
 0x6cf   : > { %18974 = vmatprep.subr.bf16.mxu0 %v18973_v31  ;;  %v18985_v44 = vpack.c.bf16 %v8396_v36, %v8395_v8  ;;  %v22894_v36 = vld [vmem:[#allocation2 + $0xa1] sm:$0xff]  ;;  %v22907_v8 = vld [vmem:[#allocation2 + $0xb9] sm:$0xff] }
 0x6d0   : > { %25085 = vst [vmem:[#allocation109_spill] sm:$0xff] %v22907_v8 }
 0x6d1   : > { %17049 = vmatmul.mubr.msk.f32.gmra.mrb[42].mxu0 %vm24791_vm7, %v22862_v37  ;;  %vm25084_vm7 = vnez %v24935_v32  ;;  %v22923_v32 = vld [vmem:[#allocation2 + $0xd9] sm:$0xff] }
 0x6d2   : > { %17051 = vmatprep.mubr.f32.mxu0 %v22867_v42  ;;  %18976 = vmatpush3.bf16.msra.mxu0 %v18973_v31  ;;  %v22886_v31 = vld [vmem:[#allocation2 + $0x91] sm:$0xff]  ;;  %25090 = vst [vmem:[#allocation113_spill] sm:$0xff] %v22923_v32 }
 0x6d3   : > { %18978 = vmatprep.subr.bf16.mxu0 %v18977_v24 }
 0x6d5   : > { %17052 = vmatmul.mubr.msk.f32.gmra.mrb[44].mxu0 %vm25080_vm2, %v22870_v7  ;;  %vm25081_vm2 = vnez %v24930_v25  ;;  %v22910_v25 = vld [vmem:[#allocation2 + $0xc1] sm:$0xff] }
 0x6d6   : > { %17054 = vmatprep.mubr.f32.mxu0 %v22875_v33  ;;  %18980 = vmatpush3.bf16.msra.mxu0 %v18977_v24  ;;  %v22891_v24 = vld [vmem:[#allocation2 + $0x99] sm:$0xff]  ;;  %25086 = vst [vmem:[#allocation110_spill] sm:$0xff] %v22910_v25 }
 0x6d7   : > { %18982 = vmatprep.subr.bf16.mxu0 %v18981_v28 }
 0x6d9   : > { %17055 = vmatmul.mubr.msk.f32.gmra.mrb[46].mxu0 %vm24793_vm8, %v22878_v49  ;;  %vm25082_vm8 = vnez %v24932_v19  ;;  %v22915_v19 = vld [vmem:[#allocation2 + $0xc9] sm:$0xff] }
 0x6da   : > { %17057 = vmatprep.mubr.f32.mxu0 %v22883_v22  ;;  %18984 = vmatpush3.bf16.msra.mxu0 %v18981_v28  ;;  %v22902_v28 = vld [vmem:[#allocation2 + $0xb1] sm:$0xff]  ;;  %25088 = vst [vmem:[#allocation111_spill] sm:$0xff] %v22915_v19 }
 0x6db   : > { %18986 = vmatprep.subr.bf16.mxu0 %v18985_v44 }
 0x6dd   : > { %17058 = vmatmul.mubr.msk.f32.gmra.mrb[48].mxu0 %vm25081_vm2, %v22886_v31  ;;  %vm25087_vm2 = vnez %v24938_v40  ;;  %v22931_v40 = vld [vmem:[#allocation2 + $0xe9] sm:$0xff] }
 0x6de   : > { %17060 = vmatprep.mubr.f32.mxu0 %v22891_v24  ;;  %25092 = vst [vmem:[#allocation115_spill] sm:$0xff] %v22931_v40 }
 0x6e1   : > { %17061 = vmatmul.mubr.msk.f32.gmra.mrb[50].mxu0 %vm25082_vm8, %v22894_v36 }
 0x6e2   : > { %17063 = vmatprep.mubr.f32.mxu0 %v22899_v29  ;;  %v22918_v29 = vld [vmem:[#allocation2 + $0xd1] sm:$0xff] }
 0x6e3   : > { %25089 = vst [vmem:[#allocation112_spill] sm:$0xff] %v22918_v29 }
 0x6e5   : > { %17064 = vmatmul.mubr.msk.f32.gmra.mrb[52].mxu0 %vm25084_vm7, %v22902_v28 }
 0x6e6   : > { %17066 = vmatprep.mubr.f32.mxu0 %v22907_v8  ;;  %v22926_v8 = vld [vmem:[#allocation2 + $0xe1] sm:$0xff] }
 0x6e7   : > { %25091 = vst [vmem:[#allocation114_spill] sm:$0xff] %v22926_v8 }
 0x6e9   : > { %17067 = vmatmul.mubr.msk.f32.gmra.mrb[54].mxu0 %vm25087_vm2, %v22910_v25  ;;  %vm25094_vm2 = vnez %v24946_v5  ;;  %v8398_v25 = vld [vmem:[#allocation7 + $0x218] sm:$0xff]  ;;  %v8400_v5 = vld [vmem:[#allocation7 + $0x228] sm:$0xff] }
 0x6ea   : > { %17069 = vmatprep.mubr.f32.mxu0 %v22915_v19  ;;  %v22934_v19 = vld [vmem:[#allocation2 + $0xf1] sm:$0xff] }
 0x6eb   : > { %25093 = vst [vmem:[#allocation116_spill] sm:$0xff] %v22934_v19 }
 0x6ed   : > { %17070 = vmatmul.mubr.msk.f32.gmra.mrb[56].mxu0 %vm24989_vm5, %v22918_v29  ;;  %v8397_v29 = vld [vmem:[#allocation7 + $0x210] sm:$0xff]  ;;  %vm25097_vm5 = vnez %v24598_v53 }
 0x6ee   : > { %17072 = vmatprep.mubr.f32.mxu0 %v22923_v32  ;;  %v22942_v32 = vld [vmem:[#allocation2 + $0x101] sm:$0xff]  ;;  %v18989_v13 = vpack.c.bf16 %v8398_v25, %v8397_v29  ;;  %v8408_v29 = vld [vmem:[#allocation7 + $0x268] sm:$0xff] }
 0x6f1   : > { %17073 = vmatmul.mubr.msk.f32.gmra.mrb[58].mxu0 %vm24990_vm11, %v22926_v8  ;;  %vm25096_vm11 = vnez %v24799_v46  ;;  %v8402_v8 = vld [vmem:[#allocation7 + $0x238] sm:$0xff] }
 0x6f2   : > { %17075 = vmatprep.mubr.f32.mxu0 %v22931_v40  ;;  %v8399_v40 = vld [vmem:[#allocation7 + $0x220] sm:$0xff] }
 0x6f5   : > { %17076 = vmatmul.mubr.msk.f32.gmra.mrb[60].mxu0 %vm25094_vm2, %v22934_v19  ;;  %vm25098_vm2 = vnez %v24821_v62  ;;  %v8401_v19 = vld [vmem:[#allocation7 + $0x230] sm:$0xff] }
 0x6f6   : > { %17078 = vmatprep.mubr.f32.mxu0 %v22939_v57  ;;  %v18993_v57 = vpack.c.bf16 %v8400_v5, %v8399_v40  ;;  %v18997_v25 = vpack.c.bf16 %v8402_v8, %v8401_v19  ;;  %v8405_v5 = vld [vmem:[#allocation7 + $0x250] sm:$0xff] }
 0x6f7   : > { %v8409_v8 = vld [vmem:[#allocation7 + $0x270] sm:$0xff] }
 0x6f9   : > { %17079 = vmatmul.mubr.msk.f32.gmra.mrb[62].mxu0 %vm25096_vm11, %v22942_v32  ;;  %vm25099_vm11 = vnez %v24603_v3 }
 0x6fa   : > { %17113 = vmatprep.mubr.msk.f32.mxu0 %vm25097_vm5, %v22704_v30  ;;  %v8403_v30 = vld [vmem:[#allocation7 + $0x240] sm:$0xff] }
 0x6fd   : > { %17114 = vmatmul.mubr.f32.vlgmr.msra.gmra.mrb[32].mxu0 %v22710_v26  ;;  %v8404_v26 = vld [vmem:[#allocation7 + $0x248] sm:$0xff] }
 0x6fe   : > { %17116 = vmatprep.mubr.msk.f32.mxu0 %vm25098_vm2, %v22713_v14  ;;  %18988 = vmatpush3.bf16.msra.mxu0 %v18985_v44  ;;  %vm25100_vm2 = vnez %v24605_v10  ;;  %v19001_v40 = vpack.c.bf16 %v8404_v26, %v8403_v30  ;;  %v8406_v44 = vld [vmem:[#allocation7 + $0x258] sm:$0xff]  ;;  %v8732_v26 = vld [vmem:[#allocation7 + $0x280] sm:$0xff] }
 0x6ff   : > { %18990 = vmatprep.subr.bf16.mxu0 %v18989_v13  ;;  %v19005_v19 = vpack.c.bf16 %v8406_v44, %v8405_v5  ;;  %v8410_v30 = vld [vmem:[#allocation7 + $0x278] sm:$0xff]  ;;  %v8733_v5 = vld [vmem:[#allocation7 + $0x288] sm:$0xff] }
 0x700   : > { %v23007_v44 = vld [vmem:[#allocation2 + $0x107] sm:$0xff] }
 0x701   : > { %17117 = vmatmul.mubr.f32.gmra.mrb[34].mxu0 %v22718_v54  ;;  %25116 = vst [vmem:[#allocation15_spill] sm:$0xff] %v23007_v44 }
 0x702   : > { %17119 = vmatprep.mubr.msk.f32.mxu0 %vm25099_vm11, %v22721_v38  ;;  %18992 = vmatpush3.bf16.msra.mxu0 %v18989_v13  ;;  %vm25101_vm11 = vnez %v24607_v41  ;;  %v8407_v13 = vld [vmem:[#allocation7 + $0x260] sm:$0xff] }
 0x703   : > { %18994 = vmatprep.subr.bf16.mxu0 %v18993_v57 }
 0x705   : > { %17120 = vmatmul.mubr.f32.gmra.mrb[36].mxu0 %v22726_v45 }
 0x706   : > { %17122 = vmatprep.mubr.msk.f32.mxu0 %vm25100_vm2, %v22729_v43  ;;  %18996 = vmatpush3.bf16.msra.mxu0 %v18993_v57  ;;  %vm25102_vm2 = vnez %v24609_v59  ;;  %v19009_v57 = vpack.c.bf16 %v8408_v29, %v8407_v13  ;;  %v25107_v13 = vld [vmem:[#allocation107_spill] sm:$0xff]  ;;  %v25108_v29 = vld [vmem:[#allocation46_spill] sm:$0xff] }
 0x707   : > { %18998 = vmatprep.subr.bf16.mxu0 %v18997_v25 }
 0x709   : > { %17123 = vmatmul.mubr.f32.gmra.mrb[38].mxu0 %v22734_v35 }
 0x70a   : > { %17125 = vmatprep.mubr.msk.f32.mxu0 %vm25101_vm11, %v22737_v58  ;;  %19000 = vmatpush3.bf16.msra.mxu0 %v18997_v25  ;;  %v19013_v25 = vpack.c.bf16 %v8410_v30, %v8409_v8  ;;  %vm25104_vm11 = vnez %v24615_v2  ;;  %v25111_v8 = vld [vmem:[#allocation87_spill] sm:$0xff] }
 0x70b   : > { %19002 = vmatprep.subr.bf16.mxu0 %v19001_v40  ;;  %v8363_v30 = vld [vmem:[#allocation2 + $0x18] sm:$0xff] }
 0x70d   : > { %17126 = vmatmul.mubr.f32.gmra.mrb[40].mxu0 %v22742_v48 }
 0x70e   : > { %17128 = vmatprep.mubr.msk.f32.mxu0 %vm25102_vm2, %v22745_v60  ;;  %19004 = vmatpush3.bf16.msra.mxu0 %v19001_v40  ;;  %vm25103_vm2 = vnez %v24613_v52  ;;  %v19017_v40 = vpack.c.bf16 %v8733_v5, %v8732_v26  ;;  %v25114_v26 = vld [vmem:[#allocation90_spill] sm:$0xff] }
 0x70f   : > { %19006 = vmatprep.subr.bf16.mxu0 %v19005_v19  ;;  %v8736_v5 = vld [vmem:[#allocation7 + $0x2a0] sm:$0xff] }
 0x711   : > { %17129 = vmatmul.mubr.f32.gmra.mrb[42].mxu0 %v22750_v34 }
 0x712   : > { %17131 = vmatprep.mubr.msk.f32.mxu0 %vm25063_vm9, %v22753_v4  ;;  %19008 = vmatpush3.bf16.msra.mxu0 %v19005_v19  ;;  %v25106_v19 = vld [vmem:[#allocation106_spill] sm:$0xff] }
 0x713   : > { %19010 = vmatprep.subr.bf16.mxu0 %v19009_v57 }
 0x715   : > { %17132 = vmatmul.mubr.f32.gmra.mrb[44].mxu0 %v22758_v61 }
 0x716   : > { %17134 = vmatprep.mubr.msk.f32.mxu0 %vm25103_vm2, %v22761_v50  ;;  %19012 = vmatpush3.bf16.msra.mxu0 %v19009_v57  ;;  %v25110_v57 = vld [vmem:[#allocation86_spill] sm:$0xff] }
 0x717   : > { %19014 = vmatprep.subr.bf16.mxu0 %v19013_v25 }
 0x719   : > { %17135 = vmatmul.mubr.f32.gmra.mrb[46].mxu0 %v22766_v11 }
 0x71a   : > { %17137 = vmatprep.mubr.msk.f32.mxu0 %vm25104_vm11, %v22769_v55  ;;  %19016 = vmatpush3.bf16.msra.mxu0 %v19013_v25  ;;  %vm25109_vm11 = vnez %v25108_v29  ;;  %v25113_v25 = vld [vmem:[#allocation89_spill] sm:$0xff] }
 0x71b   : > { %19018 = vmatprep.subr.bf16.mxu0 %v19017_v40  ;;  %v23012_v29 = vld [vmem:[#allocation2 + $0x10f] sm:$0xff] }
 0x71c   : > { %25118 = vst [vmem:[#allocation14_spill] sm:$0xff] %v23012_v29 }
 0x71d   : > { %17138 = vmatmul.mubr.f32.gmra.mrb[48].mxu0 %v22774_v56 }
 0x71e   : > { %17140 = vmatprep.mubr.msk.f32.mxu0 %vm24868_vm13, %v22777_v18 }
 0x721   : > { %17141 = vmatmul.mubr.f32.gmra.mrb[50].mxu0 %v22782_v27 }
 0x722   : > { %17143 = vmatprep.mubr.msk.f32.mxu0 %vm25065_vm15, %v22785_v9 }
 0x725   : > { %17144 = vmatmul.mubr.f32.gmra.mrb[52].mxu0 %v22790_v16 }
 0x726   : > { %17146 = vmatprep.mubr.msk.f32.mxu0 %vm25066_vm6, %v22793_v1  ;;  %v8739_v1 = vld [vmem:[#allocation7 + $0x2b8] sm:$0xff] }
 0x729   : > { %17147 = vmatmul.mubr.f32.gmra.mrb[54].mxu0 %v25106_v19 }
 0x72a   : > { %17149 = vmatprep.mubr.msk.f32.mxu0 %vm25109_vm11, %v25107_v13  ;;  %v8735_v13 = vld [vmem:[#allocation7 + $0x298] sm:$0xff] }
 0x72d   : > { %17150 = vmatmul.mubr.f32.gmra.mrb[56].mxu0 %v25110_v57  ;;  %v8734_v57 = vld [vmem:[#allocation7 + $0x290] sm:$0xff] }
 0x72e   : > { %17152 = vmatprep.mubr.msk.f32.mxu0 %vm24834_vm4, %v25111_v8  ;;  %v8364_v8 = vld [vmem:[#allocation2 + $0x20] sm:$0xff] }
 0x731   : > { %17153 = vmatmul.mubr.f32.gmra.mrb[58].mxu0 %v25113_v25  ;;  %v19021_v25 = vpack.c.bf16 %v8735_v13, %v8734_v57  ;;  %v19029_v13 = vpack.c.bf16 %v8739_v1, %v8738_v15  ;;  %v23024_v57 = vld [vmem:[#allocation2 + $0x40] sm:$0xff]  ;;  %v23033_v15 = vld [vmem:[#allocation2 + $0x58] sm:$0xff] }
 0x732   : > { %17155 = vmatprep.mubr.msk.f32.mxu0 %vm24975_vm12, %v25114_v26  ;;  %v8737_v26 = vld [vmem:[#allocation7 + $0x2a8] sm:$0xff]  ;;  %25121 = vst [vmem:[#allocation19_spill] sm:$0xff] %v23024_v57  ;;  %25124 = vst [vmem:[#allocation20_spill] sm:$0xff] %v23033_v15 }
 0x733   : > { %v19025_v19 = vpack.c.bf16 %v8737_v26, %v8736_v5  ;;  %v23030_v5 = vld [vmem:[#allocation2 + $0x50] sm:$0xff] }
 0x734   : > { %25123 = vst [vmem:[#allocation21_spill] sm:$0xff] %v23030_v5 }
 0x735   : > { %17156 = vmatmul.mubr.f32.gmra.mrb[60].mxu0 %v22822_v47  ;;  %v23015_v47 = vld [vmem:[#allocation2 + $0x28] sm:$0xff] }
 0x736   : > { %17158 = vmatprep.mubr.msk.f32.mxu0 %vm25074_vm0, %v23007_v44  ;;  %v23018_v44 = vld [vmem:[#allocation2 + $0x30] sm:$0xff] }
 0x737   : > { %25119 = vst [vmem:[#allocation17_spill] sm:$0xff] %v23018_v44 }
 0x739   : > { %17159 = vmatmul.mubr.f32.gmra.mrb[62].mxu0 %v23012_v29  ;;  %v23021_v29 = vld [vmem:[#allocation2 + $0x38] sm:$0xff] }
 0x73a   : > { %17193 = vmatprep.mubr.f32.mxu0 %v8363_v30  ;;  %25120 = vst [vmem:[#allocation16_spill] sm:$0xff] %v23021_v29  ;;  %v8741_v30 = vld [vmem:[#allocation7 + $0x2c8] sm:$0xff] }
 0x73d   : > { %17194 = vmatmul.mubr.f32.vlgmr.msra.gmra.mrb[32].mxu0 %v8364_v8  ;;  %v8740_v8 = vld [vmem:[#allocation7 + $0x2c0] sm:$0xff] }
 0x73e   : > { %17196 = vmatprep.mubr.f32.mxu0 %v23015_v47  ;;  %19020 = vmatpush3.bf16.msra.mxu0 %v19017_v40  ;;  %v23027_v40 = vld [vmem:[#allocation2 + $0x48] sm:$0xff]  ;;  %v19033_v26 = vpack.c.bf16 %v8741_v30, %v8740_v8  ;;  %v23042_v30 = vld [vmem:[#allocation2 + $0x70] sm:$0xff] }
 0x73f   : > { %19022 = vmatprep.subr.bf16.mxu0 %v19021_v25  ;;  %25122 = vst [vmem:[#allocation18_spill] sm:$0xff] %v23027_v40  ;;  %25127 = vst [vmem:[#allocation25_spill] sm:$0xff] %v23042_v30 }
 0x741   : > { %17197 = vmatmul.mubr.f32.gmra.mrb[34].mxu0 %v23018_v44  ;;  %v8742_v44 = vld [vmem:[#allocation7 + $0x2d0] sm:$0xff] }
 0x742   : > { %17199 = vmatprep.mubr.f32.mxu0 %v23021_v29  ;;  %19024 = vmatpush3.bf16.msra.mxu0 %v19021_v25  ;;  %v8743_v29 = vld [vmem:[#allocation7 + $0x2d8] sm:$0xff]  ;;  %v23036_v25 = vld [vmem:[#allocation2 + $0x60] sm:$0xff] }
 0x743   : > { %19026 = vmatprep.subr.bf16.mxu0 %v19025_v19  ;;  %v19037_v1 = vpack.c.bf16 %v8743_v29, %v8742_v44  ;;  %25125 = vst [vmem:[#allocation23_spill] sm:$0xff] %v23036_v25  ;;  %v23045_v44 = vld [vmem:[#allocation2 + $0x78] sm:$0xff] }
 0x744   : > { %25128 = vst [vmem:[#allocation24_spill] sm:$0xff] %v23045_v44 }
 0x745   : > { %17200 = vmatmul.mubr.f32.gmra.mrb[36].mxu0 %v23024_v57  ;;  %v8744_v57 = vld [vmem:[#allocation7 + $0x2e0] sm:$0xff] }
 0x746   : > { %17202 = vmatprep.mubr.f32.mxu0 %v23027_v40  ;;  %19028 = vmatpush3.bf16.msra.mxu0 %v19025_v19  ;;  %v8745_v40 = vld [vmem:[#allocation7 + $0x2e8] sm:$0xff]  ;;  %v23039_v19 = vld [vmem:[#allocation2 + $0x68] sm:$0xff] }
 0x747   : > { %19030 = vmatprep.subr.bf16.mxu0 %v19029_v13  ;;  %25126 = vst [vmem:[#allocation22_spill] sm:$0xff] %v23039_v19  ;;  %v19041_v8 = vpack.c.bf16 %v8745_v40, %v8744_v57  ;;  %v23051_v57 = vld [vmem:[#allocation2 + $0x88] sm:$0xff] }
 0x748   : > { %25130 = vst [vmem:[#allocation26_spill] sm:$0xff] %v23051_v57 }
 0x749   : > { %17203 = vmatmul.mubr.f32.gmra.mrb[38].mxu0 %v23030_v5  ;;  %v8746_v5 = vld [vmem:[#allocation7 + $0x2f0] sm:$0xff] }
 0x74a   : > { %17205 = vmatprep.mubr.f32.mxu0 %v23033_v15  ;;  %19032 = vmatpush3.bf16.msra.mxu0 %v19029_v13  ;;  %v8747_v15 = vld [vmem:[#allocation7 + $0x2f8] sm:$0xff]  ;;  %v23048_v13 = vld [vmem:[#allocation2 + $0x80] sm:$0xff] }
 0x74b   : > { %19034 = vmatprep.subr.bf16.mxu0 %v19033_v26  ;;  %v19045_v29 = vpack.c.bf16 %v8747_v15, %v8746_v5  ;;  %25129 = vst [vmem:[#allocation27_spill] sm:$0xff] %v23048_v13  ;;  %v25133_v5 = vld [vmem:[#allocation76_spill] sm:$0xff] }
 0x74c   : > { %v25134_v15 = vld [vmem:[#allocation84_spill] sm:$0xff] }
 0x74d   : > { %17206 = vmatmul.mubr.f32.gmra.mrb[40].mxu0 %v23036_v25  ;;  %v9069_v25 = vld [vmem:[#allocation7 + $0x300] sm:$0xff] }
 0x74e   : > { %17208 = vmatprep.mubr.f32.mxu0 %v23039_v19  ;;  %19036 = vmatpush3.bf16.msra.mxu0 %v19033_v26  ;;  %v9070_v19 = vld [vmem:[#allocation7 + $0x308] sm:$0xff]  ;;  %v23054_v26 = vld [vmem:[#allocation2 + $0x90] sm:$0xff] }
 0x74f   : > { %19038 = vmatprep.subr.bf16.mxu0 %v19037_v1  ;;  %v19049_v40 = vpack.c.bf16 %v9070_v19, %v9069_v25  ;;  %25131 = vst [vmem:[#allocation29_spill] sm:$0xff] %v23054_v26  ;;  %v25139_v25 = vld [vmem:[#allocation43_spill] sm:$0xff]  ;;  %v25140_v19 = vld [vmem:[#allocation98_spill] sm:$0xff] }
 0x751   : > { %17209 = vmatmul.mubr.f32.gmra.mrb[42].mxu0 %v23042_v30  ;;  %v25147_v30 = vld [vmem:[#allocation103_spill] sm:$0xff] }
 0x752   : > { %17211 = vmatprep.mubr.f32.mxu0 %v23045_v44  ;;  %19040 = vmatpush3.bf16.msra.mxu0 %v19037_v1  ;;  %v25132_v1 = vld [vmem:[#allocation81_spill] sm:$0xff]  ;;  %v25136_v44 = vld [vmem:[#allocation88_spill] sm:$0xff] }
 0x753   : > { %19042 = vmatprep.subr.bf16.mxu0 %v19041_v8 }
 0x755   : > { %17212 = vmatmul.mubr.f32.gmra.mrb[44].mxu0 %v23048_v13  ;;  %v25135_v13 = vld [vmem:[#allocation79_spill] sm:$0xff] }
 0x756   : > { %17214 = vmatprep.mubr.f32.mxu0 %v23051_v57  ;;  %19044 = vmatpush3.bf16.msra.mxu0 %v19041_v8  ;;  %v25137_v57 = vld [vmem:[#allocation82_spill] sm:$0xff]  ;;  %v25138_v8 = vld [vmem:[#allocation96_spill] sm:$0xff] }
 0x757   : > { %19046 = vmatprep.subr.bf16.mxu0 %v19045_v29 }
 0x759   : > { %17215 = vmatmul.mubr.f32.gmra.mrb[46].mxu0 %v23054_v26  ;;  %v25141_v26 = vld [vmem:[#allocation97_spill] sm:$0xff] }
 0x75a   : > { %17217 = vmatprep.mubr.f32.mxu0 %v25132_v1  ;;  %19048 = vmatpush3.bf16.msra.mxu0 %v19045_v29  ;;  %v25142_v29 = vld [vmem:[#allocation100_spill] sm:$0xff]  ;;  %v25143_v1 = vld [vmem:[#allocation99_spill] sm:$0xff] }
 0x75b   : > { %19050 = vmatprep.subr.bf16.mxu0 %v19049_v40 }
 0x75d   : > { %17218 = vmatmul.mubr.f32.gmra.mrb[48].mxu0 %v25133_v5  ;;  %v25144_v5 = vld [vmem:[#allocation102_spill] sm:$0xff] }
 0x75e   : > { %17220 = vmatprep.mubr.f32.mxu0 %v25134_v15  ;;  %v25145_v15 = vld [vmem:[#allocation101_spill] sm:$0xff] }
 0x761   : > { %17221 = vmatmul.mubr.f32.gmra.mrb[50].mxu0 %v25135_v13  ;;  %v25146_v13 = vld [vmem:[#allocation104_spill] sm:$0xff] }
 0x762   : > { %17223 = vmatprep.mubr.f32.mxu0 %v25136_v44  ;;  %v9071_v44 = vld [vmem:[#allocation7 + $0x310] sm:$0xff] }
 0x765   : > { %17224 = vmatmul.mubr.f32.gmra.mrb[52].mxu0 %v25137_v57  ;;  %v9072_v57 = vld [vmem:[#allocation7 + $0x318] sm:$0xff] }
 0x766   : > { %17226 = vmatprep.mubr.f32.mxu0 %v25138_v8  ;;  %v19053_v8 = vpack.c.bf16 %v9072_v57, %v9071_v44  ;;  %v9077_v44 = vld [vmem:[#allocation7 + $0x340] sm:$0xff]  ;;  %v9078_v57 = vld [vmem:[#allocation7 + $0x348] sm:$0xff] }
 0x769   : > { %17227 = vmatmul.mubr.f32.gmra.mrb[54].mxu0 %v25139_v25  ;;  %v9074_v25 = vld [vmem:[#allocation7 + $0x328] sm:$0xff] }
 0x76a   : > { %17229 = vmatprep.mubr.f32.mxu0 %v25140_v19  ;;  %v9073_v19 = vld [vmem:[#allocation7 + $0x320] sm:$0xff] }
 0x76d   : > { %17230 = vmatmul.mubr.f32.gmra.mrb[56].mxu0 %v25141_v26 }
 0x76e   : > { %17232 = vmatprep.mubr.f32.mxu0 %v25142_v29  ;;  %v25148_v29 = vld [vmem:[#allocation92_spill] sm:$0xff] }
 0x771   : > { %17233 = vmatmul.mubr.f32.gmra.mrb[58].mxu0 %v25143_v1  ;;  %v25149_v1 = vld [vmem:[#allocation53_spill] sm:$0xff] }
 0x772   : > { %17235 = vmatprep.mubr.f32.mxu0 %v25144_v5  ;;  %v19057_v5 = vpack.c.bf16 %v9074_v25, %v9073_v19  ;;  %v19065_v25 = vpack.c.bf16 %v9078_v57, %v9077_v44  ;;  %v9079_v19 = vld [vmem:[#allocation7 + $0x350] sm:$0xff]  ;;  %v9084_v57 = vld [vmem:[#allocation7 + $0x378] sm:$0xff] }
 0x773   : > { %v9083_v44 = vld [vmem:[#allocation7 + $0x370] sm:$0xff] }
 0x775   : > { %17236 = vmatmul.mubr.f32.gmra.mrb[60].mxu0 %v25145_v15  ;;  %v9075_v15 = vld [vmem:[#allocation7 + $0x330] sm:$0xff] }
 0x776   : > { %17238 = vmatprep.mubr.f32.mxu0 %v25146_v13  ;;  %v9076_v13 = vld [vmem:[#allocation7 + $0x338] sm:$0xff] }
 0x779   : > { %17239 = vmatmul.mubr.f32.gmra.mrb[62].mxu0 %v25147_v30  ;;  %v25150_v30 = vld [vmem:[#allocation93_spill] sm:$0xff] }
 0x77a   : > { %17273 = vmatprep.mubr.f32.mxu0 %v22827_v51  ;;  %v19061_v51 = vpack.c.bf16 %v9076_v13, %v9075_v15  ;;  %v9081_v15 = vld [vmem:[#allocation7 + $0x360] sm:$0xff] }
 0x77d   : > { %17274 = vmatmul.mubr.msk.f32.vlgmr.msra.gmra.mrb[32].mxu0 %vm24987_vm10, %v22830_v63  ;;  %v25151_v63 = vld [vmem:[#allocation56_spill] sm:$0xff] }
 0x77e   : > { %17276 = vmatprep.mubr.f32.mxu0 %v25148_v29  ;;  %19052 = vmatpush3.bf16.msra.mxu0 %v19049_v40  ;;  %v25152_v40 = vld [vmem:[#allocation51_spill] sm:$0xff]  ;;  %v9080_v29 = vld [vmem:[#allocation7 + $0x358] sm:$0xff] }
 0x77f   : > { %19054 = vmatprep.subr.bf16.mxu0 %v19053_v8  ;;  %v19069_v13 = vpack.c.bf16 %v9080_v29, %v9079_v19  ;;  %v9375_v19 = vld [vmem:[#allocation7 + $0x388] sm:$0xff]  ;;  %v25170_v29 = vld [vmem:[#allocation77_spill] sm:$0xff] }
 0x781   : > { %17277 = vmatmul.mubr.msk.f32.gmra.mrb[34].mxu0 %vm24921_vm1, %v22838_v39  ;;  %v25153_v39 = vld [vmem:[#allocation59_spill] sm:$0xff]  ;;  %vm25160_vm1 = vnez %v24743_v0 }
 0x782   : > { %17279 = vmatprep.mubr.f32.mxu0 %v25150_v30  ;;  %19056 = vmatpush3.bf16.msra.mxu0 %v19053_v8  ;;  %v25154_v30 = vld [vmem:[#allocation42_spill] sm:$0xff]  ;;  %v9082_v8 = vld [vmem:[#allocation7 + $0x368] sm:$0xff] }
 0x783   : > { %19058 = vmatprep.subr.bf16.mxu0 %v19057_v5 }
 0x785   : > { %17280 = vmatmul.mubr.msk.f32.gmra.mrb[36].mxu0 %vm24924_vm14, %v22846_v17  ;;  %v25155_v17 = vld [vmem:[#allocation62_spill] sm:$0xff] }
 0x786   : > { %17282 = vmatprep.mubr.f32.mxu0 %v25152_v40  ;;  %19060 = vmatpush3.bf16.msra.mxu0 %v19057_v5  ;;  %vm25156_vm14 = vnez %v25155_v17  ;;  %v19073_v5 = vpack.c.bf16 %v9082_v8, %v9081_v15  ;;  %v9374_v40 = vld [vmem:[#allocation7 + $0x380] sm:$0xff]  ;;  %v25176_v15 = vld [vmem:[#allocation115_spill] sm:$0xff] }
 0x787   : > { %19062 = vmatprep.subr.bf16.mxu0 %v19061_v51  ;;  %v25178_v8 = vld [vmem:[#allocation83_spill] sm:$0xff] }
 0x789   : > { %17283 = vmatmul.mubr.msk.f32.gmra.mrb[38].mxu0 %vm24847_vm3, %v22854_v21  ;;  %v25157_v21 = vld [vmem:[#allocation65_spill] sm:$0xff] }
 0x78a   : > { %17285 = vmatprep.mubr.f32.mxu0 %v25154_v30  ;;  %19064 = vmatpush3.bf16.msra.mxu0 %v19061_v51  ;;  %vm25158_vm3 = vnez %v25157_v21  ;;  %v19077_v51 = vpack.c.bf16 %v9084_v57, %v9083_v44  ;;  %v25172_v30 = vld [vmem:[#allocation113_spill] sm:$0xff] }
 0x78b   : > { %19066 = vmatprep.subr.bf16.mxu0 %v19065_v25  ;;  %v25181_v44 = vld [vmem:[#allocation85_spill] sm:$0xff] }
 0x78c   : > { %v23133_v57 = vld [vmem:[#allocation2 + $0x109] sm:$0xff] }
 0x78d   : > { %17286 = vmatmul.mubr.msk.f32.gmra.mrb[40].mxu0 %vm25156_vm14, %v22862_v37  ;;  %vm25159_vm14 = vnez %v24741_v23  ;;  %v19081_v37 = vpack.c.bf16 %v9375_v19, %v9374_v40  ;;  %v9376_v40 = vld [vmem:[#allocation7 + $0x390] sm:$0xff]  ;;  %v9377_v19 = vld [vmem:[#allocation7 + $0x398] sm:$0xff] }
 0x78e   : > { %17288 = vmatprep.mubr.f32.mxu0 %v22867_v42  ;;  %19068 = vmatpush3.bf16.msra.mxu0 %v19065_v25  ;;  %v25163_v42 = vld [vmem:[#allocation108_spill] sm:$0xff]  ;;  %v25167_v25 = vld [vmem:[#allocation74_spill] sm:$0xff] }
 0x78f   : > { %19070 = vmatprep.subr.bf16.mxu0 %v19069_v13 }
 0x791   : > { %17289 = vmatmul.mubr.msk.f32.gmra.mrb[42].mxu0 %vm25158_vm3, %v22870_v7  ;;  %v25161_v7 = vld [vmem:[#allocation69_spill] sm:$0xff] }
 0x792   : > { %17291 = vmatprep.mubr.f32.mxu0 %v22875_v33  ;;  %19072 = vmatpush3.bf16.msra.mxu0 %v19069_v13  ;;  %vm25162_vm3 = vnez %v25161_v7  ;;  %v25165_v33 = vld [vmem:[#allocation109_spill] sm:$0xff]  ;;  %v25174_v13 = vld [vmem:[#allocation80_spill] sm:$0xff] }
 0x793   : > { %19074 = vmatprep.subr.bf16.mxu0 %v19073_v5 }
 0x795   : > { %17292 = vmatmul.mubr.msk.f32.gmra.mrb[44].mxu0 %vm25159_vm14, %v22878_v49  ;;  %v25164_v49 = vld [vmem:[#allocation71_spill] sm:$0xff] }
 0x796   : > { %17294 = vmatprep.mubr.f32.mxu0 %v22883_v22  ;;  %19076 = vmatpush3.bf16.msra.mxu0 %v19073_v5  ;;  %v25166_v22 = vld [vmem:[#allocation110_spill] sm:$0xff]  ;;  %v25180_v5 = vld [vmem:[#allocation117_spill] sm:$0xff] }
 0x797   : > { %19078 = vmatprep.subr.bf16.mxu0 %v19077_v51 }
 0x799   : > { %17295 = vmatmul.mubr.msk.f32.gmra.mrb[46].mxu0 %vm25160_vm1, %v22886_v31  ;;  %v25168_v31 = vld [vmem:[#allocation111_spill] sm:$0xff]  ;;  %vm25171_vm1 = vnez %v25170_v29 }
 0x79a   : > { %17297 = vmatprep.mubr.f32.mxu0 %v22891_v24  ;;  %19080 = vmatpush3.bf16.msra.mxu0 %v19077_v51  ;;  %v25169_v24 = vld [vmem:[#allocation112_spill] sm:$0xff]  ;;  %v23136_v51 = vld [vmem:[#allocation2 + $0x111] sm:$0xff] }
 0x79b   : > { %19082 = vmatprep.subr.bf16.mxu0 %v19081_v37 }
 0x79d   : > { %17298 = vmatmul.mubr.msk.f32.gmra.mrb[48].mxu0 %vm25162_vm3, %v22894_v36  ;;  %v25173_v36 = vld [vmem:[#allocation114_spill] sm:$0xff]  ;;  %vm25175_vm3 = vnez %v25174_v13 }
 0x79e   : > { %17300 = vmatprep.mubr.f32.mxu0 %v25163_v42  ;;  %v19085_v42 = vpack.c.bf16 %v9377_v19, %v9376_v40  ;;  %v25198_v40 = vld [vmem:[#allocation89_spill] sm:$0xff]  ;;  %v25201_v19 = vld [vmem:[#allocation91_spill] sm:$0xff] }
 0x7a1   : > { %17301 = vmatmul.mubr.msk.f32.gmra.mrb[50].mxu0 %vm25082_vm8, %v22902_v28  ;;  %v25177_v28 = vld [vmem:[#allocation116_spill] sm:$0xff]  ;;  %vm25179_vm8 = vnez %v25178_v8 }
 0x7a2   : > { %17303 = vmatprep.mubr.f32.mxu0 %v25165_v33  ;;  %v9378_v33 = vld [vmem:[#allocation7 + $0x3a0] sm:$0xff] }
 0x7a5   : > { %17304 = vmatmul.mubr.msk.f32.gmra.mrb[52].mxu0 %vm25084_vm7, %v25166_v22  ;;  %vm25182_vm7 = vnez %v25181_v44  ;;  %v9379_v22 = vld [vmem:[#allocation7 + $0x3a8] sm:$0xff] }
 0x7a6   : > { %17306 = vmatprep.mubr.f32.mxu0 %v25168_v31  ;;  %v9380_v31 = vld [vmem:[#allocation7 + $0x3b0] sm:$0xff] }
 0x7a9   : > { %17307 = vmatmul.mubr.msk.f32.gmra.mrb[54].mxu0 %vm25171_vm1, %v25169_v24  ;;  %v9381_v24 = vld [vmem:[#allocation7 + $0x3b8] sm:$0xff] }
 0x7aa   : > { %17309 = vmatprep.mubr.f32.mxu0 %v25172_v30  ;;  %v9382_v30 = vld [vmem:[#allocation7 + $0x3c0] sm:$0xff] }
 0x7ad   : > { %17310 = vmatmul.mubr.msk.f32.gmra.mrb[56].mxu0 %vm25175_vm3, %v25173_v36  ;;  %vm25183_vm3 = vnez %v24799_v46  ;;  %v9386_v36 = vld [vmem:[#allocation7 + $0x3e0] sm:$0xff] }
 0x7ae   : > { %17312 = vmatprep.mubr.f32.mxu0 %v25176_v15  ;;  %v9388_v15 = vld [vmem:[#allocation7 + $0x3f0] sm:$0xff] }
 0x7b1   : > { %17313 = vmatmul.mubr.msk.f32.gmra.mrb[58].mxu0 %vm25179_vm8, %v25177_v28  ;;  %v9711_v28 = vld [vmem:[#allocation7 + $0x400] sm:$0xff] }
 0x7b2   : > { %17315 = vmatprep.mubr.f32.mxu0 %v25180_v5  ;;  %v25196_v5 = vld [vmem:[#allocation87_spill] sm:$0xff] }
 0x7b5   : > { %17316 = vmatmul.mubr.msk.f32.gmra.mrb[60].mxu0 %vm25182_vm7, %v22942_v32  ;;  %vm25184_vm7 = vnez %v24821_v62  ;;  %v19089_v32 = vpack.c.bf16 %v9379_v22, %v9378_v33  ;;  %v25203_v33 = vld [vmem:[#allocation48_spill] sm:$0xff]  ;;  %v25204_v22 = vld [vmem:[#allocation14_spill] sm:$0xff] }
 0x7b6   : > { %17318 = vmatprep.mubr.f32.mxu0 %v23133_v57 }
 0x7b9   : > { %17319 = vmatmul.mubr.msk.f32.gmra.mrb[62].mxu0 %vm25183_vm3, %v23136_v51  ;;  %vm25185_vm3 = vnez %v24603_v3 }
 0x7ba   : > { %17353 = vmatprep.mubr.msk.f32.mxu0 %vm25097_vm5, %v22713_v14  ;;  %v19093_v14 = vpack.c.bf16 %v9381_v24, %v9380_v31  ;;  %v25205_v31 = vld [vmem:[#allocation50_spill] sm:$0xff]  ;;  %v9036_v24 = vld [vmem:[#allocation2 + $0x11f] sm:$0xff] }
 0x7bd   : > { %17354 = vmatmul.mubr.f32.vlgmr.msra.gmra.mrb[32].mxu0 %v22718_v54  ;;  %v9383_v54 = vld [vmem:[#allocation7 + $0x3c8] sm:$0xff] }
 0x7be   : > { %17356 = vmatprep.mubr.msk.f32.mxu0 %vm25184_vm7, %v22721_v38  ;;  %19084 = vmatpush3.bf16.msra.mxu0 %v19081_v37  ;;  %vm25186_vm7 = vnez %v24605_v10  ;;  %v19097_v38 = vpack.c.bf16 %v9383_v54, %v9382_v30  ;;  %v9384_v37 = vld [vmem:[#allocation7 + $0x3d0] sm:$0xff]  ;;  %v9714_v30 = vld [vmem:[#allocation7 + $0x418] sm:$0xff]  ;;  %v10199_v54 = vld [vmem:[#allocation9 + $0x80] sm:$0xff] }
 0x7bf   : > { %19086 = vmatprep.subr.bf16.mxu0 %v19085_v42 }
 0x7c1   : > { %17357 = vmatmul.mubr.f32.gmra.mrb[34].mxu0 %v22726_v45  ;;  %v9385_v45 = vld [vmem:[#allocation7 + $0x3d8] sm:$0xff] }
 0x7c2   : > { %17359 = vmatprep.mubr.msk.f32.mxu0 %vm25185_vm3, %v22729_v43  ;;  %19088 = vmatpush3.bf16.msra.mxu0 %v19085_v42  ;;  %vm25187_vm3 = vnez %v24607_v41  ;;  %v19101_v43 = vpack.c.bf16 %v9385_v45, %v9384_v37  ;;  %v25202_v42 = vld [vmem:[#allocation15_spill] sm:$0xff]  ;;  %v10201_v37 = vld [vmem:[#allocation9 + $0x90] sm:$0xff] }
 0x7c3   : > { %19090 = vmatprep.subr.bf16.mxu0 %v19089_v32 }
 0x7c5   : > { %17360 = vmatmul.mubr.f32.gmra.mrb[36].mxu0 %v22734_v35  ;;  %v9387_v35 = vld [vmem:[#allocation7 + $0x3e8] sm:$0xff] }
 0x7c6   : > { %17362 = vmatprep.mubr.msk.f32.mxu0 %vm25186_vm7, %v22737_v58  ;;  %19092 = vmatpush3.bf16.msra.mxu0 %v19089_v32  ;;  %vm25188_vm7 = vnez %v24609_v59  ;;  %v19105_v58 = vpack.c.bf16 %v9387_v35, %v9386_v36  ;;  %v9035_v32 = vld [vmem:[#allocation2 + $0x117] sm:$0xff] }
 0x7c7   : > { %19094 = vmatprep.subr.bf16.mxu0 %v19093_v14  ;;  %v9715_v35 = vld [vmem:[#allocation7 + $0x420] sm:$0xff] }
 0x7c9   : > { %17363 = vmatmul.mubr.f32.gmra.mrb[38].mxu0 %v22742_v48  ;;  %v9389_v48 = vld [vmem:[#allocation7 + $0x3f8] sm:$0xff] }
 0x7ca   : > { %17365 = vmatprep.mubr.msk.f32.mxu0 %vm25187_vm3, %v22745_v60  ;;  %19096 = vmatpush3.bf16.msra.mxu0 %v19093_v14  ;;  %v19109_v60 = vpack.c.bf16 %v9389_v48, %v9388_v15  ;;  %v9713_v14 = vld [vmem:[#allocation7 + $0x410] sm:$0xff]  ;;  %v9716_v15 = vld [vmem:[#allocation7 + $0x428] sm:$0xff]  ;;  %v10203_v48 = vld [vmem:[#allocation9 + $0xa0] sm:$0xff] }
 0x7cb   : > { %19098 = vmatprep.subr.bf16.mxu0 %v19097_v38  ;;  %v19117_v36 = vpack.c.bf16 %v9714_v30, %v9713_v14  ;;  %v25210_v14 = vld [vmem:[#allocation21_spill] sm:$0xff]  ;;  %v25211_v30 = vld [vmem:[#allocation20_spill] sm:$0xff] }
 0x7cd   : > { %17366 = vmatmul.mubr.f32.gmra.mrb[40].mxu0 %v22750_v34  ;;  %v9712_v34 = vld [vmem:[#allocation7 + $0x408] sm:$0xff] }
 0x7ce   : > { %17368 = vmatprep.mubr.msk.f32.mxu0 %vm25188_vm7, %v22753_v4  ;;  %19100 = vmatpush3.bf16.msra.mxu0 %v19097_v38  ;;  %v19113_v4 = vpack.c.bf16 %v9712_v34, %v9711_v28  ;;  %vm25189_vm7 = vnez %v24615_v2  ;;  %v10200_v38 = vld [vmem:[#allocation9 + $0x88] sm:$0xff]  ;;  %v25206_v28 = vld [vmem:[#allocation17_spill] sm:$0xff]  ;;  %v25207_v34 = vld [vmem:[#allocation16_spill] sm:$0xff] }
 0x7cf   : > { %19102 = vmatprep.subr.bf16.mxu0 %v19101_v43  ;;  %v19145_v45 = vpack.c.bf16 %v10200_v38, %v10199_v54  ;;  %v9721_v38 = vld [vmem:[#allocation7 + $0x450] sm:$0xff] }
 0x7d1   : > { %17369 = vmatmul.mubr.f32.gmra.mrb[42].mxu0 %v22758_v61  ;;  %v25190_v61 = vld [vmem:[#allocation105_spill] sm:$0xff]  ;;  %19146 = vmatprep.subr.bf16.mxu1 %v19145_v45 }
 0x7d2   : > { %17371 = vmatprep.mubr.msk.f32.mxu0 %vm25063_vm9, %v22761_v50  ;;  %19104 = vmatpush3.bf16.msra.mxu0 %v19101_v43  ;;  %v25191_v50 = vld [vmem:[#allocation44_spill] sm:$0xff]  ;;  %v10202_v43 = vld [vmem:[#allocation9 + $0x98] sm:$0xff] }
 0x7d3   : > { %19106 = vmatprep.subr.bf16.mxu0 %v19105_v58  ;;  %19148 = vmatpush3.bf16.msra.mxu1 %v19145_v45  ;;  %v9722_v45 = vld [vmem:[#allocation7 + $0x458] sm:$0xff] }
 0x7d5   : > { %17372 = vmatmul.mubr.f32.gmra.mrb[44].mxu0 %v22766_v11  ;;  %v25192_v11 = vld [vmem:[#allocation106_spill] sm:$0xff] }
 0x7d6   : > { %17374 = vmatprep.mubr.msk.f32.mxu0 %vm25103_vm2, %v22769_v55  ;;  %19108 = vmatpush3.bf16.msra.mxu0 %v19105_v58  ;;  %v25193_v55 = vld [vmem:[#allocation107_spill] sm:$0xff]  ;;  %v19149_v58 = vpack.c.bf16 %v10202_v43, %v10201_v37  ;;  %v10209_v43 = vld [vmem:[#allocation9 + $0xd0] sm:$0xff] }
 0x7d7   : > { %19110 = vmatprep.subr.bf16.mxu0 %v19109_v60 }
 0x7d8   : > { %19150 = vmatprep.subr.bf16.mxu1 %v19149_v58 }
 0x7d9   : > { %17375 = vmatmul.mubr.f32.gmra.mrb[46].mxu0 %v22774_v56  ;;  %19152 = vmatpush3.bf16.msra.mxu1 %v19149_v58  ;;  %v25213_v58 = vld [vmem:[#allocation22_spill] sm:$0xff]  ;;  %v11073_v56 = vld [vmem:[#allocation9 + $0x1b8] sm:$0xff] }
 0x7da   : > { %17377 = vmatprep.mubr.msk.f32.mxu0 %vm25189_vm7, %v22777_v18  ;;  %19112 = vmatpush3.bf16.msra.mxu0 %v19109_v60  ;;  %v25195_v18 = vld [vmem:[#allocation86_spill] sm:$0xff]  ;;  %v10204_v60 = vld [vmem:[#allocation9 + $0xa8] sm:$0xff] }
 0x7db   : > { %19114 = vmatprep.subr.bf16.mxu0 %v19113_v4 }
 0x7dd   : > { %17378 = vmatmul.mubr.f32.gmra.mrb[48].mxu0 %v22782_v27  ;;  %v11070_v27 = vld [vmem:[#allocation9 + $0x1a0] sm:$0xff] }
 0x7de   : > { %17380 = vmatprep.mubr.msk.f32.mxu0 %vm24868_vm13, %v22785_v9  ;;  %v25199_v9 = vld [vmem:[#allocation90_spill] sm:$0xff] }
 0x7e1   : > { %17381 = vmatmul.mubr.f32.gmra.mrb[50].mxu0 %v22790_v16  ;;  %v25200_v16 = vld [vmem:[#allocation47_spill] sm:$0xff] }
 0x7e2   : > { %17383 = vmatprep.mubr.msk.f32.mxu0 %vm25065_vm15, %v25190_v61  ;;  %v19121_v61 = vpack.c.bf16 %v9716_v15, %v9715_v35  ;;  %v25212_v35 = vld [vmem:[#allocation23_spill] sm:$0xff]  ;;  %v19133_v15 = vpack.c.bf16 %v9722_v45, %v9721_v38  ;;  %v9362_v38 = vld [vmem:[#allocation2 + $0xc8] sm:$0xff] }
 0x7e3   : > { %v9364_v45 = vld [vmem:[#allocation2 + $0xd8] sm:$0xff] }
 0x7e5   : > { %17384 = vmatmul.mubr.f32.gmra.mrb[52].mxu0 %v25192_v11  ;;  %v9717_v11 = vld [vmem:[#allocation7 + $0x430] sm:$0xff] }
 0x7e6   : > { %17386 = vmatprep.mubr.msk.f32.mxu0 %vm25066_vm6, %v25193_v55  ;;  %v9718_v55 = vld [vmem:[#allocation7 + $0x438] sm:$0xff] }
 0x7e9   : > { %17387 = vmatmul.mubr.f32.gmra.mrb[54].mxu0 %v25195_v18  ;;  %v10205_v18 = vld [vmem:[#allocation9 + $0xb0] sm:$0xff] }
 0x7ea   : > { %17389 = vmatprep.mubr.msk.f32.mxu0 %vm25109_vm11, %v25196_v5  ;;  %v10206_v5 = vld [vmem:[#allocation9 + $0xb8] sm:$0xff] }
 0x7ed   : > { %17390 = vmatmul.mubr.f32.gmra.mrb[56].mxu0 %v25198_v40  ;;  %v25208_v40 = vld [vmem:[#allocation19_spill] sm:$0xff] }
 0x7ee   : > { %17392 = vmatprep.mubr.msk.f32.mxu0 %vm24834_vm4, %v25199_v9  ;;  %v25209_v9 = vld [vmem:[#allocation18_spill] sm:$0xff]  ;;  %vm25221_vm4 = vnez %v25153_v39 }
 0x7f1   : > { %17393 = vmatmul.mubr.f32.gmra.mrb[58].mxu0 %v25201_v19  ;;  %v19125_v19 = vpack.c.bf16 %v9718_v55, %v9717_v11  ;;  %v25214_v11 = vld [vmem:[#allocation25_spill] sm:$0xff] }
 0x7f2   : > { %17395 = vmatprep.mubr.msk.f32.mxu0 %vm24975_vm12, %v25202_v42  ;;  %v9719_v42 = vld [vmem:[#allocation7 + $0x440] sm:$0xff]  ;;  %vm25220_vm12 = vnez %v25151_v63 }
 0x7f5   : > { %17396 = vmatmul.mubr.f32.gmra.mrb[60].mxu0 %v25204_v22  ;;  %v19157_v22 = vpack.c.bf16 %v10206_v5, %v10205_v18  ;;  %v9725_v5 = vld [vmem:[#allocation7 + $0x470] sm:$0xff] }
 0x7f6   : > { %17398 = vmatprep.mubr.msk.f32.mxu0 %vm25074_vm0, %v9035_v32  ;;  %v10207_v32 = vld [vmem:[#allocation9 + $0xc0] sm:$0xff]  ;;  %vm25219_vm0 = vnez %v25149_v1 }
 0x7f9   : > { %17399 = vmatmul.mubr.f32.gmra.mrb[62].mxu0 %v9036_v24  ;;  %v10208_v24 = vld [vmem:[#allocation9 + $0xc8] sm:$0xff] }
 0x7fa   : > { %17433 = vmatprep.mubr.f32.mxu0 %v23015_v47  ;;  %v19153_v47 = vpack.c.bf16 %v10204_v60, %v10203_v48  ;;  %v19161_v37 = vpack.c.bf16 %v10208_v24, %v10207_v32  ;;  %v9723_v48 = vld [vmem:[#allocation7 + $0x460] sm:$0xff]  ;;  %v9357_v32 = vld [vmem:[#allocation2 + $0xa0] sm:$0xff]  ;;  %v9358_v24 = vld [vmem:[#allocation2 + $0xa8] sm:$0xff] }
 0x7fc   : > { %19154 = vmatprep.subr.bf16.mxu1 %v19153_v47 }
 0x7fd   : > { %17434 = vmatmul.mubr.f32.vlgmr.msra.gmra.mrb[32].mxu0 %v25206_v28  ;;  %19156 = vmatpush3.bf16.msra.mxu1 %v19153_v47  ;;  %v9724_v28 = vld [vmem:[#allocation7 + $0x468] sm:$0xff]  ;;  %v25215_v47 = vld [vmem:[#allocation24_spill] sm:$0xff] }
 0x7fe   : > { %17436 = vmatprep.mubr.f32.mxu0 %v25207_v34  ;;  %19116 = vmatpush3.bf16.msra.mxu0 %v19113_v4  ;;  %v9720_v4 = vld [vmem:[#allocation7 + $0x448] sm:$0xff]  ;;  %v10211_v34 = vld [vmem:[#allocation9 + $0xe0] sm:$0xff]  ;;  %v19137_v55 = vpack.c.bf16 %v9724_v28, %v9723_v48  ;;  %v9370_v48 = vld [vmem:[#allocation2 + $0x108] sm:$0xff] }
 0x7ff   : > { %19118 = vmatprep.subr.bf16.mxu0 %v19117_v36  ;;  %v19129_v54 = vpack.c.bf16 %v9720_v4, %v9719_v42  ;;  %19158 = vmatprep.subr.bf16.mxu1 %v19157_v22  ;;  %v9356_v4 = vld [vmem:[#allocation2 + $0x98] sm:$0xff]  ;;  %v23217_v28 = vld [vmem:[#allocation2 + $0x8] sm:$0xff] }
 0x801   : > { %17437 = vmatmul.mubr.f32.gmra.mrb[34].mxu0 %v25208_v40  ;;  %19160 = vmatpush3.bf16.msra.mxu1 %v19157_v22  ;;  %v9726_v40 = vld [vmem:[#allocation7 + $0x478] sm:$0xff] }
 0x802   : > { %17439 = vmatprep.mubr.f32.mxu0 %v25209_v9  ;;  %19120 = vmatpush3.bf16.msra.mxu0 %v19117_v36  ;;  %v10210_v36 = vld [vmem:[#allocation9 + $0xd8] sm:$0xff]  ;;  %v25216_v9 = vld [vmem:[#allocation27_spill] sm:$0xff]  ;;  %v19141_v42 = vpack.c.bf16 %v9726_v40, %v9725_v5 }
 0x803   : > { %19122 = vmatprep.subr.bf16.mxu0 %v19121_v61  ;;  %19162 = vmatprep.subr.bf16.mxu1 %v19161_v37  ;;  %v19165_v60 = vpack.c.bf16 %v10210_v36, %v10209_v43  ;;  %v25218_v22 = vld [vmem:[#allocation29_spill] sm:$0xff]  ;;  %v9365_v43 = vld [vmem:[#allocation2 + $0xe0] sm:$0xff] }
 0x804   : > { %v9366_v36 = vld [vmem:[#allocation2 + $0xe8] sm:$0xff]  ;;  %v9653_v5 = vld [vmem:[#allocation2 + $0x59] sm:$0xff] }
 0x805   : > { %17440 = vmatmul.mubr.f32.gmra.mrb[36].mxu0 %v25210_v14  ;;  %19164 = vmatpush3.bf16.msra.mxu1 %v19161_v37  ;;  %v9359_v14 = vld [vmem:[#allocation2 + $0xb0] sm:$0xff]  ;;  %v9654_v40 = vld [vmem:[#allocation2 + $0x61] sm:$0xff] }
 0x806   : > { %17442 = vmatprep.mubr.f32.mxu0 %v25211_v30  ;;  %19124 = vmatpush3.bf16.msra.mxu0 %v19121_v61  ;;  %v10212_v61 = vld [vmem:[#allocation9 + $0xe8] sm:$0xff]  ;;  %v9363_v37 = vld [vmem:[#allocation2 + $0xd0] sm:$0xff] }
 0x807   : > { %19126 = vmatprep.subr.bf16.mxu0 %v19125_v19  ;;  %19166 = vmatprep.subr.bf16.mxu1 %v19165_v60  ;;  %v19169_v18 = vpack.c.bf16 %v10212_v61, %v10211_v34  ;;  %v9360_v30 = vld [vmem:[#allocation2 + $0xb8] sm:$0xff]  ;;  %v9647_v34 = vld [vmem:[#allocation2 + $0x29] sm:$0xff] }
 0x808   : > { %v9648_v61 = vld [vmem:[#allocation2 + $0x31] sm:$0xff] }
 0x809   : > { %17443 = vmatmul.mubr.f32.gmra.mrb[38].mxu0 %v25212_v35  ;;  %19168 = vmatpush3.bf16.msra.mxu1 %v19165_v60  ;;  %v9367_v35 = vld [vmem:[#allocation2 + $0xf0] sm:$0xff] }
 0x80a   : > { %17445 = vmatprep.mubr.f32.mxu0 %v25213_v58  ;;  %19128 = vmatpush3.bf16.msra.mxu0 %v19125_v19  ;;  %v25217_v19 = vld [vmem:[#allocation26_spill] sm:$0xff]  ;;  %v9368_v58 = vld [vmem:[#allocation2 + $0xf8] sm:$0xff] }
 0x80b   : > { %19130 = vmatprep.subr.bf16.mxu0 %v19129_v54  ;;  %19170 = vmatprep.subr.bf16.mxu1 %v19169_v18  ;;  %v9371_v60 = vld [vmem:[#allocation2 + $0x110] sm:$0xff] }
 0x80d   : > { %17446 = vmatmul.mubr.f32.gmra.mrb[40].mxu0 %v25214_v11  ;;  %19172 = vmatpush3.bf16.msra.mxu1 %v19169_v18  ;;  %v9649_v11 = vld [vmem:[#allocation2 + $0x39] sm:$0xff]  ;;  %v9652_v18 = vld [vmem:[#allocation2 + $0x51] sm:$0xff] }
 0x80e   : > { %17448 = vmatprep.mubr.f32.mxu0 %v25215_v47  ;;  %19132 = vmatpush3.bf16.msra.mxu0 %v19129_v54  ;;  %v9361_v54 = vld [vmem:[#allocation2 + $0xc0] sm:$0xff] }
 0x80f   : > { %19134 = vmatprep.subr.bf16.mxu0 %v19133_v15  ;;  %v9650_v47 = vld [vmem:[#allocation2 + $0x41] sm:$0xff] }
 0x811   : > { %17449 = vmatmul.mubr.f32.gmra.mrb[42].mxu0 %v25216_v9  ;;  %v9655_v9 = vld [vmem:[#allocation2 + $0x69] sm:$0xff] }
 0x812   : > { %17451 = vmatprep.mubr.f32.mxu0 %v25217_v19  ;;  %19136 = vmatpush3.bf16.msra.mxu0 %v19133_v15  ;;  %v9369_v15 = vld [vmem:[#allocation2 + $0x100] sm:$0xff]  ;;  %v9656_v19 = vld [vmem:[#allocation2 + $0x71] sm:$0xff] }
 0x813   : > { %19138 = vmatprep.subr.bf16.mxu0 %v19137_v55 }
 0x815   : > { %17452 = vmatmul.mubr.f32.gmra.mrb[44].mxu0 %v25218_v22  ;;  %v9658_v22 = vld [vmem:[#allocation2 + $0x81] sm:$0xff] }
 0x816   : > { %17454 = vmatprep.mubr.f32.mxu0 %v9356_v4  ;;  %19140 = vmatpush3.bf16.msra.mxu0 %v19137_v55  ;;  %v9651_v55 = vld [vmem:[#allocation2 + $0x49] sm:$0xff] }
 0x817   : > { %19142 = vmatprep.subr.bf16.mxu0 %v19141_v42  ;;  %v9659_v4 = vld [vmem:[#allocation2 + $0x89] sm:$0xff] }
 0x819   : > { %17455 = vmatmul.mubr.f32.gmra.mrb[46].mxu0 %v9357_v32  ;;  %v9660_v32 = vld [vmem:[#allocation2 + $0x91] sm:$0xff] }
 0x81a   : > { %17457 = vmatprep.mubr.f32.mxu0 %v9358_v24  ;;  %19144 = vmatpush3.bf16.msra.mxu0 %v19141_v42  ;;  %v9657_v42 = vld [vmem:[#allocation2 + $0x79] sm:$0xff] }
 0x81b   : > { %v9661_v24 = vld [vmem:[#allocation2 + $0x99] sm:$0xff] }
 0x81d   : > { %17458 = vmatmul.mubr.f32.gmra.mrb[48].mxu0 %v9359_v14  ;;  %v9662_v14 = vld [vmem:[#allocation2 + $0xa1] sm:$0xff] }
 0x81e   : > { %17460 = vmatprep.mubr.f32.mxu0 %v9360_v30  ;;  %v9663_v30 = vld [vmem:[#allocation2 + $0xa9] sm:$0xff] }
 0x821   : > { %17461 = vmatmul.mubr.f32.gmra.mrb[50].mxu0 %v9361_v54  ;;  %v9664_v54 = vld [vmem:[#allocation2 + $0xb1] sm:$0xff] }
 0x822   : > { %17463 = vmatprep.mubr.f32.mxu0 %v9362_v38  ;;  %v9665_v38 = vld [vmem:[#allocation2 + $0xb9] sm:$0xff] }
 0x825   : > { %17464 = vmatmul.mubr.f32.gmra.mrb[52].mxu0 %v9363_v37  ;;  %v9666_v37 = vld [vmem:[#allocation2 + $0xc1] sm:$0xff] }
 0x826   : > { %17466 = vmatprep.mubr.f32.mxu0 %v9364_v45  ;;  %v9667_v45 = vld [vmem:[#allocation2 + $0xc9] sm:$0xff] }
 0x829   : > { %17467 = vmatmul.mubr.f32.gmra.mrb[54].mxu0 %v9365_v43  ;;  %v9668_v43 = vld [vmem:[#allocation2 + $0xd1] sm:$0xff] }
 0x82a   : > { %17469 = vmatprep.mubr.f32.mxu0 %v9366_v36  ;;  %v9669_v36 = vld [vmem:[#allocation2 + $0xd9] sm:$0xff] }
 0x82d   : > { %17470 = vmatmul.mubr.f32.gmra.mrb[56].mxu0 %v9367_v35  ;;  %v9670_v35 = vld [vmem:[#allocation2 + $0xe1] sm:$0xff] }
 0x82e   : > { %17472 = vmatprep.mubr.f32.mxu0 %v9368_v58  ;;  %v9671_v58 = vld [vmem:[#allocation2 + $0xe9] sm:$0xff] }
 0x831   : > { %17473 = vmatmul.mubr.f32.gmra.mrb[58].mxu0 %v9369_v15  ;;  %v9672_v15 = vld [vmem:[#allocation2 + $0xf1] sm:$0xff] }
 0x832   : > { %17475 = vmatprep.mubr.f32.mxu0 %v9370_v48  ;;  %v9673_v48 = vld [vmem:[#allocation2 + $0xf9] sm:$0xff] }
 0x835   : > { %17476 = vmatmul.mubr.f32.gmra.mrb[60].mxu0 %v9371_v60  ;;  %v9674_v60 = vld [vmem:[#allocation2 + $0x101] sm:$0xff] }
 0x836   : > { %17478 = vmatprep.mubr.f32.mxu0 %v23217_v28 }
 0x839   : > { %17479 = vmatmul.mubr.f32.gmra.mrb[62].mxu0 %v23217_v28 }
 0x83a   : > { %17513 = vmatprep.mubr.f32.mxu0 %v9647_v34  ;;  %v9677_v34 = vld [vmem:[#allocation2 + $0x119] sm:$0xff] }
 0x83d   : > { %17514 = vmatmul.mubr.msk.f32.vlgmr.msra.gmra.mrb[32].mxu0 %vm24987_vm10, %v9648_v61  ;;  %vm25222_vm10 = vnez %v25155_v17  ;;  %v9678_v61 = vld [vmem:[#allocation2 + $0x121] sm:$0xff] }
 0x83e   : > { %17516 = vmatprep.mubr.f32.mxu0 %v9649_v11  ;;  %v10213_v11 = vld [vmem:[#allocation9 + $0xf0] sm:$0xff] }
 0x841   : > { %17517 = vmatmul.mubr.msk.f32.gmra.mrb[34].mxu0 %vm25219_vm0, %v9650_v47  ;;  %vm25223_vm0 = vnez %v25157_v21  ;;  %v10214_v47 = vld [vmem:[#allocation9 + $0xf8] sm:$0xff] }
 0x842   : > { %17519 = vmatprep.mubr.f32.mxu0 %v9651_v55  ;;  %v19173_v55 = vpack.c.bf16 %v10214_v47, %v10213_v11 }
 0x844   : > { %19174 = vmatprep.subr.bf16.mxu1 %v19173_v55 }
 0x845   : > { %17520 = vmatmul.mubr.msk.f32.gmra.mrb[36].mxu0 %vm25220_vm12, %v9652_v18  ;;  %19176 = vmatpush3.bf16.msra.mxu1 %v19173_v55  ;;  %v10151_v18 = vld [vmem:[#allocation9] sm:$0xff] }
 0x846   : > { %17522 = vmatprep.mubr.f32.mxu0 %v9653_v5  ;;  %v10152_v5 = vld [vmem:[#allocation9 + $0x8] sm:$0xff] }
 0x848   : > { %17594 = vmatmul.mubr.f32.vlgmr.msra.gmra.mrb[32].mxu1 %v23217_v28  ;;  %v10159_v28 = vld [vmem:[#allocation9 + $0x40] sm:$0xff] }
 0x849   : > { %17523 = vmatmul.mubr.msk.f32.gmra.mrb[38].mxu0 %vm25221_vm4, %v9654_v40  ;;  %vm25224_vm4 = vnez %v24743_v0  ;;  %v10153_v40 = vld [vmem:[#allocation9 + $0x10] sm:$0xff] }
 0x84a   : > { %17525 = vmatprep.mubr.f32.mxu0 %v9655_v9  ;;  %v10154_v9 = vld [vmem:[#allocation9 + $0x18] sm:$0xff] }
 0x84d   : > { %17526 = vmatmul.mubr.msk.f32.gmra.mrb[40].mxu0 %vm25222_vm10, %v9656_v19  ;;  %vm25225_vm10 = vnez %v25161_v7  ;;  %v10155_v19 = vld [vmem:[#allocation9 + $0x20] sm:$0xff] }
 0x84e   : > { %17528 = vmatprep.mubr.f32.mxu0 %v9657_v42  ;;  %v10156_v42 = vld [vmem:[#allocation9 + $0x28] sm:$0xff] }
 0x851   : > { %17529 = vmatmul.mubr.msk.f32.gmra.mrb[42].mxu0 %vm25223_vm0, %v9658_v22  ;;  %vm25226_vm0 = vnez %v25164_v49  ;;  %v19185_v22 = vpack.c.bf16 %v10156_v42, %v10155_v19 }
 0x852   : > { %17531 = vmatprep.mubr.f32.mxu0 %v9659_v4  ;;  %v10157_v4 = vld [vmem:[#allocation9 + $0x30] sm:$0xff] }
 0x855   : > { %17532 = vmatmul.mubr.msk.f32.gmra.mrb[44].mxu0 %vm25159_vm14, %v9660_v32  ;;  %vm25227_vm14 = vnez %v25167_v25  ;;  %v10158_v32 = vld [vmem:[#allocation9 + $0x38] sm:$0xff] }
 0x856   : > { %17534 = vmatprep.mubr.f32.mxu0 %v9661_v24  ;;  %v19189_v24 = vpack.c.bf16 %v10158_v32, %v10157_v4 }
 0x859   : > { %17535 = vmatmul.mubr.msk.f32.gmra.mrb[46].mxu0 %vm25224_vm4, %v9662_v14  ;;  %v10160_v14 = vld [vmem:[#allocation9 + $0x48] sm:$0xff] }
 0x85a   : > { %17537 = vmatprep.mubr.f32.mxu0 %v9663_v30  ;;  %v19193_v30 = vpack.c.bf16 %v10160_v14, %v10159_v28 }
 0x85d   : > { %17538 = vmatmul.mubr.msk.f32.gmra.mrb[48].mxu0 %vm25225_vm10, %v9664_v54  ;;  %vm25228_vm10 = vnez %v25174_v13  ;;  %v10161_v54 = vld [vmem:[#allocation9 + $0x50] sm:$0xff] }
 0x85e   : > { %17540 = vmatprep.mubr.f32.mxu0 %v9665_v38  ;;  %v10162_v38 = vld [vmem:[#allocation9 + $0x58] sm:$0xff] }
 0x861   : > { %17541 = vmatmul.mubr.msk.f32.gmra.mrb[50].mxu0 %vm25226_vm0, %v9666_v37  ;;  %v19197_v37 = vpack.c.bf16 %v10162_v38, %v10161_v54 }
 0x862   : > { %17543 = vmatprep.mubr.f32.mxu0 %v9667_v45  ;;  %v10163_v45 = vld [vmem:[#allocation9 + $0x60] sm:$0xff] }
 0x865   : > { %17544 = vmatmul.mubr.msk.f32.gmra.mrb[52].mxu0 %vm25227_vm14, %v9668_v43  ;;  %vm25229_vm14 = vnez %v25181_v44  ;;  %v10164_v43 = vld [vmem:[#allocation9 + $0x68] sm:$0xff] }
 0x866   : > { %17546 = vmatprep.mubr.f32.mxu0 %v9669_v36  ;;  %v19201_v36 = vpack.c.bf16 %v10164_v43, %v10163_v45  ;;  %v11376_v44 = vld [vmem:[#allocation9 + $0x228] sm:$0xff] }
 0x869   : > { %17547 = vmatmul.mubr.msk.f32.gmra.mrb[54].mxu0 %vm25171_vm1, %v9670_v35  ;;  %vm25230_vm1 = vnez %v24799_v46  ;;  %v10165_v35 = vld [vmem:[#allocation9 + $0x70] sm:$0xff] }
 0x86a   : > { %17549 = vmatprep.mubr.f32.mxu0 %v9671_v58  ;;  %v10166_v58 = vld [vmem:[#allocation9 + $0x78] sm:$0xff] }
 0x86d   : > { %17550 = vmatmul.mubr.msk.f32.gmra.mrb[56].mxu0 %vm25228_vm10, %v9672_v15  ;;  %v19205_v15 = vpack.c.bf16 %v10166_v58, %v10165_v35 }
 0x86e   : > { %17552 = vmatprep.mubr.f32.mxu0 %v9673_v48  ;;  %v10729_v48 = vld [vmem:[#allocation9 + $0x100] sm:$0xff] }
 0x871   : > { %17553 = vmatmul.mubr.msk.f32.gmra.mrb[58].mxu0 %vm25179_vm8, %v9674_v60  ;;  %v10730_v60 = vld [vmem:[#allocation9 + $0x108] sm:$0xff] }
 0x872   : > { %17555 = vmatprep.mubr.f32.mxu0 %v23133_v57  ;;  %v19177_v57 = vpack.c.bf16 %v10152_v5, %v10151_v18 }
 0x874   : > { %19178 = vmatprep.subr.bf16.mxu1 %v19177_v57 }
 0x875   : > { %17556 = vmatmul.mubr.msk.f32.gmra.mrb[60].mxu0 %vm25229_vm14, %v23136_v51  ;;  %19180 = vmatpush3.bf16.msra.mxu1 %v19177_v57  ;;  %v19181_v51 = vpack.c.bf16 %v10154_v9, %v10153_v40 }
 0x876   : > { %17558 = vmatprep.mubr.f32.mxu0 %v9677_v34  ;;  %v23256_v34 = vpack.c.bf16 %v10730_v60, %v10729_v48 }
 0x877   : > { %19182 = vmatprep.subr.bf16.mxu1 %v19181_v51 }
 0x879   : > { %17559 = vmatmul.mubr.msk.f32.gmra.mrb[62].mxu0 %vm25230_vm1, %v9678_v61  ;;  %19184 = vmatpush3.bf16.msra.mxu1 %v19181_v51  ;;  %v23262_v61 = vld [vmem:[%s24076_s2] ss:$0 sm:$0xff]  ;;  %vm25252_vm1 = vnez %v24821_v62 }
 0x87a   : > { %19186 = vmatprep.subr.bf16.mxu1 %v19185_v22 }
 0x87d   : > { %19188 = vmatpush3.bf16.msra.mxu1 %v19185_v22 }
 0x87e   : > { %19190 = vmatprep.subr.bf16.mxu1 %v19189_v24 }
 0x881   : > { %19192 = vmatpush3.bf16.msra.mxu1 %v19189_v24 }
 0x882   : > { %19194 = vmatprep.subr.bf16.mxu1 %v19193_v30 }
 0x885   : > { %19196 = vmatpush3.bf16.msra.mxu1 %v19193_v30 }
 0x886   : > { %19198 = vmatprep.subr.bf16.mxu1 %v19197_v37 }
 0x889   : > { %19200 = vmatpush3.bf16.msra.mxu1 %v19197_v37 }
 0x88a   : > { %19202 = vmatprep.subr.bf16.mxu1 %v19201_v36 }
 0x88d   : > { %19204 = vmatpush3.bf16.msra.mxu1 %v19201_v36 }
 0x88e   : > { %19206 = vmatprep.subr.bf16.mxu1 %v19205_v15 }
 0x891   : > { %19208 = vmatpush3.bf16.msra.mxu1 %v19205_v15 }
 0x892   : > { %19210 = vmatprep.subr.bf16.mxu1 %v23256_v34 }
 0x910   : > { %v17515_v11 = vpop.f32.mrb[32].mxu0 }
 0x911   : > { %v9992_v47 = vadd.f32 %v17515_v11, %v23262_v61  ;;  %v9793_v55 = vpop.f32.mrb[33].mxu0 }
 0x912   : > { %v9991_v18 = vadd.f32 %v23262_v61, %v9793_v55 }
 0x913   : > { %v10024_v5 = vmax.f32 %v9992_v47, 0.0 }
 0x914   : > { %v10023_v57 = vmax.f32 %v9991_v18, 0.0  ;;  %v17518_v40 = vpop.f32.mrb[34].mxu0 }
 0x915   : > { %10056 = vst [vmem:[#allocation2 + $0x20] sm:$0xff] %v10024_v5  ;;  %v9994_v9 = vadd.f32 %v17518_v40, %v23262_v61  ;;  %v9803_v51 = vpop.f32.mrb[35].mxu0 }
 0x916   : > { %10055 = vst [vmem:[#allocation2 + $0x18] sm:$0xff] %v10023_v57  ;;  %v9993_v19 = vadd.f32 %v23262_v61, %v9803_v51  ;;  %17596 = vmatprep.mubr.f32.mxu1 %v10023_v57 }
 0x917   : > { %v10026_v42 = vmax.f32 %v9994_v9, 0.0  ;;  %17597 = vmatmul.mubr.f32.gmra.mrb[34].mxu1 %v10024_v5 }
 0x918   : > { %v10025_v22 = vmax.f32 %v9993_v19, 0.0  ;;  %v17521_v4 = vpop.f32.mrb[36].mxu0 }
 0x919   : > { %10058 = vst [vmem:[#allocation2 + $0x30] sm:$0xff] %v10026_v42  ;;  %v9996_v32 = vadd.f32 %v17521_v4, %v23262_v61  ;;  %v9813_v24 = vpop.f32.mrb[37].mxu0 }
 0x91a   : > { %10057 = vst [vmem:[#allocation2 + $0x28] sm:$0xff] %v10025_v22  ;;  %v9995_v28 = vadd.f32 %v23262_v61, %v9813_v24  ;;  %17599 = vmatprep.mubr.f32.mxu1 %v10025_v22 }
 0x91b   : > { %v10028_v14 = vmax.f32 %v9996_v32, 0.0  ;;  %17600 = vmatmul.mubr.f32.gmra.mrb[36].mxu1 %v10026_v42 }
 0x91c   : > { %v10027_v30 = vmax.f32 %v9995_v28, 0.0  ;;  %v17524_v54 = vpop.f32.mrb[38].mxu0 }
 0x91d   : > { %10060 = vst [vmem:[#allocation2 + $0x40] sm:$0xff] %v10028_v14  ;;  %v9998_v38 = vadd.f32 %v17524_v54, %v23262_v61  ;;  %v9823_v37 = vpop.f32.mrb[39].mxu0  ;;  %v23384_v26 = vld [vmem:[#allocation2 + $0x17] sm:$0xff] }
 0x91e   : > { %10059 = vst [vmem:[#allocation2 + $0x38] sm:$0xff] %v10027_v30  ;;  %v9997_v45 = vadd.f32 %v23262_v61, %v9823_v37  ;;  %17602 = vmatprep.mubr.f32.mxu1 %v10027_v30 }
 0x91f   : > { %v10030_v43 = vmax.f32 %v9998_v38, 0.0  ;;  %17603 = vmatmul.mubr.f32.gmra.mrb[38].mxu1 %v10028_v14 }
 0x920   : > { %v10029_v36 = vmax.f32 %v9997_v45, 0.0  ;;  %v17527_v35 = vpop.f32.mrb[40].mxu0 }
 0x921   : > { %10062 = vst [vmem:[#allocation2 + $0x50] sm:$0xff] %v10030_v43  ;;  %v10000_v58 = vadd.f32 %v17527_v35, %v23262_v61  ;;  %v9833_v15 = vpop.f32.mrb[41].mxu0 }
 0x922   : > { %10061 = vst [vmem:[#allocation2 + $0x48] sm:$0xff] %v10029_v36  ;;  %v9999_v48 = vadd.f32 %v23262_v61, %v9833_v15  ;;  %17605 = vmatprep.mubr.f32.mxu1 %v10029_v36 }
 0x923   : > { %v10032_v60 = vmax.f32 %v10000_v58, 0.0  ;;  %17606 = vmatmul.mubr.f32.gmra.mrb[40].mxu1 %v10030_v43 }
 0x924   : > { %v10031_v11 = vmax.f32 %v9999_v48, 0.0  ;;  %v17530_v47 = vpop.f32.mrb[42].mxu0 }
 0x925   : > { %10064 = vst [vmem:[#allocation2 + $0x60] sm:$0xff] %v10032_v60  ;;  %v10002_v55 = vadd.f32 %v17530_v47, %v23262_v61  ;;  %v9843_v18 = vpop.f32.mrb[43].mxu0 }
 0x926   : > { %10063 = vst [vmem:[#allocation2 + $0x58] sm:$0xff] %v10031_v11  ;;  %v10001_v5 = vadd.f32 %v23262_v61, %v9843_v18  ;;  %17608 = vmatprep.mubr.f32.mxu1 %v10031_v11 }
 0x927   : > { %v10034_v57 = vmax.f32 %v10002_v55, 0.0  ;;  %17609 = vmatmul.mubr.f32.gmra.mrb[42].mxu1 %v10032_v60 }
 0x928   : > { %v23276_v40 = vmax.f32 %v10001_v5, 0.0  ;;  %v17533_v9 = vpop.f32.mrb[44].mxu0 }
 0x929   : > { %10066 = vst [vmem:[#allocation2 + $0x70] sm:$0xff] %v10034_v57  ;;  %v10004_v51 = vadd.f32 %v17533_v9, %v23262_v61  ;;  %v9853_v19 = vpop.f32.mrb[45].mxu0 }
 0x92a   : > { %25231 = vst [vmem:[#allocation28_spill] sm:$0xff] %v23276_v40  ;;  %10065 = vst [vmem:[#allocation2 + $0x68] sm:$0xff] %v23276_v40  ;;  %v10003_v42 = vadd.f32 %v23262_v61, %v9853_v19  ;;  %17611 = vmatprep.mubr.f32.mxu1 %v23276_v40 }
 0x92b   : > { %v23282_v22 = vmax.f32 %v10004_v51, 0.0  ;;  %17612 = vmatmul.mubr.f32.gmra.mrb[44].mxu1 %v10034_v57 }
 0x92c   : > { %v23284_v4 = vmax.f32 %v10003_v42, 0.0  ;;  %v17536_v32 = vpop.f32.mrb[46].mxu0 }
 0x92d   : > { %25232 = vst [vmem:[#allocation31_spill] sm:$0xff] %v23282_v22  ;;  %10068 = vst [vmem:[#allocation2 + $0x80] sm:$0xff] %v23282_v22  ;;  %v10006_v24 = vadd.f32 %v17536_v32, %v23262_v61  ;;  %v9863_v28 = vpop.f32.mrb[47].mxu0  ;;  %v23534_v63 = vld [vmem:[#allocation2 + $0x51] sm:$0xff] }
 0x92e   : > { %25233 = vst [vmem:[#allocation30_spill] sm:$0xff] %v23284_v4  ;;  %10067 = vst [vmem:[#allocation2 + $0x78] sm:$0xff] %v23284_v4  ;;  %v10005_v14 = vadd.f32 %v23262_v61, %v9863_v28  ;;  %17614 = vmatprep.mubr.f32.mxu1 %v23284_v4  ;;  %v10665_v4 = vld [vmem:[#allocation2 + $0x9] sm:$0xff] }
 0x92f   : > { %v23291_v30 = vmax.f32 %v10006_v24, 0.0  ;;  %17615 = vmatmul.mubr.f32.gmra.mrb[46].mxu1 %v23282_v22 }
 0x930   : > { %v23294_v54 = vmax.f32 %v10005_v14, 0.0  ;;  %v17539_v38 = vpop.f32.mrb[48].mxu0 }
 0x931   : > { %25234 = vst [vmem:[#allocation33_spill] sm:$0xff] %v23291_v30  ;;  %10070 = vst [vmem:[#allocation2 + $0x90] sm:$0xff] %v23291_v30  ;;  %v10008_v37 = vadd.f32 %v17539_v38, %v23262_v61  ;;  %v9873_v45 = vpop.f32.mrb[49].mxu0 }
 0x932   : > { %25235 = vst [vmem:[#allocation32_spill] sm:$0xff] %v23294_v54  ;;  %10069 = vst [vmem:[#allocation2 + $0x88] sm:$0xff] %v23294_v54  ;;  %v10007_v43 = vadd.f32 %v23262_v61, %v9873_v45  ;;  %17617 = vmatprep.mubr.f32.mxu1 %v23294_v54 }
 0x933   : > { %v23301_v36 = vmax.f32 %v10008_v37, 0.0  ;;  %17618 = vmatmul.mubr.f32.gmra.mrb[48].mxu1 %v23291_v30 }
 0x934   : > { %v23304_v35 = vmax.f32 %v10007_v43, 0.0  ;;  %v17542_v58 = vpop.f32.mrb[50].mxu0 }
 0x935   : > { %25236 = vst [vmem:[#allocation35_spill] sm:$0xff] %v23301_v36  ;;  %10072 = vst [vmem:[#allocation2 + $0xa0] sm:$0xff] %v23301_v36  ;;  %v10010_v15 = vadd.f32 %v17542_v58, %v23262_v61  ;;  %v9883_v48 = vpop.f32.mrb[51].mxu0 }
 0x936   : > { %25237 = vst [vmem:[#allocation34_spill] sm:$0xff] %v23304_v35  ;;  %10071 = vst [vmem:[#allocation2 + $0x98] sm:$0xff] %v23304_v35  ;;  %v10009_v60 = vadd.f32 %v23262_v61, %v9883_v48  ;;  %17620 = vmatprep.mubr.f32.mxu1 %v23304_v35 }
 0x937   : > { %v23311_v11 = vmax.f32 %v10010_v15, 0.0  ;;  %17621 = vmatmul.mubr.f32.gmra.mrb[50].mxu1 %v23301_v36 }
 0x938   : > { %v23314_v47 = vmax.f32 %v10009_v60, 0.0  ;;  %v17545_v55 = vpop.f32.mrb[52].mxu0 }
 0x939   : > { %25238 = vst [vmem:[#allocation37_spill] sm:$0xff] %v23311_v11  ;;  %10074 = vst [vmem:[#allocation2 + $0xb0] sm:$0xff] %v23311_v11  ;;  %v10012_v18 = vadd.f32 %v17545_v55, %v23262_v61  ;;  %v9893_v5 = vpop.f32.mrb[53].mxu0 }
 0x93a   : > { %25239 = vst [vmem:[#allocation36_spill] sm:$0xff] %v23314_v47  ;;  %10073 = vst [vmem:[#allocation2 + $0xa8] sm:$0xff] %v23314_v47  ;;  %v10011_v57 = vadd.f32 %v23262_v61, %v9893_v5  ;;  %17623 = vmatprep.mubr.f32.mxu1 %v23314_v47 }
 0x93b   : > { %v23321_v9 = vmax.f32 %v10012_v18, 0.0  ;;  %17624 = vmatmul.mubr.f32.gmra.mrb[52].mxu1 %v23311_v11 }
 0x93c   : > { %v23324_v51 = vmax.f32 %v10011_v57, 0.0  ;;  %v17548_v19 = vpop.f32.mrb[54].mxu0 }
 0x93d   : > { %25240 = vst [vmem:[#allocation39_spill] sm:$0xff] %v23321_v9  ;;  %10076 = vst [vmem:[#allocation2 + $0xc0] sm:$0xff] %v23321_v9  ;;  %v10014_v42 = vadd.f32 %v17548_v19, %v23262_v61  ;;  %v9903_v32 = vpop.f32.mrb[55].mxu0 }
 0x93e   : > { %25241 = vst [vmem:[#allocation38_spill] sm:$0xff] %v23324_v51  ;;  %10075 = vst [vmem:[#allocation2 + $0xb8] sm:$0xff] %v23324_v51  ;;  %v10013_v24 = vadd.f32 %v23262_v61, %v9903_v32  ;;  %17626 = vmatprep.mubr.f32.mxu1 %v23324_v51 }
 0x93f   : > { %v23331_v28 = vmax.f32 %v10014_v42, 0.0  ;;  %17627 = vmatmul.mubr.f32.gmra.mrb[54].mxu1 %v23321_v9  ;;  %v23438_v9 = vld [vmem:[#allocation2 + $0x7f] sm:$0xff] }
 0x940   : > { %v23334_v14 = vmax.f32 %v10013_v24, 0.0  ;;  %v17551_v38 = vpop.f32.mrb[56].mxu0 }
 0x941   : > { %25242 = vst [vmem:[#allocation41_spill] sm:$0xff] %v23331_v28  ;;  %10078 = vst [vmem:[#allocation2 + $0xd0] sm:$0xff] %v23331_v28  ;;  %v10016_v37 = vadd.f32 %v17551_v38, %v23262_v61  ;;  %v9913_v45 = vpop.f32.mrb[57].mxu0 }
 0x942   : > { %25243 = vst [vmem:[#allocation40_spill] sm:$0xff] %v23334_v14  ;;  %10077 = vst [vmem:[#allocation2 + $0xc8] sm:$0xff] %v23334_v14  ;;  %v10015_v43 = vadd.f32 %v23262_v61, %v9913_v45  ;;  %17629 = vmatprep.mubr.f32.mxu1 %v23334_v14  ;;  %v11067_v14 = vld [vmem:[#allocation9 + $0x188] sm:$0xff] }
 0x943   : > { %v23341_v58 = vmax.f32 %v10016_v37, 0.0  ;;  %17630 = vmatmul.mubr.f32.gmra.mrb[56].mxu1 %v23331_v28  ;;  %v23430_v28 = vld [vmem:[#allocation2 + $0x6f] sm:$0xff] }
 0x944   : > { %v23344_v15 = vmax.f32 %v10015_v43, 0.0  ;;  %v17554_v48 = vpop.f32.mrb[58].mxu0 }
 0x945   : > { %25244 = vst [vmem:[#allocation95_spill] sm:$0xff] %v23341_v58  ;;  %10080 = vst [vmem:[#allocation2 + $0xe0] sm:$0xff] %v23341_v58  ;;  %v10018_v60 = vadd.f32 %v17554_v48, %v23262_v61  ;;  %v9923_v55 = vpop.f32.mrb[59].mxu0  ;;  %v23470_v51 = vld [vmem:[#allocation2 + $0xbf] sm:$0xff] }
 0x946   : > { %25245 = vst [vmem:[#allocation94_spill] sm:$0xff] %v23344_v15  ;;  %10079 = vst [vmem:[#allocation2 + $0xd8] sm:$0xff] %v23344_v15  ;;  %v10017_v18 = vadd.f32 %v23262_v61, %v9923_v55  ;;  %17632 = vmatprep.mubr.f32.mxu1 %v23344_v15  ;;  %v10744_v15 = vld [vmem:[#allocation9 + $0x178] sm:$0xff] }
 0x947   : > { %v23351_v5 = vmax.f32 %v10018_v60, 0.0  ;;  %17633 = vmatmul.mubr.f32.gmra.mrb[58].mxu1 %v23341_v58  ;;  %v10087_v60 = vld [vmem:[#allocation2 + $0x7] sm:$0xff]  ;;  %v23422_v58 = vld [vmem:[#allocation2 + $0x5f] sm:$0xff]  ;;  %25256 = vst [vmem:[#allocation108_spill] sm:$0xff] %v23470_v51 }
 0x948   : > { %v23354_v57 = vmax.f32 %v10017_v18, 0.0  ;;  %v17557_v19 = vpop.f32.mrb[60].mxu0  ;;  %v10731_v18 = vld [vmem:[#allocation9 + $0x110] sm:$0xff] }
 0x949   : > { %25246 = vst [vmem:[#allocation52_spill] sm:$0xff] %v23351_v5  ;;  %10082 = vst [vmem:[#allocation2 + $0xf0] sm:$0xff] %v23351_v5  ;;  %v10020_v42 = vadd.f32 %v17557_v19, %v23262_v61  ;;  %v9933_v32 = vpop.f32.mrb[61].mxu0  ;;  %v10732_v19 = vld [vmem:[#allocation9 + $0x118] sm:$0xff] }
 0x94a   : > { %25247 = vst [vmem:[#allocation49_spill] sm:$0xff] %v23354_v57  ;;  %10081 = vst [vmem:[#allocation2 + $0xe8] sm:$0xff] %v23354_v57  ;;  %v10019_v24 = vadd.f32 %v23262_v61, %v9933_v32  ;;  %17635 = vmatprep.mubr.f32.mxu1 %v23354_v57  ;;  %v10742_v57 = vld [vmem:[#allocation9 + $0x168] sm:$0xff]  ;;  %v23473_v11 = vld [vmem:[#allocation2 + $0xc7] sm:$0xff] }
 0x94b   : > { %v23361_v38 = vmax.f32 %v10020_v42, 0.0  ;;  %17636 = vmatmul.mubr.f32.gmra.mrb[60].mxu1 %v23351_v5  ;;  %v23414_v5 = vld [vmem:[#allocation2 + $0x4f] sm:$0xff]  ;;  %25257 = vst [vmem:[#allocation109_spill] sm:$0xff] %v23473_v11 }
 0x94c   : > { %v23364_v37 = vmax.f32 %v10019_v24, 0.0  ;;  %v17560_v45 = vpop.f32.mrb[62].mxu0  ;;  %v10088_v24 = vld [vmem:[#allocation2 + $0xf] sm:$0xff] }
 0x94d   : > { %25248 = vst [vmem:[#allocation92_spill] sm:$0xff] %v23361_v38  ;;  %10084 = vst [vmem:[#allocation2 + $0x100] sm:$0xff] %v23361_v38  ;;  %v23368_v43 = vadd.f32 %v17560_v45, %v23262_v61  ;;  %v9943_v48 = vpop.f32.mrb[63].mxu0  ;;  %v19213_v45 = vpack.c.bf16 %v10732_v19, %v10731_v18  ;;  %v10736_v18 = vld [vmem:[#allocation9 + $0x138] sm:$0xff]  ;;  %v23481_v36 = vld [vmem:[#allocation2 + $0xd7] sm:$0xff] }
 0x94e   : > { %25249 = vst [vmem:[#allocation93_spill] sm:$0xff] %v23364_v37  ;;  %10083 = vst [vmem:[#allocation2 + $0xf8] sm:$0xff] %v23364_v37  ;;  %v23372_v55 = vadd.f32 %v23262_v61, %v9943_v48  ;;  %17638 = vmatprep.mubr.f32.mxu1 %v23364_v37  ;;  %v10733_v61 = vld [vmem:[#allocation9 + $0x120] sm:$0xff]  ;;  %v10734_v48 = vld [vmem:[#allocation9 + $0x128] sm:$0xff] }
 0x94f   : > { %25250 = vst [vmem:[#allocation51_spill] sm:$0xff] %v23368_v43  ;;  %v24463_v42 = vmax.f32 %v23368_v43, 0.0  ;;  %17639 = vmatmul.mubr.f32.gmra.mrb[62].mxu1 %v23361_v38  ;;  %v23390_v38 = vld [vmem:[#allocation2 + $0x1f] sm:$0xff]  ;;  %v23393_v19 = vld [vmem:[#allocation2 + $0x27] sm:$0xff]  ;;  %v23478_v47 = vld [vmem:[#allocation2 + $0xcf] sm:$0xff] }
 0x950   : > { %25251 = vst [vmem:[#allocation42_spill] sm:$0xff] %v23372_v55  ;;  %v24465_v32 = vmax.f32 %v23372_v55, 0.0  ;;  %17673 = vmatprep.mubr.msk.f32.mxu1 %vm25097_vm5, %v10087_v60  ;;  %v19217_v60 = vpack.c.bf16 %v10734_v48, %v10733_v61  ;;  %vm25253_vm5 = vnez %v24603_v3  ;;  %v10738_v43 = vld [vmem:[#allocation9 + $0x148] sm:$0xff]  ;;  %v10740_v37 = vld [vmem:[#allocation9 + $0x158] sm:$0xff]  ;;  %25258 = vst [vmem:[#allocation110_spill] sm:$0xff] %v23478_v47 }
 0x951   : > { %10086 = vst [vmem:[#allocation2 + $0x110] sm:$0xff] %v24463_v42  ;;  %v10735_v42 = vld [vmem:[#allocation9 + $0x130] sm:$0xff]  ;;  %v23401_v61 = vld [vmem:[#allocation2 + $0x37] sm:$0xff]  ;;  %25259 = vst [vmem:[#allocation111_spill] sm:$0xff] %v23481_v36 }
 0x952   : > { %10085 = vst [vmem:[#allocation2 + $0x108] sm:$0xff] %v24465_v32  ;;  %v23398_v32 = vld [vmem:[#allocation2 + $0x2f] sm:$0xff]  ;;  %v23406_v55 = vld [vmem:[#allocation2 + $0x3f] sm:$0xff]  ;;  %v23489_v30 = vld [vmem:[#allocation2 + $0xe7] sm:$0xff] }
 0x953   : > { %17674 = vmatmul.mubr.f32.vlgmr.msra.gmra.mrb[32].mxu1 %v10088_v24  ;;  %v19221_v24 = vpack.c.bf16 %v10736_v18, %v10735_v42  ;;  %v23409_v42 = vld [vmem:[#allocation2 + $0x47] sm:$0xff]  ;;  %v23486_v35 = vld [vmem:[#allocation2 + $0xdf] sm:$0xff]  ;;  %25262 = vst [vmem:[#allocation113_spill] sm:$0xff] %v23489_v30  ;;  %v23494_v54 = vld [vmem:[#allocation2 + $0xef] sm:$0xff] }
 0x954   : > { %17676 = vmatprep.mubr.msk.f32.mxu1 %vm25252_vm1, %v23384_v26  ;;  %19212 = vmatpush3.bf16.msra.mxu1 %v23256_v34  ;;  %v10737_v34 = vld [vmem:[#allocation9 + $0x140] sm:$0xff]  ;;  %vm25254_vm1 = vnez %v24605_v10  ;;  %25261 = vst [vmem:[#allocation112_spill] sm:$0xff] %v23486_v35  ;;  %25264 = vst [vmem:[#allocation114_spill] sm:$0xff] %v23494_v54 }
 0x955   : > { %19214 = vmatprep.subr.bf16.mxu1 %v19213_v45  ;;  %v19225_v48 = vpack.c.bf16 %v10738_v43, %v10737_v34  ;;  %v23417_v43 = vld [vmem:[#allocation2 + $0x57] sm:$0xff]  ;;  %v23502_v40 = vld [vmem:[#allocation2 + $0xff] sm:$0xff]  ;;  %v23595_v49 = vld [vmem:[#allocation2 + $0xc9] sm:$0xff] }
 0x956   : > { %v23497_v22 = vld [vmem:[#allocation2 + $0xf7] sm:$0xff]  ;;  %25267 = vst [vmem:[#allocation116_spill] sm:$0xff] %v23502_v40  ;;  %25284 = vst [vmem:[#allocation90_spill] sm:$0xff] %v23595_v49 }
 0x957   : > { %17677 = vmatmul.mubr.f32.gmra.mrb[34].mxu1 %v23390_v38  ;;  %25265 = vst [vmem:[#allocation115_spill] sm:$0xff] %v23497_v22  ;;  %v23619_v13 = vld [vmem:[#allocation2 + $0xf9] sm:$0xff] }
 0x958   : > { %17679 = vmatprep.mubr.msk.f32.mxu1 %vm25253_vm5, %v23393_v19  ;;  %19216 = vmatpush3.bf16.msra.mxu1 %v19213_v45  ;;  %v10739_v45 = vld [vmem:[#allocation9 + $0x150] sm:$0xff]  ;;  %25290 = vst [vmem:[#allocation19_spill] sm:$0xff] %v23619_v13 }
 0x959   : > { %19218 = vmatprep.subr.bf16.mxu1 %v19217_v60  ;;  %v19229_v18 = vpack.c.bf16 %v10740_v37, %v10739_v45  ;;  %v23425_v37 = vld [vmem:[#allocation2 + $0x67] sm:$0xff] }
 0x95b   : > { %17680 = vmatmul.mubr.f32.gmra.mrb[36].mxu1 %v23398_v32  ;;  %v25395_v20 = vld [vmem:[#allocation114_spill] sm:$0xff] }
 0x95c   : > { %17682 = vmatprep.mubr.msk.f32.mxu1 %vm25254_vm1, %v23401_v61  ;;  %19220 = vmatpush3.bf16.msra.mxu1 %v19217_v60  ;;  %v10741_v60 = vld [vmem:[#allocation9 + $0x160] sm:$0xff]  ;;  %vm25255_vm1 = vnez %v24609_v59 }
 0x95d   : > { %19222 = vmatprep.subr.bf16.mxu1 %v19221_v24  ;;  %v19233_v34 = vpack.c.bf16 %v10742_v57, %v10741_v60  ;;  %v23433_v57 = vld [vmem:[#allocation2 + $0x77] sm:$0xff] }
 0x95f   : > { %17683 = vmatmul.mubr.f32.gmra.mrb[38].mxu1 %v23406_v55 }
 0x960   : > { %17685 = vmatprep.mubr.msk.f32.mxu1 %vm25187_vm3, %v23409_v42  ;;  %19224 = vmatpush3.bf16.msra.mxu1 %v19221_v24  ;;  %v10743_v24 = vld [vmem:[#allocation9 + $0x170] sm:$0xff] }
 0x961   : > { %19226 = vmatprep.subr.bf16.mxu1 %v19225_v48  ;;  %v19237_v45 = vpack.c.bf16 %v10744_v15, %v10743_v24  ;;  %v23441_v15 = vld [vmem:[#allocation2 + $0x87] sm:$0xff]  ;;  %v23449_v24 = vld [vmem:[#allocation2 + $0x97] sm:$0xff] }
 0x963   : > { %17686 = vmatmul.mubr.f32.gmra.mrb[40].mxu1 %v23414_v5 }
 0x964   : > { %17688 = vmatprep.mubr.msk.f32.mxu1 %vm25255_vm1, %v23417_v43  ;;  %19228 = vmatpush3.bf16.msra.mxu1 %v19225_v48  ;;  %v11066_v48 = vld [vmem:[#allocation9 + $0x180] sm:$0xff] }
 0x965   : > { %19230 = vmatprep.subr.bf16.mxu1 %v19229_v18  ;;  %v19241_v60 = vpack.c.bf16 %v11067_v14, %v11066_v48  ;;  %v23454_v14 = vld [vmem:[#allocation2 + $0x9f] sm:$0xff]  ;;  %v23465_v48 = vld [vmem:[#allocation2 + $0xb7] sm:$0xff] }
 0x967   : > { %17689 = vmatmul.mubr.f32.gmra.mrb[42].mxu1 %v23422_v58 }
 0x968   : > { %17691 = vmatprep.mubr.msk.f32.mxu1 %vm25063_vm9, %v23425_v37  ;;  %19232 = vmatpush3.bf16.msra.mxu1 %v19229_v18  ;;  %v23446_v18 = vld [vmem:[#allocation2 + $0x8f] sm:$0xff] }
 0x969   : > { %19234 = vmatprep.subr.bf16.mxu1 %v19233_v34 }
 0x96b   : > { %17692 = vmatmul.mubr.f32.gmra.mrb[44].mxu1 %v23430_v28 }
 0x96c   : > { %17694 = vmatprep.mubr.msk.f32.mxu1 %vm25103_vm2, %v23433_v57  ;;  %19236 = vmatpush3.bf16.msra.mxu1 %v19233_v34  ;;  %v23457_v34 = vld [vmem:[#allocation2 + $0xa7] sm:$0xff] }
 0x96d   : > { %19238 = vmatprep.subr.bf16.mxu1 %v19237_v45 }
 0x96f   : > { %17695 = vmatmul.mubr.f32.gmra.mrb[46].mxu1 %v23438_v9 }
 0x970   : > { %17697 = vmatprep.mubr.msk.f32.mxu1 %vm25189_vm7, %v23441_v15  ;;  %19240 = vmatpush3.bf16.msra.mxu1 %v19237_v45  ;;  %v23462_v45 = vld [vmem:[#allocation2 + $0xaf] sm:$0xff] }
 0x971   : > { %19242 = vmatprep.subr.bf16.mxu1 %v19241_v60 }
 0x973   : > { %17698 = vmatmul.mubr.f32.gmra.mrb[48].mxu1 %v23446_v18 }
 0x974   : > { %17700 = vmatprep.mubr.msk.f32.mxu1 %vm24868_vm13, %v23449_v24 }
 0x977   : > { %17701 = vmatmul.mubr.f32.gmra.mrb[50].mxu1 %v23454_v14 }
 0x978   : > { %17703 = vmatprep.mubr.msk.f32.mxu1 %vm25065_vm15, %v23457_v34  ;;  %vm25260_vm15 = vnez %v25200_v16  ;;  %v11068_v16 = vld [vmem:[#allocation9 + $0x190] sm:$0xff] }
 0x97b   : > { %17704 = vmatmul.mubr.f32.gmra.mrb[52].mxu1 %v23462_v45 }
 0x97c   : > { %17706 = vmatprep.mubr.msk.f32.mxu1 %vm25066_vm6, %v23465_v48  ;;  %vm25263_vm6 = vnez %v25203_v33 }
 0x97f   : > { %17707 = vmatmul.mubr.f32.gmra.mrb[54].mxu1 %v23470_v51 }
 0x980   : > { %17709 = vmatprep.mubr.msk.f32.mxu1 %vm25109_vm11, %v23473_v11  ;;  %vm25266_vm11 = vnez %v25205_v31 }
 0x983   : > { %17710 = vmatmul.mubr.f32.gmra.mrb[56].mxu1 %v23478_v47  ;;  %v11072_v47 = vld [vmem:[#allocation9 + $0x1b0] sm:$0xff] }
 0x984   : > { %17712 = vmatprep.mubr.msk.f32.mxu1 %vm25260_vm15, %v23481_v36  ;;  %v11071_v36 = vld [vmem:[#allocation9 + $0x1a8] sm:$0xff] }
 0x985   : > { %v19249_v31 = vpack.c.bf16 %v11071_v36, %v11070_v27  ;;  %v23523_v27 = vld [vmem:[#allocation2 + $0x39] sm:$0xff] }
 0x986   : > { %25271 = vst [vmem:[#allocation105_spill] sm:$0xff] %v23523_v27 }
 0x987   : > { %17713 = vmatmul.mubr.f32.gmra.mrb[58].mxu1 %v23486_v35  ;;  %v11069_v35 = vld [vmem:[#allocation9 + $0x198] sm:$0xff] }
 0x988   : > { %17715 = vmatprep.mubr.msk.f32.mxu1 %vm25263_vm6, %v23489_v30  ;;  %v19245_v33 = vpack.c.bf16 %v11069_v35, %v11068_v16  ;;  %v10666_v30 = vld [vmem:[#allocation2 + $0x11] sm:$0xff]  ;;  %vm25268_vm6 = vnez %v24784_v12  ;;  %v23515_v16 = vld [vmem:[#allocation2 + $0x29] sm:$0xff] }
 0x989   : > { %25270 = vst [vmem:[#allocation117_spill] sm:$0xff] %v23515_v16  ;;  %v11074_v35 = vld [vmem:[#allocation9 + $0x1c0] sm:$0xff] }
 0x98b   : > { %17716 = vmatmul.mubr.f32.gmra.mrb[60].mxu1 %v23494_v54  ;;  %v23507_v54 = vld [vmem:[#allocation2 + $0x19] sm:$0xff] }
 0x98c   : > { %17718 = vmatprep.mubr.msk.f32.mxu1 %vm25266_vm11, %v23497_v22  ;;  %v23510_v22 = vld [vmem:[#allocation2 + $0x21] sm:$0xff]  ;;  %vm25269_vm11 = vnez %v25149_v1 }
 0x98d   : > { %v23526_v1 = vld [vmem:[#allocation2 + $0x41] sm:$0xff] }
 0x98f   : > { %17719 = vmatmul.mubr.f32.gmra.mrb[62].mxu1 %v23502_v40 }
 0x990   : > { %17753 = vmatprep.mubr.f32.mxu1 %v10665_v4  ;;  %v19253_v4 = vpack.c.bf16 %v11073_v56, %v11072_v47  ;;  %v23531_v56 = vld [vmem:[#allocation2 + $0x49] sm:$0xff] }
 0x991   : > { %25273 = vst [vmem:[#allocation106_spill] sm:$0xff] %v23531_v56 }
 0x993   : > { %17754 = vmatmul.mubr.msk.f32.vlgmr.msra.gmra.mrb[32].mxu1 %vm25268_vm6, %v10666_v30  ;;  %v23518_v30 = vld [vmem:[#allocation2 + $0x31] sm:$0xff] }
 0x994   : > { %17756 = vmatprep.mubr.f32.mxu1 %v23507_v54  ;;  %19244 = vmatpush3.bf16.msra.mxu1 %v19241_v60  ;;  %v11075_v60 = vld [vmem:[#allocation9 + $0x1c8] sm:$0xff] }
 0x995   : > { %19246 = vmatprep.subr.bf16.mxu1 %v19245_v33  ;;  %v19257_v36 = vpack.c.bf16 %v11075_v60, %v11074_v35  ;;  %v23539_v35 = vld [vmem:[#allocation2 + $0x59] sm:$0xff] }
 0x996   : > { %25275 = vst [vmem:[#allocation107_spill] sm:$0xff] %v23539_v35 }
 0x997   : > { %17757 = vmatmul.mubr.msk.f32.gmra.mrb[34].mxu1 %vm25269_vm11, %v23510_v22  ;;  %vm25272_vm11 = vnez %v25153_v39  ;;  %v23542_v39 = vld [vmem:[#allocation2 + $0x61] sm:$0xff] }
 0x998   : > { %17759 = vmatprep.mubr.f32.mxu1 %v23515_v16  ;;  %19248 = vmatpush3.bf16.msra.mxu1 %v19245_v33  ;;  %v11076_v33 = vld [vmem:[#allocation9 + $0x1d0] sm:$0xff]  ;;  %v11077_v16 = vld [vmem:[#allocation9 + $0x1d8] sm:$0xff] }
 0x999   : > { %19250 = vmatprep.subr.bf16.mxu1 %v19249_v31  ;;  %v19261_v47 = vpack.c.bf16 %v11077_v16, %v11076_v33  ;;  %v23547_v16 = vld [vmem:[#allocation2 + $0x69] sm:$0xff] }
 0x99b   : > { %17760 = vmatmul.mubr.msk.f32.gmra.mrb[36].mxu1 %vm25220_vm12, %v23518_v30  ;;  %vm25274_vm12 = vnez %v25155_v17  ;;  %v23550_v17 = vld [vmem:[#allocation2 + $0x71] sm:$0xff] }
 0x99c   : > { %17762 = vmatprep.mubr.f32.mxu1 %v23523_v27  ;;  %19252 = vmatpush3.bf16.msra.mxu1 %v19249_v31  ;;  %v11078_v31 = vld [vmem:[#allocation9 + $0x1e0] sm:$0xff]  ;;  %v11079_v27 = vld [vmem:[#allocation9 + $0x1e8] sm:$0xff] }
 0x99d   : > { %19254 = vmatprep.subr.bf16.mxu1 %v19253_v4  ;;  %v19265_v60 = vpack.c.bf16 %v11079_v27, %v11078_v31  ;;  %v23555_v27 = vld [vmem:[#allocation2 + $0x79] sm:$0xff] }
 0x99f   : > { %17763 = vmatmul.mubr.msk.f32.gmra.mrb[38].mxu1 %vm25272_vm11, %v23526_v1  ;;  %vm25276_vm11 = vnez %v25157_v21  ;;  %v23558_v21 = vld [vmem:[#allocation2 + $0x81] sm:$0xff] }
 0x9a0   : > { %17765 = vmatprep.mubr.f32.mxu1 %v23531_v56  ;;  %19256 = vmatpush3.bf16.msra.mxu1 %v19253_v4  ;;  %v11080_v4 = vld [vmem:[#allocation9 + $0x1f0] sm:$0xff]  ;;  %v11081_v56 = vld [vmem:[#allocation9 + $0x1f8] sm:$0xff] }
 0x9a1   : > { %19258 = vmatprep.subr.bf16.mxu1 %v19257_v36  ;;  %v19269_v33 = vpack.c.bf16 %v11081_v56, %v11080_v4  ;;  %v23563_v56 = vld [vmem:[#allocation2 + $0x89] sm:$0xff] }
 0x9a2   : > { %v23579_v4 = vld [vmem:[#allocation2 + $0xa9] sm:$0xff] }
 0x9a3   : > { %17766 = vmatmul.mubr.msk.f32.gmra.mrb[40].mxu1 %vm25274_vm12, %v23534_v63  ;;  %vm25277_vm12 = vnez %v24741_v23  ;;  %25279 = vst [vmem:[#allocation86_spill] sm:$0xff] %v23579_v4 }
 0x9a4   : > { %17768 = vmatprep.mubr.f32.mxu1 %v23539_v35  ;;  %19260 = vmatpush3.bf16.msra.mxu1 %v19257_v36  ;;  %v11371_v36 = vld [vmem:[#allocation9 + $0x200] sm:$0xff]  ;;  %v11372_v35 = vld [vmem:[#allocation9 + $0x208] sm:$0xff] }
 0x9a5   : > { %19262 = vmatprep.subr.bf16.mxu1 %v19261_v47  ;;  %v19273_v31 = vpack.c.bf16 %v11372_v35, %v11371_v36  ;;  %v23574_v35 = vld [vmem:[#allocation2 + $0xa1] sm:$0xff]  ;;  %v23587_v36 = vld [vmem:[#allocation2 + $0xb9] sm:$0xff] }
 0x9a6   : > { %25281 = vst [vmem:[#allocation87_spill] sm:$0xff] %v23587_v36 }
 0x9a7   : > { %17769 = vmatmul.mubr.msk.f32.gmra.mrb[42].mxu1 %vm25276_vm11, %v23542_v39 }
 0x9a8   : > { %17771 = vmatprep.mubr.f32.mxu1 %v23547_v16  ;;  %19264 = vmatpush3.bf16.msra.mxu1 %v19261_v47  ;;  %v23566_v47 = vld [vmem:[#allocation2 + $0x91] sm:$0xff] }
 0x9a9   : > { %19266 = vmatprep.subr.bf16.mxu1 %v19265_v60 }
 0x9ab   : > { %17772 = vmatmul.mubr.msk.f32.gmra.mrb[44].mxu1 %vm25277_vm12, %v23550_v17  ;;  %vm25278_vm12 = vnez %v25161_v7  ;;  %v23590_v7 = vld [vmem:[#allocation2 + $0xc1] sm:$0xff] }
 0x9ac   : > { %17774 = vmatprep.mubr.f32.mxu1 %v23555_v27  ;;  %19268 = vmatpush3.bf16.msra.mxu1 %v19265_v60  ;;  %v23571_v60 = vld [vmem:[#allocation2 + $0x99] sm:$0xff]  ;;  %25282 = vst [vmem:[#allocation89_spill] sm:$0xff] %v23590_v7 }
 0x9ad   : > { %19270 = vmatprep.subr.bf16.mxu1 %v19269_v33 }
 0x9af   : > { %17775 = vmatmul.mubr.msk.f32.gmra.mrb[46].mxu1 %vm25224_vm4, %v23558_v21  ;;  %vm25280_vm4 = vnez %v25167_v25  ;;  %v23603_v25 = vld [vmem:[#allocation2 + $0xd9] sm:$0xff] }
 0x9b0   : > { %17777 = vmatprep.mubr.f32.mxu1 %v23563_v56  ;;  %19272 = vmatpush3.bf16.msra.mxu1 %v19269_v33  ;;  %v23582_v33 = vld [vmem:[#allocation2 + $0xb1] sm:$0xff]  ;;  %25286 = vst [vmem:[#allocation15_spill] sm:$0xff] %v23603_v25 }
 0x9b1   : > { %19274 = vmatprep.subr.bf16.mxu1 %v19273_v31 }
 0x9b3   : > { %17778 = vmatmul.mubr.msk.f32.gmra.mrb[48].mxu1 %vm25278_vm12, %v23566_v47  ;;  %vm25283_vm12 = vnez %v25170_v29  ;;  %v23611_v29 = vld [vmem:[#allocation2 + $0xe9] sm:$0xff] }
 0x9b4   : > { %17780 = vmatprep.mubr.f32.mxu1 %v23571_v60  ;;  %25288 = vst [vmem:[#allocation17_spill] sm:$0xff] %v23611_v29 }
 0x9b7   : > { %17781 = vmatmul.mubr.msk.f32.gmra.mrb[50].mxu1 %vm25226_vm0, %v23574_v35 }
 0x9b8   : > { %17783 = vmatprep.mubr.f32.mxu1 %v23579_v4  ;;  %v23598_v4 = vld [vmem:[#allocation2 + $0xd1] sm:$0xff] }
 0x9b9   : > { %25285 = vst [vmem:[#allocation91_spill] sm:$0xff] %v23598_v4 }
 0x9bb   : > { %17784 = vmatmul.mubr.msk.f32.gmra.mrb[52].mxu1 %vm25280_vm4, %v23582_v33 }
 0x9bc   : > { %17786 = vmatprep.mubr.f32.mxu1 %v23587_v36  ;;  %v23606_v36 = vld [vmem:[#allocation2 + $0xe1] sm:$0xff] }
 0x9bd   : > { %25287 = vst [vmem:[#allocation14_spill] sm:$0xff] %v23606_v36 }
 0x9bf   : > { %17787 = vmatmul.mubr.msk.f32.gmra.mrb[54].mxu1 %vm25283_vm12, %v23590_v7  ;;  %v11374_v7 = vld [vmem:[#allocation9 + $0x218] sm:$0xff] }
 0x9c0   : > { %17789 = vmatprep.mubr.f32.mxu1 %v23595_v49  ;;  %v23614_v49 = vld [vmem:[#allocation2 + $0xf1] sm:$0xff] }
 0x9c1   : > { %25289 = vst [vmem:[#allocation16_spill] sm:$0xff] %v23614_v49 }
 0x9c3   : > { %17790 = vmatmul.mubr.msk.f32.gmra.mrb[56].mxu1 %vm25228_vm10, %v23598_v4  ;;  %v11373_v4 = vld [vmem:[#allocation9 + $0x210] sm:$0xff]  ;;  %vm25292_vm10 = vnez %v24598_v53 }
 0x9c4   : > { %17792 = vmatprep.mubr.f32.mxu1 %v23603_v25  ;;  %v23622_v25 = vld [vmem:[#allocation2 + $0x101] sm:$0xff]  ;;  %v19277_v8 = vpack.c.bf16 %v11374_v7, %v11373_v4  ;;  %v11379_v7 = vld [vmem:[#allocation9 + $0x240] sm:$0xff]  ;;  %v11384_v4 = vld [vmem:[#allocation9 + $0x268] sm:$0xff] }
 0x9c7   : > { %17793 = vmatmul.mubr.msk.f32.gmra.mrb[58].mxu1 %vm25179_vm8, %v23606_v36  ;;  %vm25291_vm8 = vnez %v24799_v46  ;;  %v11378_v36 = vld [vmem:[#allocation9 + $0x238] sm:$0xff] }
 0x9c8   : > { %17795 = vmatprep.mubr.f32.mxu1 %v23611_v29  ;;  %v11375_v29 = vld [vmem:[#allocation9 + $0x220] sm:$0xff] }
 0x9cb   : > { %17796 = vmatmul.mubr.msk.f32.gmra.mrb[60].mxu1 %vm25229_vm14, %v23614_v49  ;;  %vm25293_vm14 = vnez %v24821_v62  ;;  %v11377_v49 = vld [vmem:[#allocation9 + $0x230] sm:$0xff] }
 0x9cc   : > { %17798 = vmatprep.mubr.f32.mxu1 %v23619_v13  ;;  %v19281_v13 = vpack.c.bf16 %v11376_v44, %v11375_v29  ;;  %v11381_v44 = vld [vmem:[#allocation9 + $0x250] sm:$0xff] }
 0x9cf   : > { %17799 = vmatmul.mubr.msk.f32.gmra.mrb[62].mxu1 %vm25291_vm8, %v23622_v25 }
 0x9d0   : > { %17833 = vmatprep.mubr.msk.f32.mxu1 %vm25292_vm10, %v23384_v26  ;;  %v19285_v26 = vpack.c.bf16 %v11378_v36, %v11377_v49  ;;  %v11385_v36 = vld [vmem:[#allocation9 + $0x270] sm:$0xff] }
 0x9d3   : > { %17834 = vmatmul.mubr.f32.vlgmr.msra.gmra.mrb[32].mxu1 %v23390_v38  ;;  %v11380_v38 = vld [vmem:[#allocation9 + $0x248] sm:$0xff] }
 0x9d4   : > { %17836 = vmatprep.mubr.msk.f32.mxu1 %vm25293_vm14, %v23393_v19  ;;  %19276 = vmatpush3.bf16.msra.mxu1 %v19273_v31  ;;  %vm25294_vm14 = vnez %v24605_v10  ;;  %v19289_v29 = vpack.c.bf16 %v11380_v38, %v11379_v7  ;;  %v11382_v31 = vld [vmem:[#allocation9 + $0x258] sm:$0xff]  ;;  %v11708_v38 = vld [vmem:[#allocation9 + $0x280] sm:$0xff] }
 0x9d5   : > { %19278 = vmatprep.subr.bf16.mxu1 %v19277_v8  ;;  %v19293_v49 = vpack.c.bf16 %v11382_v31, %v11381_v44  ;;  %v11386_v7 = vld [vmem:[#allocation9 + $0x278] sm:$0xff]  ;;  %v11709_v44 = vld [vmem:[#allocation9 + $0x288] sm:$0xff] }
 0x9d6   : > { %v25296_v31 = vld [vmem:[#allocation45_spill] sm:$0xff] }
 0x9d7   : > { %17837 = vmatmul.mubr.f32.gmra.mrb[34].mxu1 %v23398_v32 }
 0x9d8   : > { %17839 = vmatprep.mubr.msk.f32.mxu1 %vm25253_vm5, %v23401_v61  ;;  %19280 = vmatpush3.bf16.msra.mxu1 %v19277_v8  ;;  %v11383_v8 = vld [vmem:[#allocation9 + $0x260] sm:$0xff] }
 0x9d9   : > { %19282 = vmatprep.subr.bf16.mxu1 %v19281_v13 }
 0x9db   : > { %17840 = vmatmul.mubr.f32.gmra.mrb[36].mxu1 %v23406_v55 }
 0x9dc   : > { %17842 = vmatprep.mubr.msk.f32.mxu1 %vm25294_vm14, %v23409_v42  ;;  %19284 = vmatpush3.bf16.msra.mxu1 %v19281_v13  ;;  %v19297_v13 = vpack.c.bf16 %v11384_v4, %v11383_v8  ;;  %v25299_v8 = vld [vmem:[#allocation111_spill] sm:$0xff]  ;;  %v25300_v4 = vld [vmem:[#allocation46_spill] sm:$0xff] }
 0x9dd   : > { %19286 = vmatprep.subr.bf16.mxu1 %v19285_v26 }
 0x9df   : > { %17843 = vmatmul.mubr.f32.gmra.mrb[38].mxu1 %v23414_v5 }
 0x9e0   : > { %17845 = vmatprep.mubr.msk.f32.mxu1 %vm25187_vm3, %v23417_v43  ;;  %19288 = vmatpush3.bf16.msra.mxu1 %v19285_v26  ;;  %v19301_v26 = vpack.c.bf16 %v11386_v7, %v11385_v36  ;;  %v25303_v36 = vld [vmem:[#allocation113_spill] sm:$0xff]  ;;  %v11339_v7 = vld [vmem:[#allocation2 + $0x18] sm:$0xff] }
 0x9e1   : > { %19290 = vmatprep.subr.bf16.mxu1 %v19289_v29 }
 0x9e3   : > { %17846 = vmatmul.mubr.f32.gmra.mrb[40].mxu1 %v23422_v58 }
 0x9e4   : > { %17848 = vmatprep.mubr.msk.f32.mxu1 %vm25255_vm1, %v23425_v37  ;;  %19292 = vmatpush3.bf16.msra.mxu1 %v19289_v29  ;;  %v19305_v29 = vpack.c.bf16 %v11709_v44, %v11708_v38  ;;  %v25306_v38 = vld [vmem:[#allocation115_spill] sm:$0xff]  ;;  %v25307_v44 = vld [vmem:[#allocation48_spill] sm:$0xff] }
 0x9e5   : > { %19294 = vmatprep.subr.bf16.mxu1 %v19293_v49 }
 0x9e7   : > { %17849 = vmatmul.mubr.f32.gmra.mrb[42].mxu1 %v23430_v28 }
 0x9e8   : > { %17851 = vmatprep.mubr.msk.f32.mxu1 %vm25063_vm9, %v23433_v57  ;;  %19296 = vmatpush3.bf16.msra.mxu1 %v19293_v49  ;;  %vm25297_vm9 = vnez %v25296_v31  ;;  %v25298_v49 = vld [vmem:[#allocation110_spill] sm:$0xff]  ;;  %v23687_v31 = vld [vmem:[#allocation2 + $0x107] sm:$0xff] }
 0x9e9   : > { %19298 = vmatprep.subr.bf16.mxu1 %v19297_v13  ;;  %25309 = vst [vmem:[#allocation18_spill] sm:$0xff] %v23687_v31 }
 0x9eb   : > { %17852 = vmatmul.mubr.f32.gmra.mrb[44].mxu1 %v23438_v9 }
 0x9ec   : > { %17854 = vmatprep.mubr.msk.f32.mxu1 %vm25103_vm2, %v23441_v15  ;;  %19300 = vmatpush3.bf16.msra.mxu1 %v19297_v13  ;;  %vm25295_vm2 = vnez %v25191_v50  ;;  %v25302_v13 = vld [vmem:[#allocation112_spill] sm:$0xff] }
 0x9ed   : > { %19302 = vmatprep.subr.bf16.mxu1 %v19301_v26  ;;  %v11714_v50 = vld [vmem:[#allocation9 + $0x2b0] sm:$0xff] }
 0x9ef   : > { %17855 = vmatmul.mubr.f32.gmra.mrb[46].mxu1 %v23446_v18 }
 0x9f0   : > { %17857 = vmatprep.mubr.msk.f32.mxu1 %vm25189_vm7, %v23449_v24  ;;  %19304 = vmatpush3.bf16.msra.mxu1 %v19301_v26  ;;  %vm25301_vm7 = vnez %v25300_v4  ;;  %v25305_v26 = vld [vmem:[#allocation114_spill] sm:$0xff] }
 0x9f1   : > { %19306 = vmatprep.subr.bf16.mxu1 %v19305_v29  ;;  %v23692_v4 = vld [vmem:[#allocation2 + $0x10f] sm:$0xff] }
 0x9f2   : > { %25312 = vst [vmem:[#allocation21_spill] sm:$0xff] %v23692_v4 }
 0x9f3   : > { %17858 = vmatmul.mubr.f32.gmra.mrb[48].mxu1 %v23454_v14 }
 0x9f4   : > { %17860 = vmatprep.mubr.msk.f32.mxu1 %vm24868_vm13, %v23457_v34 }
 0x9f7   : > { %17861 = vmatmul.mubr.f32.gmra.mrb[50].mxu1 %v23462_v45 }
 0x9f8   : > { %17863 = vmatprep.mubr.msk.f32.mxu1 %vm25295_vm2, %v23465_v48  ;;  %vm25308_vm2 = vnez %v25307_v44  ;;  %v11712_v44 = vld [vmem:[#allocation9 + $0x2a0] sm:$0xff] }
 0x9fb   : > { %17864 = vmatmul.mubr.f32.gmra.mrb[52].mxu1 %v23470_v51  ;;  %v25323_v51 = vld [vmem:[#allocation31_spill] sm:$0xff] }
 0x9fc   : > { %17866 = vmatprep.mubr.msk.f32.mxu1 %vm25297_vm9, %v23473_v11  ;;  %v11715_v11 = vld [vmem:[#allocation9 + $0x2b8] sm:$0xff] }
 0x9ff   : > { %17867 = vmatmul.mubr.f32.gmra.mrb[54].mxu1 %v25298_v49  ;;  %v25310_v49 = vld [vmem:[#allocation50_spill] sm:$0xff] }
 0xa00   : > { %17869 = vmatprep.mubr.msk.f32.mxu1 %vm25301_vm7, %v25299_v8  ;;  %vm25311_vm9 = vnez %v25310_v49  ;;  %v11711_v8 = vld [vmem:[#allocation9 + $0x298] sm:$0xff] }
 0xa03   : > { %17870 = vmatmul.mubr.f32.gmra.mrb[56].mxu1 %v25302_v13  ;;  %v11710_v13 = vld [vmem:[#allocation9 + $0x290] sm:$0xff] }
 0xa04   : > { %17872 = vmatprep.mubr.msk.f32.mxu1 %vm25260_vm15, %v25303_v36  ;;  %v11340_v36 = vld [vmem:[#allocation2 + $0x20] sm:$0xff] }
 0xa07   : > { %17873 = vmatmul.mubr.f32.gmra.mrb[58].mxu1 %v25305_v26  ;;  %v19309_v26 = vpack.c.bf16 %v11711_v8, %v11710_v13  ;;  %v19317_v8 = vpack.c.bf16 %v11715_v11, %v11714_v50  ;;  %v23704_v13 = vld [vmem:[#allocation2 + $0x40] sm:$0xff]  ;;  %v23713_v50 = vld [vmem:[#allocation2 + $0x58] sm:$0xff] }
 0xa08   : > { %17875 = vmatprep.mubr.msk.f32.mxu1 %vm25308_vm2, %v25306_v38  ;;  %v11713_v38 = vld [vmem:[#allocation9 + $0x2a8] sm:$0xff]  ;;  %25316 = vst [vmem:[#allocation25_spill] sm:$0xff] %v23704_v13  ;;  %25319 = vst [vmem:[#allocation26_spill] sm:$0xff] %v23713_v50 }
 0xa09   : > { %v19313_v49 = vpack.c.bf16 %v11713_v38, %v11712_v44  ;;  %v23710_v44 = vld [vmem:[#allocation2 + $0x50] sm:$0xff] }
 0xa0a   : > { %25318 = vst [vmem:[#allocation27_spill] sm:$0xff] %v23710_v44 }
 0xa0b   : > { %17876 = vmatmul.mubr.f32.gmra.mrb[60].mxu1 %v23502_v40  ;;  %v23695_v40 = vld [vmem:[#allocation2 + $0x28] sm:$0xff] }
 0xa0c   : > { %17878 = vmatprep.mubr.msk.f32.mxu1 %vm25311_vm9, %v23687_v31  ;;  %25313 = vst [vmem:[#allocation20_spill] sm:$0xff] %v23695_v40  ;;  %v23698_v31 = vld [vmem:[#allocation2 + $0x30] sm:$0xff] }
 0xa0d   : > { %25314 = vst [vmem:[#allocation23_spill] sm:$0xff] %v23698_v31 }
 0xa0f   : > { %17879 = vmatmul.mubr.f32.gmra.mrb[62].mxu1 %v23692_v4  ;;  %v23701_v4 = vld [vmem:[#allocation2 + $0x38] sm:$0xff] }
 0xa10   : > { %17913 = vmatprep.mubr.f32.mxu1 %v11339_v7  ;;  %25315 = vst [vmem:[#allocation22_spill] sm:$0xff] %v23701_v4  ;;  %v11717_v7 = vld [vmem:[#allocation9 + $0x2c8] sm:$0xff] }
 0xa13   : > { %17914 = vmatmul.mubr.f32.vlgmr.msra.gmra.mrb[32].mxu1 %v11340_v36  ;;  %v11716_v36 = vld [vmem:[#allocation9 + $0x2c0] sm:$0xff] }
 0xa14   : > { %17916 = vmatprep.mubr.f32.mxu1 %v23695_v40  ;;  %19308 = vmatpush3.bf16.msra.mxu1 %v19305_v29  ;;  %v23707_v29 = vld [vmem:[#allocation2 + $0x48] sm:$0xff]  ;;  %v19321_v38 = vpack.c.bf16 %v11717_v7, %v11716_v36  ;;  %v23720_v7 = vld [vmem:[#allocation2 + $0x70] sm:$0xff] }
 0xa15   : > { %19310 = vmatprep.subr.bf16.mxu1 %v19309_v26  ;;  %25317 = vst [vmem:[#allocation24_spill] sm:$0xff] %v23707_v29  ;;  %v11723_v40 = vld [vmem:[#allocation9 + $0x2f8] sm:$0xff] }
 0xa17   : > { %17917 = vmatmul.mubr.f32.gmra.mrb[34].mxu1 %v23698_v31  ;;  %v11718_v31 = vld [vmem:[#allocation9 + $0x2d0] sm:$0xff] }
 0xa18   : > { %17919 = vmatprep.mubr.f32.mxu1 %v23701_v4  ;;  %19312 = vmatpush3.bf16.msra.mxu1 %v19309_v26  ;;  %v11719_v4 = vld [vmem:[#allocation9 + $0x2d8] sm:$0xff]  ;;  %v23716_v26 = vld [vmem:[#allocation2 + $0x60] sm:$0xff] }
 0xa19   : > { %19314 = vmatprep.subr.bf16.mxu1 %v19313_v49  ;;  %v19325_v11 = vpack.c.bf16 %v11719_v4, %v11718_v31  ;;  %25320 = vst [vmem:[#allocation29_spill] sm:$0xff] %v23716_v26  ;;  %v12045_v4 = vld [vmem:[#allocation9 + $0x300] sm:$0xff] }
 0xa1b   : > { %17920 = vmatmul.mubr.f32.gmra.mrb[36].mxu1 %v23704_v13  ;;  %v11720_v13 = vld [vmem:[#allocation9 + $0x2e0] sm:$0xff] }
 0xa1c   : > { %17922 = vmatprep.mubr.f32.mxu1 %v23707_v29  ;;  %19316 = vmatpush3.bf16.msra.mxu1 %v19313_v49  ;;  %v11721_v29 = vld [vmem:[#allocation9 + $0x2e8] sm:$0xff]  ;;  %v25321_v49 = vld [vmem:[#allocation28_spill] sm:$0xff] }
 0xa1d   : > { %19318 = vmatprep.subr.bf16.mxu1 %v19317_v8  ;;  %v19329_v36 = vpack.c.bf16 %v11721_v29, %v11720_v13  ;;  %v25325_v29 = vld [vmem:[#allocation33_spill] sm:$0xff] }
 0xa1f   : > { %17923 = vmatmul.mubr.f32.gmra.mrb[38].mxu1 %v23710_v44  ;;  %v11722_v44 = vld [vmem:[#allocation9 + $0x2f0] sm:$0xff] }
 0xa20   : > { %17925 = vmatprep.mubr.f32.mxu1 %v23713_v50  ;;  %19320 = vmatpush3.bf16.msra.mxu1 %v19317_v8  ;;  %v25322_v8 = vld [vmem:[#allocation30_spill] sm:$0xff]  ;;  %v19333_v31 = vpack.c.bf16 %v11723_v40, %v11722_v44  ;;  %v12046_v50 = vld [vmem:[#allocation9 + $0x308] sm:$0xff]  ;;  %v25329_v40 = vld [vmem:[#allocation37_spill] sm:$0xff] }
 0xa21   : > { %19322 = vmatprep.subr.bf16.mxu1 %v19321_v38  ;;  %v19337_v13 = vpack.c.bf16 %v12046_v50, %v12045_v4  ;;  %v25330_v44 = vld [vmem:[#allocation38_spill] sm:$0xff]  ;;  %v25337_v4 = vld [vmem:[#allocation52_spill] sm:$0xff] }
 0xa22   : > { %v25334_v50 = vld [vmem:[#allocation94_spill] sm:$0xff] }
 0xa23   : > { %17926 = vmatmul.mubr.f32.gmra.mrb[40].mxu1 %v23716_v26  ;;  %v25324_v26 = vld [vmem:[#allocation32_spill] sm:$0xff] }
 0xa24   : > { %17928 = vmatprep.mubr.f32.mxu1 %v25321_v49  ;;  %19324 = vmatpush3.bf16.msra.mxu1 %v19321_v38  ;;  %v25326_v38 = vld [vmem:[#allocation34_spill] sm:$0xff]  ;;  %v25327_v49 = vld [vmem:[#allocation35_spill] sm:$0xff] }
 0xa25   : > { %19326 = vmatprep.subr.bf16.mxu1 %v19325_v11 }
 0xa27   : > { %17929 = vmatmul.mubr.f32.gmra.mrb[42].mxu1 %v23720_v7 }
 0xa28   : > { %17931 = vmatprep.mubr.f32.mxu1 %v25322_v8  ;;  %19328 = vmatpush3.bf16.msra.mxu1 %v19325_v11  ;;  %v25328_v11 = vld [vmem:[#allocation36_spill] sm:$0xff]  ;;  %v25335_v8 = vld [vmem:[#allocation95_spill] sm:$0xff] }
 0xa29   : > { %19330 = vmatprep.subr.bf16.mxu1 %v19329_v36 }
 0xa2b   : > { %17932 = vmatmul.mubr.f32.gmra.mrb[44].mxu1 %v25323_v51  ;;  %v25331_v51 = vld [vmem:[#allocation39_spill] sm:$0xff] }
 0xa2c   : > { %17934 = vmatprep.mubr.f32.mxu1 %v25324_v26  ;;  %19332 = vmatpush3.bf16.msra.mxu1 %v19329_v36  ;;  %v25332_v26 = vld [vmem:[#allocation40_spill] sm:$0xff]  ;;  %v25333_v36 = vld [vmem:[#allocation41_spill] sm:$0xff] }
 0xa2d   : > { %19334 = vmatprep.subr.bf16.mxu1 %v19333_v31 }
 0xa2f   : > { %17935 = vmatmul.mubr.f32.gmra.mrb[46].mxu1 %v25325_v29  ;;  %v25338_v29 = vld [vmem:[#allocation93_spill] sm:$0xff] }
 0xa30   : > { %17937 = vmatprep.mubr.f32.mxu1 %v25326_v38  ;;  %19336 = vmatpush3.bf16.msra.mxu1 %v19333_v31  ;;  %v25336_v31 = vld [vmem:[#allocation49_spill] sm:$0xff]  ;;  %v25339_v38 = vld [vmem:[#allocation92_spill] sm:$0xff] }
 0xa31   : > { %19338 = vmatprep.subr.bf16.mxu1 %v19337_v13 }
 0xa33   : > { %17938 = vmatmul.mubr.f32.gmra.mrb[48].mxu1 %v25327_v49  ;;  %v25340_v49 = vld [vmem:[#allocation42_spill] sm:$0xff] }
 0xa34   : > { %17940 = vmatprep.mubr.f32.mxu1 %v25328_v11  ;;  %v25341_v11 = vmax.f32 %v25340_v49, 0.0  ;;  %v25345_v49 = vld [vmem:[#allocation53_spill] sm:$0xff] }
 0xa35   : > { %vm25346_vm9 = vnez %v25345_v49 }
 0xa37   : > { %17941 = vmatmul.mubr.f32.gmra.mrb[50].mxu1 %v25329_v40  ;;  %v12047_v40 = vld [vmem:[#allocation9 + $0x310] sm:$0xff] }
 0xa38   : > { %17943 = vmatprep.mubr.f32.mxu1 %v25330_v44  ;;  %v12048_v44 = vld [vmem:[#allocation9 + $0x318] sm:$0xff] }
 0xa3b   : > { %17944 = vmatmul.mubr.f32.gmra.mrb[52].mxu1 %v25331_v51  ;;  %v25342_v51 = vld [vmem:[#allocation51_spill] sm:$0xff] }
 0xa3c   : > { %17946 = vmatprep.mubr.f32.mxu1 %v25332_v26  ;;  %v25343_v26 = vmax.f32 %v25342_v51, 0.0 }
 0xa3f   : > { %17947 = vmatmul.mubr.f32.gmra.mrb[54].mxu1 %v25333_v36  ;;  %v19341_v36 = vpack.c.bf16 %v12048_v44, %v12047_v40  ;;  %v12053_v40 = vld [vmem:[#allocation9 + $0x340] sm:$0xff]  ;;  %v12054_v44 = vld [vmem:[#allocation9 + $0x348] sm:$0xff] }
 0xa40   : > { %17949 = vmatprep.mubr.f32.mxu1 %v25334_v50  ;;  %v12049_v50 = vld [vmem:[#allocation9 + $0x320] sm:$0xff]  ;;  %v19353_v51 = vpack.c.bf16 %v12054_v44, %v12053_v40  ;;  %v12351_v44 = vld [vmem:[#allocation9 + $0x388] sm:$0xff] }
 0xa41   : > { %v12350_v40 = vld [vmem:[#allocation9 + $0x380] sm:$0xff] }
 0xa43   : > { %17950 = vmatmul.mubr.f32.gmra.mrb[56].mxu1 %v25335_v8  ;;  %v12050_v8 = vld [vmem:[#allocation9 + $0x328] sm:$0xff] }
 0xa44   : > { %17952 = vmatprep.mubr.f32.mxu1 %v25336_v31  ;;  %v25344_v31 = vld [vmem:[#allocation117_spill] sm:$0xff] }
 0xa47   : > { %17953 = vmatmul.mubr.f32.gmra.mrb[58].mxu1 %v25337_v4  ;;  %v19345_v4 = vpack.c.bf16 %v12050_v8, %v12049_v50  ;;  %v12056_v50 = vld [vmem:[#allocation9 + $0x358] sm:$0xff] }
 0xa48   : > { %17955 = vmatprep.mubr.f32.mxu1 %v25338_v29  ;;  %v12051_v29 = vld [vmem:[#allocation9 + $0x330] sm:$0xff] }
 0xa4b   : > { %17956 = vmatmul.mubr.f32.gmra.mrb[60].mxu1 %v25339_v38  ;;  %v12052_v38 = vld [vmem:[#allocation9 + $0x338] sm:$0xff] }
 0xa4c   : > { %17958 = vmatprep.mubr.f32.mxu1 %v25341_v11  ;;  %v25347_v11 = vld [vmem:[#allocation105_spill] sm:$0xff] }
 0xa4f   : > { %17959 = vmatmul.mubr.f32.gmra.mrb[62].mxu1 %v25343_v26  ;;  %v12055_v26 = vld [vmem:[#allocation9 + $0x350] sm:$0xff] }
 0xa50   : > { %17993 = vmatprep.mubr.f32.mxu1 %v23507_v54  ;;  %v19349_v54 = vpack.c.bf16 %v12052_v38, %v12051_v29  ;;  %v19357_v8 = vpack.c.bf16 %v12056_v50, %v12055_v26  ;;  %v12058_v29 = vld [vmem:[#allocation9 + $0x368] sm:$0xff]  ;;  %v12059_v38 = vld [vmem:[#allocation9 + $0x370] sm:$0xff] }
 0xa51   : > { %v25369_v26 = vld [vmem:[#allocation15_spill] sm:$0xff]  ;;  %v25371_v50 = vld [vmem:[#allocation80_spill] sm:$0xff] }
 0xa53   : > { %17994 = vmatmul.mubr.msk.f32.vlgmr.msra.gmra.mrb[32].mxu1 %vm25268_vm6, %v23510_v22  ;;  %v25348_v22 = vld [vmem:[#allocation56_spill] sm:$0xff] }
 0xa54   : > { %17996 = vmatprep.mubr.f32.mxu1 %v25344_v31  ;;  %19340 = vmatpush3.bf16.msra.mxu1 %v19337_v13  ;;  %vm25349_vm6 = vnez %v25348_v22  ;;  %v25350_v13 = vld [vmem:[#allocation106_spill] sm:$0xff] }
 0xa55   : > { %19342 = vmatprep.subr.bf16.mxu1 %v19341_v36  ;;  %v12057_v31 = vld [vmem:[#allocation9 + $0x360] sm:$0xff] }
 0xa57   : > { %17997 = vmatmul.mubr.msk.f32.gmra.mrb[34].mxu1 %vm25346_vm9, %v23518_v30  ;;  %v25351_v30 = vld [vmem:[#allocation59_spill] sm:$0xff] }
 0xa58   : > { %17999 = vmatprep.mubr.f32.mxu1 %v25347_v11  ;;  %19344 = vmatpush3.bf16.msra.mxu1 %v19341_v36  ;;  %vm25352_vm9 = vnez %v25351_v30  ;;  %v25353_v36 = vld [vmem:[#allocation107_spill] sm:$0xff]  ;;  %v12060_v11 = vld [vmem:[#allocation9 + $0x378] sm:$0xff] }
 0xa59   : > { %19346 = vmatprep.subr.bf16.mxu1 %v19345_v4 }
 0xa5b   : > { %18000 = vmatmul.mubr.msk.f32.gmra.mrb[36].mxu1 %vm25349_vm6, %v23526_v1  ;;  %v25354_v1 = vld [vmem:[#allocation62_spill] sm:$0xff] }
 0xa5c   : > { %18002 = vmatprep.mubr.f32.mxu1 %v25350_v13  ;;  %19348 = vmatpush3.bf16.msra.mxu1 %v19345_v4  ;;  %vm25355_vm6 = vnez %v25354_v1  ;;  %v19361_v4 = vpack.c.bf16 %v12058_v29, %v12057_v31  ;;  %v25365_v13 = vld [vmem:[#allocation74_spill] sm:$0xff]  ;;  %v25377_v31 = vld [vmem:[#allocation19_spill] sm:$0xff]  ;;  %v25378_v29 = vld [vmem:[#allocation85_spill] sm:$0xff] }
 0xa5d   : > { %19350 = vmatprep.subr.bf16.mxu1 %v19349_v54 }
 0xa5f   : > { %18003 = vmatmul.mubr.msk.f32.gmra.mrb[38].mxu1 %vm25352_vm9, %v23534_v63  ;;  %v25356_v63 = vld [vmem:[#allocation65_spill] sm:$0xff]  ;;  %vm25358_vm9 = vnez %v24743_v0  ;;  %v12645_v0 = vld [vmem:[#allocation2 + $0xd9] sm:$0xff] }
 0xa60   : > { %18005 = vmatprep.mubr.f32.mxu1 %v25353_v36  ;;  %19352 = vmatpush3.bf16.msra.mxu1 %v19349_v54  ;;  %v19365_v54 = vpack.c.bf16 %v12060_v11, %v12059_v38  ;;  %v25373_v36 = vld [vmem:[#allocation17_spill] sm:$0xff]  ;;  %v23808_v38 = vld [vmem:[#allocation2 + $0x111] sm:$0xff]  ;;  %v12352_v11 = vld [vmem:[#allocation9 + $0x390] sm:$0xff] }
 0xa61   : > { %19354 = vmatprep.subr.bf16.mxu1 %v19353_v51 }
 0xa63   : > { %18006 = vmatmul.mubr.msk.f32.gmra.mrb[40].mxu1 %vm25355_vm6, %v23542_v39  ;;  %vm25357_vm6 = vnez %v24741_v23  ;;  %v19369_v39 = vpack.c.bf16 %v12351_v44, %v12350_v40  ;;  %v12354_v44 = vld [vmem:[#allocation9 + $0x3a0] sm:$0xff] }
 0xa64   : > { %18008 = vmatprep.mubr.f32.mxu1 %v23547_v16  ;;  %19356 = vmatpush3.bf16.msra.mxu1 %v19353_v51  ;;  %v25361_v16 = vld [vmem:[#allocation86_spill] sm:$0xff]  ;;  %v12654_v51 = vld [vmem:[#allocation2 + $0x121] sm:$0xff] }
 0xa65   : > { %19358 = vmatprep.subr.bf16.mxu1 %v19357_v8  ;;  %v12643_v23 = vld [vmem:[#allocation2 + $0xc9] sm:$0xff] }
 0xa67   : > { %18009 = vmatmul.mubr.msk.f32.gmra.mrb[42].mxu1 %vm25276_vm11, %v23550_v17  ;;  %v25359_v17 = vld [vmem:[#allocation69_spill] sm:$0xff] }
 0xa68   : > { %18011 = vmatprep.mubr.f32.mxu1 %v23555_v27  ;;  %19360 = vmatpush3.bf16.msra.mxu1 %v19357_v8  ;;  %vm25360_vm11 = vnez %v25359_v17  ;;  %v25363_v27 = vld [vmem:[#allocation87_spill] sm:$0xff] }
 0xa69   : > { %19362 = vmatprep.subr.bf16.mxu1 %v19361_v4  ;;  %v25375_v8 = vld [vmem:[#allocation83_spill] sm:$0xff] }
 0xa6b   : > { %18012 = vmatmul.mubr.msk.f32.gmra.mrb[44].mxu1 %vm25357_vm6, %v23558_v21  ;;  %v25362_v21 = vld [vmem:[#allocation71_spill] sm:$0xff] }
 0xa6c   : > { %18014 = vmatprep.mubr.f32.mxu1 %v23563_v56  ;;  %19364 = vmatpush3.bf16.msra.mxu1 %v19361_v4  ;;  %v25364_v56 = vld [vmem:[#allocation89_spill] sm:$0xff] }
 0xa6d   : > { %19366 = vmatprep.subr.bf16.mxu1 %v19365_v54  ;;  %v23805_v4 = vld [vmem:[#allocation2 + $0x109] sm:$0xff] }
 0xa6f   : > { %18015 = vmatmul.mubr.msk.f32.gmra.mrb[46].mxu1 %vm25358_vm9, %v23566_v47  ;;  %v25366_v47 = vld [vmem:[#allocation90_spill] sm:$0xff] }
 0xa70   : > { %18017 = vmatprep.mubr.f32.mxu1 %v23571_v60  ;;  %19368 = vmatpush3.bf16.msra.mxu1 %v19365_v54  ;;  %v25367_v60 = vld [vmem:[#allocation91_spill] sm:$0xff]  ;;  %v12353_v54 = vld [vmem:[#allocation9 + $0x398] sm:$0xff] }
 0xa71   : > { %19370 = vmatprep.subr.bf16.mxu1 %v19369_v39  ;;  %v19373_v40 = vpack.c.bf16 %v12353_v54, %v12352_v11  ;;  %v25404_v11 = vld [vmem:[#allocation20_spill] sm:$0xff] }
 0xa73   : > { %18018 = vmatmul.mubr.msk.f32.gmra.mrb[48].mxu1 %vm25360_vm11, %v23574_v35  ;;  %v25370_v35 = vld [vmem:[#allocation14_spill] sm:$0xff]  ;;  %vm25372_vm11 = vnez %v25371_v50  ;;  %v23921_v50 = vld [vmem:[%s24078_s4] ss:$0 sm:$0xff] }
 0xa74   : > { %18020 = vmatprep.mubr.f32.mxu1 %v25361_v16  ;;  %v12355_v16 = vld [vmem:[#allocation9 + $0x3a8] sm:$0xff] }
 0xa77   : > { %18021 = vmatmul.mubr.msk.f32.gmra.mrb[50].mxu1 %vm25226_vm0, %v23582_v33  ;;  %v25374_v33 = vld [vmem:[#allocation16_spill] sm:$0xff]  ;;  %vm25376_vm0 = vnez %v25375_v8 }
 0xa78   : > { %18023 = vmatprep.mubr.f32.mxu1 %v25363_v27  ;;  %v12356_v27 = vld [vmem:[#allocation9 + $0x3b0] sm:$0xff] }
 0xa7b   : > { %18024 = vmatmul.mubr.msk.f32.gmra.mrb[52].mxu1 %vm25280_vm4, %v25364_v56  ;;  %vm25379_vm4 = vnez %v25378_v29  ;;  %v12357_v56 = vld [vmem:[#allocation9 + $0x3b8] sm:$0xff] }
 0xa7c   : > { %18026 = vmatprep.mubr.f32.mxu1 %v25366_v47  ;;  %v19381_v53 = vpack.c.bf16 %v12357_v56, %v12356_v27  ;;  %v12693_v56 = vld [vmem:[#allocation9 + $0x430] sm:$0xff]  ;;  %v12339_v47 = vld [vmem:[#allocation2 + $0xd0] sm:$0xff] }
 0xa7f   : > { %18027 = vmatmul.mubr.msk.f32.gmra.mrb[54].mxu1 %vm25283_vm12, %v25367_v60  ;;  %v25401_v60 = vld [vmem:[#allocation21_spill] sm:$0xff] }
 0xa80   : > { %18029 = vmatprep.mubr.f32.mxu1 %v25369_v26  ;;  %v12011_v26 = vld [vmem:[#allocation2 + $0x117] sm:$0xff] }
 0xa83   : > { %18030 = vmatmul.mubr.msk.f32.gmra.mrb[56].mxu1 %vm25372_vm11, %v25370_v35  ;;  %v25402_v35 = vld [vmem:[#allocation50_spill] sm:$0xff] }
 0xa84   : > { %18032 = vmatprep.mubr.f32.mxu1 %v25373_v36  ;;  %v12012_v36 = vld [vmem:[#allocation2 + $0x11f] sm:$0xff] }
 0xa87   : > { %18033 = vmatmul.mubr.msk.f32.gmra.mrb[58].mxu1 %vm25376_vm0, %v25374_v33  ;;  %v12689_v33 = vld [vmem:[#allocation9 + $0x410] sm:$0xff] }
 0xa88   : > { %18035 = vmatprep.mubr.f32.mxu1 %v25377_v31  ;;  %v12690_v31 = vld [vmem:[#allocation9 + $0x418] sm:$0xff] }
 0xa89   : > { %v19405_v54 = vpack.c.bf16 %v12690_v31, %v12689_v33  ;;  %v12344_v33 = vld [vmem:[#allocation2 + $0xf8] sm:$0xff]  ;;  %v12345_v31 = vld [vmem:[#allocation2 + $0x100] sm:$0xff] }
 0xa8b   : > { %18036 = vmatmul.mubr.msk.f32.gmra.mrb[60].mxu1 %vm25379_vm4, %v23622_v25  ;;  %vm25380_vm4 = vnez %v24821_v62  ;;  %v19377_v25 = vpack.c.bf16 %v12355_v16, %v12354_v44  ;;  %v12692_v44 = vld [vmem:[#allocation9 + $0x428] sm:$0xff] }
 0xa8c   : > { %18038 = vmatprep.mubr.f32.mxu1 %v23805_v4  ;;  %v25405_v16 = vld [vmem:[#allocation23_spill] sm:$0xff] }
 0xa8f   : > { %18039 = vmatmul.mubr.msk.f32.gmra.mrb[62].mxu1 %vm25291_vm8, %v23808_v38 }
 0xa90   : > { %18073 = vmatprep.mubr.msk.f32.mxu1 %vm25292_vm10, %v23393_v19  ;;  %v12358_v19 = vld [vmem:[#allocation9 + $0x3c0] sm:$0xff] }
 0xa93   : > { %18074 = vmatmul.mubr.f32.vlgmr.msra.gmra.mrb[32].mxu1 %v23398_v32  ;;  %v12359_v32 = vld [vmem:[#allocation9 + $0x3c8] sm:$0xff] }
 0xa94   : > { %18076 = vmatprep.mubr.msk.f32.mxu1 %vm25380_vm4, %v23401_v61  ;;  %19372 = vmatpush3.bf16.msra.mxu1 %v19369_v39  ;;  %v19385_v62 = vpack.c.bf16 %v12359_v32, %v12358_v19  ;;  %v12360_v61 = vld [vmem:[#allocation9 + $0x3d0] sm:$0xff]  ;;  %vm25383_vm4 = vnez %v24615_v2  ;;  %v25399_v39 = vld [vmem:[#allocation18_spill] sm:$0xff]  ;;  %v25407_v19 = vld [vmem:[#allocation25_spill] sm:$0xff] }
 0xa95   : > { %19374 = vmatprep.subr.bf16.mxu1 %v19373_v40  ;;  %v25392_v2 = vld [vmem:[#allocation112_spill] sm:$0xff] }
 0xa96   : > { %v25408_v32 = vld [vmem:[#allocation24_spill] sm:$0xff] }
 0xa97   : > { %18077 = vmatmul.mubr.f32.gmra.mrb[34].mxu1 %v23406_v55  ;;  %v12361_v55 = vld [vmem:[#allocation9 + $0x3d8] sm:$0xff] }
 0xa98   : > { %18079 = vmatprep.mubr.msk.f32.mxu1 %vm25253_vm5, %v23409_v42  ;;  %19376 = vmatpush3.bf16.msra.mxu1 %v19373_v40  ;;  %v19389_v3 = vpack.c.bf16 %v12361_v55, %v12360_v61  ;;  %v12362_v42 = vld [vmem:[#allocation9 + $0x3e0] sm:$0xff]  ;;  %v12696_v55 = vld [vmem:[#allocation9 + $0x448] sm:$0xff] }
 0xa99   : > { %19378 = vmatprep.subr.bf16.mxu1 %v19377_v25  ;;  %v12691_v40 = vld [vmem:[#allocation9 + $0x420] sm:$0xff] }
 0xa9a   : > { %v19409_v27 = vpack.c.bf16 %v12692_v44, %v12691_v40  ;;  %v12695_v61 = vld [vmem:[#allocation9 + $0x440] sm:$0xff]  ;;  %v20536_v40 = vld [vmem:[#allocation2 + $0x8] sm:$0xff] }
 0xa9b   : > { %18080 = vmatmul.mubr.f32.gmra.mrb[36].mxu1 %v23414_v5  ;;  %v12363_v5 = vld [vmem:[#allocation9 + $0x3e8] sm:$0xff]  ;;  %v12623_v44 = vld [vmem:[#allocation2 + $0x29] sm:$0xff] }
 0xa9c   : > { %18082 = vmatprep.mubr.msk.f32.mxu1 %vm25294_vm14, %v23417_v43  ;;  %19380 = vmatpush3.bf16.msra.mxu1 %v19377_v25  ;;  %v19393_v10 = vpack.c.bf16 %v12363_v5, %v12362_v42  ;;  %v12364_v43 = vld [vmem:[#allocation9 + $0x3f0] sm:$0xff]  ;;  %v25406_v25 = vld [vmem:[#allocation22_spill] sm:$0xff]  ;;  %v19417_v5 = vpack.c.bf16 %v12696_v55, %v12695_v61  ;;  %vm25414_vm14 = vnez %v25348_v22 }
 0xa9d   : > { %19382 = vmatprep.subr.bf16.mxu1 %v19381_v53  ;;  %v25410_v42 = vld [vmem:[#allocation26_spill] sm:$0xff]  ;;  %v12634_v61 = vld [vmem:[#allocation2 + $0x81] sm:$0xff] }
 0xa9e   : > { %v12635_v22 = vld [vmem:[#allocation2 + $0x89] sm:$0xff]  ;;  %v12636_v55 = vld [vmem:[#allocation2 + $0x91] sm:$0xff] }
 0xa9f   : > { %18083 = vmatmul.mubr.f32.gmra.mrb[38].mxu1 %v23422_v58  ;;  %v12365_v58 = vld [vmem:[#allocation9 + $0x3f8] sm:$0xff] }
 0xaa0   : > { %18085 = vmatprep.mubr.msk.f32.mxu1 %vm25187_vm3, %v23425_v37  ;;  %19384 = vmatpush3.bf16.msra.mxu1 %v19381_v53  ;;  %vm25381_vm3 = vnez %v24611_v6  ;;  %v19397_v41 = vpack.c.bf16 %v12365_v58, %v12364_v43  ;;  %v12687_v37 = vld [vmem:[#allocation9 + $0x400] sm:$0xff]  ;;  %v25384_v6 = vld [vmem:[#allocation108_spill] sm:$0xff]  ;;  %v12694_v53 = vld [vmem:[#allocation9 + $0x438] sm:$0xff] }
 0xaa1   : > { %19386 = vmatprep.subr.bf16.mxu1 %v19385_v62  ;;  %v12698_v43 = vld [vmem:[#allocation9 + $0x458] sm:$0xff] }
 0xaa2   : > { %v25411_v58 = vld [vmem:[#allocation29_spill] sm:$0xff] }
 0xaa3   : > { %18086 = vmatmul.mubr.f32.gmra.mrb[40].mxu1 %v23430_v28  ;;  %v12688_v28 = vld [vmem:[#allocation9 + $0x408] sm:$0xff] }
 0xaa4   : > { %18088 = vmatprep.mubr.msk.f32.mxu1 %vm25255_vm1, %v23433_v57  ;;  %19388 = vmatpush3.bf16.msra.mxu1 %v19385_v62  ;;  %vm25382_vm1 = vnez %v24613_v52  ;;  %v19401_v59 = vpack.c.bf16 %v12688_v28, %v12687_v37  ;;  %v25385_v52 = vld [vmem:[#allocation109_spill] sm:$0xff]  ;;  %v25388_v57 = vld [vmem:[#allocation110_spill] sm:$0xff]  ;;  %v19413_v62 = vpack.c.bf16 %v12694_v53, %v12693_v56 }
 0xaa5   : > { %19390 = vmatprep.subr.bf16.mxu1 %v19389_v3  ;;  %v12699_v28 = vld [vmem:[#allocation9 + $0x460] sm:$0xff] }
 0xaa6   : > { %v12627_v56 = vld [vmem:[#allocation2 + $0x49] sm:$0xff]  ;;  %v12628_v53 = vld [vmem:[#allocation2 + $0x51] sm:$0xff] }
 0xaa7   : > { %18089 = vmatmul.mubr.f32.gmra.mrb[42].mxu1 %v23438_v9  ;;  %v25386_v9 = vld [vmem:[#allocation44_spill] sm:$0xff] }
 0xaa8   : > { %18091 = vmatprep.mubr.msk.f32.mxu1 %vm25381_vm3, %v23441_v15  ;;  %19392 = vmatpush3.bf16.msra.mxu1 %v19389_v3  ;;  %vm25387_vm5 = vnez %v25386_v9  ;;  %v25389_v15 = vld [vmem:[#allocation111_spill] sm:$0xff]  ;;  %v12329_v9 = vld [vmem:[#allocation2 + $0x80] sm:$0xff]  ;;  %vm25416_vm3 = vnez %v25354_v1  ;;  %v12639_v1 = vld [vmem:[#allocation2 + $0xa9] sm:$0xff] }
 0xaa9   : > { %19394 = vmatprep.subr.bf16.mxu1 %v19393_v10  ;;  %v25409_v3 = vld [vmem:[#allocation27_spill] sm:$0xff] }
 0xaab   : > { %18092 = vmatmul.mubr.f32.gmra.mrb[44].mxu1 %v23446_v18  ;;  %v25390_v18 = vld [vmem:[#allocation45_spill] sm:$0xff] }
 0xaac   : > { %18094 = vmatprep.mubr.msk.f32.mxu1 %vm25382_vm1, %v23449_v24  ;;  %19396 = vmatpush3.bf16.msra.mxu1 %v19393_v10  ;;  %vm25391_vm10 = vnez %v25390_v18  ;;  %v25393_v24 = vld [vmem:[#allocation113_spill] sm:$0xff]  ;;  %v12697_v10 = vld [vmem:[#allocation9 + $0x450] sm:$0xff]  ;;  %vm25417_vm1 = vnez %v25356_v63 }
 0xaad   : > { %19398 = vmatprep.subr.bf16.mxu1 %v19397_v41  ;;  %v19421_v37 = vpack.c.bf16 %v12698_v43, %v12697_v10  ;;  %v12330_v18 = vld [vmem:[#allocation2 + $0x88] sm:$0xff]  ;;  %v12641_v63 = vld [vmem:[#allocation2 + $0xb9] sm:$0xff]  ;;  %v12644_v10 = vld [vmem:[#allocation2 + $0xd1] sm:$0xff] }
 0xaae   : > { %v12646_v43 = vld [vmem:[#allocation2 + $0xe1] sm:$0xff] }
 0xaaf   : > { %18095 = vmatmul.mubr.f32.gmra.mrb[46].mxu1 %v23454_v14  ;;  %v12332_v14 = vld [vmem:[#allocation2 + $0x98] sm:$0xff] }
 0xab0   : > { %18097 = vmatprep.mubr.msk.f32.mxu1 %vm25383_vm4, %v23457_v34  ;;  %19400 = vmatpush3.bf16.msra.mxu1 %v19397_v41  ;;  %v25396_v34 = vld [vmem:[#allocation115_spill] sm:$0xff]  ;;  %v12326_v41 = vld [vmem:[#allocation2 + $0x68] sm:$0xff]  ;;  %vm25418_vm4 = vnez %v25359_v17 }
 0xab1   : > { %19402 = vmatprep.subr.bf16.mxu1 %v19401_v59  ;;  %v12647_v17 = vld [vmem:[#allocation2 + $0xe9] sm:$0xff] }
 0xab3   : > { %18098 = vmatmul.mubr.f32.gmra.mrb[48].mxu1 %v23462_v45  ;;  %v12336_v45 = vld [vmem:[#allocation2 + $0xb8] sm:$0xff] }
 0xab4   : > { %18100 = vmatprep.mubr.msk.f32.mxu1 %vm24868_vm13, %v23465_v48  ;;  %v25398_v48 = vld [vmem:[#allocation116_spill] sm:$0xff]  ;;  %vm25403_vm13 = vnez %v25402_v35  ;;  %v12342_v35 = vld [vmem:[#allocation2 + $0xe8] sm:$0xff] }
 0xab7   : > { %18101 = vmatmul.mubr.f32.gmra.mrb[50].mxu1 %v25384_v6  ;;  %v12328_v6 = vld [vmem:[#allocation2 + $0x78] sm:$0xff] }
 0xab8   : > { %18103 = vmatprep.mubr.msk.f32.mxu1 %vm25387_vm5, %v25385_v52  ;;  %vm25419_vm5 = vnez %v25362_v21  ;;  %v12649_v21 = vld [vmem:[#allocation2 + $0xf9] sm:$0xff] }
 0xabb   : > { %18104 = vmatmul.mubr.f32.gmra.mrb[52].mxu1 %v25388_v57  ;;  %v12701_v57 = vld [vmem:[#allocation9 + $0x470] sm:$0xff] }
 0xabc   : > { %18106 = vmatprep.mubr.msk.f32.mxu1 %vm25391_vm10, %v25389_v15  ;;  %v12702_v15 = vld [vmem:[#allocation9 + $0x478] sm:$0xff] }
 0xabf   : > { %18107 = vmatmul.mubr.f32.gmra.mrb[54].mxu1 %v25392_v2  ;;  %v19429_v2 = vpack.c.bf16 %v12702_v15, %v12701_v57  ;;  %v25424_v15 = vld [vmem:[#allocation55_spill] sm:$0xff] }
 0xac0   : > { %18109 = vmatprep.mubr.msk.f32.mxu1 %vm25301_vm7, %v25393_v24  ;;  %v12331_v24 = vld [vmem:[#allocation2 + $0x90] sm:$0xff]  ;;  %vm25413_vm7 = vnez %v25345_v49  ;;  %v12633_v49 = vld [vmem:[#allocation2 + $0x79] sm:$0xff] }
 0xac3   : > { %18110 = vmatmul.mubr.f32.gmra.mrb[56].mxu1 %v25395_v20  ;;  %v12334_v20 = vld [vmem:[#allocation2 + $0xa8] sm:$0xff] }
 0xac4   : > { %18112 = vmatprep.mubr.msk.f32.mxu1 %vm25260_vm15, %v25396_v34  ;;  %v12335_v34 = vld [vmem:[#allocation2 + $0xb0] sm:$0xff]  ;;  %vm25415_vm15 = vnez %v25351_v30  ;;  %v12637_v30 = vld [vmem:[#allocation2 + $0x99] sm:$0xff] }
 0xac7   : > { %18113 = vmatmul.mubr.f32.gmra.mrb[58].mxu1 %v25398_v48  ;;  %v12337_v48 = vld [vmem:[#allocation2 + $0xc0] sm:$0xff] }
 0xac8   : > { %18115 = vmatprep.mubr.msk.f32.mxu1 %vm25308_vm2, %v25399_v39  ;;  %v12338_v39 = vld [vmem:[#allocation2 + $0xc8] sm:$0xff]  ;;  %vm25412_vm2 = vnez %v24784_v12 }
 0xac9   : > { %v12631_v12 = vld [vmem:[#allocation2 + $0x69] sm:$0xff] }
 0xacb   : > { %18116 = vmatmul.mubr.f32.gmra.mrb[60].mxu1 %v25401_v60  ;;  %v12340_v60 = vld [vmem:[#allocation2 + $0xd8] sm:$0xff] }
 0xacc   : > { %18118 = vmatprep.mubr.msk.f32.mxu1 %vm25403_vm13, %v12011_v26  ;;  %v12341_v26 = vld [vmem:[#allocation2 + $0xe0] sm:$0xff] }
 0xacf   : > { %18119 = vmatmul.mubr.f32.gmra.mrb[62].mxu1 %v12012_v36  ;;  %v12343_v36 = vld [vmem:[#allocation2 + $0xf0] sm:$0xff] }
 0xad0   : > { %18153 = vmatprep.mubr.f32.mxu1 %v25404_v11  ;;  %v12346_v11 = vld [vmem:[#allocation2 + $0x108] sm:$0xff] }
 0xad3   : > { %18154 = vmatmul.mubr.f32.vlgmr.msra.gmra.mrb[32].mxu1 %v25405_v16  ;;  %v12624_v16 = vld [vmem:[#allocation2 + $0x31] sm:$0xff] }
 0xad4   : > { %18156 = vmatprep.mubr.f32.mxu1 %v25406_v25  ;;  %19404 = vmatpush3.bf16.msra.mxu1 %v19401_v59  ;;  %v12700_v59 = vld [vmem:[#allocation9 + $0x468] sm:$0xff] }
 0xad5   : > { %19406 = vmatprep.subr.bf16.mxu1 %v19405_v54  ;;  %v19425_v52 = vpack.c.bf16 %v12700_v59, %v12699_v28  ;;  %v12625_v25 = vld [vmem:[#allocation2 + $0x39] sm:$0xff]  ;;  %v25422_v59 = vld [vmem:[#allocation54_spill] sm:$0xff] }
 0xad7   : > { %18157 = vmatmul.mubr.f32.gmra.mrb[34].mxu1 %v25407_v19  ;;  %v12629_v19 = vld [vmem:[#allocation2 + $0x59] sm:$0xff] }
 0xad8   : > { %18159 = vmatprep.mubr.f32.mxu1 %v25408_v32  ;;  %19408 = vmatpush3.bf16.msra.mxu1 %v19405_v54  ;;  %v12347_v54 = vld [vmem:[#allocation2 + $0x110] sm:$0xff]  ;;  %v12630_v32 = vld [vmem:[#allocation2 + $0x61] sm:$0xff] }
 0xad9   : > { %19410 = vmatprep.subr.bf16.mxu1 %v19409_v27 }
 0xadb   : > { %18160 = vmatmul.mubr.f32.gmra.mrb[36].mxu1 %v25409_v3  ;;  %v12638_v3 = vld [vmem:[#allocation2 + $0xa1] sm:$0xff] }
 0xadc   : > { %18162 = vmatprep.mubr.f32.mxu1 %v25410_v42  ;;  %19412 = vmatpush3.bf16.msra.mxu1 %v19409_v27  ;;  %v12626_v27 = vld [vmem:[#allocation2 + $0x41] sm:$0xff]  ;;  %v12640_v42 = vld [vmem:[#allocation2 + $0xb1] sm:$0xff] }
 0xadd   : > { %19414 = vmatprep.subr.bf16.mxu1 %v19413_v62 }
 0xadf   : > { %18163 = vmatmul.mubr.f32.gmra.mrb[38].mxu1 %v25411_v58  ;;  %v12648_v58 = vld [vmem:[#allocation2 + $0xf1] sm:$0xff] }
 0xae0   : > { %18165 = vmatprep.mubr.f32.mxu1 %v12326_v41  ;;  %19416 = vmatpush3.bf16.msra.mxu1 %v19413_v62  ;;  %v12632_v62 = vld [vmem:[#allocation2 + $0x71] sm:$0xff]  ;;  %v12650_v41 = vld [vmem:[#allocation2 + $0x101] sm:$0xff] }
 0xae1   : > { %19418 = vmatprep.subr.bf16.mxu1 %v19417_v5 }
 0xae3   : > { %18166 = vmatmul.mubr.f32.gmra.mrb[40].mxu1 %v23720_v7  ;;  %v12333_v7 = vld [vmem:[#allocation2 + $0xa0] sm:$0xff] }
 0xae4   : > { %18168 = vmatprep.mubr.f32.mxu1 %v12328_v6  ;;  %19420 = vmatpush3.bf16.msra.mxu1 %v19417_v5  ;;  %v12642_v5 = vld [vmem:[#allocation2 + $0xc1] sm:$0xff] }
 0xae5   : > { %19422 = vmatprep.subr.bf16.mxu1 %v19421_v37 }
 0xae7   : > { %18169 = vmatmul.mubr.f32.gmra.mrb[42].mxu1 %v12329_v9 }
 0xae8   : > { %18171 = vmatprep.mubr.f32.mxu1 %v12330_v18  ;;  %19424 = vmatpush3.bf16.msra.mxu1 %v19421_v37 }
 0xae9   : > { %19426 = vmatprep.subr.bf16.mxu1 %v19425_v52 }
 0xaeb   : > { %18172 = vmatmul.mubr.f32.gmra.mrb[44].mxu1 %v12331_v24 }
 0xaec   : > { %18174 = vmatprep.mubr.f32.mxu1 %v12332_v14  ;;  %19428 = vmatpush3.bf16.msra.mxu1 %v19425_v52 }
 0xaed   : > { %19430 = vmatprep.subr.bf16.mxu1 %v19429_v2 }
 0xaef   : > { %18175 = vmatmul.mubr.f32.gmra.mrb[46].mxu1 %v12333_v7 }
 0xaf0   : > { %18177 = vmatprep.mubr.f32.mxu1 %v12334_v20  ;;  %19432 = vmatpush3.bf16.msra.mxu1 %v19429_v2  ;;  %v25425_v2 = vld [vmem:[#allocation60_spill] sm:$0xff] }
 0xaf3   : > { %18178 = vmatmul.mubr.f32.gmra.mrb[48].mxu1 %v12335_v34 }
 0xaf4   : > { %18180 = vmatprep.mubr.f32.mxu1 %v12336_v45  ;;  %v25426_v45 = vld [vmem:[#allocation58_spill] sm:$0xff] }
 0xaf7   : > { %18181 = vmatmul.mubr.f32.gmra.mrb[50].mxu1 %v12337_v48 }
 0xaf8   : > { %18183 = vmatprep.mubr.f32.mxu1 %v12338_v39  ;;  %v25427_v39 = vld [vmem:[#allocation63_spill] sm:$0xff] }
 0xafb   : > { %18184 = vmatmul.mubr.f32.gmra.mrb[52].mxu1 %v12339_v47 }
 0xafc   : > { %18186 = vmatprep.mubr.f32.mxu1 %v12340_v60 }
 0xaff   : > { %18187 = vmatmul.mubr.f32.gmra.mrb[54].mxu1 %v12341_v26 }
 0xb00   : > { %18189 = vmatprep.mubr.f32.mxu1 %v12342_v35 }
 0xb03   : > { %18190 = vmatmul.mubr.f32.gmra.mrb[56].mxu1 %v12343_v36 }
 0xb04   : > { %18192 = vmatprep.mubr.f32.mxu1 %v12344_v33  ;;  %v25428_v33 = vld [vmem:[#allocation61_spill] sm:$0xff] }
 0xb07   : > { %18193 = vmatmul.mubr.f32.gmra.mrb[58].mxu1 %v12345_v31 }
 0xb08   : > { %18195 = vmatprep.mubr.f32.mxu1 %v12346_v11  ;;  %v25429_v11 = vld [vmem:[#allocation66_spill] sm:$0xff] }
 0xb0b   : > { %18196 = vmatmul.mubr.f32.gmra.mrb[60].mxu1 %v12347_v54 }
 0xb0c   : > { %18198 = vmatprep.mubr.f32.mxu1 %v20536_v40 }
 0xb0f   : > { %18199 = vmatmul.mubr.f32.gmra.mrb[62].mxu1 %v20536_v40 }
 0xb10   : > { %18233 = vmatprep.mubr.f32.mxu1 %v12623_v44 }
 0xb13   : > { %18234 = vmatmul.mubr.msk.f32.vlgmr.msra.gmra.mrb[32].mxu1 %vm25412_vm2, %v12624_v16 }
 0xb14   : > { %18236 = vmatprep.mubr.f32.mxu1 %v12625_v25 }
 0xb17   : > { %18237 = vmatmul.mubr.msk.f32.gmra.mrb[34].mxu1 %vm25413_vm7, %v12626_v27  ;;  %v25430_v27 = vld [vmem:[#allocation64_spill] sm:$0xff] }
 0xb18   : > { %18239 = vmatprep.mubr.f32.mxu1 %v12627_v56 }
 0xb1b   : > { %18240 = vmatmul.mubr.msk.f32.gmra.mrb[36].mxu1 %vm25414_vm14, %v12628_v53  ;;  %v25431_v53 = vld [vmem:[#allocation68_spill] sm:$0xff] }
 0xb1c   : > { %18242 = vmatprep.mubr.f32.mxu1 %v12629_v19 }
 0xb1f   : > { %18243 = vmatmul.mubr.msk.f32.gmra.mrb[38].mxu1 %vm25415_vm15, %v12630_v32 }
 0xb20   : > { %18245 = vmatprep.mubr.f32.mxu1 %v12631_v12 }
 0xb23   : > { %18246 = vmatmul.mubr.msk.f32.gmra.mrb[40].mxu1 %vm25416_vm3, %v12632_v62 }
 0xb24   : > { %18248 = vmatprep.mubr.f32.mxu1 %v12633_v49 }
 0xb27   : > { %18249 = vmatmul.mubr.msk.f32.gmra.mrb[42].mxu1 %vm25417_vm1, %v12634_v61  ;;  %v25432_v61 = vld [vmem:[#allocation67_spill] sm:$0xff] }
 0xb28   : > { %18251 = vmatprep.mubr.f32.mxu1 %v12635_v22 }
 0xb2b   : > { %18252 = vmatmul.mubr.msk.f32.gmra.mrb[44].mxu1 %vm25357_vm6, %v12636_v55  ;;  %vm25420_vm6 = vnez %v25365_v13  ;;  %v12653_v13 = vld [vmem:[#allocation2 + $0x119] sm:$0xff] }
 0xb2c   : > { %18254 = vmatprep.mubr.f32.mxu1 %v12637_v30  ;;  %v25433_v55 = vld [vmem:[#allocation72_spill] sm:$0xff] }
 0xb2f   : > { %18255 = vmatmul.mubr.msk.f32.gmra.mrb[46].mxu1 %vm25358_vm9, %v12638_v3  ;;  %vm25421_vm9 = vnez %v25378_v29  ;;  %v25423_v29 = vld [vmem:[#allocation57_spill] sm:$0xff] }
 0xb30   : > { %18257 = vmatprep.mubr.f32.mxu1 %v12639_v1 }
 0xb33   : > { %18258 = vmatmul.mubr.msk.f32.gmra.mrb[48].mxu1 %vm25418_vm4, %v12640_v42 }
 0xb34   : > { %18260 = vmatprep.mubr.f32.mxu1 %v12641_v63 }
 0xb37   : > { %18261 = vmatmul.mubr.msk.f32.gmra.mrb[50].mxu1 %vm25419_vm5, %v12642_v5  ;;  %v25434_v5 = vld [vmem:[#allocation70_spill] sm:$0xff] }
 0xb38   : > { %18263 = vmatprep.mubr.f32.mxu1 %v12643_v23 }
 0xb3b   : > { %18264 = vmatmul.mubr.msk.f32.gmra.mrb[52].mxu1 %vm25420_vm6, %v12644_v10  ;;  %v25435_v10 = vld [vmem:[#allocation75_spill] sm:$0xff] }
 0xb3c   : > { %18266 = vmatprep.mubr.f32.mxu1 %v12645_v0 }
 0xb3f   : > { %18267 = vmatmul.mubr.msk.f32.gmra.mrb[54].mxu1 %vm25283_vm12, %v12646_v43 }
 0xb40   : > { %18269 = vmatprep.mubr.f32.mxu1 %v12647_v17 }
 0xb43   : > { %18270 = vmatmul.mubr.msk.f32.gmra.mrb[56].mxu1 %vm25372_vm11, %v12648_v58 }
 0xb44   : > { %18272 = vmatprep.mubr.f32.mxu1 %v12649_v21 }
 0xb47   : > { %18273 = vmatmul.mubr.msk.f32.gmra.mrb[58].mxu1 %vm25376_vm0, %v12650_v41  ;;  %v25436_v41 = vld [vmem:[#allocation73_spill] sm:$0xff] }
 0xb48   : > { %18275 = vmatprep.mubr.f32.mxu1 %v23805_v4 }
 0xb4b   : > { %18276 = vmatmul.mubr.msk.f32.gmra.mrb[60].mxu1 %vm25421_vm9, %v23808_v38 }
 0xb4c   : > { %18278 = vmatprep.mubr.f32.mxu1 %v12653_v13 }
 0xb4f   : > { %18279 = vmatmul.mubr.msk.f32.gmra.mrb[62].mxu1 %vm25291_vm8, %v12654_v51  ;;  %v25437_v51 = vld [vmem:[#allocation78_spill] sm:$0xff] }
 0xbe6   : > { %v18235_v8 = vpop.f32.mrb[32].mxu1 }
 0xbe7   : > { %v12968_v37 = vadd.f32 %v18235_v8, %v23921_v50  ;;  %v12769_v28 = vpop.f32.mrb[33].mxu1 }
 0xbe8   : > { %v12967_v4 = vadd.f32 %v23921_v50, %v12769_v28 }
 0xbe9   : > { %v13032_v6 = vadd.f32 %v12968_v37, %v25422_v59 }
 0xbea   : > { %v13031_v38 = vadd.f32 %v12967_v4, %v25423_v29  ;;  %v18238_v52 = vpop.f32.mrb[34].mxu1 }
 0xbeb   : > { %13128 = vst [vmem:[%s23929_s30 + $0x8] sm:$0xff] %v13032_v6  ;;  %v12970_v46 = vadd.f32 %v18238_v52, %v23921_v50  ;;  %v12779_v9 = vpop.f32.mrb[35].mxu1  ;;  %v25438_v6 = vld [vmem:[#allocation76_spill] sm:$0xff] }
 0xbec   : > { %13127 = vst [vmem:[%s23929_s30] sm:$0xff] %v13031_v38  ;;  %v12969_v57 = vadd.f32 %v23921_v50, %v12779_v9  ;;  %v25439_v38 = vld [vmem:[#allocation81_spill] sm:$0xff] }
 0xbed   : > { %v13034_v18 = vadd.f32 %v12970_v46, %v25424_v15 }
 0xbee   : > { %v13033_v24 = vadd.f32 %v12969_v57, %v25425_v2  ;;  %v18241_v14 = vpop.f32.mrb[36].mxu1 }
 0xbef   : > { %13130 = vst [vmem:[%s23929_s30 + $0x18] sm:$0xff] %v13034_v18  ;;  %v12972_v7 = vadd.f32 %v18241_v14, %v23921_v50  ;;  %v12789_v20 = vpop.f32.mrb[37].mxu1  ;;  %v25440_v18 = vld [vmem:[#allocation79_spill] sm:$0xff] }
 0xbf0   : > { %13129 = vst [vmem:[%s23929_s30 + $0x10] sm:$0xff] %v13033_v24  ;;  %v12971_v34 = vadd.f32 %v23921_v50, %v12789_v20  ;;  %v25441_v24 = vld [vmem:[#allocation84_spill] sm:$0xff] }
 0xbf1   : > { %v13036_v48 = vadd.f32 %v12972_v7, %v25426_v45 }
 0xbf2   : > { %v13035_v47 = vadd.f32 %v12971_v34, %v25427_v39  ;;  %v18244_v60 = vpop.f32.mrb[38].mxu1 }
 0xbf3   : > { %13132 = vst [vmem:[%s23929_s30 + $0x28] sm:$0xff] %v13036_v48  ;;  %v12974_v26 = vadd.f32 %v18244_v60, %v23921_v50  ;;  %v12799_v35 = vpop.f32.mrb[39].mxu1  ;;  %v25442_v48 = vld [vmem:[#allocation82_spill] sm:$0xff] }
 0xbf4   : > { %13131 = vst [vmem:[%s23929_s30 + $0x20] sm:$0xff] %v13035_v47  ;;  %v12973_v36 = vadd.f32 %v23921_v50, %v12799_v35  ;;  %v25443_v47 = vld [vmem:[#allocation88_spill] sm:$0xff] }
 0xbf5   : > { %v13038_v31 = vadd.f32 %v12974_v26, %v25428_v33 }
 0xbf6   : > { %v13037_v54 = vadd.f32 %v12973_v36, %v25429_v11  ;;  %v18247_v40 = vpop.f32.mrb[40].mxu1 }
 0xbf7   : > { %13134 = vst [vmem:[%s23929_s30 + $0x38] sm:$0xff] %v13038_v31  ;;  %v12976_v44 = vadd.f32 %v18247_v40, %v23921_v50  ;;  %v12809_v16 = vpop.f32.mrb[41].mxu1  ;;  %v25444_v31 = vld [vmem:[#allocation43_spill] sm:$0xff] }
 0xbf8   : > { %13133 = vst [vmem:[%s23929_s30 + $0x30] sm:$0xff] %v13037_v54  ;;  %v12975_v25 = vadd.f32 %v23921_v50, %v12809_v16  ;;  %v25445_v54 = vld [vmem:[#allocation96_spill] sm:$0xff] }
 0xbf9   : > { %v13040_v56 = vadd.f32 %v12976_v44, %v25430_v27 }
 0xbfa   : > { %v13039_v19 = vadd.f32 %v12975_v25, %v25431_v53  ;;  %v18250_v32 = vpop.f32.mrb[42].mxu1 }
 0xbfb   : > { %13136 = vst [vmem:[%s23929_s30 + $0x48] sm:$0xff] %v13040_v56  ;;  %v12978_v12 = vadd.f32 %v18250_v32, %v23921_v50  ;;  %v12819_v62 = vpop.f32.mrb[43].mxu1  ;;  %v25446_v56 = vld [vmem:[#allocation97_spill] sm:$0xff] }
 0xbfc   : > { %13135 = vst [vmem:[%s23929_s30 + $0x40] sm:$0xff] %v13039_v19  ;;  %v12977_v49 = vadd.f32 %v23921_v50, %v12819_v62  ;;  %v25447_v19 = vld [vmem:[#allocation98_spill] sm:$0xff] }
 0xbfd   : > { %v13042_v22 = vadd.f32 %v12978_v12, %v25432_v61 }
 0xbfe   : > { %v13041_v30 = vadd.f32 %v12977_v49, %v25433_v55  ;;  %v18253_v3 = vpop.f32.mrb[44].mxu1 }
 0xbff   : > { %13138 = vst [vmem:[%s23929_s30 + $0x58] sm:$0xff] %v13042_v22  ;;  %v12980_v1 = vadd.f32 %v18253_v3, %v23921_v50  ;;  %v12829_v42 = vpop.f32.mrb[45].mxu1  ;;  %v25448_v22 = vld [vmem:[#allocation99_spill] sm:$0xff] }
 0xc00   : > { %13137 = vst [vmem:[%s23929_s30 + $0x50] sm:$0xff] %v13041_v30  ;;  %v12979_v63 = vadd.f32 %v23921_v50, %v12829_v42  ;;  %v25449_v30 = vld [vmem:[#allocation100_spill] sm:$0xff] }
 0xc01   : > { %v13044_v23 = vadd.f32 %v12980_v1, %v25434_v5 }
 0xc02   : > { %v13043_v0 = vadd.f32 %v12979_v63, %v25435_v10  ;;  %v18256_v43 = vpop.f32.mrb[46].mxu1 }
 0xc03   : > { %13140 = vst [vmem:[%s23929_s30 + $0x68] sm:$0xff] %v13044_v23  ;;  %v12982_v17 = vadd.f32 %v18256_v43, %v23921_v50  ;;  %v12839_v58 = vpop.f32.mrb[47].mxu1  ;;  %v25450_v23 = vld [vmem:[#allocation101_spill] sm:$0xff] }
 0xc04   : > { %13139 = vst [vmem:[%s23929_s30 + $0x60] sm:$0xff] %v13043_v0  ;;  %v12981_v21 = vadd.f32 %v23921_v50, %v12839_v58  ;;  %v25451_v0 = vld [vmem:[#allocation102_spill] sm:$0xff] }
 0xc05   : > { %v13046_v13 = vadd.f32 %v12982_v17, %v25436_v41 }
 0xc06   : > { %v13045_v8 = vadd.f32 %v12981_v21, %v25437_v51  ;;  %v18259_v37 = vpop.f32.mrb[48].mxu1 }
 0xc07   : > { %13142 = vst [vmem:[%s23929_s30 + $0x78] sm:$0xff] %v13046_v13  ;;  %v12984_v28 = vadd.f32 %v18259_v37, %v23921_v50  ;;  %v12849_v4 = vpop.f32.mrb[49].mxu1  ;;  %v25452_v13 = vld [vmem:[#allocation103_spill] sm:$0xff] }
 0xc08   : > { %13141 = vst [vmem:[%s23929_s30 + $0x70] sm:$0xff] %v13045_v8  ;;  %v12983_v59 = vadd.f32 %v23921_v50, %v12849_v4  ;;  %v25453_v8 = vld [vmem:[#allocation104_spill] sm:$0xff] }
 0xc09   : > { %v13048_v29 = vadd.f32 %v12984_v28, %v25438_v6 }
 0xc0a   : > { %v13047_v52 = vadd.f32 %v12983_v59, %v25439_v38  ;;  %v18262_v46 = vpop.f32.mrb[50].mxu1 }
 0xc0b   : > { %13144 = vst [vmem:[%s23929_s30 + $0x88] sm:$0xff] %v13048_v29  ;;  %v12986_v9 = vadd.f32 %v18262_v46, %v23921_v50  ;;  %v12859_v57 = vpop.f32.mrb[51].mxu1 }
 0xc0c   : > { %13143 = vst [vmem:[%s23929_s30 + $0x80] sm:$0xff] %v13047_v52  ;;  %v12985_v15 = vadd.f32 %v23921_v50, %v12859_v57 }
 0xc0d   : > { %v13050_v2 = vadd.f32 %v12986_v9, %v25440_v18 }
 0xc0e   : > { %v13049_v14 = vadd.f32 %v12985_v15, %v25441_v24  ;;  %v18265_v7 = vpop.f32.mrb[52].mxu1 }
 0xc0f   : > { %13146 = vst [vmem:[%s23929_s30 + $0x98] sm:$0xff] %v13050_v2  ;;  %v12988_v20 = vadd.f32 %v18265_v7, %v23921_v50  ;;  %v12869_v34 = vpop.f32.mrb[53].mxu1 }
 0xc10   : > { %13145 = vst [vmem:[%s23929_s30 + $0x90] sm:$0xff] %v13049_v14  ;;  %v12987_v45 = vadd.f32 %v23921_v50, %v12869_v34 }
 0xc11   : > { %v13052_v39 = vadd.f32 %v12988_v20, %v25442_v48 }
 0xc12   : > { %v13051_v60 = vadd.f32 %v12987_v45, %v25443_v47  ;;  %v18268_v26 = vpop.f32.mrb[54].mxu1 }
 0xc13   : > { %13148 = vst [vmem:[%s23929_s30 + $0xa8] sm:$0xff] %v13052_v39  ;;  %v12990_v35 = vadd.f32 %v18268_v26, %v23921_v50  ;;  %v12879_v36 = vpop.f32.mrb[55].mxu1 }
 0xc14   : > { %13147 = vst [vmem:[%s23929_s30 + $0xa0] sm:$0xff] %v13051_v60  ;;  %v12989_v33 = vadd.f32 %v23921_v50, %v12879_v36 }
 0xc15   : > { %v13054_v11 = vadd.f32 %v12990_v35, %v25444_v31 }
 0xc16   : > { %v13053_v40 = vadd.f32 %v12989_v33, %v25445_v54  ;;  %v18271_v44 = vpop.f32.mrb[56].mxu1 }
 0xc17   : > { %13150 = vst [vmem:[%s23929_s30 + $0xb8] sm:$0xff] %v13054_v11  ;;  %v12992_v16 = vadd.f32 %v18271_v44, %v23921_v50  ;;  %v12889_v25 = vpop.f32.mrb[57].mxu1 }
 0xc18   : > { %13149 = vst [vmem:[%s23929_s30 + $0xb0] sm:$0xff] %v13053_v40  ;;  %v12991_v27 = vadd.f32 %v23921_v50, %v12889_v25 }
 0xc19   : > { %v13056_v53 = vadd.f32 %v12992_v16, %v25446_v56 }
 0xc1a   : > { %v13055_v32 = vadd.f32 %v12991_v27, %v25447_v19  ;;  %v18274_v12 = vpop.f32.mrb[58].mxu1 }
 0xc1b   : > { %13152 = vst [vmem:[%s23929_s30 + $0xc8] sm:$0xff] %v13056_v53  ;;  %v12994_v62 = vadd.f32 %v18274_v12, %v23921_v50  ;;  %v12899_v49 = vpop.f32.mrb[59].mxu1 }
 0xc1c   : > { %13151 = vst [vmem:[%s23929_s30 + $0xc0] sm:$0xff] %v13055_v32  ;;  %v12993_v61 = vadd.f32 %v23921_v50, %v12899_v49 }
 0xc1d   : > { %v13058_v55 = vadd.f32 %v12994_v62, %v25448_v22 }
 0xc1e   : > { %v13057_v3 = vadd.f32 %v12993_v61, %v25449_v30  ;;  %v18277_v1 = vpop.f32.mrb[60].mxu1 }
 0xc1f   : > { %13154 = vst [vmem:[%s23929_s30 + $0xd8] sm:$0xff] %v13058_v55  ;;  %v12996_v42 = vadd.f32 %v18277_v1, %v23921_v50  ;;  %v12909_v63 = vpop.f32.mrb[61].mxu1 }
 0xc20   : > { %13153 = vst [vmem:[%s23929_s30 + $0xd0] sm:$0xff] %v13057_v3  ;;  %v12995_v5 = vadd.f32 %v23921_v50, %v12909_v63 }
 0xc21   : > { %v13060_v10 = vadd.f32 %v12996_v42, %v25450_v23 }
 0xc22   : > { %v13059_v43 = vadd.f32 %v12995_v5, %v25451_v0  ;;  %v18280_v17 = vpop.f32.mrb[62].mxu1 }
 0xc23   : > { %13156 = vst [vmem:[%s23929_s30 + $0xe8] sm:$0xff] %v13060_v10  ;;  %v12998_v58 = vadd.f32 %v18280_v17, %v23921_v50  ;;  %v12919_v21 = vpop.f32.mrb[63].mxu1 }
 0xc24   : > { %13155 = vst [vmem:[%s23929_s30 + $0xe0] sm:$0xff] %v13059_v43  ;;  %v12997_v41 = vadd.f32 %v23921_v50, %v12919_v21 }
 0xc25   : > { %v13062_v51 = vadd.f32 %v12998_v58, %v25452_v13 }
 0xc26   : > { %v13061_v37 = vadd.f32 %v12997_v41, %v25453_v8 }
 0xc27   : > { %13158 = vst [vmem:[%s23929_s30 + $0xf8] sm:$0xff] %v13062_v51 }
 0xc28   : > { %13157 = vst [vmem:[%s23929_s30 + $0xf0] sm:$0xff] %v13061_v37 }
 0xc29   : > { %20636 = shalt.err (!%p20633_p1)
}
 0xc2a   : > { %s20637_s16 = scalar_lea.hbm %s24025_s8, 4096  ;;  %s20641_s13 = scalar_lea.hbm %s24079_s5, 8192 }
 0xc2b   : > { %p20638_p13 = scmp.ne.s32.totalorder %s24025_s8, %s20637_s16  ;;  %p20642_p4 = scmp.lt.u32.totalorder %s24025_s8, %s24079_s5 }
 0xc2c   : > { %p20643_p5 = scmp.lt.u32.totalorder %s20641_s13, %s20637_s16  ;;  %p20645_p11 = scmp.lt.u32.totalorder %s20637_s16, %s24025_s8 }
 0xc2d   : > { %p20639_p6 = pnand %p20638_p13, %p25454_p0 }
 0xc2e   : > { %p20644_p8 = por %p20643_p5, %p20642_p4 }
 0xc2f   : > { %p20640_p10 = pneg %p20639_p6 }
 0xc30   : > { %p20646_p2 = por %p20645_p11, %p20644_p8 }
 0xc32   : > { %p20647_p3 = pnand %p20646_p2, %p20640_p10 }
 0xc34   : > { %20650 = shalt.err (!%p20647_p3)
}
 0xc35   : > { %s20702_s11 = smov 128   ;;  %s20703_s7 = smov 8  }
 0xc36   : > { %20467 = dma.vmem_to_hbm [thread:$0]  (%p25454_p0), %s24027_s17, 4096, %s24025_s8, %s13160_s22, %s20702_s11, %s20702_s11, %s20703_s7  }
 0xc37 PF: > { %s13188_s6 = sand.u32 1, %s20681_s18   ;;  %p25455_p7 = scmp.ne.s32.totalorder %s24559_s25, 0 }
 0xc38   : > { %p25456_p9 = scmp.ge.s32.totalorder %s20693_s21, 2  ;;  %s13189_s12 = scalar_lea.sflag [#allocation6], %s13188_s6 }
 0xc3a   : > { %p20481_p12 = pnand %p25456_p9, %p25455_p7 }
 0xc3c   : > { %20676 = dma.done.wait (!%p20481_p12), %s13189_s12, 4096  }
 0xc3d   : > { %20678 = vsyncadd (!%p20481_p12), %s13189_s12, 4294963200  ;;  %p19_p1 = scmp.ge.s32.totalorder %s20850_s29, 4   ;;  %s25457_s18 = smov %s20685_s19 }
 0xc3e   : > { %s25458_s19 = smov %s20689_s20  ;;  %s25459_s20 = smov %s20866_s27 }
 0xc3f   : > { %s25460_s21 = smov %s20850_s29  ;;  %21 = sbr.rel (!%p19_p1) target bundleno = 6 (0x6), region = 109 }
 0xc46   :  { %13194 = vsyncpa [#allocation5], 1 }
 0xc47   :  { %13196 = vsyncpa [#allocation5 + $0x1], 1 }
 0xc48   :  { %13197 = vsyncpa [#allocation8], 1 }
 0xc49   :  { %13198 = vsyncpa [#allocation6], 1 }
 0xc4a   :  { %13200 = vsyncpa [#allocation6 + $0x1], 1 }

</bundles_post_ra>
